<compile_context>
chip_gen: v7x
topology: tpu7x:2x2x1
jax: 0.10.0
libtpu: 0.0.40
codegen_flags: <defaults>
</compile_context>

<pallas_src>
import functools

import jax
import jax.numpy as jnp
from jax.experimental import pallas as pl
from jax.experimental.pallas import tpu as pltpu

SIGMA_DATA = 0.5
N_AUGMENTATIONS = 9


def _gelu(x):
    # TODO(synk): PyTorch nn.GELU defaults to exact erf; tanh approximation used.
    return jax.nn.gelu(x, approximate=True)


def _round_up(v, m):
    return ((v + m - 1) // m) * m


def _pick_batch_tile(n, max_tile=8):
    for t in range(min(n, max_tile), 0, -1):
        if n % t == 0:
            return t
    return 1


# ----------------------------------------------------------------------------
# Fused Pallas kernel: B_TILE samples per grid step, stacked along M with
# zero gap rows between samples (isolates the vertical 3x3 taps).
# ----------------------------------------------------------------------------
def _fused_denoiser_kernel(scal_ref, film_ref, xs_ref, mask_ref,
                           w_in_ref, b_in_ref, w_mid_ref, b_mid_ref,
                           w_out_ref, b_out_ref, out_ref,
                           *, height, width, b_tile, gap, hidden):
    hw = height * width
    stride = hw + gap
    rp = gap + b_tile * stride          # rows of the gap-padded activation
    c_img = xs_ref.shape[-1]
    g0 = pl.program_id(0) * b_tile      # first sample handled by this step

    # Precomputed per-row masks over the padded row space (bf16, values {0,1}):
    #   [0] image row (re-zeroes inter-sample gap garbage)
    #   [1] image row & x > 0           (left neighbour valid)
    #   [2] image row & x < width - 1   (right neighbour valid)
    m_gap = mask_ref[0]
    m_left = mask_ref[1]
    m_right = mask_ref[2]

    def conv3x3(h_f32, w_ref, b_ref):
        """3x3 'same' conv over the gap-padded row space as ONE im2col matmul.

        2 unaligned (+-1 row) slices build the left/right taps; the +-width
        (dy) taps are sublane-aligned slices of a zero-padded copy; everything
        is cast to bf16 once and lane-concatenated into (rp, 9*cin)."""
        cin = h_f32.shape[-1]
        hb = h_f32.astype(jnp.bfloat16)                 # single f32 -> bf16 cast
        mg = m_gap[:, :cin]
        ml = m_left[:, :cin]
        mr = m_right[:, :cin]

        zx = jnp.zeros((16, cin), jnp.bfloat16)
        hpad = jnp.concatenate([zx, hb, zx], axis=0)    # (rp + 32, cin)
        center = hb * mg                                # value at (y, x)
        left = hpad[15:15 + rp] * ml                    # value at (y, x-1)
        right = hpad[17:17 + rp] * mr                   # value at (y, x+1)

        u = jnp.concatenate([left, center, right], axis=-1)   # (rp, 3*cin)
        zy = jnp.zeros((gap, 3 * cin), jnp.bfloat16)
        upad = jnp.concatenate([zy, u, zy], axis=0)            # (rp + 2*gap, 3*cin)
        cols = jnp.concatenate(
            [upad[gap - width:gap - width + rp],               # dy = -1 (aligned)
             u,                                                # dy =  0
             upad[gap + width:gap + width + rp]],              # dy = +1 (aligned)
            axis=-1)                                           # (rp, 9*cin) bf16
        return jnp.dot(cols, w_ref[...],
                       preferred_element_type=jnp.float32) + b_ref[...]

    # ---- build gap-padded, c_in-scaled input + per-row FiLM vectors --------
    zc = jnp.zeros((gap, c_img), jnp.float32)
    zh = jnp.zeros((gap, hidden), jnp.float32)
    x_pieces = [zc]
    sc_pieces = [zh]
    sh_pieces = [zh]
    for b in range(b_tile):
        c_in = scal_ref[g0 + b, 0]                      # SMEM scalar splat
        x_pieces += [xs_ref[b] * c_in, zc]
        f = film_ref[b]                                 # (2, hidden)
        sc_pieces += [jnp.broadcast_to(f[0:1, :], (hw, hidden)), zh]
        sh_pieces += [jnp.broadcast_to(f[1:2, :], (hw, hidden)), zh]
    x_pad = jnp.concatenate(x_pieces, axis=0)           # (rp, c_img) f32
    scale_rows = jnp.concatenate(sc_pieces, axis=0)     # (rp, hidden) f32
    shift_rows = jnp.concatenate(sh_pieces, axis=0)     # (rp, hidden) f32

    # ---- conv_in -> GELU -> FiLM -> GELU ------------------------------------
    h = _gelu(conv3x3(x_pad, w_in_ref, b_in_ref))
    h = _gelu(h * (1.0 + scale_rows) + shift_rows)
    # ---- conv_mid -> GELU ----------------------------------------------------
    h = _gelu(conv3x3(h, w_mid_ref, b_mid_ref))
    # ---- conv_out + EDM combine ----------------------------------------------
    net = conv3x3(h, w_out_ref, b_out_ref)              # (rp, c_img) f32
    for b in range(b_tile):
        c_skip = scal_ref[g0 + b, 1]
        c_out = scal_ref[g0 + b, 2]
        row0 = gap + b * stride                         # static, 8-aligned
        out_ref[b] = c_skip * xs_ref[b] + c_out * net[row0:row0 + hw]


# ----------------------------------------------------------------------------
# Parameters (deterministic synthetic init) + one-time kernel-layout prep
# ----------------------------------------------------------------------------
def init_params(key, c_img=4, hidden=32, ff_dim=16, mapping_dim=32,
                n_aug=N_AUGMENTATIONS):
    ks = jax.random.split(key, 8)

    def w(k, fan_in, shape):
        return jax.random.normal(k, shape, jnp.float32) / jnp.sqrt(fan_in)

    return {
        "ff_w": jax.random.normal(ks[0], (ff_dim // 2,), jnp.float32),
        "map_w1": w(ks[1], ff_dim + n_aug, (ff_dim + n_aug, mapping_dim)),
        "map_b1": jnp.zeros((mapping_dim,), jnp.float32),
        "map_w2": w(ks[2], mapping_dim, (mapping_dim, mapping_dim)),
        "map_b2": jnp.zeros((mapping_dim,), jnp.float32),
        "film_w": w(ks[3], mapping_dim, (mapping_dim, 2 * hidden)),
        "film_b": jnp.zeros((2 * hidden,), jnp.float32),
        # conv weights in im2col layout (9*Cin, Cout), tap order (dy, dx) row-major
        "conv_in_w": w(ks[4], 9 * c_img, (9 * c_img, hidden)),
        "conv_in_b": jnp.zeros((hidden,), jnp.float32),
        "conv_mid_w": w(ks[5], 9 * hidden, (9 * hidden, hidden)),
        "conv_mid_b": jnp.zeros((hidden,), jnp.float32),
        "conv_out_w": w(ks[6], 9 * hidden, (9 * hidden, c_img)),
        "conv_out_b": jnp.zeros((c_img,), jnp.float32),
    }


def prepare_params(params):
    """One-time: cast MXU operands to bf16, reshape biases to (1, Cout) f32.
    No per-tap channel padding (taps are packed into K instead)."""
    prep = {k: params[k] for k in ("ff_w", "map_w1", "map_b1", "map_w2",
                                   "map_b2", "film_w", "film_b")}
    prep.update(
        w_in=params["conv_in_w"].astype(jnp.bfloat16),
        b_in=params["conv_in_b"].reshape(1, -1).astype(jnp.float32),
        w_mid=params["conv_mid_w"].astype(jnp.bfloat16),
        b_mid=params["conv_mid_b"].reshape(1, -1).astype(jnp.float32),
        w_out=params["conv_out_w"].astype(jnp.bfloat16),
        b_out=params["conv_out_b"].reshape(1, -1).astype(jnp.float32),
    )
    return prep


# ----------------------------------------------------------------------------
# Forward pass (MonsterDiffusion.denoised_ / forward)
# ----------------------------------------------------------------------------
def monster_diffusion_forward(prep, diffused_images_nchw, ts,
                              nonleaky_augmentations=None, max_batch_tile=8):
    x = jnp.transpose(diffused_images_nchw, (0, 2, 3, 1)).astype(jnp.float32)
    n, h, w, c = x.shape
    hw = h * w
    hidden = prep["b_in"].shape[-1]
    if nonleaky_augmentations is None:
        nonleaky_augmentations = jnp.zeros((n, N_AUGMENTATIONS), jnp.float32)

    # standardize.encode
    xs = (x - 0.5) * 2.0
    xs2d = xs.reshape(n, hw, c)

    # EDM preconditioning scalars (sigmas(ts) == ts)
    sigma = ts.reshape(n).astype(jnp.float32)
    s2 = SIGMA_DATA ** 2 + sigma ** 2
    c_in = 1.0 / jnp.sqrt(s2)
    c_skip = SIGMA_DATA ** 2 / s2
    c_out = sigma * SIGMA_DATA / jnp.sqrt(s2)
    # guard the log against ts == 0 (identical to the original for valid ts > 0)
    c_noise = 0.25 * jnp.log(jnp.maximum(sigma, 1e-20))
    scal = jnp.stack([c_in, c_skip, c_out, jnp.zeros_like(c_in)], axis=-1)  # (n,4)

    # Tiny mapping network (Fourier features of c_noise + augmentations), plain JAX.
    proj = 2.0 * jnp.pi * c_noise[:, None] * prep["ff_w"][None, :]
    t_emb = jnp.concatenate([jnp.cos(proj), jnp.sin(proj)], axis=-1)
    m_in = jnp.concatenate(
        [t_emb, nonleaky_augmentations.astype(jnp.float32)], axis=-1)
    cond = _gelu(m_in @ prep["map_w1"] + prep["map_b1"])
    cond = _gelu(cond @ prep["map_w2"] + prep["map_b2"])
    ss = cond @ prep["film_w"] + prep["film_b"]                  # (n, 2*hidden)
    film = jnp.stack([ss[:, :hidden], ss[:, hidden:]], axis=1)   # (n, 2, hidden)

    # Batch tiling: B_TILE samples per grid step, stacked along M with `gap`
    # zero rows between samples so the +-width taps never cross samples.
    b_tile = _pick_batch_tile(n, max_batch_tile)
    gap = _round_up(w, 8)
    stride = hw + gap
    rp = gap + b_tile * stride

    # Precomputed, pre-broadcast border masks (constant index_map -> VMEM resident).
    rows = jnp.arange(rp, dtype=jnp.int32)
    pos = (rows - gap) % stride
    is_img = (rows >= gap) & (pos < hw)
    xcrd = pos % w

    def bmask(m):
        return jnp.broadcast_to(m[:, None], (rp, hidden)).astype(jnp.bfloat16)

    masks = jnp.stack([bmask(is_img),
                       bmask(is_img & (xcrd > 0)),
                       bmask(is_img & (xcrd < w - 1))], axis=0)  # (3, rp, hidden)

    kernel = functools.partial(_fused_denoiser_kernel, height=h, width=w,
                               b_tile=b_tile, gap=gap, hidden=hidden)
    denoised2d = pl.pallas_call(
        kernel,
        out_shape=jax.ShapeDtypeStruct((n, hw, c), jnp.float32),
        grid_spec=pltpu.PrefetchScalarGridSpec(
            num_scalar_prefetch=1,                               # scal -> SMEM
            grid=(n // b_tile,),
            in_specs=[
                pl.BlockSpec((b_tile, 2, hidden), lambda i, s: (i, 0, 0)),   # FiLM
                pl.BlockSpec((b_tile, hw, c), lambda i, s: (i, 0, 0)),       # xs
                pl.BlockSpec((3, rp, hidden), lambda i, s: (0, 0, 0)),       # masks
                pl.BlockSpec((9 * c, hidden), lambda i, s: (0, 0)),          # w_in
                pl.BlockSpec((1, hidden), lambda i, s: (0, 0)),              # b_in
                pl.BlockSpec((9 * hidden, hidden), lambda i, s: (0, 0)),     # w_mid
                pl.BlockSpec((1, hidden), lambda i, s: (0, 0)),              # b_mid
                pl.BlockSpec((9 * hidden, c), lambda i, s: (0, 0)),          # w_out
                pl.BlockSpec((1, c), lambda i, s: (0, 0)),                   # b_out
            ],
            out_specs=pl.BlockSpec((b_tile, hw, c), lambda i, s: (i, 0, 0)),
        ),
        compiler_params=pltpu.CompilerParams(
            dimension_semantics=("parallel",),
            vmem_limit_bytes=32 * 1024 * 1024),
    )(scal, film, xs2d, masks, prep["w_in"], prep["b_in"], prep["w_mid"],
      prep["b_mid"], prep["w_out"], prep["b_out"])

    denoised_xs = denoised2d.reshape(n, h, w, c)
    return jnp.transpose(denoised_xs, (0, 3, 1, 2))              # NCHW


# ----------------------------------------------------------------------------
# Pure-JAX reference (f32 im2col path) for a correctness check
# ----------------------------------------------------------------------------
def _reference_forward(params, diffused_images_nchw, ts, nonleaky_augmentations):
    x = jnp.transpose(diffused_images_nchw, (0, 2, 3, 1)).astype(jnp.float32)
    n, h, w, c = x.shape
    hidden = params["conv_in_b"].shape[0]
    xs = (x - 0.5) * 2.0
    sigma = ts.reshape(n).astype(jnp.float32)
    s2 = SIGMA_DATA ** 2 + sigma ** 2
    c_in = 1.0 / jnp.sqrt(s2)
    c_skip = SIGMA_DATA ** 2 / s2
    c_out = sigma * SIGMA_DATA / jnp.sqrt(s2)
    c_noise = 0.25 * jnp.log(sigma)

    proj = 2.0 * jnp.pi * c_noise[:, None] * params["ff_w"][None, :]
    t_emb = jnp.concatenate([jnp.cos(proj), jnp.sin(proj)], axis=-1)
    m_in = jnp.concatenate([t_emb, nonleaky_augmentations], axis=-1)
    cond = _gelu(m_in @ params["map_w1"] + params["map_b1"])
    cond = _gelu(cond @ params["map_w2"] + params["map_b2"])
    ss = cond @ params["film_w"] + params["film_b"]
    scale = ss[:, :hidden][:, None, :]
    shift = ss[:, hidden:][:, None, :]

    def im2col(z):
        zp = jnp.pad(z, ((0, 0), (1, 1), (1, 1), (0, 0)))
        taps = [zp[:, ky:ky + h, kx:kx + w, :] for ky in range(3) for kx in range(3)]
        return jnp.concatenate(taps, axis=-1).reshape(n * h * w, -1)

    xin = xs * c_in[:, None, None, None]
    a = _gelu(im2col(xin) @ params["conv_in_w"] + params["conv_in_b"])
    a = a.reshape(n, h * w, hidden)
    a = _gelu(a * (1.0 + scale) + shift).reshape(n, h, w, hidden)
    a = _gelu(im2col(a) @ params["conv_mid_w"] + params["conv_mid_b"])
    a = a.reshape(n, h, w, hidden)
    net = (im2col(a) @ params["conv_out_w"] + params["conv_out_b"]).reshape(n, h, w, c)
    den = c_skip[:, None, None, None] * xs + c_out[:, None, None, None] * net
    return jnp.transpose(den, (0, 3, 1, 2))


# ----------------------------------------------------------------------------
if __name__ == "__main__":
    key = jax.random.PRNGKey(0)
    k_param, k_img, k_ts = jax.random.split(key, 3)

    batch, channels, spatial = 2, 4, 16
    raw_params = init_params(k_param, c_img=channels, hidden=32)
    prep = prepare_params(raw_params)

    diffused_images = jax.random.uniform(
        k_img, (batch, channels, spatial, spatial), jnp.float32)
    # training-style ts: exp(P_mean + randn * P_std), P_mean=-1.2, P_std=1.2
    ts = jnp.exp(-1.2 + 1.2 * jax.random.normal(k_ts, (batch,), jnp.float32))
    nonleaky_augmentations = jnp.zeros((batch, N_AUGMENTATIONS), jnp.float32)

    forward = jax.jit(monster_diffusion_forward)
    denoised_xs = forward(prep, diffused_images, ts, nonleaky_augmentations)
    denoised_xs = jax.block_until_ready(denoised_xs)

    assert denoised_xs.shape == (batch, channels, spatial, spatial)
    assert bool(jnp.all(jnp.isfinite(denoised_xs)))

    # Cross-check against the pure-JAX f32 im2col reference (bf16 MXU tolerance).
    reference = _reference_forward(raw_params, diffused_images, ts,
                                   nonleaky_augmentations)
    max_diff = float(jnp.max(jnp.abs(denoised_xs - reference)))
    assert max_diff < 0.1, f"kernel/reference mismatch: {max_diff}"

    print("KERNEL_OK")
</pallas_src>

<mosaic_0001>
module attributes {stable_mosaic.version = 11 : i64} {
  func.func @_fused_denoiser_kernel(%arg0: i32, %arg1: memref<2x4xf32, #tpu.memory_space<smem>>, %arg2: memref<2x2x32xf32, #tpu.memory_space<vmem>>, %arg3: memref<2x256x4xf32, #tpu.memory_space<vmem>>, %arg4: memref<3x560x32xbf16, #tpu.memory_space<vmem>>, %arg5: memref<36x32xbf16, #tpu.memory_space<vmem>>, %arg6: memref<1x32xf32, #tpu.memory_space<vmem>>, %arg7: memref<288x32xbf16, #tpu.memory_space<vmem>>, %arg8: memref<1x32xf32, #tpu.memory_space<vmem>>, %arg9: memref<288x4xbf16, #tpu.memory_space<vmem>>, %arg10: memref<1x4xf32, #tpu.memory_space<vmem>>, %arg11: memref<2x256x4xf32, #tpu.memory_space<vmem>>) attributes {dimension_semantics = [#tpu.dimension_semantics<parallel>], iteration_bounds = array<i64: 1>, scalar_prefetch = 1 : i64, scratch_operands = 0 : i64, tpu.core_type = #tpu.core_type<tc>, window_params = [{transform_indices = @transform_0, window_bounds = array<i64: 2, 2, 32>}, {transform_indices = @transform_1, window_bounds = array<i64: 2, 256, 4>}, {pipeline_mode = #tpu.pipeline_mode<synchronous>, transform_indices = @transform_2, window_bounds = array<i64: 3, 560, 32>}, {pipeline_mode = #tpu.pipeline_mode<synchronous>, transform_indices = @transform_3, window_bounds = array<i64: 36, 32>}, {pipeline_mode = #tpu.pipeline_mode<synchronous>, transform_indices = @transform_4, window_bounds = array<i64: 1, 32>}, {pipeline_mode = #tpu.pipeline_mode<synchronous>, transform_indices = @transform_5, window_bounds = array<i64: 288, 32>}, {pipeline_mode = #tpu.pipeline_mode<synchronous>, transform_indices = @transform_6, window_bounds = array<i64: 1, 32>}, {pipeline_mode = #tpu.pipeline_mode<synchronous>, transform_indices = @transform_7, window_bounds = array<i64: 288, 4>}, {pipeline_mode = #tpu.pipeline_mode<synchronous>, transform_indices = @transform_8, window_bounds = array<i64: 1, 4>}, {transform_indices = @transform_9, window_bounds = array<i64: 2, 256, 4>}]} {
    %c2_i32 = arith.constant 2 : i32
    %0 = arith.muli %arg0, %c2_i32 : i32
    %c0 = arith.constant 0 : index
    %c0_0 = arith.constant 0 : index
    %c0_1 = arith.constant 0 : index
    %1 = vector.load %arg4[%c0, %c0_0, %c0_1] : memref<3x560x32xbf16, #tpu.memory_space<vmem>>, vector<1x560x32xbf16>
    %2 = vector.shape_cast %1 : vector<1x560x32xbf16> to vector<560x32xbf16>
    %c1 = arith.constant 1 : index
    %c0_2 = arith.constant 0 : index
    %c0_3 = arith.constant 0 : index
    %3 = vector.load %arg4[%c1, %c0_2, %c0_3] : memref<3x560x32xbf16, #tpu.memory_space<vmem>>, vector<1x560x32xbf16>
    %4 = vector.shape_cast %3 : vector<1x560x32xbf16> to vector<560x32xbf16>
    %c2 = arith.constant 2 : index
    %c0_4 = arith.constant 0 : index
    %c0_5 = arith.constant 0 : index
    %5 = vector.load %arg4[%c2, %c0_4, %c0_5] : memref<3x560x32xbf16, #tpu.memory_space<vmem>>, vector<1x560x32xbf16>
    %6 = vector.shape_cast %5 : vector<1x560x32xbf16> to vector<560x32xbf16>
    %cst = arith.constant 0.000000e+00 : f32
    %7 = vector.broadcast %cst : f32 to vector<16x4xf32>
    %cst_6 = arith.constant 0.000000e+00 : f32
    %8 = vector.broadcast %cst_6 : f32 to vector<16x32xf32>
    %c0_i32 = arith.constant 0 : i32
    %9 = arith.addi %0, %c0_i32 : i32
    %10 = arith.index_cast %9 : i32 to index
    %c0_7 = arith.constant 0 : index
    %11 = memref.load %arg1[%10, %c0_7] : memref<2x4xf32, #tpu.memory_space<smem>>
    %c0_8 = arith.constant 0 : index
    %c0_9 = arith.constant 0 : index
    %c0_10 = arith.constant 0 : index
    %12 = vector.load %arg3[%c0_8, %c0_9, %c0_10] : memref<2x256x4xf32, #tpu.memory_space<vmem>>, vector<1x256x4xf32>
    %13 = vector.shape_cast %12 : vector<1x256x4xf32> to vector<256x4xf32>
    %14 = vector.broadcast %11 : f32 to vector<256x4xf32>
    %15 = arith.mulf %13, %14 : vector<256x4xf32>
    %c0_11 = arith.constant 0 : index
    %c0_12 = arith.constant 0 : index
    %c0_13 = arith.constant 0 : index
    %16 = vector.load %arg2[%c0_11, %c0_12, %c0_13] : memref<2x2x32xf32, #tpu.memory_space<vmem>>, vector<1x2x32xf32>
    %17 = vector.shape_cast %16 : vector<1x2x32xf32> to vector<2x32xf32>
    %18 = vector.extract_strided_slice %17 {offsets = [0, 0], sizes = [1, 32], strides = [1, 1]} : vector<2x32xf32> to vector<1x32xf32>
    %19 = vector.shape_cast %18 : vector<1x32xf32> to vector<1x32xf32>
    %20 = vector.broadcast %19 : vector<1x32xf32> to vector<256x32xf32>
    %21 = vector.extract_strided_slice %17 {offsets = [1, 0], sizes = [1, 32], strides = [1, 1]} : vector<2x32xf32> to vector<1x32xf32>
    %22 = vector.shape_cast %21 : vector<1x32xf32> to vector<1x32xf32>
    %23 = vector.broadcast %22 : vector<1x32xf32> to vector<256x32xf32>
    %c1_i32 = arith.constant 1 : i32
    %24 = arith.addi %0, %c1_i32 : i32
    %25 = arith.index_cast %24 : i32 to index
    %c0_14 = arith.constant 0 : index
    %26 = memref.load %arg1[%25, %c0_14] : memref<2x4xf32, #tpu.memory_space<smem>>
    %c1_15 = arith.constant 1 : index
    %c0_16 = arith.constant 0 : index
    %c0_17 = arith.constant 0 : index
    %27 = vector.load %arg3[%c1_15, %c0_16, %c0_17] : memref<2x256x4xf32, #tpu.memory_space<vmem>>, vector<1x256x4xf32>
    %28 = vector.shape_cast %27 : vector<1x256x4xf32> to vector<256x4xf32>
    %29 = vector.broadcast %26 : f32 to vector<256x4xf32>
    %30 = arith.mulf %28, %29 : vector<256x4xf32>
    %c1_18 = arith.constant 1 : index
    %c0_19 = arith.constant 0 : index
    %c0_20 = arith.constant 0 : index
    %31 = vector.load %arg2[%c1_18, %c0_19, %c0_20] : memref<2x2x32xf32, #tpu.memory_space<vmem>>, vector<1x2x32xf32>
    %32 = vector.shape_cast %31 : vector<1x2x32xf32> to vector<2x32xf32>
    %33 = vector.extract_strided_slice %32 {offsets = [0, 0], sizes = [1, 32], strides = [1, 1]} : vector<2x32xf32> to vector<1x32xf32>
    %34 = vector.shape_cast %33 : vector<1x32xf32> to vector<1x32xf32>
    %35 = vector.broadcast %34 : vector<1x32xf32> to vector<256x32xf32>
    %36 = vector.extract_strided_slice %32 {offsets = [1, 0], sizes = [1, 32], strides = [1, 1]} : vector<2x32xf32> to vector<1x32xf32>
    %37 = vector.shape_cast %36 : vector<1x32xf32> to vector<1x32xf32>
    %38 = vector.broadcast %37 : vector<1x32xf32> to vector<256x32xf32>
    %39 = tpu.concatenate %7, %15, %7, %30, %7 in 0 : vector<16x4xf32>, vector<256x4xf32>, vector<16x4xf32>, vector<256x4xf32>, vector<16x4xf32> -> vector<560x4xf32>
    %40 = tpu.concatenate %8, %20, %8, %35, %8 in 0 : vector<16x32xf32>, vector<256x32xf32>, vector<16x32xf32>, vector<256x32xf32>, vector<16x32xf32> -> vector<560x32xf32>
    %41 = tpu.concatenate %8, %23, %8, %38, %8 in 0 : vector<16x32xf32>, vector<256x32xf32>, vector<16x32xf32>, vector<256x32xf32>, vector<16x32xf32> -> vector<560x32xf32>
    %42 = arith.truncf %39 : vector<560x4xf32> to vector<560x4xbf16>
    %43 = vector.extract_strided_slice %2 {offsets = [0, 0], sizes = [560, 4], strides = [1, 1]} : vector<560x32xbf16> to vector<560x4xbf16>
    %44 = vector.extract_strided_slice %4 {offsets = [0, 0], sizes = [560, 4], strides = [1, 1]} : vector<560x32xbf16> to vector<560x4xbf16>
    %45 = vector.extract_strided_slice %6 {offsets = [0, 0], sizes = [560, 4], strides = [1, 1]} : vector<560x32xbf16> to vector<560x4xbf16>
    %cst_21 = arith.constant 0.000000e+00 : bf16
    %46 = vector.broadcast %cst_21 : bf16 to vector<16x4xbf16>
    %47 = tpu.concatenate %46, %42, %46 in 0 : vector<16x4xbf16>, vector<560x4xbf16>, vector<16x4xbf16> -> vector<592x4xbf16>
    %48 = arith.mulf %42, %43 : vector<560x4xbf16>
    %49 = vector.extract_strided_slice %47 {offsets = [15, 0], sizes = [560, 4], strides = [1, 1]} : vector<592x4xbf16> to vector<560x4xbf16>
    %50 = arith.mulf %49, %44 : vector<560x4xbf16>
    %51 = vector.extract_strided_slice %47 {offsets = [17, 0], sizes = [560, 4], strides = [1, 1]} : vector<592x4xbf16> to vector<560x4xbf16>
    %52 = arith.mulf %51, %45 : vector<560x4xbf16>
    %53 = tpu.concatenate %50, %48, %52 in 1 : vector<560x4xbf16>, vector<560x4xbf16>, vector<560x4xbf16> -> vector<560x12xbf16>
    %cst_22 = arith.constant 0.000000e+00 : bf16
    %54 = vector.broadcast %cst_22 : bf16 to vector<16x12xbf16>
    %55 = tpu.concatenate %54, %53, %54 in 0 : vector<16x12xbf16>, vector<560x12xbf16>, vector<16x12xbf16> -> vector<592x12xbf16>
    %56 = vector.extract_strided_slice %55 {offsets = [0, 0], sizes = [560, 12], strides = [1, 1]} : vector<592x12xbf16> to vector<560x12xbf16>
    %57 = vector.extract_strided_slice %55 {offsets = [32, 0], sizes = [560, 12], strides = [1, 1]} : vector<592x12xbf16> to vector<560x12xbf16>
    %58 = tpu.concatenate %56, %53, %57 in 1 : vector<560x12xbf16>, vector<560x12xbf16>, vector<560x12xbf16> -> vector<560x36xbf16>
    %c0_23 = arith.constant 0 : index
    %c0_24 = arith.constant 0 : index
    %59 = vector.load %arg5[%c0_23, %c0_24] : memref<36x32xbf16, #tpu.memory_space<vmem>>, vector<36x32xbf16>
    %cst_25 = arith.constant dense<0.000000e+00> : vector<560x32xf32>
    %60 = tpu.matmul %58, %59, %cst_25 {dimension_numbers = #tpu.dot_dimension_numbers<[1], [0], [0], [1], [0, 0, 1, 1], [], []>} : vector<560x36xbf16>, vector<36x32xbf16>, vector<560x32xf32> -> vector<560x32xf32>
    %c0_26 = arith.constant 0 : index
    %c0_27 = arith.constant 0 : index
    %61 = vector.load %arg6[%c0_26, %c0_27] : memref<1x32xf32, #tpu.memory_space<vmem>>, vector<1x32xf32>
    %62 = vector.broadcast %61 : vector<1x32xf32> to vector<560x32xf32>
    %63 = arith.addf %60, %62 : vector<560x32xf32>
    %64 = arith.mulf %63, %63 : vector<560x32xf32>
    %65 = arith.mulf %63, %64 : vector<560x32xf32>
    %cst_28 = arith.constant 4.471500e-02 : f32
    %66 = vector.broadcast %cst_28 : f32 to vector<560x32xf32>
    %67 = arith.mulf %66, %65 : vector<560x32xf32>
    %68 = arith.addf %63, %67 : vector<560x32xf32>
    %cst_29 = arith.constant 0.797884583 : f32
    %69 = vector.broadcast %cst_29 : f32 to vector<560x32xf32>
    %70 = arith.mulf %69, %68 : vector<560x32xf32>
    %71 = math.tanh %70 : vector<560x32xf32>
    %cst_30 = arith.constant 1.000000e+00 : f32
    %72 = vector.broadcast %cst_30 : f32 to vector<560x32xf32>
    %73 = arith.addf %72, %71 : vector<560x32xf32>
    %cst_31 = arith.constant 5.000000e-01 : f32
    %74 = vector.broadcast %cst_31 : f32 to vector<560x32xf32>
    %75 = arith.mulf %74, %73 : vector<560x32xf32>
    %76 = arith.mulf %63, %75 : vector<560x32xf32>
    %cst_32 = arith.constant 1.000000e+00 : f32
    %77 = vector.broadcast %cst_32 : f32 to vector<560x32xf32>
    %78 = arith.addf %77, %40 : vector<560x32xf32>
    %79 = arith.mulf %76, %78 : vector<560x32xf32>
    %80 = arith.addf %79, %41 : vector<560x32xf32>
    %81 = arith.mulf %80, %80 : vector<560x32xf32>
    %82 = arith.mulf %80, %81 : vector<560x32xf32>
    %cst_33 = arith.constant 4.471500e-02 : f32
    %83 = vector.broadcast %cst_33 : f32 to vector<560x32xf32>
    %84 = arith.mulf %83, %82 : vector<560x32xf32>
    %85 = arith.addf %80, %84 : vector<560x32xf32>
    %cst_34 = arith.constant 0.797884583 : f32
    %86 = vector.broadcast %cst_34 : f32 to vector<560x32xf32>
    %87 = arith.mulf %86, %85 : vector<560x32xf32>
    %88 = math.tanh %87 : vector<560x32xf32>
    %cst_35 = arith.constant 1.000000e+00 : f32
    %89 = vector.broadcast %cst_35 : f32 to vector<560x32xf32>
    %90 = arith.addf %89, %88 : vector<560x32xf32>
    %cst_36 = arith.constant 5.000000e-01 : f32
    %91 = vector.broadcast %cst_36 : f32 to vector<560x32xf32>
    %92 = arith.mulf %91, %90 : vector<560x32xf32>
    %93 = arith.mulf %80, %92 : vector<560x32xf32>
    %94 = arith.truncf %93 : vector<560x32xf32> to vector<560x32xbf16>
    %cst_37 = arith.constant 0.000000e+00 : bf16
    %95 = vector.broadcast %cst_37 : bf16 to vector<16x32xbf16>
    %96 = tpu.concatenate %95, %94, %95 in 0 : vector<16x32xbf16>, vector<560x32xbf16>, vector<16x32xbf16> -> vector<592x32xbf16>
    %97 = arith.mulf %94, %2 : vector<560x32xbf16>
    %98 = vector.extract_strided_slice %96 {offsets = [15, 0], sizes = [560, 32], strides = [1, 1]} : vector<592x32xbf16> to vector<560x32xbf16>
    %99 = arith.mulf %98, %4 : vector<560x32xbf16>
    %100 = vector.extract_strided_slice %96 {offsets = [17, 0], sizes = [560, 32], strides = [1, 1]} : vector<592x32xbf16> to vector<560x32xbf16>
    %101 = arith.mulf %100, %6 : vector<560x32xbf16>
    %102 = tpu.concatenate %99, %97, %101 in 1 : vector<560x32xbf16>, vector<560x32xbf16>, vector<560x32xbf16> -> vector<560x96xbf16>
    %cst_38 = arith.constant 0.000000e+00 : bf16
    %103 = vector.broadcast %cst_38 : bf16 to vector<16x96xbf16>
    %104 = tpu.concatenate %103, %102, %103 in 0 : vector<16x96xbf16>, vector<560x96xbf16>, vector<16x96xbf16> -> vector<592x96xbf16>
    %105 = vector.extract_strided_slice %104 {offsets = [0, 0], sizes = [560, 96], strides = [1, 1]} : vector<592x96xbf16> to vector<560x96xbf16>
    %106 = vector.extract_strided_slice %104 {offsets = [32, 0], sizes = [560, 96], strides = [1, 1]} : vector<592x96xbf16> to vector<560x96xbf16>
    %107 = tpu.concatenate %105, %102, %106 in 1 : vector<560x96xbf16>, vector<560x96xbf16>, vector<560x96xbf16> -> vector<560x288xbf16>
    %c0_39 = arith.constant 0 : index
    %c0_40 = arith.constant 0 : index
    %108 = vector.load %arg7[%c0_39, %c0_40] : memref<288x32xbf16, #tpu.memory_space<vmem>>, vector<288x32xbf16>
    %cst_41 = arith.constant dense<0.000000e+00> : vector<560x32xf32>
    %109 = tpu.matmul %107, %108, %cst_41 {dimension_numbers = #tpu.dot_dimension_numbers<[1], [0], [0], [1], [0, 0, 1, 1], [], []>} : vector<560x288xbf16>, vector<288x32xbf16>, vector<560x32xf32> -> vector<560x32xf32>
    %c0_42 = arith.constant 0 : index
    %c0_43 = arith.constant 0 : index
    %110 = vector.load %arg8[%c0_42, %c0_43] : memref<1x32xf32, #tpu.memory_space<vmem>>, vector<1x32xf32>
    %111 = vector.broadcast %110 : vector<1x32xf32> to vector<560x32xf32>
    %112 = arith.addf %109, %111 : vector<560x32xf32>
    %113 = arith.mulf %112, %112 : vector<560x32xf32>
    %114 = arith.mulf %112, %113 : vector<560x32xf32>
    %cst_44 = arith.constant 4.471500e-02 : f32
    %115 = vector.broadcast %cst_44 : f32 to vector<560x32xf32>
    %116 = arith.mulf %115, %114 : vector<560x32xf32>
    %117 = arith.addf %112, %116 : vector<560x32xf32>
    %cst_45 = arith.constant 0.797884583 : f32
    %118 = vector.broadcast %cst_45 : f32 to vector<560x32xf32>
    %119 = arith.mulf %118, %117 : vector<560x32xf32>
    %120 = math.tanh %119 : vector<560x32xf32>
    %cst_46 = arith.constant 1.000000e+00 : f32
    %121 = vector.broadcast %cst_46 : f32 to vector<560x32xf32>
    %122 = arith.addf %121, %120 : vector<560x32xf32>
    %cst_47 = arith.constant 5.000000e-01 : f32
    %123 = vector.broadcast %cst_47 : f32 to vector<560x32xf32>
    %124 = arith.mulf %123, %122 : vector<560x32xf32>
    %125 = arith.mulf %112, %124 : vector<560x32xf32>
    %126 = arith.truncf %125 : vector<560x32xf32> to vector<560x32xbf16>
    %cst_48 = arith.constant 0.000000e+00 : bf16
    %127 = vector.broadcast %cst_48 : bf16 to vector<16x32xbf16>
    %128 = tpu.concatenate %127, %126, %127 in 0 : vector<16x32xbf16>, vector<560x32xbf16>, vector<16x32xbf16> -> vector<592x32xbf16>
    %129 = arith.mulf %126, %2 : vector<560x32xbf16>
    %130 = vector.extract_strided_slice %128 {offsets = [15, 0], sizes = [560, 32], strides = [1, 1]} : vector<592x32xbf16> to vector<560x32xbf16>
    %131 = arith.mulf %130, %4 : vector<560x32xbf16>
    %132 = vector.extract_strided_slice %128 {offsets = [17, 0], sizes = [560, 32], strides = [1, 1]} : vector<592x32xbf16> to vector<560x32xbf16>
    %133 = arith.mulf %132, %6 : vector<560x32xbf16>
    %134 = tpu.concatenate %131, %129, %133 in 1 : vector<560x32xbf16>, vector<560x32xbf16>, vector<560x32xbf16> -> vector<560x96xbf16>
    %cst_49 = arith.constant 0.000000e+00 : bf16
    %135 = vector.broadcast %cst_49 : bf16 to vector<16x96xbf16>
    %136 = tpu.concatenate %135, %134, %135 in 0 : vector<16x96xbf16>, vector<560x96xbf16>, vector<16x96xbf16> -> vector<592x96xbf16>
    %137 = vector.extract_strided_slice %136 {offsets = [0, 0], sizes = [560, 96], strides = [1, 1]} : vector<592x96xbf16> to vector<560x96xbf16>
    %138 = vector.extract_strided_slice %136 {offsets = [32, 0], sizes = [560, 96], strides = [1, 1]} : vector<592x96xbf16> to vector<560x96xbf16>
    %139 = tpu.concatenate %137, %134, %138 in 1 : vector<560x96xbf16>, vector<560x96xbf16>, vector<560x96xbf16> -> vector<560x288xbf16>
    %c0_50 = arith.constant 0 : index
    %c0_51 = arith.constant 0 : index
    %140 = vector.load %arg9[%c0_50, %c0_51] : memref<288x4xbf16, #tpu.memory_space<vmem>>, vector<288x4xbf16>
    %cst_52 = arith.constant dense<0.000000e+00> : vector<560x4xf32>
    %141 = tpu.matmul %139, %140, %cst_52 {dimension_numbers = #tpu.dot_dimension_numbers<[1], [0], [0], [1], [0, 0, 1, 1], [], []>} : vector<560x288xbf16>, vector<288x4xbf16>, vector<560x4xf32> -> vector<560x4xf32>
    %c0_53 = arith.constant 0 : index
    %c0_54 = arith.constant 0 : index
    %142 = vector.load %arg10[%c0_53, %c0_54] : memref<1x4xf32, #tpu.memory_space<vmem>>, vector<1x4xf32>
    %143 = vector.broadcast %142 : vector<1x4xf32> to vector<560x4xf32>
    %144 = arith.addf %141, %143 : vector<560x4xf32>
    %c0_i32_55 = arith.constant 0 : i32
    %145 = arith.addi %0, %c0_i32_55 : i32
    %146 = arith.index_cast %145 : i32 to index
    %c1_56 = arith.constant 1 : index
    %147 = memref.load %arg1[%146, %c1_56] : memref<2x4xf32, #tpu.memory_space<smem>>
    %c0_i32_57 = arith.constant 0 : i32
    %148 = arith.addi %0, %c0_i32_57 : i32
    %149 = arith.index_cast %148 : i32 to index
    %c2_58 = arith.constant 2 : index
    %150 = memref.load %arg1[%149, %c2_58] : memref<2x4xf32, #tpu.memory_space<smem>>
    %c0_59 = arith.constant 0 : index
    %c0_60 = arith.constant 0 : index
    %c0_61 = arith.constant 0 : index
    %151 = vector.load %arg3[%c0_59, %c0_60, %c0_61] : memref<2x256x4xf32, #tpu.memory_space<vmem>>, vector<1x256x4xf32>
    %152 = vector.shape_cast %151 : vector<1x256x4xf32> to vector<256x4xf32>
    %153 = vector.broadcast %147 : f32 to vector<256x4xf32>
    %154 = arith.mulf %153, %152 : vector<256x4xf32>
    %155 = vector.extract_strided_slice %144 {offsets = [16, 0], sizes = [256, 4], strides = [1, 1]} : vector<560x4xf32> to vector<256x4xf32>
    %156 = vector.broadcast %150 : f32 to vector<256x4xf32>
    %157 = arith.mulf %156, %155 : vector<256x4xf32>
    %158 = arith.addf %154, %157 : vector<256x4xf32>
    %c0_62 = arith.constant 0 : index
    %c0_63 = arith.constant 0 : index
    %c0_64 = arith.constant 0 : index
    %159 = vector.load %arg11[%c0_62, %c0_63, %c0_64] : memref<2x256x4xf32, #tpu.memory_space<vmem>>, vector<1x256x4xf32>
    %160 = vector.shape_cast %159 : vector<1x256x4xf32> to vector<256x4xf32>
    %161 = vector.shape_cast %158 : vector<256x4xf32> to vector<1x256x4xf32>
    tpu.vector_store %arg11[%c0_62, %c0_63, %c0_64], %161 {strides = array<i32>} : memref<2x256x4xf32, #tpu.memory_space<vmem>>, vector<1x256x4xf32>,
    %c1_i32_65 = arith.constant 1 : i32
    %162 = arith.addi %0, %c1_i32_65 : i32
    %163 = arith.index_cast %162 : i32 to index
    %c1_66 = arith.constant 1 : index
    %164 = memref.load %arg1[%163, %c1_66] : memref<2x4xf32, #tpu.memory_space<smem>>
    %c1_i32_67 = arith.constant 1 : i32
    %165 = arith.addi %0, %c1_i32_67 : i32
    %166 = arith.index_cast %165 : i32 to index
    %c2_68 = arith.constant 2 : index
    %167 = memref.load %arg1[%166, %c2_68] : memref<2x4xf32, #tpu.memory_space<smem>>
    %c1_69 = arith.constant 1 : index
    %c0_70 = arith.constant 0 : index
    %c0_71 = arith.constant 0 : index
    %168 = vector.load %arg3[%c1_69, %c0_70, %c0_71] : memref<2x256x4xf32, #tpu.memory_space<vmem>>, vector<1x256x4xf32>
    %169 = vector.shape_cast %168 : vector<1x256x4xf32> to vector<256x4xf32>
    %170 = vector.broadcast %164 : f32 to vector<256x4xf32>
    %171 = arith.mulf %170, %169 : vector<256x4xf32>
    %172 = vector.extract_strided_slice %144 {offsets = [288, 0], sizes = [256, 4], strides = [1, 1]} : vector<560x4xf32> to vector<256x4xf32>
    %173 = vector.broadcast %167 : f32 to vector<256x4xf32>
    %174 = arith.mulf %173, %172 : vector<256x4xf32>
    %175 = arith.addf %171, %174 : vector<256x4xf32>
    %c1_72 = arith.constant 1 : index
    %c0_73 = arith.constant 0 : index
    %c0_74 = arith.constant 0 : index
    %176 = vector.load %arg11[%c1_72, %c0_73, %c0_74] : memref<2x256x4xf32, #tpu.memory_space<vmem>>, vector<1x256x4xf32>
    %177 = vector.shape_cast %176 : vector<1x256x4xf32> to vector<256x4xf32>
    %178 = vector.shape_cast %175 : vector<256x4xf32> to vector<1x256x4xf32>
    tpu.vector_store %arg11[%c1_72, %c0_73, %c0_74], %178 {strides = array<i32>} : memref<2x256x4xf32, #tpu.memory_space<vmem>>, vector<1x256x4xf32>,
    return
  }
  func.func @transform_0(%arg0: i32, %arg1: memref<2x4xf32, #tpu.memory_space<smem>>) -> (i32, i32, i32) {
    %c0_i32 = arith.constant 0 : i32
    %c0_i32_0 = arith.constant 0 : i32
    %c0_i32_1 = arith.constant 0 : i32
    return %arg0, %c0_i32, %c0_i32_0 : i32, i32, i32
  }
  func.func @transform_1(%arg0: i32, %arg1: memref<2x4xf32, #tpu.memory_space<smem>>) -> (i32, i32, i32) {
    %c0_i32 = arith.constant 0 : i32
    %c0_i32_0 = arith.constant 0 : i32
    %c0_i32_1 = arith.constant 0 : i32
    return %arg0, %c0_i32, %c0_i32_0 : i32, i32, i32
  }
  func.func @transform_2(%arg0: i32, %arg1: memref<2x4xf32, #tpu.memory_space<smem>>) -> (i32, i32, i32) {
    %c0_i32 = arith.constant 0 : i32
    %c0_i32_0 = arith.constant 0 : i32
    %c0_i32_1 = arith.constant 0 : i32
    %c0_i32_2 = arith.constant 0 : i32
    return %c0_i32, %c0_i32_0, %c0_i32_1 : i32, i32, i32
  }
  func.func @transform_3(%arg0: i32, %arg1: memref<2x4xf32, #tpu.memory_space<smem>>) -> (i32, i32) {
    %c0_i32 = arith.constant 0 : i32
    %c0_i32_0 = arith.constant 0 : i32
    %c0_i32_1 = arith.constant 0 : i32
    return %c0_i32, %c0_i32_0 : i32, i32
  }
  func.func @transform_4(%arg0: i32, %arg1: memref<2x4xf32, #tpu.memory_space<smem>>) -> (i32, i32) {
    %c0_i32 = arith.constant 0 : i32
    %c0_i32_0 = arith.constant 0 : i32
    %c0_i32_1 = arith.constant 0 : i32
    return %c0_i32, %c0_i32_0 : i32, i32
  }
  func.func @transform_5(%arg0: i32, %arg1: memref<2x4xf32, #tpu.memory_space<smem>>) -> (i32, i32) {
    %c0_i32 = arith.constant 0 : i32
    %c0_i32_0 = arith.constant 0 : i32
    %c0_i32_1 = arith.constant 0 : i32
    return %c0_i32, %c0_i32_0 : i32, i32
  }
  func.func @transform_6(%arg0: i32, %arg1: memref<2x4xf32, #tpu.memory_space<smem>>) -> (i32, i32) {
    %c0_i32 = arith.constant 0 : i32
    %c0_i32_0 = arith.constant 0 : i32
    %c0_i32_1 = arith.constant 0 : i32
    return %c0_i32, %c0_i32_0 : i32, i32
  }
  func.func @transform_7(%arg0: i32, %arg1: memref<2x4xf32, #tpu.memory_space<smem>>) -> (i32, i32) {
    %c0_i32 = arith.constant 0 : i32
    %c0_i32_0 = arith.constant 0 : i32
    %c0_i32_1 = arith.constant 0 : i32
    return %c0_i32, %c0_i32_0 : i32, i32
  }
  func.func @transform_8(%arg0: i32, %arg1: memref<2x4xf32, #tpu.memory_space<smem>>) -> (i32, i32) {
    %c0_i32 = arith.constant 0 : i32
    %c0_i32_0 = arith.constant 0 : i32
    %c0_i32_1 = arith.constant 0 : i32
    return %c0_i32, %c0_i32_0 : i32, i32
  }
  func.func @transform_9(%arg0: i32, %arg1: memref<2x4xf32, #tpu.memory_space<smem>>) -> (i32, i32, i32) {
    %c0_i32 = arith.constant 0 : i32
    %c0_i32_0 = arith.constant 0 : i32
    %c0_i32_1 = arith.constant 0 : i32
    return %arg0, %c0_i32, %c0_i32_0 : i32, i32, i32
  }
}

</mosaic_0001>

<bundles_post_ra>
// kernel: monster_diffusion_forward.1
= control target key start
LH: loop header
LB: loop body
LE: loop exit
PB: predicated region body
PF: predicated region fallthrough
CT: control target
= control target key end

     0   :  { %s20650_s0 = inlined_call_operand.vmem [shape: f32[2,4], index: 0, kind: input, shape index: {}]   ;;  %s20651_s1 = inlined_call_operand.vmem [shape: f32[2,2,32], index: 1, kind: input, shape index: {}]   ;;  %s20652_s2 = inlined_call_operand.vmem [shape: f32[2,256,4], index: 2, kind: input, shape index: {}]   ;;  %s20653_s3 = inlined_call_operand.vmem [shape: bf16[3,560,32], index: 3, kind: input, shape index: {}]   ;;  %s20654_s4 = inlined_call_operand.vmem [shape: bf16[36,32], index: 4, kind: input, shape index: {}]   ;;  %s20655_s5 = inlined_call_operand.vmem [shape: f32[1,32], index: 5, kind: input, shape index: {}]   ;;  %s20656_s6 = inlined_call_operand.vmem [shape: bf16[288,32], index: 6, kind: input, shape index: {}]   ;;  %s20657_s7 = inlined_call_operand.vmem [shape: f32[1,32], index: 7, kind: input, shape index: {}]   ;;  %s20658_s8 = inlined_call_operand.vmem [shape: bf16[288,4], index: 8, kind: input, shape index: {}]   ;;  %s20659_s9 = inlined_call_operand.vmem [shape: f32[1,4], index: 9, kind: input, shape index: {}]   ;;  %s20660_s10 = inlined_call_operand.vmem [shape: f32[2,256,4], index: 10, kind: output, shape index: {}]  }
   0x1   :  { %s15_s15 = sshll.u32 %s20650_s0, 4  ;;  %s16_s15 = int_to_ptr.vmem [resolvable:$true] %s15_s15 }
   0x2   :  { %s12537_s16 = scalar_lea.vmem %s16_s15, 32  ;;  %p12542_p1 = scmp.lt.s32.totalorder %s16_s15, %s16_s15 }
   0x3   :  { %p12538_p0 = scmp.ne.s32.totalorder %s16_s15, %s12537_s16  ;;  %p12543_p2 = scmp.lt.s32.totalorder %s12537_s16, %s12537_s16 }
   0x5   :  { %p12544_p3 = por %p12543_p2, %p12542_p1 }
   0x7   :  { %p12545_p4 = pnand %p12544_p3, %p12538_p0 }
   0x9   :  { %12548 = shalt.err (!%p12545_p4)  }
   0xa   :  { %s12551_s17 = smov [#allocation3]  }
   0xb   :  { %18 = dma.vmem_to_smem %s16_s15, 32, %s12551_s17, [#allocation2] }
   0xc   :  { %12549 = dma.done.wait [#allocation2], 32 }
   0xd   :  { %12550 = vsyncadd [#allocation2], 4294967264 }
   0xe   :  { %20 = sfence }
   0xf   :  { %v11866_v0 = vld [vmem:[%s20653_s3] sm:$0xff]   ;;  %s254_s20 = sld [smem:[#allocation3]]  ;;  %v11867_v2 = vld [vmem:[%s20653_s3 + $0x230] sm:$0xff]   ;;  %v11868_v3 = vld [vmem:[%s20653_s3 + $0x238] sm:$0xff]   ;;  %vm1388_vm0 = vsmask.f32 256 }
  0x10   :  { %v651_v1 = vmul.bf16 0.0|0.0, %v11866_v0  ;;  %v255_v5 = vld [vmem:[%s20652_s2] sm:$0xff]  ;;  %v256_v6 = vld [vmem:[%s20652_s2 + $0x8] sm:$0xff]  ;;  %v1390_v7 = vshrl.u32 %v11867_v2, 16  ;;  %v1393_v8 = vshll.u32 %v11867_v2, 16  ;;  %v1397_v9 = vshrl.u32 %v11868_v3, 16 }
  0x11   :  { %v1400_v10 = vshll.u32 %v11868_v3, 16  ;;  %v11869_v15 = vld [vmem:[%s20653_s3 + $0x8] sm:$0xff]   ;;  %v257_v16 = vld [vmem:[%s20652_s2 + $0x10] sm:$0xff]  ;;  %v258_v17 = vld [vmem:[%s20652_s2 + $0x18] sm:$0xff]  ;;  %s12552_s14 = smov 4   ;;  %vm2127_vm1 = vcmask 1046528  }
  0x12   :  { %v1741_v4 = vshll.u32 %v651_v1, 16  ;;  %v1744_v12 = vshrl.u32 %v651_v1, 16  ;;  %v1392_v13 = vrot.slane %v1390_v7, 7  ;;  %v1399_v14 = vrot.slane %v1397_v9, 7  ;;  %v11870_v19 = vld [vmem:[%s20653_s3 + $0x10] sm:$0xff]   ;;  %v11871_v24 = vld [vmem:[%s20653_s3 + $0x240] sm:$0xff]  }
  0x13   :  { %vm861_vm2 = vsmask.f32 7424  ;;  %v259_v28 = vld [vmem:[%s20652_s2 + $0x20] sm:$0xff]  ;;  %v260_v29 = vld [vmem:[%s20652_s2 + $0x28] sm:$0xff]  ;;  %v11872_v30 = vld [vmem:[%s20653_s3 + $0x18] sm:$0xff]   ;;  %v1405_v34 = vshrl.u32 %v11871_v24, 16 }
  0x14   :  { %v1743_v11 = vrot.slane %v1741_v4, 1  ;;  %v12652_v22 = vor.u32 %v1393_v8, %v1392_v13  ;;  %v1402_v23 = vor.u32 %v1400_v10, %v1399_v14  ;;  %v1408_v36 = vshll.u32 %v11871_v24, 16  ;;  %v11873_v39 = vld [vmem:[%s20653_s3 + $0x248] sm:$0xff]   ;;  %v261_v44 = vld [vmem:[%s20652_s2 + $0x30] sm:$0xff]  ;;  %v262_v57 = vld [vmem:[%s20652_s2 + $0x38] sm:$0xff]  ;;  %s12553_s12 = smov 8  }
  0x15   :  { %v12645_v18 = vstv %s254_s20  ;;  %v1407_v43 = vrot.slane %v1405_v34, 7  ;;  %v1413_v47 = vshrl.u32 %v11873_v39, 16  ;;  %v1416_v48 = vshll.u32 %v11873_v39, 16  ;;  %v11875_v62 = vld [vmem:[%s20653_s3 + $0x250] sm:$0xff]   ;;  %v11874_v3 = vld [vmem:[%s20653_s3 + $0x20] sm:$0xff]   ;;  %s12556_s20 = smov 12  }
  0x16   :  { %2019 = vrot.lane.b32.xlu1 %v1743_v11, %s12552_s14  ;;  %v288_v20 = vmul.f32 %v12645_v18, %v255_v5  ;;  %v289_v21 = vmul.f32 %v12645_v18, %v256_v6  ;;  %20890 = vst [vmem:[#allocation5_spill] sm:$0xff] %v12652_v22  ;;  %v1746_v25 = vor.u32 %v1744_v12, %v1743_v11  ;;  %v1704_v33 = vmul.bf16 0.0|0.0, %v12652_v22  ;;  %v263_v8 = vld [vmem:[%s20652_s2 + $0x40] sm:$0xff]  ;;  %s12557_s28 = smov 24   ;;  %s13298_s24 = sld [smem:[#allocation3 + $0x80]] }
  0x17   :  { %v290_v26 = vmul.f32 %v12645_v18, %v257_v16  ;;  %v291_v27 = vmul.f32 %v12645_v18, %v258_v17  ;;  %v12671_v32 = vsel %vm1388_vm0, %v1392_v13, %v1402_v23  ;;  %v292_v37 = vmul.f32 %v12645_v18, %v259_v28  ;;  %v264_v13 = vld [vmem:[%s20652_s2 + $0x48] sm:$0xff]  ;;  %s12559_s19 = smov 64   ;;  %s12560_s22 = smov 32  }
  0x18   :  { %v12668_v31 = vpack.c.bf16 %v289_v21, %v288_v20  ;;  %20891 = vst [vmem:[#allocation6_spill] sm:$0xff] %v12671_v32  ;;  %v293_v38 = vmul.f32 %v12645_v18, %v260_v29  ;;  %v2128_v41 = vrot.slane %v1704_v33, 1  ;;  %v1410_v52 = vor.u32 %v1408_v36, %v1407_v43  ;;  %v265_v20 = vld [vmem:[%s20652_s2 + $0x50] sm:$0xff]  ;;  %v11876_v36 = vld [vmem:[%s20653_s3 + $0x28] sm:$0xff]   ;;  %s12561_s21 = smov 96   ;;  %s10835_s30 = sld [smem:[#allocation3 + $0x81]] }
  0x19   :  { %v12674_v35 = vpack.c.bf16 %v291_v27, %v290_v26  ;;  %v1415_v56 = vrot.slane %v1413_v47, 7  ;;  %v294_v61 = vmul.f32 %v12645_v18, %v261_v44  ;;  %v295_v6 = vmul.f32 %v12645_v18, %v262_v57  ;;  %v266_v26 = vld [vmem:[%s20652_s2 + $0x58] sm:$0xff]  ;;  %v11879_v27 = vld [vmem:[%s20653_s3 + $0x260] sm:$0xff]   ;;  %v268_v47 = vld [vmem:[%s20652_s2 + $0x68] sm:$0xff]  ;;  %s10836_s13 = sld [smem:[#allocation3 + $0x82]] }
  0x1a   :  { %v1705_v40 = vmul.bf16 %v12671_v32, %v12668_v31  ;;  %v652_v42 = vmul.bf16 %v11869_v15, %v12668_v31  ;;  %v12688_v46 = vpack.c.bf16 %v293_v38, %v292_v37  ;;  %v12696_v60 = vsel %vm1388_vm0, %v1399_v14, %v1410_v52  ;;  %v11877_v14 = vld [vmem:[%s20653_s3 + $0x258] sm:$0xff]  }
  0x1b   :  { %v653_v45 = vmul.bf16 %v11870_v19, %v12674_v35  ;;  %20892 = vst [vmem:[#allocation7_spill] sm:$0xff] %v12696_v60  ;;  %v1706_v0 = vmul.bf16 %v12696_v60, %v12674_v35  ;;  %v1418_v2 = vor.u32 %v1416_v48, %v1415_v56  ;;  %v12726_v17 = vpack.c.bf16 %v295_v6, %v294_v61 }
  0x1c   :  { %v2129_v49 = vrot.slane %v1705_v40, 1  ;;  %v1748_v50 = vshll.u32 %v652_v42, 16  ;;  %v1752_v51 = vshrl.u32 %v652_v42, 16  ;;  %v654_v54 = vmul.bf16 %v11872_v30, %v12688_v46  ;;  %v267_v40 = vld [vmem:[%s20652_s2 + $0x60] sm:$0xff] }
  0x1d   :  { %v1756_v53 = vshll.u32 %v653_v45, 16  ;;  %v1760_v55 = vshrl.u32 %v653_v45, 16  ;;  %v2131_v9 = vrot.slane %v1706_v0, 1  ;;  %v12715_v12 = vsel %vm1388_vm0, %v1407_v43, %v1418_v2  ;;  %v11878_v45 = vld [vmem:[%s20653_s3 + $0x30] sm:$0xff]   ;;  %v11881_v2 = vld [vmem:[%s20653_s3 + $0x268] sm:$0xff]  }
  0x1e   :  { %v2130_v58 = vsel %vm2127_vm1, %v2128_v41, %v2129_v49  ;;  %v1750_v59 = vrot.slane %v1748_v50, 1  ;;  %v1764_v1 = vshll.u32 %v654_v54, 16  ;;  %v1768_v7 = vshrl.u32 %v654_v54, 16  ;;  %20893 = vst [vmem:[#allocation8_spill] sm:$0xff] %v12715_v12 }
  0x1f   :  { %2201 = vrot.lane.b32.xlu1 %v2130_v58, %s12553_s12  ;;  %v1758_v63 = vrot.slane %v1756_v53, 1  ;;  %v1707_v16 = vmul.bf16 %v12715_v12, %v12688_v46  ;;  %v1421_v19 = vshrl.u32 %v11875_v62, 16  ;;  %v2132_v21 = vsel %vm2127_vm1, %v2129_v49, %v2131_v9 }
  0x20   :  { %v1751_v4 = vsel %vm861_vm2, %v1746_v25, %v1750_v59  ;;  %v1754_v5 = vor.u32 %v1752_v51, %v1750_v59  ;;  %v1766_v11 = vrot.slane %v1764_v1, 1  ;;  %v1424_v25 = vshll.u32 %v11875_v62, 16  ;;  %v11880_v62 = vld [vmem:[%s20653_s3 + $0x38] sm:$0xff]  }
  0x21   :  { %2021 = vrot.lane.b32.xlu0 %v1751_v4, %s12552_s14  ;;  %v1762_v10 = vor.u32 %v1760_v55, %v1758_v63  ;;  %v2133_v28 = vrot.slane %v1707_v16, 1  ;;  %v655_v29 = vmul.bf16 %v11874_v3, %v12726_v17  ;;  %v1423_v30 = vrot.slane %v1421_v19, 7  ;;  %v270_v19 = vld [vmem:[%s20652_s2 + $0x78] sm:$0xff] }
  0x22   :  { %v1759_v15 = vsel %vm861_vm2, %v1754_v5, %v1758_v63  ;;  %v1770_v24 = vor.u32 %v1768_v7, %v1766_v11  ;;  %v296_v33 = vmul.f32 %v12645_v18, %v263_v8  ;;  %v297_v34 = vmul.f32 %v12645_v18, %v264_v13 }
  0x23   :  { %2199 = vrot.lane.b32.xlu1 %v2128_v41, %s12553_s12  ;;  %v1767_v23 = vsel %vm861_vm2, %v1762_v10, %v1766_v11  ;;  %v1429_v37 = vshrl.u32 %v11877_v14, 16  ;;  %v1432_v38 = vshll.u32 %v11877_v14, 16  ;;  %v298_v39 = vmul.f32 %v12645_v18, %v265_v20  ;;  %v269_v11 = vld [vmem:[%s20652_s2 + $0x70] sm:$0xff] }
  0x24   :  { %v2134_v41 = vsel %vm2127_vm1, %v2131_v9, %v2133_v28  ;;  %v1772_v42 = vshll.u32 %v655_v29, 16  ;;  %v1426_v43 = vor.u32 %v1424_v25, %v1423_v30  ;;  %v1776_v44 = vshrl.u32 %v655_v29, 16  ;;  %v11883_v20 = vld [vmem:[%s20653_s3 + $0x270] sm:$0xff]  }
  0x25   :  { %2023 = vrot.lane.b32.xlu0 %v1759_v15, %s12552_s14  ;;  %v12759_v48 = vpack.c.bf16 %v297_v34, %v296_v33  ;;  %v1431_v49 = vrot.slane %v1429_v37, 7  ;;  %v299_v50 = vmul.f32 %v12645_v18, %v266_v26  ;;  %v1437_v51 = vshrl.u32 %v11879_v27, 16 }
  0x26   :  { %v1774_v52 = vrot.slane %v1772_v42, 1  ;;  %v12763_v53 = vsel %vm1388_vm0, %v1415_v56, %v1426_v43  ;;  %v1440_v54 = vshll.u32 %v11879_v27, 16  ;;  %v300_v55 = vmul.f32 %v12645_v18, %v267_v40 }
  0x27   :  { %2205 = vrot.lane.b32.xlu1 %v2134_v41, %s12553_s12  ;;  %20894 = vst [vmem:[#allocation9_spill] sm:$0xff] %v12763_v53  ;;  %v1708_v57 = vmul.bf16 %v12763_v53, %v12726_v17  ;;  %v656_v58 = vmul.bf16 %v11876_v36, %v12759_v48  ;;  %v1434_v59 = vor.u32 %v1432_v38, %v1431_v49  ;;  %v1439_v0 = vrot.slane %v1437_v51, 7  ;;  %v11882_v38 = vld [vmem:[%s20653_s3 + $0x40] sm:$0xff]  }
  0x28   :  { %v12770_v61 = vpack.c.bf16 %v299_v50, %v298_v39  ;;  %v1775_v56 = vsel %vm861_vm2, %v1770_v24, %v1774_v52  ;;  %v1778_v63 = vor.u32 %v1776_v44, %v1774_v52  ;;  %v301_v1 = vmul.f32 %v12645_v18, %v268_v47  ;;  %v272_v39 = vld [vmem:[%s20652_s2 + $0x88] sm:$0xff]  ;;  %v11885_v44 = vld [vmem:[%s20653_s3 + $0x278] sm:$0xff]  }
  0x29   :  { %2203 = vrot.lane.b32.xlu0 %v2132_v21, %s12553_s12  ;;  %v2135_v3 = vrot.slane %v1708_v57, 1  ;;  %v1780_v4 = vshll.u32 %v656_v58, 16  ;;  %v12781_v5 = vsel %vm1388_vm0, %v1423_v30, %v1434_v59  ;;  %v1784_v8 = vshrl.u32 %v656_v58, 16  ;;  %v271_v30 = vld [vmem:[%s20652_s2 + $0x80] sm:$0xff]  ;;  %v273_v57 = vld [vmem:[%s20652_s2 + $0x90] sm:$0xff]  ;;  %v274_v58 = vld [vmem:[%s20652_s2 + $0x98] sm:$0xff] }
  0x2a   :  { %20895 = vst [vmem:[#allocation10_spill] sm:$0xff] %v12781_v5  ;;  %v657_v6 = vmul.bf16 %v11878_v45, %v12770_v61  ;;  %v1709_v7 = vmul.bf16 %v12781_v5, %v12759_v48  ;;  %v1442_v9 = vor.u32 %v1440_v54, %v1439_v0  ;;  %v12786_v10 = vpack.c.bf16 %v301_v1, %v300_v55  ;;  %v11884_v1 = vld [vmem:[%s20653_s3 + $0x48] sm:$0xff]  }
  0x2b   :  { %v2136_v13 = vsel %vm2127_vm1, %v2133_v28, %v2135_v3  ;;  %v1782_v14 = vrot.slane %v1780_v4, 1  ;;  %v1445_v25 = vshrl.u32 %v11881_v2, 16  ;;  %v1448_v37 = vshll.u32 %v11881_v2, 16  ;;  %v11887_v2 = vld [vmem:[%s20653_s3 + $0x280] sm:$0xff]  }
  0x2c   :  { %v1788_v15 = vshll.u32 %v657_v6, 16  ;;  %v1792_v16 = vshrl.u32 %v657_v6, 16  ;;  %2207 = vrot.lane.b32.xlu1 %v2136_v13, %s12553_s12  ;;  %v2137_v21 = vrot.slane %v1709_v7, 1  ;;  %v12801_v24 = vsel %vm1388_vm0, %v1431_v49, %v1442_v9  ;;  %v11886_v13 = vld [vmem:[%s20653_s3 + $0x50] sm:$0xff]  }
  0x2d   :  { %2025 = vrot.lane.b32.xlu0 %v1767_v23, %s12552_s14  ;;  %20896 = vst [vmem:[#allocation11_spill] sm:$0xff] %v12801_v24  ;;  %v658_v23 = vmul.bf16 %v11880_v62, %v12786_v10  ;;  %v1783_v26 = vsel %vm861_vm2, %v1778_v63, %v1782_v14  ;;  %v1786_v27 = vor.u32 %v1784_v8, %v1782_v14  ;;  %v1447_v36 = vrot.slane %v1445_v25, 7 }
  0x2e   :  { %v1790_v28 = vrot.slane %v1788_v15, 1  ;;  %v1710_v29 = vmul.bf16 %v12801_v24, %v12770_v61  ;;  %v2138_v33 = vsel %vm2127_vm1, %v2135_v3, %v2137_v21  ;;  %v302_v43 = vmul.f32 %v12645_v18, %v269_v11 }
  0x2f   :  { %v1796_v34 = vshll.u32 %v658_v23, 16  ;;  %v1450_v47 = vor.u32 %v1448_v37, %v1447_v36  ;;  %v303_v49 = vmul.f32 %v12645_v18, %v270_v19  ;;  %v1800_v50 = vshrl.u32 %v658_v23, 16 }
  0x30   :  { %v1791_v40 = vsel %vm861_vm2, %v1786_v27, %v1790_v28  ;;  %v2139_v41 = vrot.slane %v1710_v29, 1  ;;  %v1794_v42 = vor.u32 %v1792_v16, %v1790_v28  ;;  %2209 = vrot.lane.b32.xlu1 %v2138_v33, %s12553_s12  ;;  %v1453_v52 = vshrl.u32 %v11883_v20, 16 }
  0x31   :  { %2027 = vrot.lane.b32.xlu0 %v1775_v56, %s12552_s14  ;;  %v1798_v45 = vrot.slane %v1796_v34, 1  ;;  %v1456_v54 = vshll.u32 %v11883_v20, 16  ;;  %v304_v55 = vmul.f32 %v12645_v18, %v271_v30  ;;  %v12835_v62 = vsel %vm1388_vm0, %v1439_v0, %v1450_v47 }
  0x32   :  { %v2140_v51 = vsel %vm2127_vm1, %v2137_v21, %v2139_v41  ;;  %20897 = vst [vmem:[#allocation12_spill] sm:$0xff] %v12835_v62  ;;  %v12837_v56 = vpack.c.bf16 %v303_v49, %v302_v43  ;;  %v1711_v3 = vmul.bf16 %v12835_v62, %v12786_v10  ;;  %v1455_v4 = vrot.slane %v1453_v52, 7 }
  0x33   :  { %v1799_v59 = vsel %vm861_vm2, %v1794_v42, %v1798_v45  ;;  %v1802_v63 = vor.u32 %v1800_v50, %v1798_v45  ;;  %v305_v0 = vmul.f32 %v12645_v18, %v272_v39  ;;  %v1461_v6 = vshrl.u32 %v11885_v44, 16 }
  0x34   :  { %2211 = vrot.lane.b32.xlu1 %v2140_v51, %s12553_s12  ;;  %v659_v7 = vmul.bf16 %v11882_v38, %v12837_v56  ;;  %v1464_v8 = vshll.u32 %v11885_v44, 16  ;;  %v306_v9 = vmul.f32 %v12645_v18, %v273_v57  ;;  %v307_v11 = vmul.f32 %v12645_v18, %v274_v58 }
  0x35   :  { %2029 = vrot.lane.b32.xlu0 %v1783_v26, %s12552_s14  ;;  %v2141_v14 = vrot.slane %v1711_v3, 1  ;;  %v1458_v15 = vor.u32 %v1456_v54, %v1455_v4  ;;  %v12856_v16 = vpack.c.bf16 %v305_v0, %v304_v55  ;;  %v1463_v19 = vrot.slane %v1461_v6, 7  ;;  %v11888_v0 = vld [vmem:[%s20653_s3 + $0x118] sm:$0xff]   ;;  %v11889_v6 = vld [vmem:[%s20653_s3 + $0x120] sm:$0xff]  }
  0x36   :  { %v1804_v20 = vshll.u32 %v659_v7, 16  ;;  %v1808_v21 = vshrl.u32 %v659_v7, 16  ;;  %v12858_v23 = vpack.c.bf16 %v307_v11, %v306_v9  ;;  %v1469_v25 = vshrl.u32 %v11887_v2, 16  ;;  %v276_v9 = vld [vmem:[%s20652_s2 + $0xa8] sm:$0xff] }
  0x37   :  { %v2142_v26 = vsel %vm2127_vm1, %v2139_v41, %v2141_v14  ;;  %v12863_v27 = vsel %vm1388_vm0, %v1447_v36, %v1458_v15  ;;  %v660_v28 = vmul.bf16 %v11884_v1, %v12856_v16  ;;  %v1466_v29 = vor.u32 %v1464_v8, %v1463_v19  ;;  %v275_v8 = vld [vmem:[%s20652_s2 + $0xa0] sm:$0xff] }
  0x38   :  { %20898 = vst [vmem:[#allocation13_spill] sm:$0xff] %v12863_v27  ;;  %2213 = vrot.lane.b32.xlu1 %v2142_v26, %s12553_s12  ;;  %v1806_v30 = vrot.slane %v1804_v20, 1  ;;  %v1712_v33 = vmul.bf16 %v12863_v27, %v12837_v56  ;;  %v661_v34 = vmul.bf16 %v11886_v13, %v12858_v23  ;;  %v12870_v37 = vrot.slane %v1469_v25, 7  ;;  %v11890_v20 = vld [vmem:[%s20653_s3 + $0x128] sm:$0xff]  }
  0x39   :  { %2031 = vrot.lane.b32.xlu0 %v1791_v40, %s12552_s14  ;;  %v1812_v38 = vshll.u32 %v660_v28, 16  ;;  %v12873_v39 = vsel %vm1388_vm0, %v1455_v4, %v1466_v29  ;;  %v1472_v40 = vshll.u32 %v11887_v2, 16  ;;  %v1816_v44 = vshrl.u32 %v660_v28, 16  ;;  %v11892_v29 = vld [vmem:[%s20653_s3 + $0x58] sm:$0xff]  }
  0x3a   :  { %20899 = vst [vmem:[#allocation14_spill] sm:$0xff] %v12873_v39  ;;  %v2143_v36 = vrot.slane %v1712_v33, 1  ;;  %v1713_v41 = vmul.bf16 %v12873_v39, %v12856_v16  ;;  %v1807_v42 = vsel %vm861_vm2, %v1802_v63, %v1806_v30  ;;  %v1810_v43 = vor.u32 %v1808_v21, %v1806_v30  ;;  %v11891_v21 = vld [vmem:[%s20653_s3 + $0x130] sm:$0xff]   ;;  %v11893_v30 = vld [vmem:[%s20653_s3 + $0x138] sm:$0xff]  }
  0x3b   :  { %v1474_v45 = vor.u32 %v1472_v40, %v12870_v37  ;;  %v1814_v49 = vrot.slane %v1812_v38, 1  ;;  %v1820_v51 = vshll.u32 %v661_v34, 16  ;;  %v1824_v2 = vshrl.u32 %v661_v34, 16  ;;  %v11894_v38 = vld [vmem:[%s20653_s3 + $0x288] sm:$0xff]  }
  0x3c   :  { %v2144_v47 = vsel %vm2127_vm1, %v2141_v14, %v2143_v36  ;;  %v2145_v50 = vrot.slane %v1713_v41, 1  ;;  %v863_v7 = vshll.u32 %v11888_v0, 16  ;;  %v866_v11 = vshrl.u32 %v11888_v0, 16 }
  0x3d   :  { %2033 = vrot.lane.b32.xlu0 %v1799_v59, %s12552_s14  ;;  %2215 = vrot.lane.b32.xlu1 %v2144_v47, %s12553_s12  ;;  %v12883_v52 = vsel %vm1388_vm0, %v1463_v19, %v1474_v45  ;;  %v1815_v57 = vsel %vm861_vm2, %v1810_v43, %v1814_v49  ;;  %v1818_v58 = vor.u32 %v1816_v44, %v1814_v49  ;;  %v1822_v59 = vrot.slane %v1820_v51, 1 }
  0x3e   :  { %20900 = vst [vmem:[#allocation15_spill] sm:$0xff] %v12883_v52  ;;  %v2146_v54 = vsel %vm2127_vm1, %v2143_v36, %v2145_v50  ;;  %v1714_v55 = vmul.bf16 %v12883_v52, %v12858_v23  ;;  %v865_v13 = vrot.slane %v863_v7, 1  ;;  %v870_v14 = vshll.u32 %v11889_v6, 16  ;;  %v12935_v36 = vld [vmem:[%s20653_s3 + $0x290] sm:$0xff]  }
  0x3f   :  { %v1823_v3 = vsel %vm861_vm2, %v1818_v58, %v1822_v59  ;;  %v12897_v4 = vor.u32 %v1824_v2, %v1822_v59  ;;  %v308_v15 = vmul.f32 %v12645_v18, %v275_v8  ;;  %v309_v19 = vmul.f32 %v12645_v18, %v276_v9  ;;  %v12952_v58 = vld [vmem:[%s20653_s3 + $0x140] sm:$0xff]  }
  0x40   :  { %v12890_v63 = vrot.slane %v1714_v55, 1  ;;  %v868_v25 = vor.u32 %v866_v11, %v865_v13  ;;  %v872_v26 = vrot.slane %v870_v14, 1  ;;  %v878_v33 = vshll.u32 %v11890_v20, 16  ;;  %v278_v14 = vld [vmem:[%s20652_s2 + $0xb8] sm:$0xff] }
  0x41   :  { %2035 = vrot.lane.b32.xlu0 %v1807_v42, %s12552_s14  ;;  %2217 = vrot.lane.b32.xlu1 %v2146_v54, %s12553_s12  ;;  %v12921_v28 = vpack.c.bf16 %v309_v19, %v308_v15  ;;  %v886_v34 = vshll.u32 %v11891_v21, 16  ;;  %v874_v40 = vshrl.u32 %v11889_v6, 16  ;;  %v882_v42 = vshrl.u32 %v11890_v20, 16  ;;  %v279_v20 = vld [vmem:[%s20652_s2 + $0xc0] sm:$0xff] }
  0x42   :  { %v2148_v1 = vsel %vm2127_vm1, %v2145_v50, %v12890_v63  ;;  %v12938_v41 = vsel %vm861_vm2, %v868_v25, %v872_v26  ;;  %v894_v44 = vshll.u32 %v11893_v30, 16  ;;  %v12943_v45 = vmul.bf16 0, %v865_v13  ;;  %v11917_v50 = vld [vmem:[%s20654_s4] sm:$0xff]   ;;  %v277_v13 = vld [vmem:[%s20652_s2 + $0xb0] sm:$0xff] }
  0x43   :  { %20901 = vst [vmem:[#allocation16_spill] sm:$0xff] %v12938_v41  ;;  %v12941_v43 = vmul.bf16 %v11892_v29, %v12921_v28  ;;  %v880_v47 = vrot.slane %v878_v33, 1  ;;  %v888_v49 = vrot.slane %v886_v34, 1  ;;  %v1178_v51 = vmul.bf16 0.0|0.0, %v12938_v41 }
  0x44   :  { %20902 = vst [vmem:[#allocation17_spill] sm:$0xff] %v12943_v45  ;;  %v890_v54 = vshrl.u32 %v11891_v21, 16  ;;  %v1477_v55 = vshrl.u32 %v11894_v38, 16  ;;  %v1485_v2 = vshrl.u32 %v12935_v36, 16  ;;  %v898_v6 = vshrl.u32 %v11893_v30, 16  ;;  %v280_v21 = vld [vmem:[%s20652_s2 + $0xc8] sm:$0xff] }
  0x45   :  { %2037 = vrot.lane.b32.xlu0 %v1815_v57, %s12552_s14  ;;  %2219 = vrot.lane.b32.xlu1 %v2148_v1, %s12553_s12  ;;  %v1480_v57 = vshll.u32 %v11894_v38, 16  ;;  %v1828_v59 = vshll.u32 %v12941_v43, 16  ;;  %v896_v1 = vrot.slane %v894_v44, 1  ;;  %v902_v8 = vshll.u32 %v12952_v58, 16 }
  0x46   :  { %v12958_v0 = vrot.slane %v1477_v55, 7  ;;  %v12965_v9 = vrot.slane %v1485_v2, 7  ;;  %v1488_v11 = vshll.u32 %v12935_v36, 16  ;;  %vm2271_vm3 = vcmask 31744   ;;  %v12999_v36 = vld [vmem:[%s20653_s3 + $0x148] sm:$0xff]  }
  0x47   :  { %v12962_v7 = vrot.slane %v1828_v59, 1  ;;  %v876_v15 = vor.u32 %v874_v40, %v872_v26  ;;  %v884_v19 = vor.u32 %v882_v42, %v880_v47  ;;  %vm2380_vm4 = vcmask 64512   ;;  %v12985_v26 = vld [vmem:[%s20653_s3 + $0x298] sm:$0xff]   ;;  %v11896_v40 = vld [vmem:[%s20653_s3 + $0x60] sm:$0xff]   ;;  %v11918_v55 = vld [vmem:[%s20654_s4 + $0x8] sm:$0xff]  }
  0x48   :  { %v892_v25 = vor.u32 %v890_v54, %v888_v49  ;;  %v310_v30 = vmul.f32 %v12645_v18, %v277_v13  ;;  %v311_v33 = vmul.f32 %v12645_v18, %v278_v14  ;;  %v1482_v44 = vor.u32 %v1480_v57, %v12958_v0  ;;  %v11899_v57 = vld [vmem:[%s20653_s3 + $0x68] sm:$0xff]  }
  0x49   :  { %2039 = vrot.lane.b32.xlu0 %v1823_v3, %s12552_s14  ;;  %v20661_v3 = vmov 0.0   ;;  %v12988_v34 = vsel %vm861_vm2, %v876_v15, %v880_v47  ;;  %v12991_v38 = vsel %vm861_vm2, %v884_v19, %v888_v49  ;;  %v312_v47 = vmul.f32 %v12645_v18, %v279_v20 }
  0x4a   :  { %11013 = vmatprep.subr.bf16.mxu0 %v20661_v3  ;;  %11447 = vmatprep.subr.bf16.mxu1 %v20661_v3  ;;  %20903 = vst [vmem:[#allocation18_spill] sm:$0xff] %v12988_v34  ;;  %20904 = vst [vmem:[#allocation19_spill] sm:$0xff] %v12991_v38  ;;  %v13002_v42 = vsel %vm861_vm2, %v892_v25, %v896_v1  ;;  %v13007_v49 = vpack.c.bf16 %v311_v33, %v310_v30  ;;  %v1832_v54 = vshrl.u32 %v12941_v43, 16  ;;  %vm3117_vm5 = vcmask 1041408  }
  0x4b   :  { %11014 = vmatpush3.bf16.msra.mxu0 %v11917_v50  ;;  %11450 = vmatpush3.bf16.msra.mxu1 %v11917_v50  ;;  %20905 = vst [vmem:[#allocation20_spill] sm:$0xff] %v13002_v42  ;;  %v313_v50 = vmul.f32 %v12645_v18, %v280_v21  ;;  %v1179_v59 = vmul.bf16 %v12988_v34, %v12668_v31  ;;  %v904_v13 = vrot.slane %v902_v8, 1  ;;  %v906_v14 = vshrl.u32 %v12952_v58, 16  ;;  %v11920_v8 = vld [vmem:[%s20654_s4 + $0x10] ss:$0 sps:$4 sm:$0x33]  }
  0x4c   :  { %11015 = vmatprep.subr.bf16.mxu0 %v20661_v3  ;;  %11448 = vmatprep.subr.bf16.mxu1 %v20661_v3  ;;  %v900_v2 = vor.u32 %v898_v6, %v896_v1  ;;  %v1490_v20 = vor.u32 %v1488_v11, %v12965_v9  ;;  %v13027_v31 = vsel %vm861_vm2, %v12897_v4, %v12962_v7  ;;  %v1493_v6 = vshrl.u32 %v12985_v26, 16 }
  0x4d   :  { %v13031_v58 = vsel %vm1388_vm0, %v12870_v37, %v1482_v44  ;;  %v13033_v1 = vpack.c.bf16 %v313_v50, %v312_v47  ;;  %v13044_v21 = vmul.bf16 %v11896_v40, %v13007_v49  ;;  %v910_v37 = vshll.u32 %v12999_v36, 16 }
  0x4e   :  { %20906 = vst [vmem:[#allocation21_spill] sm:$0xff] %v13031_v58  ;;  %v13051_v30 = vsel %vm861_vm2, %v900_v2, %v904_v13  ;;  %v1496_v33 = vshll.u32 %v12985_v26, 16  ;;  %v3119_v44 = vsel %vm3117_vm5, %v11920_v8, 0  ;;  %v1715_v40 = vmul.bf16 %v13031_v58, %v12921_v28 }
  0x4f   :  { %11016 = vmatpush3.bf16.msra.mxu0 %v11918_v55  ;;  %11451 = vmatpush3.bf16.msra.mxu1 %v11918_v55  ;;  %20907 = vst [vmem:[#allocation22_spill] sm:$0xff] %v13051_v30  ;;  %v13059_v50 = vsel %vm1388_vm0, %v12958_v0, %v1490_v20  ;;  %v13063_v2 = vmul.bf16 %v11899_v57, %v13033_v1  ;;  %v13065_v26 = vrot.slane %v1493_v6, 7  ;;  %v1836_v0 = vshll.u32 %v13044_v21, 16  ;;  %v281_v57 = vld [vmem:[%s20652_s2 + $0xd0] sm:$0xff] }
  0x50   :  { %11017 = vmatprep.subr.bf16.mxu0 %v20661_v3  ;;  %11449 = vmatprep.subr.bf16.mxu1 %v20661_v3  ;;  %20908 = vst [vmem:[#allocation23_spill] sm:$0xff] %v13059_v50  ;;  %v912_v20 = vrot.slane %v910_v37, 1  ;;  %vm12555_vm6 = vmmov 0   ;;  %v1840_v19 = vshrl.u32 %v13044_v21, 16  ;;  %vm2842_vm7 = vcmask 97280  }
  0x51   :  { %11019 = vmatprep.mubr.msk.bf16.mxu0 %vm12555_vm6, %v20661_v3  ;;  %11091 = vmatprep.mubr.msk.bf16.mxu1 %vm12555_vm6, %v20661_v3  ;;  %v1844_v3 = vshll.u32 %v13063_v2, 16  ;;  %vm2948_vm8 = vcmask 195584   ;;  %vm3046_vm9 = vcmask 293888   ;;  %vm5498_vm10 = vcmask 261120  }
  0x52   :  { %vm5606_vm11 = vcmask 523264   ;;  %vm6067_vm12 = vcmask 785408  }
  0x53   :  { %11018 = vmatpush3.bf16.msra.mxu0 %v3119_v44  ;;  %11452 = vmatpush3.bf16.msra.mxu1 %v3119_v44  ;;  %vm16546_vm13 = vmneg %vm6067_vm12 }
  0x88   :  { %v2020_v29 = vpop.permute.xlu1 %2019 }
  0x89   :  { %v2274_v4 = vsel %vm2271_vm3, %v12943_v45, %v2020_v29 }
  0x91   :  { %v2202_v15 = vpop.permute.xlu1 %2201 }
  0x93   :  { %v2022_v11 = vpop.permute.xlu0 %2021 }
  0x94   :  { %v2277_v25 = vsel %vm2271_vm3, %v1178_v51, %v2022_v11 }
  0x95   :  { %v2384_v47 = vsel %vm2380_vm4, %v2277_v25, %v2202_v15  ;;  %v2200_v29 = vpop.permute.xlu1 %2199  ;;  %v13070_v15 = vld [vmem:[%s20653_s3 + $0x150] sm:$0xff]  }
  0x96   :  { %v2456_v55 = vshrl.u32 %v2384_v47, 16  ;;  %v2382_v51 = vsel %vm2380_vm4, %v2274_v4, %v2200_v29  ;;  %v2459_v44 = vshll.u32 %v2384_v47, 16  ;;  %v1716_v4 = vmul.bf16 %v13059_v50, %v13007_v49 }
  0x97   :  { %v2453_v8 = vshrl.u32 %v2382_v51, 16  ;;  %v2024_v11 = vpop.permute.xlu0 %2023  ;;  %v908_v29 = vor.u32 %v906_v14, %v904_v13  ;;  %v2149_v51 = vrot.slane %v1715_v40, 1  ;;  %v1834_v47 = vor.u32 %v1832_v54, %v12962_v7  ;;  %v282_v13 = vld [vmem:[%s20652_s2 + $0xd8] sm:$0xff]  ;;  %v13091_v14 = vld [vmem:[%s20653_s3 + $0x2a0] sm:$0xff]  }
  0x98   :  { %v2458_v25 = vrot.slane %v2456_v55, 7  ;;  %v1498_v40 = vor.u32 %v1496_v33, %v13065_v26  ;;  %v2280_v37 = vsel %vm2271_vm3, %v1179_v59, %v2024_v11  ;;  %v1838_v54 = vrot.slane %v1836_v0, 1 }
  0x99   :  { %v2455_v6 = vrot.slane %v2453_v8, 7  ;;  %v2206_v43 = vpop.permute.xlu1 %2205  ;;  %v918_v8 = vshll.u32 %v13070_v15, 16  ;;  %v914_v50 = vshrl.u32 %v12999_v36, 16  ;;  %v13106_v52 = vsel %vm861_vm2, %v908_v29, %v912_v20 }
  0x9a   :  { %v2461_v55 = vor.u32 %v2459_v44, %v2458_v25  ;;  %v13103_v44 = vrot.slane %v1716_v4, 1  ;;  %20909 = vst [vmem:[#allocation24_spill] sm:$0xff] %v13106_v52  ;;  %v314_v59 = vmul.f32 %v12645_v18, %v281_v57  ;;  %v315_v21 = vmul.f32 %v12645_v18, %v282_v13 }
  0x9b   :  { %v2204_v7 = vpop.permute.xlu0 %2203  ;;  %v1848_v36 = vshrl.u32 %v13063_v2, 16  ;;  %v1846_v11 = vrot.slane %v1844_v3, 1  ;;  %v13115_v0 = vsel %vm1388_vm0, %v12965_v9, %v1498_v40  ;;  %v920_v4 = vrot.slane %v918_v8, 1 }
  0x9c   :  { %v2386_v45 = vsel %vm2380_vm4, %v2280_v37, %v2204_v7  ;;  %v13101_v58 = vsel %vm1388_vm0, %v2455_v6, %v2461_v55  ;;  %20910 = vst [vmem:[#allocation25_spill] sm:$0xff] %v13115_v0  ;;  %v1501_v29 = vshrl.u32 %v13091_v14, 16  ;;  %v13121_v6 = vld [vmem:[%s20653_s3 + $0x158] sm:$0xff]   ;;  %v2150_v13 = vsel %vm2127_vm1, %v12890_v63, %v2149_v51 }
  0x9d   :  { %v2463_v33 = vshrl.u32 %v2386_v45, 16  ;;  %2701 = vrot.lane.b32.xlu0 %v13101_v58, %s12556_s20  ;;  %v2466_v55 = vshll.u32 %v2386_v45, 16  ;;  %v1839_v3 = vsel %vm861_vm2, %v1834_v47, %v1838_v54  ;;  %v20911_v9 = vmul.bf16 %v12991_v38, %v12674_v35  ;;  %v11902_v35 = vld [vmem:[%s20653_s3 + $0x70] sm:$0xff]  }
  0x9e   :  { %v2208_v40 = vpop.permute.xlu1 %2207  ;;  %v1842_v7 = vor.u32 %v1840_v19, %v1838_v54  ;;  %v916_v39 = vor.u32 %v914_v50, %v912_v20  ;;  %v1717_v63 = vmul.bf16 %v13115_v0, %v13033_v1  ;;  %v13137_v47 = vpack.c.bf16 %v315_v21, %v314_v59  ;;  %v283_v59 = vld [vmem:[%s20652_s2 + $0xe0] sm:$0xff] }
  0x9f   :  { %v2465_v37 = vrot.slane %v2463_v33, 7  ;;  %v2026_v57 = vpop.permute.xlu0 %2025  ;;  %v1504_v19 = vshll.u32 %v13091_v14, 16  ;;  %v922_v20 = vshrl.u32 %v13070_v15, 16  ;;  %v926_v54 = vshll.u32 %v13121_v6, 16  ;;  %v284_v14 = vld [vmem:[%s20652_s2 + $0xe8] sm:$0xff] }
  0xa0   :  { %v2283_v2 = vsel %vm2271_vm3, %v20911_v9, %v2026_v57  ;;  %v13142_v9 = vrot.slane %v1501_v29, 7  ;;  %v13167_v15 = vsel %vm861_vm2, %v1842_v7, %v1846_v11  ;;  %v13175_v29 = vld [vmem:[%s20653_s3 + $0x160] sm:$0xff]   ;;  %v13185_v7 = vor.u32 %v1848_v36, %v1846_v11 }
  0xa1   :  { %v2468_v34 = vor.u32 %v2466_v55, %v2465_v37  ;;  %v2388_v45 = vsel %vm2380_vm4, %v2283_v2, %v2206_v43  ;;  %2041 = vrot.lane.b32.xlu0 %v13027_v31, %s12552_s14  ;;  %v13150_v31 = vsel %vm2127_vm1, %v2149_v51, %v13103_v44  ;;  %v13170_v51 = vsel %vm861_vm2, %v916_v39, %v920_v4 }
  0xa2   :  { %v2470_v33 = vshrl.u32 %v2388_v45, 16  ;;  %v2473_v57 = vshll.u32 %v2388_v45, 16  ;;  %20913 = vst [vmem:[#allocation26_spill] sm:$0xff] %v13170_v51  ;;  %v13183_v2 = vmul.bf16 %v11902_v35, %v13137_v47  ;;  %v924_v0 = vor.u32 %v922_v20, %v920_v4 }
  0xa3   :  { %v2028_v50 = vpop.permute.xlu0 %2027  ;;  %v13146_v43 = vsel %vm1388_vm0, %v2458_v25, %v2468_v34  ;;  %v20912_v34 = vmul.bf16 %v13002_v42, %v12688_v46  ;;  %v13180_v46 = vrot.slane %v1717_v63, 1  ;;  %v928_v42 = vrot.slane %v926_v54, 1  ;;  %v13193_v63 = vld [vmem:[%s20653_s3 + $0x2a8] sm:$0xff]  }
  0xa4   :  { %v2472_v21 = vrot.slane %v2470_v33, 7  ;;  %2772 = vrot.lane.b32.xlu1 %v13146_v43, %s12557_s28  ;;  %v20914_v11 = vmul.bf16 %v13051_v30, %v12726_v17  ;;  %v930_v17 = vshrl.u32 %v13121_v6, 16 }
  0xa5   :  { %v2286_v25 = vsel %vm2271_vm3, %v20912_v34, %v2028_v50  ;;  %2703 = vrot.lane.b32.xlu0 %v13146_v43, %s12556_s20  ;;  %v2210_v50 = vpop.permute.xlu1 %2209  ;;  %v1506_v34 = vor.u32 %v1504_v19, %v13142_v9  ;;  %v13209_v20 = vsel %vm2127_vm1, %v13103_v44, %v13180_v46 }
  0xa6   :  { %v2390_v55 = vsel %vm2380_vm4, %v2286_v25, %v2208_v40  ;;  %v2475_v45 = vor.u32 %v2473_v57, %v2472_v21  ;;  %v316_v40 = vmul.f32 %v12645_v18, %v283_v59  ;;  %v317_v25 = vmul.f32 %v12645_v18, %v284_v14 }
  0xa7   :  { %v2477_v39 = vshrl.u32 %v2390_v55, 16  ;;  %v2480_v33 = vshll.u32 %v2390_v55, 16  ;;  %v2030_v8 = vpop.permute.xlu0 %2029  ;;  %v934_v57 = vshll.u32 %v13175_v29, 16  ;;  %v13222_v44 = vsel %vm1388_vm0, %v13065_v26, %v1506_v34 }
  0xa8   :  { %2221 = vrot.lane.b32.xlu1 %v2150_v13, %s12553_s12  ;;  %v2289_v35 = vsel %vm2271_vm3, %v20914_v11, %v2030_v8  ;;  %v13201_v4 = vsel %vm1388_vm0, %v2465_v37, %v2475_v45  ;;  %v1184_v13 = vmul.bf16 %v13170_v51, %v12770_v61  ;;  %v13217_v37 = vld [vmem:[%s20653_s3 + $0x168] sm:$0xff]   ;;  %20915 = vst [vmem:[#allocation27_spill] sm:$0xff] %v13222_v44  ;;  %v11905_v45 = vld [vmem:[%s20653_s3 + $0x78] sm:$0xff]  }
  0xa9   :  { %v2479_v36 = vrot.slane %v2477_v39, 7  ;;  %v2392_v19 = vsel %vm2380_vm4, %v2289_v35, %v2210_v50  ;;  %2043 = vrot.lane.b32.xlu0 %v1839_v3, %s12552_s14  ;;  %v2212_v14 = vpop.permute.xlu1 %2211  ;;  %v1852_v3 = vshll.u32 %v13183_v2, 16  ;;  %v13225_v61 = vsel %vm861_vm2, %v924_v0, %v928_v42 }
  0xaa   :  { %v2484_v54 = vshrl.u32 %v2392_v19, 16  ;;  %v2487_v59 = vshll.u32 %v2392_v19, 16  ;;  %20916 = vst [vmem:[#allocation28_spill] sm:$0xff] %v13225_v61  ;;  %v13227_v6 = vpack.c.bf16 %v317_v25, %v316_v40  ;;  %v1509_v39 = vshrl.u32 %v13193_v63, 16 }
  0xab   :  { %v2482_v8 = vor.u32 %v2480_v33, %v2479_v36  ;;  %v2032_v55 = vpop.permute.xlu0 %2031  ;;  %v285_v33 = vld [vmem:[%s20652_s2 + $0xf0] sm:$0xff]  ;;  %v20917_v26 = vmul.bf16 %v13106_v52, %v12759_v48  ;;  %v936_v40 = vrot.slane %v934_v57, 1  ;;  %v932_v11 = vor.u32 %v930_v17, %v928_v42 }
  0xac   :  { %v2486_v50 = vrot.slane %v2484_v54, 7  ;;  %2774 = vrot.lane.b32.xlu1 %v13201_v4, %s12557_s28  ;;  %v938_v35 = vshrl.u32 %v13175_v29, 16  ;;  %v942_v19 = vshll.u32 %v13217_v37, 16  ;;  %v1854_v52 = vrot.slane %v1852_v3, 1 }
  0xad   :  { %v2292_v0 = vsel %vm2271_vm3, %v20917_v26, %v2032_v55  ;;  %v13243_v34 = vsel %vm1388_vm0, %v2472_v21, %v2482_v8  ;;  %2705 = vrot.lane.b32.xlu0 %v13201_v4, %s12556_s20  ;;  %v2214_v48 = vpop.permute.xlu1 %2213  ;;  %v286_v21 = vld [vmem:[%s20652_s2 + $0xf8] sm:$0xff]  ;;  %v1185_v8 = vmul.bf16 %v13225_v61, %v12786_v10  ;;  %v13258_v42 = vrot.slane %v1509_v39, 7 }
  0xae   :  { %v2394_v25 = vsel %vm2380_vm4, %v2292_v0, %v2212_v14  ;;  %v2489_v54 = vor.u32 %v2487_v59, %v2486_v50  ;;  %v13256_v14 = vmul.bf16 %v11905_v45, %v13227_v6  ;;  %v1512_v29 = vshll.u32 %v13193_v63, 16 }
  0xaf   :  { %v2491_v51 = vshrl.u32 %v2394_v25, 16  ;;  %v2494_v30 = vshll.u32 %v2394_v25, 16  ;;  %v2034_v57 = vpop.permute.xlu0 %2033  ;;  %v318_v55 = vmul.f32 %v12645_v18, %v285_v33  ;;  %v13272_v45 = vsel %vm861_vm2, %v932_v11, %v936_v40 }
  0xb0   :  { %2223 = vrot.lane.b32.xlu1 %v13150_v31, %s12553_s12  ;;  %v2295_v59 = vsel %vm2271_vm3, %v1184_v13, %v2034_v57  ;;  %v13265_v3 = vsel %vm1388_vm0, %v2479_v36, %v2489_v54  ;;  %20918 = vst [vmem:[#allocation29_spill] sm:$0xff] %v13272_v45  ;;  %v11909_v31 = vld [vmem:[%s20653_s3 + $0x2b0] sm:$0xff]   ;;  %v13277_v63 = vrot.slane %v942_v19, 1  ;;  %v319_v33 = vmul.f32 %v12645_v18, %v286_v21 }
  0xb1   :  { %v2493_v17 = vrot.slane %v2491_v51, 7  ;;  %2045 = vrot.lane.b32.xlu0 %v13167_v15, %s12552_s14  ;;  %v2396_v10 = vsel %vm2380_vm4, %v2295_v59, %v2214_v48  ;;  %v940_v51 = vor.u32 %v938_v35, %v936_v40  ;;  %v2216_v26 = vpop.permute.xlu1 %2215  ;;  %v1718_v15 = vmul.bf16 %v13222_v44, %v13137_v47  ;;  %v11908_v59 = vld [vmem:[%s20653_s3 + $0x80] sm:$0xff]  }
  0xb2   :  { %v2498_v36 = vshrl.u32 %v2396_v10, 16  ;;  %v2501_v39 = vshll.u32 %v2396_v10, 16  ;;  %v1856_v25 = vshrl.u32 %v13183_v2, 16  ;;  %v1860_v11 = vshll.u32 %v13256_v14, 16 }
  0xb3   :  { %v2496_v13 = vor.u32 %v2494_v30, %v2493_v17  ;;  %v2036_v0 = vpop.permute.xlu0 %2035  ;;  %v1514_v54 = vor.u32 %v1512_v29, %v13258_v42  ;;  %v1186_v18 = vmul.bf16 %v13272_v45, %v12837_v56  ;;  %v1855_v2 = vsel %vm861_vm2, %v13185_v7, %v1854_v52 }
  0xb4   :  { %2776 = vrot.lane.b32.xlu1 %v13243_v34, %s12557_s28  ;;  %v2500_v40 = vrot.slane %v2498_v36, 7  ;;  %v2298_v30 = vsel %vm2271_vm3, %v1185_v8, %v2036_v0  ;;  %v1517_v48 = vshrl.u32 %v11909_v31, 16  ;;  %v13302_v21 = vsel %vm861_vm2, %v940_v51, %v13277_v63 }
  0xb5   :  { %v13289_v35 = vsel %vm1388_vm0, %v2486_v50, %v2496_v13  ;;  %2707 = vrot.lane.b32.xlu0 %v13243_v34, %s12556_s20  ;;  %v2398_v19 = vsel %vm2380_vm4, %v2298_v30, %v2216_v26  ;;  %20919 = vst [vmem:[#allocation30_spill] sm:$0xff] %v13302_v21  ;;  %v2218_v29 = vpop.permute.xlu1 %2217  ;;  %v13304_v56 = vpack.c.bf16 %v319_v33, %v318_v55  ;;  %v2155_v7 = vrot.slane %v1718_v15, 1 }
  0xb6   :  { %v2503_v50 = vor.u32 %v2501_v39, %v2500_v40  ;;  %v2505_v57 = vshrl.u32 %v2398_v19, 16  ;;  %v2508_v8 = vshll.u32 %v2398_v19, 16  ;;  %v1858_v10 = vor.u32 %v1856_v25, %v1854_v52 }
  0xb7   :  { %v1862_v13 = vrot.slane %v1860_v11, 1  ;;  %v13311_v36 = vsel %vm1388_vm0, %v13142_v9, %v1514_v54  ;;  %v2038_v26 = vpop.permute.xlu0 %2037  ;;  %v1187_v33 = vmul.bf16 %v13302_v21, %v12856_v16  ;;  %v13323_v15 = vrot.slane %v1517_v48, 7  ;;  %v11910_v48 = vld [vmem:[%s20653_s3 + $0x88] sm:$0xff]  }
  0xb8   :  { %20920 = vst [vmem:[#allocation31_spill] sm:$0xff] %v13311_v36  ;;  %2225 = vrot.lane.b32.xlu1 %v13209_v20, %s12553_s12  ;;  %v2507_v51 = vrot.slane %v2505_v57, 7  ;;  %v2301_v39 = vsel %vm2271_vm3, %v1186_v18, %v2038_v26  ;;  %v13317_v55 = vsel %vm1388_vm0, %v2493_v17, %v2503_v50  ;;  %v1520_v9 = vshll.u32 %v11909_v31, 16  ;;  %v11911_v20 = vld [vmem:[%s20653_s3 + $0x2b8] sm:$0xff]   ;;  %v10544_v26 = vld [vmem:[%s20652_s2 + $0x100] sm:$0xff] }
  0xb9   :  { %2047 = vrot.lane.b32.xlu0 %v1855_v2, %s12552_s14  ;;  %v2400_v52 = vsel %vm2380_vm4, %v2301_v39, %v2218_v29  ;;  %v667_v17 = vmul.bf16 %v11908_v59, %v13304_v56  ;;  %v2220_v54 = vpop.permute.xlu1 %2219  ;;  %v2156_v16 = vsel %vm2127_vm1, %v13180_v46, %v2155_v7  ;;  %v1719_v30 = vmul.bf16 %v13311_v36, %v13227_v6 }
  0xba   :  { %v2510_v0 = vor.u32 %v2508_v8, %v2507_v51  ;;  %v2512_v25 = vshrl.u32 %v2400_v52, 16  ;;  %v2515_v11 = vshll.u32 %v2400_v52, 16  ;;  %v1864_v18 = vshrl.u32 %v13256_v14, 16 }
  0xbb   :  { %v2040_v31 = vpop.permute.xlu0 %2039  ;;  %v1863_v2 = vsel %vm861_vm2, %v1858_v10, %v1862_v13  ;;  %v1522_v14 = vor.u32 %v1520_v9, %v13323_v15  ;;  %v1525_v57 = vshrl.u32 %v11911_v20, 16  ;;  %v13348_v8 = vstv %s13298_s24 }
  0xbc   :  { %2778 = vrot.lane.b32.xlu1 %v13265_v3, %s12557_s28  ;;  %v2514_v19 = vrot.slane %v2512_v25, 7  ;;  %v13341_v50 = vsel %vm1388_vm0, %v2500_v40, %v2510_v0  ;;  %v2304_v46 = vsel %vm2271_vm3, %v1187_v33, %v2040_v31  ;;  %v1868_v10 = vshll.u32 %v667_v17, 16  ;;  %v10545_v40 = vld [vmem:[%s20652_s2 + $0x108] sm:$0xff] }
  0xbd   :  { %2709 = vrot.lane.b32.xlu0 %v13265_v3, %s12556_s20  ;;  %v2402_v29 = vsel %vm2380_vm4, %v2304_v46, %v2220_v54  ;;  %v2157_v52 = vrot.slane %v1719_v30, 1  ;;  %v668_v9 = vmul.bf16 0.0|0.0, %v11910_v48  ;;  %v1528_v54 = vshll.u32 %v11911_v20, 16 }
  0xbe   :  { %v2517_v59 = vor.u32 %v2515_v11, %v2514_v19  ;;  %v2519_v39 = vshrl.u32 %v2402_v29, 16  ;;  %v2522_v33 = vshll.u32 %v2402_v29, 16  ;;  %v1527_v11 = vrot.slane %v1525_v57, 7  ;;  %v11912_v57 = vld [vmem:[%s20653_s3 + $0x90] sm:$0xff]  }
  0xbf   :  { %v366_v31 = vmul.f32 %v10544_v26, %v13348_v8  ;;  %v367_v46 = vmul.f32 %v10545_v40, %v13348_v8  ;;  %v1866_v36 = vor.u32 %v1864_v18, %v1862_v13  ;;  %v1870_v44 = vrot.slane %v1868_v10, 1 }
  0xc0   :  { %2227 = vrot.lane.b32.xlu1 %v2156_v16, %s12553_s12  ;;  %v13358_v0 = vrot.slane %v2519_v39, 7  ;;  %v13361_v25 = vsel %vm1388_vm0, %v2507_v51, %v2517_v59  ;;  %v13368_v16 = vsel %vm1388_vm0, %v13258_v42, %v1522_v14  ;;  %v11914_v51 = vld [vmem:[%s20653_s3 + $0x2c0] sm:$0xff]   ;;  %v2158_v20 = vsel %vm2127_vm1, %v2155_v7, %v2157_v52  ;;  %v10547_v59 = vld [vmem:[%s20652_s2 + $0x118] sm:$0xff]  ;;  %v11916_v39 = vld [vmem:[%s20653_s3 + $0x2c8] sm:$0xff]  }
  0xc1   :  { %2049 = vrot.lane.b32.xlu0 %v1863_v2, %s12552_s14  ;;  %20921 = vst [vmem:[#allocation32_spill] sm:$0xff] %v13368_v16  ;;  %v1876_v2 = vshll.u32 %v668_v9, 16  ;;  %v1720_v42 = vmul.bf16 %v13368_v16, %v13304_v56  ;;  %v1872_v13 = vshrl.u32 %v667_v17, 16  ;;  %v1530_v18 = vor.u32 %v1528_v54, %v1527_v11 }
  0xc2   :  { %v2524_v30 = vor.u32 %v2522_v33, %v13358_v0  ;;  %v13384_v14 = vpack.c.bf16 %v367_v46, %v366_v31  ;;  %v1871_v7 = vsel %vm861_vm2, %v1866_v36, %v1870_v44  ;;  %v1533_v29 = vshrl.u32 %v11914_v51, 16 }
  0xc3   :  { %v1878_v17 = vrot.slane %v1876_v2, 1  ;;  %v2159_v10 = vrot.slane %v1720_v42, 1  ;;  %v1874_v26 = vor.u32 %v1872_v13, %v1870_v44  ;;  %v13400_v40 = vsel %vm1388_vm0, %v13323_v15, %v1530_v18  ;;  %v11915_v18 = vld [vmem:[%s20653_s3 + $0x98] sm:$0xff]  }
  0xc4   :  { %2780 = vrot.lane.b32.xlu1 %v13289_v35, %s12557_s28  ;;  %v13378_v48 = vsel %vm1388_vm0, %v2514_v19, %v2524_v30  ;;  %v10546_v19 = vld [vmem:[%s20652_s2 + $0x110] sm:$0xff]  ;;  %20922 = vst [vmem:[#allocation33_spill] sm:$0xff] %v13400_v40  ;;  %v669_v36 = vmul.bf16 %v11912_v57, %v13384_v14  ;;  %v1535_v33 = vrot.slane %v1533_v29, 7  ;;  %v1536_v54 = vshll.u32 %v11914_v51, 16 }
  0xc5   :  { %2711 = vrot.lane.b32.xlu0 %v13289_v35, %s12556_s20  ;;  %v368_v31 = vmul.f32 %v10546_v19, %v13348_v8  ;;  %v369_v46 = vmul.f32 %v10547_v59, %v13348_v8  ;;  %v1880_v44 = vshrl.u32 %v668_v9, 16  ;;  %v2160_v15 = vsel %vm2127_vm1, %v2157_v52, %v2159_v10  ;;  %v10548_v9 = vld [vmem:[%s20652_s2 + $0x120] sm:$0xff]  ;;  %v10549_v52 = vld [vmem:[%s20652_s2 + $0x128] sm:$0xff] }
  0xc6   :  { %v1721_v30 = vmul.bf16 0.0|0.0, %v13400_v40  ;;  %v1541_v2 = vshrl.u32 %v11916_v39, 16  ;;  %v1879_v42 = vsel %vm861_vm2, %v1874_v26, %v1878_v17  ;;  %v1538_v51 = vor.u32 %v1536_v54, %v1535_v33 }
  0xc7   :  { %v13415_v13 = vpack.c.bf16 %v369_v46, %v368_v31  ;;  %v1882_v57 = vor.u32 %v1880_v44, %v1878_v17  ;;  %v1544_v59 = vshll.u32 %v11916_v39, 16  ;;  %v370_v31 = vmul.f32 %v10548_v9, %v13348_v8 }
  0xc8   :  { %2229 = vrot.lane.b32.xlu1 %v2158_v20, %s12553_s12  ;;  %v1884_v20 = vshll.u32 %v669_v36, 16  ;;  %v13428_v19 = vrot.slane %v1541_v2, 7  ;;  %v13431_v26 = vsel %vm1388_vm0, %v1527_v11, %v1538_v51  ;;  %v371_v46 = vmul.f32 %v10549_v52, %v13348_v8  ;;  %v11922_v2 = vld [vmem:[%s20653_s3 + $0xa0] sm:$0xff]  }
  0xc9   :  { %2051 = vrot.lane.b32.xlu0 %v1871_v7, %s12552_s14  ;;  %v2161_v7 = vrot.slane %v1721_v30, 1  ;;  %20923 = vst [vmem:[#allocation34_spill] sm:$0xff] %v13431_v26  ;;  %v670_v54 = vmul.bf16 %v11915_v18, %v13415_v13  ;;  %v1722_v39 = vmul.bf16 %v13431_v26, %v13384_v14  ;;  %v1888_v44 = vshrl.u32 %v669_v36, 16 }
  0xca   :  { %v1886_v29 = vrot.slane %v1884_v20, 1  ;;  %v1546_v30 = vor.u32 %v1544_v59, %v13428_v19  ;;  %v13445_v20 = vpack.c.bf16 %v371_v46, %v370_v31 }
  0xcb   :  { %v2162_v17 = vsel %vm2127_vm1, %v2159_v10, %v2161_v7  ;;  %v2163_v10 = vrot.slane %v1722_v39, 1  ;;  %v11925_v39 = vld [vmem:[%s20653_s3 + $0x2d0] sm:$0xff]  }
  0xcc   :  { %2782 = vrot.lane.b32.xlu1 %v13317_v55, %s12557_s28  ;;  %v1887_v11 = vsel %vm861_vm2, %v1882_v57, %v1886_v29  ;;  %v13453_v36 = vsel %vm1388_vm0, %v1535_v33, %v1546_v30  ;;  %v13456_v18 = vmul.bf16 %v11922_v2, %v13445_v20 }
  0xcd   :  { %2713 = vrot.lane.b32.xlu0 %v13317_v55, %s12556_s20  ;;  %20924 = vst [vmem:[#allocation35_spill] sm:$0xff] %v13453_v36  ;;  %v2164_v9 = vsel %vm2127_vm1, %v2161_v7, %v2163_v10  ;;  %v1723_v52 = vmul.bf16 %v13453_v36, %v13415_v13 }
  0xce   :  { %v1900_v33 = vshll.u32 %v13456_v18, 16 }
  0xcf   :  { %v13469_v59 = vrot.slane %v1723_v52, 1 }
  0xd0   :  { %2231 = vrot.lane.b32.xlu1 %v2160_v15, %s12553_s12  ;;  %v1892_v15 = vshll.u32 %v670_v54, 16  ;;  %v1902_v46 = vrot.slane %v1900_v33, 1  ;;  %v1552_v33 = vshll.u32 %v11925_v39, 16 }
  0xd1   :  { %2053 = vrot.lane.b32.xlu0 %v1879_v42, %s12552_s14  ;;  %v1890_v42 = vor.u32 %v1888_v44, %v1886_v29  ;;  %v1896_v29 = vshrl.u32 %v670_v54, 16  ;;  %v2166_v7 = vsel %vm2127_vm1, %v2163_v10, %v13469_v59  ;;  %v10550_v44 = vld [vmem:[%s20652_s2 + $0x130] sm:$0xff] }
  0xd2   :  { %v1894_v51 = vrot.slane %v1892_v15, 1  ;;  %v946_v15 = vshrl.u32 %v13217_v37, 16  ;;  %v372_v2 = vmul.f32 %v10550_v44, %v13348_v8 }
  0xd4   :  { %2784 = vrot.lane.b32.xlu1 %v13341_v50, %s12557_s28  ;;  %v1895_v57 = vsel %vm861_vm2, %v1890_v42, %v1894_v51  ;;  %v1898_v31 = vor.u32 %v1896_v29, %v1894_v51  ;;  %v1549_v42 = vshrl.u32 %v11925_v39, 16  ;;  %v11921_v51 = vld [vmem:[%s20653_s3 + $0x178] sm:$0xff]   ;;  %v11924_v29 = vld [vmem:[%s20653_s3 + $0xa8] sm:$0xff]  }
  0xd5   :  { %2715 = vrot.lane.b32.xlu0 %v13341_v50, %s12556_s20  ;;  %v962_v39 = vshrl.u32 %v11921_v51, 16 }
  0xd6   :  { %v1903_v54 = vsel %vm861_vm2, %v1898_v31, %v1902_v46  ;;  %v13504_v37 = vrot.slane %v1549_v42, 7  ;;  %v11923_v31 = vld [vmem:[%s20653_s3 + $0x180] sm:$0xff]  }
  0xd8   :  { %2233 = vrot.lane.b32.xlu1 %v2162_v17, %s12553_s12  ;;  %v11919_v17 = vld [vmem:[%s20653_s3 + $0x170] sm:$0xff]  }
  0xd9   :  { %2055 = vrot.lane.b32.xlu0 %v1887_v11, %s12552_s14  ;;  %v10551_v11 = vld [vmem:[%s20652_s2 + $0x138] sm:$0xff]  ;;  %v950_v30 = vshll.u32 %v11919_v17, 16 }
  0xda   :  { %v373_v10 = vmul.f32 %v10551_v11, %v13348_v8 }
  0xdb   :  { %v952_v52 = vrot.slane %v950_v30, 1  ;;  %v1554_v30 = vor.u32 %v1552_v33, %v13504_v37  ;;  %v1904_v33 = vshrl.u32 %v13456_v18, 16 }
  0xdc   :  { %2786 = vrot.lane.b32.xlu1 %v13361_v25, %s12557_s28 }
  0xdd   :  { %2717 = vrot.lane.b32.xlu0 %v13361_v25, %s12556_s20  ;;  %v13531_v40 = vsel %vm1388_vm0, %v13428_v19, %v1554_v30 }
  0xde   :  { %20926 = vst [vmem:[#allocation37_spill] sm:$0xff] %v13531_v40 }
  0xe0   :  { %2235 = vrot.lane.b32.xlu1 %v2164_v9, %s12553_s12  ;;  %v948_v9 = vor.u32 %v946_v15, %v13277_v63  ;;  %v11928_v63 = vld [vmem:[%s20653_s3 + $0x2d8] sm:$0xff]  }
  0xe1   :  { %2057 = vrot.lane.b32.xlu0 %v1895_v57, %s12552_s14  ;;  %v13499_v57 = vpack.c.bf16 %v373_v10, %v372_v2  ;;  %v966_v2 = vshll.u32 %v11923_v31, 16  ;;  %v10553_v10 = vld [vmem:[%s20652_s2 + $0x148] sm:$0xff] }
  0xe2   :  { %v13513_v11 = vsel %vm861_vm2, %v948_v9, %v952_v52  ;;  %v375_v21 = vmul.f32 %v10553_v10, %v13348_v8 }
  0xe3   :  { %20925 = vst [vmem:[#allocation36_spill] sm:$0xff] %v13513_v11  ;;  %v13516_v15 = vmul.bf16 %v11924_v29, %v13499_v57  ;;  %v1188_v9 = vmul.bf16 %v13513_v11, %v12858_v23  ;;  %v13538_v23 = vld [vmem:[%s20653_s3 + $0x188] sm:$0xff]  }
  0xe4   :  { %2788 = vrot.lane.b32.xlu1 %v13378_v48, %s12557_s28 }
  0xe5   :  { %2719 = vrot.lane.b32.xlu0 %v13378_v48, %s12556_s20  ;;  %v1908_v26 = vshll.u32 %v13516_v15, 16 }
  0xe8   :  { %2237 = vrot.lane.b32.xlu1 %v2166_v7, %s12553_s12  ;;  %v954_v7 = vshrl.u32 %v11919_v17, 16  ;;  %v10552_v17 = vld [vmem:[%s20652_s2 + $0x140] sm:$0xff] }
  0xe9   :  { %2059 = vrot.lane.b32.xlu0 %v1903_v54, %s12552_s14  ;;  %v958_v54 = vshll.u32 %v11921_v51, 16  ;;  %v1557_v51 = vshrl.u32 %v11928_v63, 16  ;;  %v374_v16 = vmul.f32 %v10552_v17, %v13348_v8  ;;  %v1724_v17 = vmul.bf16 %v13531_v40, %v13445_v20 }
  0xea   :  { %v956_v42 = vor.u32 %v954_v7, %v952_v52  ;;  %v968_v7 = vrot.slane %v966_v2, 1  ;;  %v13552_v2 = vld [vmem:[%s20653_s3 + $0x2e0] sm:$0xff]   ;;  %v974_v40 = vshll.u32 %v13538_v23, 16 }
  0xeb   :  { %v960_v36 = vrot.slane %v958_v54, 1  ;;  %v13547_v10 = vrot.slane %v1557_v51, 7  ;;  %v13556_v45 = vpack.c.bf16 %v375_v21, %v374_v16  ;;  %v20928_v51 = vmov 0.0   ;;  %v10554_v21 = vld [vmem:[%s20652_s2 + $0x150] sm:$0xff]  ;;  %v10555_v16 = vld [vmem:[%s20652_s2 + $0x158] sm:$0xff] }
  0xec   :  { %v976_v41 = vrot.slane %v974_v40, 1 }
  0xed   :  { %v964_v52 = vor.u32 %v962_v39, %v960_v36  ;;  %v13542_v11 = vsel %vm861_vm2, %v956_v42, %v960_v36  ;;  %v1560_v39 = vshll.u32 %v11928_v63, 16  ;;  %v1906_v36 = vor.u32 %v1904_v33, %v1902_v46 }
  0xee   :  { %20927 = vst [vmem:[#allocation38_spill] sm:$0xff] %v13542_v11  ;;  %v1910_v42 = vrot.slane %v1908_v26, 1  ;;  %v1189_v46 = vmul.bf16 %v13542_v11, %v12921_v28  ;;  %v13576_v33 = vrot.slane %v1724_v17, 1  ;;  %v13589_v17 = vld [vmem:[%s20653_s3 + $0x190] sm:$0xff]  }
  0xef   :  { %v13564_v63 = vsel %vm861_vm2, %v964_v52, %v968_v7  ;;  %v1565_v52 = vshrl.u32 %v13552_v2, 16 }
  0xf0   :  { %20929 = vst [vmem:[#allocation39_spill] sm:$0xff] %v13564_v63  ;;  %v1911_v11 = vsel %vm861_vm2, %v1906_v36, %v1910_v42 }
  0xf1   :  { %v13603_v62 = vrot.slane %v1565_v52, 7 }
 0x10f   :  { %v2702_v44 = vpop.permute.xlu0 %2701 }
 0x110   :  { %v2845_v18 = vsel %vm2842_vm7, 0, %v2702_v44 }
 0x113   :  { %v2042_v29 = vpop.permute.xlu0 %2041 }
 0x114   :  { %v2307_v44 = vsel %vm2271_vm3, %v1188_v9, %v2042_v29 }
 0x116   :  { %v2773_v54 = vpop.permute.xlu1 %2772 }
 0x117   :  { %v2950_v19 = vsel %vm2948_vm8, %v2845_v18, %v2773_v54  ;;  %v2704_v30 = vpop.permute.xlu0 %2703  ;;  %v11927_v18 = vld [vmem:[%s20653_s3 + $0xb0] sm:$0xff]   ;;  %v970_v54 = vshrl.u32 %v11923_v31, 16  ;;  %v1562_v31 = vor.u32 %v1560_v39, %v13547_v10  ;;  %v376_v39 = vmul.f32 %v10554_v21, %v13348_v8 }
 0x118   :  { %11020 = vmatmul.mubr.msk.bf16.vlgmr.msra.gmra.mrb[0].mxu0 %vm3046_vm9, %v2950_v19  ;;  %v13584_v61 = vmul.bf16 %v11927_v18, %v13556_v45  ;;  %v1912_v18 = vshrl.u32 %v13516_v15, 16  ;;  %v1568_v21 = vshll.u32 %v13552_v2, 16  ;;  %v10557_v15 = vld [vmem:[%s20652_s2 + $0x168] sm:$0xff] }
 0x119   :  { %11023 = vmatprep.mubr.msk.bf16.mxu0 %vm12555_vm6, %v20928_v51  ;;  %v972_v38 = vor.u32 %v970_v54, %v968_v7  ;;  %v13601_v54 = vsel %vm1388_vm0, %v13504_v37, %v1562_v31  ;;  %v13622_v2 = vld [vmem:[%s20653_s3 + $0x2e8] sm:$0xff]   ;;  %v11930_v31 = vld [vmem:[%s20653_s3 + $0xb8] sm:$0xff]  }
 0x11a   :  { %v2222_v9 = vpop.permute.xlu1 %2221  ;;  %20930 = vst [vmem:[#allocation40_spill] sm:$0xff] %v13601_v54  ;;  %v1916_v37 = vshll.u32 %v13584_v61, 16 }
 0x11b   :  { %v2404_v26 = vsel %vm2380_vm4, %v2307_v44, %v2222_v9  ;;  %v2044_v29 = vpop.permute.xlu0 %2043  ;;  %v377_v44 = vmul.f32 %v10555_v16, %v13348_v8  ;;  %v2848_v9 = vsel %vm2842_vm7, %v13101_v58, %v2704_v30  ;;  %v10556_v58 = vld [vmem:[%s20652_s2 + $0x160] sm:$0xff] }
 0x11c   :  { %v2526_v19 = vshrl.u32 %v2404_v26, 16  ;;  %v2529_v36 = vshll.u32 %v2404_v26, 16  ;;  %v2310_v16 = vsel %vm2271_vm3, %v1189_v46, %v2044_v29  ;;  %v13627_v46 = vsel %vm861_vm2, %v972_v38, %v976_v41 }
 0x11d   :  { %20931 = vst [vmem:[#allocation41_spill] sm:$0xff] %v13627_v46  ;;  %v978_v26 = vshrl.u32 %v13538_v23, 16  ;;  %v13631_v29 = vpack.c.bf16 %v377_v44, %v376_v39  ;;  %v1725_v38 = vmul.bf16 %v13601_v54, %v13499_v57  ;;  %v1570_v44 = vor.u32 %v1568_v21, %v13603_v62  ;;  %v13660_v21 = vld [vmem:[%s20653_s3 + $0x198] sm:$0xff]  }
 0x11e   :  { %v13595_v28 = vrot.slane %v2526_v19, 7  ;;  %v2775_v27 = vpop.permute.xlu1 %2774  ;;  %v1920_v54 = vshrl.u32 %v13584_v61, 16 }
 0x11f   :  { %v2952_v40 = vsel %vm2948_vm8, %v2848_v9, %v2775_v27  ;;  %v2706_v7 = vpop.permute.xlu0 %2705  ;;  %v2168_v27 = vsel %vm2127_vm1, %v13469_v59, %v13576_v33  ;;  %v982_v59 = vshll.u32 %v13589_v17, 16  ;;  %v1914_v9 = vor.u32 %v1912_v18, %v1910_v42 }
 0x120   :  { %v2531_v30 = vor.u32 %v2529_v36, %v13595_v28  ;;  %11024 = vmatmul.mubr.msk.bf16.gmra.mrb[4].mxu0 %vm3046_vm9, %v2952_v40  ;;  %v378_v36 = vmul.f32 %v10556_v58, %v13348_v8  ;;  %v1918_v18 = vrot.slane %v1916_v37, 1  ;;  %v1573_v58 = vshrl.u32 %v13622_v2, 16 }
 0x121   :  { %11027 = vmatprep.mubr.msk.bf16.mxu0 %vm12555_vm6, %v20928_v51  ;;  %v13666_v5 = vrot.slane %v1725_v38, 1 }
 0x122   :  { %v2224_v52 = vpop.permute.xlu1 %2223  ;;  %v13638_v19 = vsel %vm1388_vm0, %v13358_v0, %v2531_v30  ;;  %v379_v0 = vmul.f32 %v10557_v15, %v13348_v8  ;;  %v980_v30 = vor.u32 %v978_v26, %v976_v41  ;;  %v2851_v15 = vsel %vm2842_vm7, %v13146_v43, %v2706_v7  ;;  %v11933_v43 = vld [vmem:[%s20653_s3 + $0xc0] sm:$0xff]  }
 0x123   :  { %v2406_v23 = vsel %vm2380_vm4, %v2310_v16, %v2224_v52  ;;  %2721 = vrot.lane.b32.xlu0 %v13638_v19, %s12556_s20  ;;  %2790 = vrot.lane.b32.xlu1 %v13638_v19, %s12557_s28  ;;  %v2046_v39 = vpop.permute.xlu0 %2045  ;;  %v984_v16 = vrot.slane %v982_v59, 1  ;;  %v13654_v52 = vmul.bf16 %v11930_v31, %v13631_v29  ;;  %v13673_v26 = vsel %vm1388_vm0, %v13547_v10, %v1570_v44 }
 0x124   :  { %v2533_v40 = vshrl.u32 %v2406_v23, 16  ;;  %v2536_v37 = vshll.u32 %v2406_v23, 16  ;;  %20932 = vst [vmem:[#allocation42_spill] sm:$0xff] %v13673_v26  ;;  %v13675_v59 = vpack.c.bf16 %v379_v0, %v378_v36  ;;  %v20933_v31 = vmul.bf16 %v13564_v63, %v13007_v49  ;;  %v10558_v49 = vld [vmem:[%s20652_s2 + $0x170] sm:$0xff] }
 0x125   :  { %v1576_v10 = vshll.u32 %v13622_v2, 16  ;;  %v1919_v38 = vsel %vm861_vm2, %v1914_v9, %v1918_v18  ;;  %v1924_v36 = vshll.u32 %v13654_v52, 16  ;;  %v986_v23 = vshrl.u32 %v13589_v17, 16  ;;  %v13704_v2 = vld [vmem:[%s20653_s3 + $0x2f0] sm:$0xff]  }
 0x126   :  { %v13664_v24 = vrot.slane %v2533_v40, 7  ;;  %v2777_v42 = vpop.permute.xlu1 %2776  ;;  %v990_v44 = vshll.u32 %v13660_v21, 16  ;;  %v2170_v17 = vsel %vm2127_vm1, %v13576_v33, %v13666_v5  ;;  %v13714_v40 = vsel %vm861_vm2, %v980_v30, %v984_v16 }
 0x127   :  { %v2954_v41 = vsel %vm2948_vm8, %v2851_v15, %v2777_v42  ;;  %2061 = vrot.lane.b32.xlu0 %v1911_v11, %s12552_s14  ;;  %2239 = vrot.lane.b32.xlu1 %v2168_v27, %s12553_s12  ;;  %v2708_v61 = vpop.permute.xlu0 %2707  ;;  %v2313_v11 = vsel %vm2271_vm3, %v20933_v31, %v2046_v39  ;;  %v13686_v27 = vrot.slane %v1573_v58, 7  ;;  %v10559_v39 = vld [vmem:[%s20652_s2 + $0x178] sm:$0xff]  ;;  %20934 = vst [vmem:[#allocation43_spill] sm:$0xff] %v13714_v40 }
 0x128   :  { %v2538_v7 = vor.u32 %v2536_v37, %v13664_v24  ;;  %11028 = vmatmul.mubr.msk.bf16.gmra.mrb[8].mxu0 %vm3046_vm9, %v2954_v41  ;;  %v1922_v42 = vor.u32 %v1920_v54, %v1918_v18  ;;  %v13724_v37 = vmul.bf16 %v11933_v43, %v13675_v59  ;;  %v380_v54 = vmul.f32 %v10558_v49, %v13348_v8 }
 0x129   :  { %11031 = vmatprep.mubr.msk.bf16.mxu0 %vm12555_vm6, %v20928_v51  ;;  %v1578_v30 = vor.u32 %v1576_v10, %v13686_v27  ;;  %v381_v18 = vmul.f32 %v10559_v39, %v13348_v8  ;;  %v1926_v41 = vrot.slane %v1924_v36, 1  ;;  %v992_v31 = vrot.slane %v990_v44, 1 }
 0x12a   :  { %v2226_v9 = vpop.permute.xlu1 %2225  ;;  %v13708_v0 = vsel %vm1388_vm0, %v13595_v28, %v2538_v7  ;;  %v1726_v28 = vmul.bf16 %v13673_v26, %v13556_v45  ;;  %v988_v7 = vor.u32 %v986_v23, %v984_v16  ;;  %v2854_v43 = vsel %vm2842_vm7, %v13201_v4, %v2708_v61 }
 0x12b   :  { %v2408_v58 = vsel %vm2380_vm4, %v2313_v11, %v2226_v9  ;;  %2723 = vrot.lane.b32.xlu0 %v13708_v0, %s12556_s20  ;;  %2792 = vrot.lane.b32.xlu1 %v13708_v0, %s12557_s28  ;;  %v2048_v15 = vpop.permute.xlu0 %2047  ;;  %v13732_v11 = vld [vmem:[%s20653_s3 + $0x1a0] sm:$0xff]   ;;  %v1581_v9 = vshrl.u32 %v13704_v2, 16  ;;  %v1928_v49 = vshrl.u32 %v13654_v52, 16  ;;  %v1932_v44 = vshll.u32 %v13724_v37, 16 }
 0x12c   :  { %v2540_v33 = vshrl.u32 %v2408_v58, 16  ;;  %v2543_v10 = vshll.u32 %v2408_v58, 16  ;;  %v13743_v23 = vrot.slane %v1726_v28, 1  ;;  %v994_v39 = vshrl.u32 %v13660_v21, 16 }
 0x12d   :  { %v20935_v61 = vmul.bf16 %v13627_v46, %v13033_v1  ;;  %v1192_v21 = vmul.bf16 %v13714_v40, %v13137_v47  ;;  %v998_v1 = vshll.u32 %v13732_v11, 16  ;;  %v13767_v58 = vrot.slane %v1581_v9, 7  ;;  %v10561_v9 = vld [vmem:[%s20652_s2 + $0x188] sm:$0xff] }
 0x12e   :  { %v13737_v26 = vrot.slane %v2540_v33, 7  ;;  %v2779_v63 = vpop.permute.xlu1 %2778  ;;  %v1927_v47 = vsel %vm861_vm2, %v1922_v42, %v1926_v41  ;;  %v2172_v42 = vsel %vm2127_vm1, %v13666_v5, %v13743_v23 }
 0x12f   :  { %v2956_v36 = vsel %vm2948_vm8, %v2854_v43, %v2779_v63  ;;  %2063 = vrot.lane.b32.xlu0 %v1919_v38, %s12552_s14  ;;  %2241 = vrot.lane.b32.xlu1 %v2170_v17, %s12553_s12  ;;  %v2710_v16 = vpop.permute.xlu0 %2709  ;;  %v2316_v52 = vsel %vm2271_vm3, %v20935_v61, %v2048_v15  ;;  %v13755_v63 = vsel %vm1388_vm0, %v13603_v62, %v1578_v30  ;;  %v11936_v17 = vld [vmem:[%s20653_s3 + $0xc8] sm:$0xff]   ;;  %v1584_v15 = vshll.u32 %v13704_v2, 16  ;;  %v13773_v62 = vld [vmem:[%s20653_s3 + $0x2f8] sm:$0xff]  }
 0x130   :  { %v2545_v4 = vor.u32 %v2543_v10, %v13737_v26  ;;  %11032 = vmatmul.mubr.msk.bf16.gmra.mrb[12].mxu0 %vm3046_vm9, %v2956_v36  ;;  %20936 = vst [vmem:[#allocation44_spill] sm:$0xff] %v13755_v63  ;;  %v13757_v38 = vpack.c.bf16 %v381_v18, %v380_v54  ;;  %v13781_v30 = vsel %vm861_vm2, %v988_v7, %v992_v31  ;;  %v10560_v2 = vld [vmem:[%s20652_s2 + $0x180] sm:$0xff]  ;;  %v1936_v7 = vshrl.u32 %v13724_v37, 16 }
 0x131   :  { %11035 = vmatprep.mubr.msk.bf16.mxu0 %vm12555_vm6, %v20928_v51  ;;  %20937 = vst [vmem:[#allocation45_spill] sm:$0xff] %v13781_v30  ;;  %v1930_v54 = vor.u32 %v1928_v49, %v1926_v41  ;;  %v1727_v41 = vmul.bf16 %v13755_v63, %v13631_v29  ;;  %v1934_v10 = vrot.slane %v1932_v44, 1  ;;  %v996_v49 = vor.u32 %v994_v39, %v992_v31  ;;  %v13809_v37 = vld [vmem:[%s20653_s3 + $0x300] sm:$0xff]  }
 0x132   :  { %v2228_v28 = vpop.permute.xlu1 %2227  ;;  %v13777_v33 = vsel %vm1388_vm0, %v13664_v24, %v2545_v4  ;;  %v13801_v36 = vmul.bf16 %v11936_v17, %v13757_v38  ;;  %v1000_v4 = vrot.slane %v998_v1, 1  ;;  %v1586_v61 = vor.u32 %v1584_v15, %v13767_v58 }
 0x133   :  { %v2410_v18 = vsel %vm2380_vm4, %v2316_v52, %v2228_v28  ;;  %2725 = vrot.lane.b32.xlu0 %v13777_v33, %s12556_s20  ;;  %2794 = vrot.lane.b32.xlu1 %v13777_v33, %s12557_s28  ;;  %v2050_v24 = vpop.permute.xlu0 %2049  ;;  %v382_v5 = vmul.f32 %v10560_v2, %v13348_v8  ;;  %v1589_v52 = vshrl.u32 %v13773_v62, 16  ;;  %v2857_v28 = vsel %vm2842_vm7, %v13243_v34, %v2710_v16  ;;  %v13826_v34 = vld [vmem:[%s20653_s3 + $0x1a8] sm:$0xff]  }
 0x134   :  { %v2547_v43 = vshrl.u32 %v2410_v18, 16  ;;  %v2550_v31 = vshll.u32 %v2410_v18, 16  ;;  %v383_v17 = vmul.f32 %v10561_v9, %v13348_v8  ;;  %v1193_v2 = vmul.bf16 %v13781_v30, %v13227_v6 }
 0x135   :  { %v13821_v63 = vrot.slane %v1727_v41, 1  ;;  %v2319_v18 = vsel %vm2271_vm3, %v1192_v21, %v2050_v24  ;;  %v13837_v6 = vsel %vm1388_vm0, %v13686_v27, %v1586_v61  ;;  %v13839_v41 = vrot.slane %v1589_v52, 7  ;;  %v10562_v21 = vld [vmem:[%s20652_s2 + $0x190] sm:$0xff] }
 0x136   :  { %v13813_v44 = vrot.slane %v2547_v43, 7  ;;  %v2781_v39 = vpop.permute.xlu1 %2780  ;;  %20938 = vst [vmem:[#allocation46_spill] sm:$0xff] %v13837_v6  ;;  %v1592_v9 = vshll.u32 %v13773_v62, 16  ;;  %v1597_v24 = vshrl.u32 %v13809_v37, 16  ;;  %v13854_v27 = vsel %vm861_vm2, %v996_v49, %v1000_v4 }
 0x137   :  { %v2958_v1 = vsel %vm2948_vm8, %v2857_v28, %v2781_v39  ;;  %2065 = vrot.lane.b32.xlu0 %v1927_v47, %s12552_s14  ;;  %2243 = vrot.lane.b32.xlu1 %v2172_v42, %s12553_s12  ;;  %v2712_v15 = vpop.permute.xlu0 %2711  ;;  %v1935_v47 = vsel %vm861_vm2, %v1930_v54, %v1934_v10  ;;  %v1940_v42 = vshll.u32 %v13801_v36, 16  ;;  %v10563_v54 = vld [vmem:[%s20652_s2 + $0x198] sm:$0xff]  ;;  %20939 = vst [vmem:[#allocation47_spill] sm:$0xff] %v13854_v27  ;;  %v1002_v39 = vshrl.u32 %v13732_v11, 16 }
 0x138   :  { %v2552_v16 = vor.u32 %v2550_v31, %v13813_v44  ;;  %11036 = vmatmul.mubr.msk.bf16.gmra.mrb[16].mxu0 %vm3046_vm9, %v2958_v1  ;;  %v1938_v61 = vor.u32 %v1936_v7, %v1934_v10  ;;  %v13856_v62 = vpack.c.bf16 %v383_v17, %v382_v5  ;;  %v1006_v49 = vshll.u32 %v13826_v34, 16  ;;  %v11939_v7 = vld [vmem:[%s20653_s3 + $0xd0] sm:$0xff]  }
 0x139   :  { %11039 = vmatprep.mubr.msk.bf16.mxu0 %vm12555_vm6, %v20928_v51  ;;  %v1728_v5 = vmul.bf16 %v13837_v6, %v13675_v59  ;;  %v384_v17 = vmul.f32 %v10562_v21, %v13348_v8  ;;  %v385_v1 = vmul.f32 %v10563_v54, %v13348_v8  ;;  %v1600_v11 = vshll.u32 %v13809_v37, 16 }
 0x13a   :  { %v2230_v43 = vpop.permute.xlu1 %2229  ;;  %v13851_v28 = vsel %vm1388_vm0, %v13737_v26, %v2552_v16  ;;  %v2174_v26 = vsel %vm2127_vm1, %v13743_v23, %v13821_v63  ;;  %v1942_v16 = vrot.slane %v1940_v42, 1  ;;  %v13876_v23 = vrot.slane %v1597_v24, 7 }
 0x13b   :  { %v2412_v52 = vsel %vm2380_vm4, %v2319_v18, %v2230_v43  ;;  %2727 = vrot.lane.b32.xlu0 %v13851_v28, %s12556_s20  ;;  %2796 = vrot.lane.b32.xlu1 %v13851_v28, %s12557_s28  ;;  %v2052_v31 = vpop.permute.xlu0 %2051  ;;  %v1594_v18 = vor.u32 %v1592_v9, %v13839_v41  ;;  %v2860_v43 = vsel %vm2842_vm7, %v13265_v3, %v2712_v15  ;;  %v1944_v6 = vshrl.u32 %v13801_v36, 16  ;;  %v13893_v3 = vld [vmem:[%s20653_s3 + $0x308] sm:$0xff]  }
 0x13c   :  { %v2554_v10 = vshrl.u32 %v2412_v52, 16  ;;  %v2557_v40 = vshll.u32 %v2412_v52, 16  ;;  %v1004_v9 = vor.u32 %v1002_v39, %v1000_v4  ;;  %v1008_v54 = vrot.slane %v1006_v49, 1  ;;  %v11942_v4 = vld [vmem:[%s20653_s3 + $0xd8] sm:$0xff]  }
 0x13d   :  { %v13888_v37 = vmul.bf16 %v11939_v7, %v13856_v62  ;;  %v2322_v36 = vsel %vm2271_vm3, %v1193_v2, %v2052_v31  ;;  %v13909_v24 = vsel %vm1388_vm0, %v13767_v58, %v1594_v18  ;;  %v1602_v2 = vor.u32 %v1600_v11, %v13876_v23  ;;  %v10564_v58 = vld [vmem:[%s20652_s2 + $0x1a0] sm:$0xff] }
 0x13e   :  { %v13881_v30 = vrot.slane %v2554_v10, 7  ;;  %v2783_v46 = vpop.permute.xlu1 %2782  ;;  %20940 = vst [vmem:[#allocation48_spill] sm:$0xff] %v13909_v24  ;;  %v1943_v39 = vsel %vm861_vm2, %v1938_v61, %v1942_v16  ;;  %v1946_v49 = vor.u32 %v1944_v6, %v1942_v16  ;;  %v13933_v10 = vsel %vm861_vm2, %v1004_v9, %v1008_v54  ;;  %v10565_v6 = vld [vmem:[%s20652_s2 + $0x1a8] sm:$0xff] }
 0x13f   :  { %v2960_v21 = vsel %vm2948_vm8, %v2860_v43, %v2783_v46  ;;  %2067 = vrot.lane.b32.xlu0 %v1935_v47, %s12552_s14  ;;  %2245 = vrot.lane.b32.xlu1 %v2174_v26, %s12553_s12  ;;  %v2714_v42 = vpop.permute.xlu0 %2713  ;;  %v13898_v46 = vrot.slane %v1728_v5, 1  ;;  %v13900_v47 = vpack.c.bf16 %v385_v1, %v384_v17  ;;  %v1194_v26 = vmul.bf16 %v13854_v27, %v13304_v56 }
 0x140   :  { %v2559_v15 = vor.u32 %v2557_v40, %v13881_v30  ;;  %11040 = vmatmul.mubr.msk.bf16.gmra.mrb[20].mxu0 %vm3046_vm9, %v2960_v21  ;;  %v13914_v40 = vld [vmem:[%s20653_s3 + $0x1b0] sm:$0xff]   ;;  %20941 = vst [vmem:[#allocation49_spill] sm:$0xff] %v13933_v10  ;;  %v1948_v56 = vshll.u32 %v13888_v37, 16  ;;  %v1605_v61 = vshrl.u32 %v13893_v3, 16  ;;  %v1729_v1 = vmul.bf16 %v13909_v24, %v13757_v38 }
 0x141   :  { %11043 = vmatprep.mubr.msk.bf16.mxu0 %vm12555_vm6, %v20928_v51  ;;  %v2176_v17 = vsel %vm2127_vm1, %v13821_v63, %v13898_v46  ;;  %v13946_v16 = vmul.bf16 %v11942_v4, %v13900_v47  ;;  %v1010_v18 = vshrl.u32 %v13826_v34, 16  ;;  %v1014_v11 = vshll.u32 %v13914_v40, 16 }
 0x142   :  { %v2232_v52 = vpop.permute.xlu1 %2231  ;;  %v13919_v31 = vsel %vm1388_vm0, %v13813_v44, %v2559_v15  ;;  %v13952_v43 = vsel %vm1388_vm0, %v13839_v41, %v1602_v2  ;;  %v386_v21 = vmul.f32 %v10564_v58, %v13348_v8  ;;  %v2863_v9 = vsel %vm2842_vm7, %v13289_v35, %v2714_v42  ;;  %v13969_v35 = vld [vmem:[%s20653_s3 + $0x310] sm:$0xff]  }
 0x143   :  { %v2414_v7 = vsel %vm2380_vm4, %v2322_v36, %v2232_v52  ;;  %2729 = vrot.lane.b32.xlu0 %v13919_v31, %s12556_s20  ;;  %2798 = vrot.lane.b32.xlu1 %v13919_v31, %s12557_s28  ;;  %v2054_v44 = vpop.permute.xlu0 %2053  ;;  %20942 = vst [vmem:[#allocation50_spill] sm:$0xff] %v13952_v43  ;;  %v387_v4 = vmul.f32 %v10565_v6, %v13348_v8  ;;  %v1950_v41 = vrot.slane %v1948_v56, 1  ;;  %v13963_v2 = vrot.slane %v1605_v61, 7 }
 0x144   :  { %v2561_v5 = vshrl.u32 %v2414_v7, 16  ;;  %v2564_v15 = vshll.u32 %v2414_v7, 16  ;;  %v1608_v58 = vshll.u32 %v13893_v3, 16  ;;  %v2325_v7 = vsel %vm2271_vm3, %v1194_v26, %v2054_v44 }
 0x145   :  { %v1952_v6 = vshrl.u32 %v13888_v37, 16  ;;  %v1012_v56 = vor.u32 %v1010_v18, %v1008_v54  ;;  %v13977_v61 = vrot.slane %v1014_v11, 1  ;;  %v1956_v3 = vshll.u32 %v13946_v16, 16  ;;  %v11944_v37 = vld [vmem:[%s20653_s3 + $0xe0] sm:$0xff]  }
 0x146   :  { %v13957_v63 = vrot.slane %v2561_v5, 7  ;;  %v2785_v36 = vpop.permute.xlu1 %2784  ;;  %v1730_v5 = vmul.bf16 %v13952_v43, %v13856_v62  ;;  %v13986_v44 = vpack.c.bf16 %v387_v4, %v386_v21  ;;  %v1610_v18 = vor.u32 %v1608_v58, %v13963_v2  ;;  %v10566_v58 = vld [vmem:[%s20652_s2 + $0x1b0] sm:$0xff] }
 0x147   :  { %v2962_v52 = vsel %vm2948_vm8, %v2863_v9, %v2785_v36  ;;  %2069 = vrot.lane.b32.xlu0 %v1943_v39, %s12552_s14  ;;  %2247 = vrot.lane.b32.xlu1 %v2176_v17, %s12553_s12  ;;  %v2716_v34 = vpop.permute.xlu0 %2715  ;;  %v2177_v39 = vrot.slane %v1729_v1, 1  ;;  %v1195_v21 = vmul.bf16 0.0|0.0, %v13933_v10  ;;  %v1951_v9 = vsel %vm861_vm2, %v1946_v49, %v1950_v41 }
 0x148   :  { %v2566_v42 = vor.u32 %v2564_v15, %v13957_v63  ;;  %11044 = vmatmul.mubr.msk.bf16.gmra.mrb[24].mxu0 %vm3046_vm9, %v2962_v52  ;;  %v14004_v36 = vsel %vm861_vm2, %v1012_v56, %v13977_v61  ;;  %v1954_v4 = vor.u32 %v1952_v6, %v1950_v41  ;;  %v1958_v52 = vrot.slane %v1956_v3, 1 }
 0x149   :  { %11047 = vmatprep.mubr.msk.bf16.mxu0 %vm12555_vm6, %v20928_v51  ;;  %v2178_v15 = vsel %vm2127_vm1, %v13898_v46, %v2177_v39  ;;  %20943 = vst [vmem:[#allocation51_spill] sm:$0xff] %v14004_v36  ;;  %v2866_v49 = vsel %vm2842_vm7, %v13317_v55, %v2716_v34  ;;  %v14015_v56 = vmul.bf16 %v11944_v37, %v13986_v44  ;;  %v1616_v55 = vshll.u32 %v13969_v35, 16 }
 0x14a   :  { %v2234_v17 = vpop.permute.xlu1 %2233  ;;  %v13984_v26 = vsel %vm1388_vm0, %v13881_v30, %v2566_v42  ;;  %v1613_v30 = vshrl.u32 %v13969_v35, 16  ;;  %v2179_v42 = vrot.slane %v1730_v5, 1  ;;  %v14022_v6 = vsel %vm1388_vm0, %v13876_v23, %v1610_v18 }
 0x14b   :  { %v2416_v54 = vsel %vm2380_vm4, %v2325_v7, %v2234_v17  ;;  %2731 = vrot.lane.b32.xlu0 %v13984_v26, %s12556_s20  ;;  %2800 = vrot.lane.b32.xlu1 %v13984_v26, %s12557_s28  ;;  %v2056_v1 = vpop.permute.xlu0 %2055  ;;  %v10567_v7 = vld [vmem:[%s20652_s2 + $0x1b8] sm:$0xff]  ;;  %20944 = vst [vmem:[#allocation52_spill] sm:$0xff] %v14022_v6  ;;  %v388_v37 = vmul.f32 %v10566_v58, %v13348_v8  ;;  %v1960_v18 = vshrl.u32 %v13946_v16, 16  ;;  %v11949_v58 = vld [vmem:[%s20653_s3 + $0xe8] sm:$0xff]  }
 0x14c   :  { %v2568_v11 = vshrl.u32 %v2416_v54, 16  ;;  %v2571_v46 = vshll.u32 %v2416_v54, 16  ;;  %v14024_v3 = vrot.slane %v1613_v30, 7  ;;  %v2328_v5 = vsel %vm2271_vm3, %v1195_v21, %v2056_v1 }
 0x14d   :  { %v1959_v1 = vsel %vm861_vm2, %v1954_v4, %v1958_v52  ;;  %v1964_v30 = vshll.u32 %v14015_v56, 16 }
 0x14e   :  { %v2570_v17 = vrot.slane %v2568_v11, 7  ;;  %v2787_v10 = vpop.permute.xlu1 %2786  ;;  %v1196_v11 = vmul.bf16 %v14004_v36, %v13384_v14  ;;  %v2180_v14 = vsel %vm2127_vm1, %v2177_v39, %v2179_v42  ;;  %v1618_v4 = vor.u32 %v1616_v55, %v14024_v3 }
 0x14f   :  { %v2964_v41 = vsel %vm2948_vm8, %v2866_v49, %v2787_v10  ;;  %2071 = vrot.lane.b32.xlu0 %v1951_v9, %s12552_s14  ;;  %2249 = vrot.lane.b32.xlu1 %v2178_v15, %s12553_s12  ;;  %v389_v10 = vmul.f32 %v10567_v7, %v13348_v8  ;;  %v2718_v54 = vpop.permute.xlu0 %2717  ;;  %v1966_v39 = vrot.slane %v1964_v30, 1 }
 0x150   :  { %v2573_v34 = vor.u32 %v2571_v46, %v2570_v17  ;;  %11048 = vmatmul.mubr.msk.bf16.gmra.mrb[28].mxu0 %vm3046_vm9, %v2964_v41  ;;  %v2869_v7 = vsel %vm2842_vm7, %v13341_v50, %v2718_v54  ;;  %v1962_v41 = vor.u32 %v1960_v18, %v1958_v52  ;;  %v14065_v50 = vsel %vm1388_vm0, %v13963_v2, %v1618_v4 }
 0x151   :  { %11051 = vmatprep.mubr.msk.bf16.mxu0 %vm12555_vm6, %v20928_v51  ;;  %v14051_v16 = vpack.c.bf16 %v389_v10, %v388_v37  ;;  %20945 = vst [vmem:[#allocation53_spill] sm:$0xff] %v14065_v50  ;;  %v1732_v18 = vmul.bf16 %v14065_v50, %v13986_v44 }
 0x152   :  { %v2236_v23 = vpop.permute.xlu1 %2235  ;;  %v14037_v35 = vsel %vm1388_vm0, %v13957_v63, %v2573_v34  ;;  %v1731_v63 = vmul.bf16 %v14022_v6, %v13900_v47 }
 0x153   :  { %v2418_v21 = vsel %vm2380_vm4, %v2328_v5, %v2236_v23  ;;  %2733 = vrot.lane.b32.xlu0 %v14037_v35, %s12556_s20  ;;  %2802 = vrot.lane.b32.xlu1 %v14037_v35, %s12557_s28  ;;  %v2058_v34 = vpop.permute.xlu0 %2057  ;;  %v14068_v52 = vmul.bf16 %v11949_v58, %v14051_v16 }
 0x154   :  { %v2575_v9 = vshrl.u32 %v2418_v21, 16  ;;  %v2578_v15 = vshll.u32 %v2418_v21, 16  ;;  %v2181_v55 = vrot.slane %v1731_v63, 1  ;;  %v2331_v10 = vsel %vm2271_vm3, %v1196_v11, %v2058_v34  ;;  %v10568_v34 = vld [vmem:[%s20652_s2 + $0x1c0] sm:$0xff] }
 0x156   :  { %v2577_v49 = vrot.slane %v2575_v9, 7  ;;  %v2789_v46 = vpop.permute.xlu1 %2788  ;;  %v2182_v2 = vsel %vm2127_vm1, %v2179_v42, %v2181_v55 }
 0x157   :  { %v2966_v5 = vsel %vm2948_vm8, %v2869_v7, %v2789_v46  ;;  %2073 = vrot.lane.b32.xlu0 %v1959_v1, %s12552_s14  ;;  %2251 = vrot.lane.b32.xlu1 %v2180_v14, %s12553_s12  ;;  %v1967_v1 = vsel %vm861_vm2, %v1962_v41, %v1966_v39  ;;  %v1972_v14 = vshll.u32 %v14068_v52, 16  ;;  %v11952_v46 = vld [vmem:[%s20653_s3 + $0x318] sm:$0xff]   ;;  %v1018_v41 = vshrl.u32 %v13914_v40, 16 }
 0x158   :  { %v2580_v37 = vor.u32 %v2578_v15, %v2577_v49  ;;  %11052 = vmatmul.mubr.msk.bf16.gmra.mrb[32].mxu0 %vm3046_vm9, %v2966_v5  ;;  %v14091_v15 = vrot.slane %v1732_v18, 1  ;;  %v10569_v5 = vld [vmem:[%s20652_s2 + $0x1c8] sm:$0xff] }
 0x159   :  { %11055 = vmatprep.mubr.msk.bf16.mxu0 %vm12555_vm6, %v20928_v51  ;;  %v14093_v4 = vrot.slane %v1972_v14, 1  ;;  %v1020_v40 = vor.u32 %v1018_v41, %v13977_v61 }
 0x15a   :  { %v2238_v54 = vpop.permute.xlu1 %2237  ;;  %v14073_v23 = vsel %vm1388_vm0, %v2570_v17, %v2580_v37  ;;  %v1968_v17 = vshrl.u32 %v14015_v56, 16  ;;  %v2184_v56 = vsel %vm2127_vm1, %v2181_v55, %v14091_v15  ;;  %v1621_v55 = vshrl.u32 %v11952_v46, 16  ;;  %v11967_v37 = vld [vmem:[%s20653_s3 + $0x1f8] sm:$0xff]  }
 0x15b   :  { %v2420_v11 = vsel %vm2380_vm4, %v2331_v10, %v2238_v54  ;;  %2735 = vrot.lane.b32.xlu0 %v14073_v23, %s12556_s20  ;;  %2804 = vrot.lane.b32.xlu1 %v14073_v23, %s12557_s28  ;;  %v2720_v10 = vpop.permute.xlu0 %2719  ;;  %v390_v54 = vmul.f32 %v10568_v34, %v13348_v8  ;;  %v1090_v34 = vshrl.u32 %v11967_v37, 16 }
 0x15c   :  { %v2582_v30 = vshrl.u32 %v2420_v11, 16  ;;  %v2585_v21 = vshll.u32 %v2420_v11, 16  ;;  %v1970_v42 = vor.u32 %v1968_v17, %v1966_v39  ;;  %v14130_v18 = vrot.slane %v1621_v55, 7 }
 0x15e   :  { %v14086_v63 = vrot.slane %v2582_v30, 7  ;;  %v1975_v7 = vsel %vm861_vm2, %v1970_v42, %v14093_v4  ;;  %v1624_v30 = vshll.u32 %v11952_v46, 16  ;;  %v11950_v46 = vld [vmem:[%s20653_s3 + $0x1c8] sm:$0xff]  }
 0x15f   :  { %2075 = vrot.lane.b32.xlu0 %v1967_v1, %s12552_s14  ;;  %2253 = vrot.lane.b32.xlu1 %v2182_v2, %s12553_s12  ;;  %v391_v1 = vmul.f32 %v10569_v5, %v13348_v8  ;;  %v11948_v2 = vld [vmem:[%s20653_s3 + $0x1c0] sm:$0xff]   ;;  %v2060_v17 = vpop.permute.xlu0 %2059  ;;  %v1038_v6 = vshll.u32 %v11950_v46, 16 }
 0x160   :  { %v2587_v9 = vor.u32 %v2585_v21, %v14086_v63  ;;  %v1086_v21 = vshll.u32 %v11967_v37, 16  ;;  %v1626_v41 = vor.u32 %v1624_v30, %v14130_v18  ;;  %v1034_v50 = vshrl.u32 %v11948_v2, 16 }
 0x161   :  { %v14132_v14 = vpack.c.bf16 %v391_v1, %v390_v54  ;;  %v10571_v54 = vld [vmem:[%s20652_s2 + $0x1d8] sm:$0xff] }
 0x162   :  { %v14096_v58 = vsel %vm1388_vm0, %v2577_v49, %v2587_v9  ;;  %v11947_v49 = vld [vmem:[%s20653_s3 + $0x1b8] sm:$0xff]   ;;  %v11951_v9 = vld [vmem:[%s20653_s3 + $0xf0] sm:$0xff]  }
 0x163   :  { %2737 = vrot.lane.b32.xlu0 %v14096_v58, %s12556_s20  ;;  %2806 = vrot.lane.b32.xlu1 %v14096_v58, %s12557_s28  ;;  %v1022_v39 = vshll.u32 %v11947_v49, 16  ;;  %v1026_v61 = vshrl.u32 %v11947_v49, 16  ;;  %v14152_v55 = vmul.bf16 %v11951_v9, %v14132_v14  ;;  %v10570_v49 = vld [vmem:[%s20652_s2 + $0x1d0] sm:$0xff] }
 0x165   :  { %v1024_v11 = vrot.slane %v1022_v39, 1  ;;  %v14147_v39 = vrot.slane %v1086_v21, 1 }
 0x167   :  { %2255 = vrot.lane.b32.xlu1 %v2184_v56, %s12553_s12  ;;  %2077 = vrot.lane.b32.xlu0 %v1975_v7, %s12552_s14  ;;  %v14138_v42 = vsel %vm861_vm2, %v1020_v40, %v1024_v11  ;;  %v1030_v56 = vshll.u32 %v11948_v2, 16  ;;  %v11955_v7 = vld [vmem:[%s20653_s3 + $0x320] sm:$0xff]   ;;  %v1028_v1 = vor.u32 %v1026_v61, %v1024_v11  ;;  %v14161_v21 = vor.u32 %v1090_v34, %v14147_v39 }
 0x168   :  { %20946 = vst [vmem:[#allocation54_spill] sm:$0xff] %v14138_v42  ;;  %v1197_v5 = vmul.bf16 %v14138_v42, %v13415_v13  ;;  %v1629_v30 = vshrl.u32 %v11955_v7, 16  ;;  %v2872_v13 = vsel %vm2842_vm7, %v13361_v25, %v2720_v10  ;;  %v14167_v42 = vsel %vm1388_vm0, %v14024_v3, %v1626_v41  ;;  %v14186_v41 = vld [vmem:[%s20653_s3 + $0x1d0] sm:$0xff]  }
 0x169   :  { %v1032_v40 = vrot.slane %v1030_v56, 1  ;;  %20947 = vst [vmem:[#allocation55_spill] sm:$0xff] %v14167_v42  ;;  %v392_v11 = vmul.f32 %v10570_v49, %v13348_v8  ;;  %v393_v61 = vmul.f32 %v10571_v54, %v13348_v8  ;;  %v1976_v25 = vshrl.u32 %v14068_v52, 16  ;;  %v11958_v52 = vld [vmem:[%s20653_s3 + $0x328] sm:$0xff]  }
 0x16a   :  { %v2334_v56 = vsel %vm2271_vm3, %v1197_v5, %v2060_v17  ;;  %v1980_v10 = vshll.u32 %v14152_v55, 16  ;;  %v1733_v3 = vmul.bf16 %v14167_v42, %v14051_v16  ;;  %v14188_v17 = vrot.slane %v1629_v30, 7  ;;  %v11954_v42 = vld [vmem:[%s20653_s3 + $0xf8] sm:$0xff]  }
 0x16b   :  { %v14177_v2 = vsel %vm861_vm2, %v1028_v1, %v1032_v40  ;;  %v1036_v49 = vor.u32 %v1034_v50, %v1032_v40  ;;  %v1040_v54 = vrot.slane %v1038_v6, 1  ;;  %v1978_v43 = vor.u32 %v1976_v25, %v14093_v4  ;;  %v10573_v40 = vld [vmem:[%s20652_s2 + $0x1e8] sm:$0xff] }
 0x16c   :  { %20948 = vst [vmem:[#allocation56_spill] sm:$0xff] %v14177_v2  ;;  %v1982_v24 = vrot.slane %v1980_v10, 1  ;;  %v14202_v27 = vrot.slane %v1733_v3, 1  ;;  %v1046_v6 = vshll.u32 %v14186_v41, 16 }
 0x16d   :  { %v14217_v10 = vsel %vm861_vm2, %v1036_v49, %v1040_v54 }
 0x16e   :  { %20949 = vst [vmem:[#allocation57_spill] sm:$0xff] %v14217_v10  ;;  %v1048_v49 = vrot.slane %v1046_v6, 1  ;;  %v1983_v6 = vsel %vm861_vm2, %v1978_v43, %v1982_v24 }
 0x195   :  { %v2791_v37 = vpop.permute.xlu1 %2790  ;;  %v2722_v9 = vpop.permute.xlu0 %2721 }
 0x196   :  { %v2968_v36 = vsel %vm2948_vm8, %v2872_v13, %v2791_v37  ;;  %v1042_v13 = vshrl.u32 %v11950_v46, 16  ;;  %v14194_v37 = vpack.c.bf16 %v393_v61, %v392_v11  ;;  %v10572_v46 = vld [vmem:[%s20652_s2 + $0x1e0] sm:$0xff]  ;;  %v1637_v11 = vshrl.u32 %v11958_v52, 16 }
 0x197   :  { %11056 = vmatmul.mubr.msk.bf16.gmra.mrb[36].mxu0 %vm3046_vm9, %v2968_v36  ;;  %v1632_v36 = vshll.u32 %v11955_v7, 16  ;;  %v1198_v7 = vmul.bf16 %v14177_v2, %v13445_v20  ;;  %v2875_v20 = vsel %vm2842_vm7, %v13378_v48, %v2722_v9  ;;  %v1984_v2 = vshrl.u32 %v14152_v55, 16 }
 0x198   :  { %11059 = vmatprep.mubr.msk.bf16.mxu0 %vm12555_vm6, %v20928_v51  ;;  %v394_v9 = vmul.f32 %v10572_v46, %v13348_v8  ;;  %v1640_v55 = vshll.u32 %v11958_v52, 16 }
 0x199   :  { %v2240_v34 = vpop.permute.xlu1 %2239  ;;  %v2062_v5 = vpop.permute.xlu0 %2061  ;;  %v1634_v50 = vor.u32 %v1632_v36, %v14188_v17  ;;  %v1044_v36 = vor.u32 %v1042_v13, %v1040_v54  ;;  %v14235_v54 = vrot.slane %v1637_v11, 7  ;;  %v1986_v46 = vor.u32 %v1984_v2, %v1982_v24 }
 0x19a   :  { %v2422_v1 = vsel %vm2380_vm4, %v2334_v56, %v2240_v34  ;;  %v14221_v34 = vmul.bf16 %v11954_v42, %v14194_v37  ;;  %v2337_v48 = vsel %vm2271_vm3, %v1198_v7, %v2062_v5  ;;  %v14240_v5 = vld [vmem:[%s20653_s3 + $0x330] sm:$0xff]   ;;  %v1050_v24 = vshrl.u32 %v14186_v41, 16 }
 0x19b   :  { %v2589_v30 = vshrl.u32 %v2422_v1, 16  ;;  %v2592_v61 = vshll.u32 %v2422_v1, 16  ;;  %v395_v1 = vmul.f32 %v10573_v40, %v13348_v8  ;;  %v14233_v42 = vsel %vm1388_vm0, %v14130_v18, %v1634_v50  ;;  %v14250_v18 = vld [vmem:[%s20653_s3 + $0x1d8] sm:$0xff]  }
 0x19c   :  { %20950 = vst [vmem:[#allocation58_spill] sm:$0xff] %v14233_v42  ;;  %v1199_v50 = vmul.bf16 %v14217_v10, %v13499_v57  ;;  %v1988_v43 = vshll.u32 %v14221_v34, 16  ;;  %v1734_v40 = vmul.bf16 %v14233_v42, %v14132_v14  ;;  %v11957_v57 = vld [vmem:[%s20653_s3 + $0x100] sm:$0xff]   ;;  %v1642_v2 = vor.u32 %v1640_v55, %v14235_v54 }
 0x19d   :  { %v14214_v4 = vrot.slane %v2589_v30, 7  ;;  %v2793_v56 = vpop.permute.xlu1 %2792  ;;  %v2724_v25 = vpop.permute.xlu0 %2723  ;;  %v14265_v11 = vpack.c.bf16 %v395_v1, %v394_v9  ;;  %v1054_v42 = vshll.u32 %v14250_v18, 16 }
 0x19e   :  { %v2970_v3 = vsel %vm2948_vm8, %v2875_v20, %v2793_v56  ;;  %v10574_v20 = vld [vmem:[%s20652_s2 + $0x1f0] sm:$0xff]  ;;  %v1645_v56 = vshrl.u32 %v14240_v5, 16  ;;  %v1990_v41 = vrot.slane %v1988_v43, 1 }
 0x19f   :  { %v2594_v53 = vor.u32 %v2592_v61, %v14214_v4  ;;  %11060 = vmatmul.mubr.msk.bf16.gmra.mrb[40].mxu0 %vm3046_vm9, %v2970_v3  ;;  %v14277_v61 = vsel %vm861_vm2, %v1044_v36, %v1048_v49  ;;  %v2878_v3 = vsel %vm2842_vm7, %v13638_v19, %v2724_v25  ;;  %v396_v36 = vmul.f32 %v10574_v20, %v13348_v8 }
 0x1a0   :  { %11063 = vmatprep.mubr.msk.bf16.mxu0 %vm12555_vm6, %v20928_v51  ;;  %20951 = vst [vmem:[#allocation59_spill] sm:$0xff] %v14277_v61  ;;  %v1200_v43 = vmul.bf16 %v14277_v61, %v13556_v45  ;;  %v14328_v45 = vld [vmem:[%s20653_s3 + $0x1e0] sm:$0xff]  }
 0x1a1   :  { %v2242_v13 = vpop.permute.xlu1 %2241  ;;  %v2064_v30 = vpop.permute.xlu0 %2063  ;;  %v14244_v7 = vsel %vm1388_vm0, %v14086_v63, %v2594_v53  ;;  %v2186_v53 = vsel %vm2127_vm1, %v14091_v15, %v14202_v27  ;;  %v10575_v15 = vld [vmem:[%s20652_s2 + $0x1f8] sm:$0xff] }
 0x1a2   :  { %v2424_v52 = vsel %vm2380_vm4, %v2337_v48, %v2242_v13  ;;  %2739 = vrot.lane.b32.xlu0 %v14244_v7, %s12556_s20  ;;  %2808 = vrot.lane.b32.xlu1 %v14244_v7, %s12557_s28  ;;  %v397_v55 = vmul.f32 %v10575_v15, %v13348_v8  ;;  %v2340_v25 = vsel %vm2271_vm3, %v1199_v50, %v2064_v30  ;;  %v14307_v8 = vrot.slane %v1645_v56, 7 }
 0x1a3   :  { %v2596_v63 = vshrl.u32 %v2424_v52, 16  ;;  %v2599_v9 = vshll.u32 %v2424_v52, 16  ;;  %v14295_v52 = vrot.slane %v1734_v40, 1  ;;  %v1648_v30 = vshll.u32 %v14240_v5, 16 }
 0x1a4   :  { %v1991_v5 = vsel %vm861_vm2, %v1986_v46, %v1990_v41  ;;  %v14330_v15 = vpack.c.bf16 %v397_v55, %v396_v36 }
 0x1a5   :  { %v14284_v48 = vrot.slane %v2596_v63, 7  ;;  %v2795_v1 = vpop.permute.xlu1 %2794  ;;  %v2726_v13 = vpop.permute.xlu0 %2725  ;;  %v14298_v63 = vmul.bf16 %v11957_v57, %v14265_v11  ;;  %v1052_v57 = vor.u32 %v1050_v24, %v1048_v49  ;;  %v1650_v56 = vor.u32 %v1648_v30, %v14307_v8 }
 0x1a6   :  { %v2972_v10 = vsel %vm2948_vm8, %v2878_v3, %v2795_v1  ;;  %2079 = vrot.lane.b32.xlu0 %v1983_v6, %s12552_s14  ;;  %2257 = vrot.lane.b32.xlu1 %v2186_v53, %s12553_s12  ;;  %v1992_v6 = vshrl.u32 %v14221_v34, 16  ;;  %v14305_v53 = vsel %vm1388_vm0, %v14188_v17, %v1642_v2  ;;  %v1056_v17 = vrot.slane %v1054_v42, 1 }
 0x1a7   :  { %v2601_v19 = vor.u32 %v2599_v9, %v14284_v48  ;;  %11064 = vmatmul.mubr.msk.bf16.gmra.mrb[44].mxu0 %vm3046_vm9, %v2972_v10  ;;  %20952 = vst [vmem:[#allocation60_spill] sm:$0xff] %v14305_v53  ;;  %v11964_v10 = vld [vmem:[%s20653_s3 + $0x338] sm:$0xff]   ;;  %v2188_v42 = vsel %vm2127_vm1, %v14202_v27, %v14295_v52  ;;  %v1996_v24 = vshll.u32 %v14298_v63, 16  ;;  %v1735_v46 = vmul.bf16 %v14305_v53, %v14194_v37 }
 0x1a8   :  { %11067 = vmatprep.mubr.msk.bf16.mxu0 %vm12555_vm6, %v20928_v51  ;;  %v1994_v2 = vor.u32 %v1992_v6, %v1990_v41  ;;  %v1653_v3 = vshrl.u32 %v11964_v10, 16  ;;  %v2881_v9 = vsel %vm2842_vm7, %v13708_v0, %v2726_v13  ;;  %v1058_v41 = vshrl.u32 %v14250_v18, 16 }
 0x1a9   :  { %v2244_v50 = vpop.permute.xlu1 %2243  ;;  %v2066_v40 = vpop.permute.xlu0 %2065  ;;  %v14317_v34 = vsel %vm1388_vm0, %v14214_v4, %v2601_v19  ;;  %v11960_v4 = vld [vmem:[%s20653_s3 + $0x108] sm:$0xff]   ;;  %v1062_v6 = vshll.u32 %v14328_v45, 16 }
 0x1aa   :  { %v2426_v20 = vsel %vm2380_vm4, %v2340_v25, %v2244_v50  ;;  %2741 = vrot.lane.b32.xlu0 %v14317_v34, %s12556_s20  ;;  %2810 = vrot.lane.b32.xlu1 %v14317_v34, %s12557_s28  ;;  %v14347_v25 = vsel %vm861_vm2, %v1052_v57, %v1056_v17  ;;  %v14355_v0 = vmul.bf16 %v11960_v4, %v14330_v15  ;;  %v1998_v50 = vrot.slane %v1996_v24, 1  ;;  %v11966_v4 = vld [vmem:[%s20653_s3 + $0x340] sm:$0xff]  }
 0x1ab   :  { %v2603_v49 = vshrl.u32 %v2426_v20, 16  ;;  %v2606_v36 = vshll.u32 %v2426_v20, 16  ;;  %20953 = vst [vmem:[#allocation61_spill] sm:$0xff] %v14347_v25  ;;  %v2343_v30 = vsel %vm2271_vm3, %v1200_v43, %v2066_v40  ;;  %v2189_v57 = vrot.slane %v1735_v46, 1 }
 0x1ac   :  { %v14364_v20 = vsel %vm1388_vm0, %v14235_v54, %v1650_v56  ;;  %v14366_v18 = vrot.slane %v1653_v3, 7  ;;  %v1201_v43 = vmul.bf16 %v14347_v25, %v13631_v29  ;;  %v2000_v24 = vshrl.u32 %v14298_v63, 16  ;;  %v14387_v29 = vld [vmem:[%s20653_s3 + $0x110] sm:$0xff]  }
 0x1ad   :  { %v14344_v1 = vrot.slane %v2603_v49, 7  ;;  %v2797_v55 = vpop.permute.xlu1 %2796  ;;  %v2728_v19 = vpop.permute.xlu0 %2727  ;;  %20954 = vst [vmem:[#allocation62_spill] sm:$0xff] %v14364_v20  ;;  %v1064_v46 = vrot.slane %v1062_v6, 1  ;;  %v2004_v56 = vshll.u32 %v14355_v0, 16  ;;  %v1999_v63 = vsel %vm861_vm2, %v1994_v2, %v1998_v50 }
 0x1ae   :  { %v2974_v27 = vsel %vm2948_vm8, %v2881_v9, %v2797_v55  ;;  %2081 = vrot.lane.b32.xlu0 %v1991_v5, %s12552_s14  ;;  %2259 = vrot.lane.b32.xlu1 %v2188_v42, %s12553_s12  ;;  %v1656_v5 = vshll.u32 %v11964_v10, 16  ;;  %v1060_v10 = vor.u32 %v1058_v41, %v1056_v17  ;;  %v2190_v3 = vsel %vm2127_vm1, %v14295_v52, %v2189_v57  ;;  %v14397_v17 = vld [vmem:[%s20653_s3 + $0x1e8] sm:$0xff]  }
 0x1af   :  { %v2608_v13 = vor.u32 %v2606_v36, %v14344_v1  ;;  %11068 = vmatmul.mubr.msk.bf16.gmra.mrb[48].mxu0 %vm3046_vm9, %v2974_v27  ;;  %v1736_v9 = vmul.bf16 %v14364_v20, %v14265_v11  ;;  %v1661_v55 = vshrl.u32 %v11966_v4, 16  ;;  %v2884_v27 = vsel %vm2842_vm7, %v13777_v33, %v2728_v19 }
 0x1b0   :  { %11071 = vmatprep.mubr.msk.bf16.mxu0 %vm12555_vm6, %v20928_v51  ;;  %v1658_v36 = vor.u32 %v1656_v5, %v14366_v18  ;;  %v2006_v25 = vrot.slane %v2004_v56, 1  ;;  %v685_v5 = vmul.bf16 0.0|0.0, %v14387_v29  ;;  %v1664_v56 = vshll.u32 %v11966_v4, 16 }
 0x1b1   :  { %v2246_v49 = vpop.permute.xlu1 %2245  ;;  %v2068_v40 = vpop.permute.xlu0 %2067  ;;  %v14375_v42 = vsel %vm1388_vm0, %v14284_v48, %v2608_v13  ;;  %v2191_v19 = vrot.slane %v1736_v9, 1 }
 0x1b2   :  { %v2428_v54 = vsel %vm2380_vm4, %v2343_v30, %v2246_v49  ;;  %2743 = vrot.lane.b32.xlu0 %v14375_v42, %s12556_s20  ;;  %2812 = vrot.lane.b32.xlu1 %v14375_v42, %s12557_s28  ;;  %v2002_v30 = vor.u32 %v2000_v24, %v1998_v50  ;;  %v14406_v49 = vsel %vm861_vm2, %v1060_v10, %v1064_v46  ;;  %v1066_v50 = vshrl.u32 %v14328_v45, 16 }
 0x1b3   :  { %v2610_v48 = vshrl.u32 %v2428_v54, 16  ;;  %v2613_v6 = vshll.u32 %v2428_v54, 16  ;;  %20955 = vst [vmem:[#allocation63_spill] sm:$0xff] %v14406_v49  ;;  %v2346_v33 = vsel %vm2271_vm3, %v1201_v43, %v2068_v40  ;;  %v1070_v24 = vshll.u32 %v14397_v17, 16 }
 0x1b4   :  { %v14417_v54 = vsel %vm1388_vm0, %v14307_v8, %v1658_v36  ;;  %v14419_v10 = vrot.slane %v1661_v55, 7  ;;  %v1202_v40 = vmul.bf16 %v14406_v49, %v13675_v59  ;;  %v2008_v8 = vshrl.u32 %v14355_v0, 16  ;;  %v11965_v55 = vld [vmem:[%s20653_s3 + $0x1f0] sm:$0xff]  }
 0x1b5   :  { %v2612_v41 = vrot.slane %v2610_v48, 7  ;;  %v2799_v2 = vpop.permute.xlu1 %2798  ;;  %v2730_v13 = vpop.permute.xlu0 %2729  ;;  %20956 = vst [vmem:[#allocation64_spill] sm:$0xff] %v14417_v54  ;;  %v14435_v4 = vshll.u32 %v685_v5, 16  ;;  %v1737_v59 = vmul.bf16 %v14417_v54, %v14330_v15  ;;  %v1068_v9 = vor.u32 %v1066_v50, %v1064_v46 }
 0x1b6   :  { %v2976_v52 = vsel %vm2948_vm8, %v2884_v27, %v2799_v2  ;;  %2083 = vrot.lane.b32.xlu0 %v1999_v63, %s12552_s14  ;;  %2261 = vrot.lane.b32.xlu1 %v2190_v3, %s12553_s12  ;;  %v1072_v36 = vrot.slane %v1070_v24, 1  ;;  %v1666_v0 = vor.u32 %v1664_v56, %v14419_v10  ;;  %v2887_v27 = vsel %vm2842_vm7, %v13851_v28, %v2730_v13 }
 0x1b7   :  { %v2615_v20 = vor.u32 %v2613_v6, %v2612_v41  ;;  %11072 = vmatmul.mubr.msk.bf16.gmra.mrb[52].mxu0 %vm3046_vm9, %v2976_v52  ;;  %v2010_v46 = vor.u32 %v2008_v8, %v2006_v25  ;;  %v2193_v56 = vrot.slane %v1737_v59, 1  ;;  %v1074_v13 = vshrl.u32 %v14397_v17, 16 }
 0x1b8   :  { %11075 = vmatprep.mubr.msk.bf16.mxu0 %vm12555_vm6, %v20928_v51  ;;  %v14454_v28 = vsel %vm861_vm2, %v1068_v9, %v1072_v36 }
 0x1b9   :  { %v2248_v48 = vpop.permute.xlu1 %2247  ;;  %v2070_v63 = vpop.permute.xlu0 %2069  ;;  %v14423_v43 = vsel %vm1388_vm0, %v14344_v1, %v2615_v20  ;;  %v2007_v1 = vsel %vm861_vm2, %v2002_v30, %v2006_v25  ;;  %v2192_v20 = vsel %vm2127_vm1, %v2189_v57, %v2191_v19  ;;  %20957 = vst [vmem:[#allocation65_spill] sm:$0xff] %v14454_v28  ;;  %v14461_v25 = vsel %vm1388_vm0, %v14366_v18, %v1666_v0 }
 0x1ba   :  { %v2430_v45 = vsel %vm2380_vm4, %v2346_v33, %v2248_v48  ;;  %2745 = vrot.lane.b32.xlu0 %v14423_v43, %s12556_s20  ;;  %2814 = vrot.lane.b32.xlu1 %v14423_v43, %s12557_s28  ;;  %v2014_v33 = vrot.slane %v14435_v4, 1  ;;  %v2349_v24 = vsel %vm2271_vm3, %v1202_v40, %v2070_v63  ;;  %v1078_v48 = vshll.u32 %v11965_v55, 16  ;;  %20958 = vst [vmem:[#allocation66_spill] sm:$0xff] %v14461_v25 }
 0x1bb   :  { %v2617_v3 = vshrl.u32 %v2430_v45, 16  ;;  %v2620_v2 = vshll.u32 %v2430_v45, 16  ;;  %v1203_v18 = vmul.bf16 %v14454_v28, %v13757_v38  ;;  %v2016_v38 = vshrl.u32 %v685_v5, 16 }
 0x1bc   :  { %v2015_v17 = vsel %vm861_vm2, %v2010_v46, %v2014_v33 }
 0x1bd   :  { %v2619_v6 = vrot.slane %v2617_v3, 7  ;;  %v2801_v52 = vpop.permute.xlu1 %2800  ;;  %v2732_v30 = vpop.permute.xlu0 %2731  ;;  %v2194_v3 = vsel %vm2127_vm1, %v2191_v19, %v2193_v56 }
 0x1be   :  { %v2978_v57 = vsel %vm2948_vm8, %v2887_v27, %v2801_v52  ;;  %2085 = vrot.lane.b32.xlu0 %v2007_v1, %s12552_s14  ;;  %2263 = vrot.lane.b32.xlu1 %v2192_v20, %s12553_s12  ;;  %v1738_v1 = vmul.bf16 0.0|0.0, %v14461_v25  ;;  %v1080_v20 = vrot.slane %v1078_v48, 1  ;;  %v2890_v59 = vsel %vm2842_vm7, %v13919_v31, %v2732_v30 }
 0x1bf   :  { %v2622_v50 = vor.u32 %v2620_v2, %v2619_v6  ;;  %11076 = vmatmul.mubr.msk.bf16.gmra.mrb[56].mxu0 %vm3046_vm9, %v2978_v57  ;;  %v1082_v30 = vshrl.u32 %v11965_v55, 16 }
 0x1c0   :  { %11079 = vmatprep.mubr.msk.bf16.mxu0 %vm12555_vm6, %v20928_v51  ;;  %v2195_v57 = vrot.slane %v1738_v1, 1 }
 0x1c1   :  { %v2250_v45 = vpop.permute.xlu1 %2249  ;;  %v2072_v8 = vpop.permute.xlu0 %2071  ;;  %v14464_v63 = vsel %vm1388_vm0, %v2612_v41, %v2622_v50  ;;  %v1076_v41 = vor.u32 %v1074_v13, %v1072_v36 }
 0x1c2   :  { %v2432_v40 = vsel %vm2380_vm4, %v2349_v24, %v2250_v45  ;;  %2747 = vrot.lane.b32.xlu0 %v14464_v63, %s12556_s20  ;;  %2816 = vrot.lane.b32.xlu1 %v14464_v63, %s12557_s28  ;;  %v2352_v36 = vsel %vm2271_vm3, %v1203_v18, %v2072_v8  ;;  %v2018_v24 = vor.u32 %v2016_v38, %v2014_v33  ;;  %v1739_v45 = vmul.bf16 0, %v14419_v10 }
 0x1c3   :  { %v2624_v4 = vshrl.u32 %v2432_v40, 16  ;;  %v2627_v0 = vshll.u32 %v2432_v40, 16  ;;  %v14486_v31 = vsel %vm861_vm2, %v1076_v41, %v1080_v20  ;;  %v2196_v55 = vsel %vm2127_vm1, %v2193_v56, %v2195_v57 }
 0x1c4   :  { %20959 = vst [vmem:[#allocation67_spill] sm:$0xff] %v14486_v31  ;;  %v1204_v48 = vmul.bf16 %v14486_v31, %v13856_v62  ;;  %v14509_v56 = vrot.slane %v1739_v45, 1 }
 0x1c5   :  { %v2626_v9 = vrot.slane %v2624_v4, 7  ;;  %v2803_v27 = vpop.permute.xlu1 %2802  ;;  %v2734_v2 = vpop.permute.xlu0 %2733 }
 0x1c6   :  { %v2980_v52 = vsel %vm2948_vm8, %v2890_v59, %v2803_v27  ;;  %2087 = vrot.lane.b32.xlu0 %v2015_v17, %s12552_s14  ;;  %2265 = vrot.lane.b32.xlu1 %v2194_v3, %s12553_s12  ;;  %v2893_v8 = vsel %vm2842_vm7, %v13984_v26, %v2734_v2  ;;  %20960 = vst [vmem:[#allocation68_spill] sm:$0xff] %v14509_v56 }
 0x1c7   :  { %v2629_v19 = vor.u32 %v2627_v0, %v2626_v9  ;;  %11080 = vmatmul.mubr.msk.bf16.gmra.mrb[60].mxu0 %vm3046_vm9, %v2980_v52  ;;  %v2198_v0 = vsel %vm2127_vm1, %v2195_v57, %v14509_v56 }
 0x1c8   :  { %11083 = vmatprep.mubr.msk.bf16.mxu0 %vm12555_vm6, %v20928_v51 }
 0x1c9   :  { %v2252_v46 = vpop.permute.xlu1 %2251  ;;  %v14491_v50 = vsel %vm1388_vm0, %v2619_v6, %v2629_v19  ;;  %v2074_v5 = vpop.permute.xlu0 %2073  ;;  %v1084_v6 = vor.u32 %v1082_v30, %v1080_v20 }
 0x1ca   :  { %v2434_v29 = vsel %vm2380_vm4, %v2352_v36, %v2252_v46  ;;  %2749 = vrot.lane.b32.xlu0 %v14491_v50, %s12556_s20  ;;  %2818 = vrot.lane.b32.xlu1 %v14491_v50, %s12557_s28  ;;  %v2355_v62 = vsel %vm2271_vm3, %v1204_v48, %v2074_v5 }
 0x1cb   :  { %v2631_v13 = vshrl.u32 %v2434_v29, 16  ;;  %v2634_v17 = vshll.u32 %v2434_v29, 16  ;;  %v14513_v26 = vsel %vm861_vm2, %v1084_v6, %v14147_v39 }
 0x1cc   :  { %20961 = vst [vmem:[#allocation69_spill] sm:$0xff] %v14513_v26  ;;  %v1205_v39 = vmul.bf16 %v14513_v26, %v13900_v47 }
 0x1cd   :  { %v2633_v40 = vrot.slane %v2631_v13, 7  ;;  %v2805_v4 = vpop.permute.xlu1 %2804  ;;  %v2736_v10 = vpop.permute.xlu0 %2735  ;;  %v14556_v13 = vld [vmem:[%s20655_s5] ss:$0 sm:$0xff] }
 0x1ce   :  { %v2982_v18 = vsel %vm2948_vm8, %v2893_v8, %v2805_v4  ;;  %2089 = vrot.lane.b32.xlu0 %v2018_v24, %s12552_s14  ;;  %2267 = vrot.lane.b32.xlu1 %v2196_v55, %s12553_s12  ;;  %v321_v55 = vlaneseq }
 0x1cf   :  { %v2636_v33 = vor.u32 %v2634_v17, %v2633_v40  ;;  %11084 = vmatmul.mubr.msk.bf16.gmra.mrb[64].mxu0 %vm3046_vm9, %v2982_v18 }
 0x1d0   :  { %11087 = vmatprep.mubr.msk.bf16.mxu0 %vm12555_vm6, %v20928_v51 }
 0x1d1   :  { %v2254_v3 = vpop.permute.xlu1 %2253  ;;  %v14518_v1 = vsel %vm1388_vm0, %v2626_v9, %v2636_v33  ;;  %v2896_v9 = vsel %vm2842_vm7, %v14037_v35, %v2736_v10  ;;  %v2076_v52 = vpop.permute.xlu0 %2075  ;;  %v14568_v33 = vshrl.u32 %v321_v55, 7 }
 0x1d2   :  { %20962 = vst [vmem:[#allocation70_spill] sm:$0xff] %v14518_v1  ;;  %v2436_v41 = vsel %vm2380_vm4, %v2355_v62, %v2254_v3  ;;  %2751 = vrot.lane.b32.xlu0 %v14518_v1, %s12556_s20  ;;  %2820 = vrot.lane.b32.xlu1 %v14518_v1, %s12557_s28  ;;  %v2358_v36 = vsel %vm2271_vm3, %v1205_v39, %v2076_v52  ;;  %v11968_v62 = vld [vmem:[%s20653_s3 + $0x200] sm:$0xff]  }
 0x1d3   :  { %v2638_v20 = vshrl.u32 %v2436_v41, 16  ;;  %v2641_v59 = vshll.u32 %v2436_v41, 16  ;;  %20965 = vst [vmem:[#allocation73_spill] sm:$0xff] %v14568_v33  ;;  %v320_v52 = vld [vmem:[%s20651_s1] sm:$0x3] }
 0x1d5   :  { %v2640_v27 = vrot.slane %v2638_v20, 7  ;;  %v2807_v2 = vpop.permute.xlu1 %2806 }
 0x1d6   :  { %v2984_v38 = vsel %vm2948_vm8, %v2896_v9, %v2807_v2  ;;  %2269 = vrot.lane.b32.xlu1 %v2198_v0, %s12553_s12  ;;  %v1094_v0 = vshll.u32 %v11968_v62, 16  ;;  %v11969_v9 = vld [vmem:[%s20653_s3 + $0x208] sm:$0xff]  }
 0x1d7   :  { %v2643_v19 = vor.u32 %v2641_v59, %v2640_v27  ;;  %11088 = vmatmul.mubr.msk.bf16.gmra.mrb[68].mxu0 %vm3046_vm9, %v2984_v38  ;;  %v20767_v59 = vsub.s32 0, %v14568_v33 }
 0x1d9   :  { %v2256_v30 = vpop.permute.xlu1 %2255  ;;  %v14536_v47 = vsel %vm1388_vm0, %v2633_v40, %v2643_v19  ;;  %v20768_v40 = vmov 0   ;;  %v324_v55 = vrot.slane %v320_v52, %v20767_v59 }
 0x1da   :  { %20963 = vst [vmem:[#allocation71_spill] sm:$0xff] %v14536_v47  ;;  %v2438_v57 = vsel %vm2380_vm4, %v2358_v36, %v2256_v30  ;;  %2753 = vrot.lane.b32.xlu0 %v14536_v47, %s12556_s20  ;;  %2822 = vrot.lane.b32.xlu1 %v14536_v47, %s12557_s28  ;;  %v1098_v30 = vshrl.u32 %v11968_v62, 16 }
 0x1db   :  { %v2645_v35 = vshrl.u32 %v2438_v57, 16  ;;  %v2648_v46 = vshll.u32 %v2438_v57, 16  ;;  %6533 = vmatprep.subr.bf16.mxu1 %v20768_v40  ;;  %9484 = vmatprep.subr.bf16.mxu0 %v20768_v40 }
 0x1dd   :  { %v14543_v29 = vrot.slane %v2645_v35, 7 }
 0x1df   :  { %v2650_v5 = vor.u32 %v2648_v46, %v14543_v29 }
 0x1e1   :  { %v14547_v24 = vsel %vm1388_vm0, %v2640_v27, %v2650_v5 }
 0x1e2   :  { %20964 = vst [vmem:[#allocation72_spill] sm:$0xff] %v14547_v24  ;;  %2755 = vrot.lane.b32.xlu0 %v14547_v24, %s12556_s20  ;;  %2824 = vrot.lane.b32.xlu1 %v14547_v24, %s12557_s28 }
 0x1eb   :  { %v3155_v48 = vpop.f32.mrb[0].mxu0 }
 0x1ec   :  { %v14559_v45 = vadd.f32 %v14556_v13, %v3155_v48  ;;  %v11021_v6 = vpop.f32.mrb[1].mxu0 }
 0x1ed   :  { %v3158_v8 = vpop.f32.mrb[2].mxu0  ;;  %v1096_v6 = vrot.slane %v1094_v0, 1 }
 0x1ee   :  { %v3434_v17 = vmul.f32 %v14559_v45, %v14559_v45  ;;  %v14566_v4 = vadd.f32 %v14556_v13, %v3158_v8  ;;  %v11022_v18 = vpop.f32.mrb[3].mxu0  ;;  %v1102_v8 = vshll.u32 %v11969_v9, 16 }
 0x1ef   :  { %v11971_v18 = vld [vmem:[%s20653_s3 + $0x218] sm:$0xff]  }
 0x1f0   :  { %v3504_v10 = vmul.f32 %v3434_v17, %v14559_v45  ;;  %v3435_v3 = vmul.f32 %v14566_v4, %v14566_v4  ;;  %v11970_v17 = vld [vmem:[%s20653_s3 + $0x210] sm:$0xff]  }
 0x1f2   :  { %v3574_v41 = vmul.f32 0.044715, %v3504_v10  ;;  %v3505_v20 = vmul.f32 %v3435_v3, %v14566_v4 }
 0x1f3   :  { %v3163_v39 = vpop.f32.mrb[4].mxu0 }
 0x1f4   :  { %v3644_v27 = vadd.f32 %v3574_v41, %v14559_v45  ;;  %v3575_v2 = vmul.f32 0.044715, %v3505_v20  ;;  %v14586_v38 = vadd.f32 %v14556_v13, %v3163_v39  ;;  %v11025_v19 = vpop.f32.mrb[5].mxu0  ;;  %v14609_v20 = vld [vmem:[%s20653_s3 + $0x220] sm:$0xff]  }
 0x1f5   :  { %v3166_v36 = vpop.f32.mrb[6].mxu0  ;;  %v1104_v19 = vrot.slane %v1102_v8, 1  ;;  %v1130_v28 = vshrl.u32 %v14609_v20, 16 }
 0x1f6   :  { %v3714_v57 = vmul.f32 0.7978846, %v3644_v27  ;;  %v3645_v35 = vadd.f32 %v3575_v2, %v14566_v4  ;;  %v3436_v46 = vmul.f32 %v14586_v38, %v14586_v38  ;;  %v14592_v5 = vadd.f32 %v14556_v13, %v3166_v36  ;;  %v11026_v48 = vpop.f32.mrb[7].mxu0 }
 0x1f7   :  { %v1100_v27 = vor.u32 %v1098_v30, %v1096_v6  ;;  %v1106_v36 = vshrl.u32 %v11969_v9, 16  ;;  %v14613_v48 = vadd.f32 1.0, %v324_v55  ;;  %v1114_v30 = vshrl.u32 %v11970_v17, 16 }
 0x1f8   :  { %12010 = vtanh.f32 %v3714_v57  ;;  %v3715_v62 = vmul.f32 0.7978846, %v3645_v35  ;;  %v3506_v10 = vmul.f32 %v3436_v46, %v14586_v38  ;;  %v3437_v3 = vmul.f32 %v14592_v5, %v14592_v5 }
 0x1f9   :  { %v1110_v57 = vshll.u32 %v11970_v17, 16  ;;  %v1118_v35 = vshll.u32 %v11971_v18, 16  ;;  %v1126_v9 = vshll.u32 %v14609_v20, 16  ;;  %v14635_v17 = vld [vmem:[%s20653_s3 + $0x228] sm:$0xff]  }
 0x1fa   :  { %12012 = vtanh.f32 %v3715_v62  ;;  %v3576_v39 = vmul.f32 0.044715, %v3506_v10  ;;  %v3507_v0 = vmul.f32 %v3437_v3, %v14592_v5  ;;  %v14620_v62 = vsel %vm861_vm2, %v14161_v21, %v1096_v6 }
 0x1fb   :  { %v3171_v2 = vpop.f32.mrb[8].mxu0  ;;  %20966 = vst [vmem:[#allocation74_spill] sm:$0xff] %v14620_v62  ;;  %v1122_v10 = vshrl.u32 %v11971_v18, 16  ;;  %v1112_v21 = vrot.slane %v1110_v57, 1  ;;  %v1120_v6 = vrot.slane %v1118_v35, 1  ;;  %v20977_v60 = vmul.bf16 %v14620_v62, %v13986_v44 }
 0x1fc   :  { %v3646_v46 = vadd.f32 %v3576_v39, %v14586_v38  ;;  %v3577_v59 = vmul.f32 0.044715, %v3507_v0  ;;  %v14616_v40 = vadd.f32 %v14556_v13, %v3171_v2  ;;  %v11029_v41 = vpop.f32.mrb[9].mxu0  ;;  %v1108_v2 = vor.u32 %v1106_v36, %v1104_v19 }
 0x1fd   :  { %v3174_v26 = vpop.f32.mrb[10].mxu0  ;;  %v14630_v41 = vsel %vm861_vm2, %v1100_v27, %v1104_v19  ;;  %v1116_v27 = vor.u32 %v1114_v30, %v1112_v21  ;;  %v1124_v19 = vor.u32 %v1122_v10, %v1120_v6  ;;  %v1128_v36 = vrot.slane %v1126_v9, 1 }
 0x1fe   :  { %v3716_v8 = vmul.f32 0.7978846, %v3646_v46  ;;  %v3647_v3 = vadd.f32 %v3577_v59, %v14592_v5  ;;  %v3438_v55 = vmul.f32 %v14616_v40, %v14616_v40  ;;  %v14627_v39 = vadd.f32 %v14556_v13, %v3174_v26  ;;  %v11030_v0 = vpop.f32.mrb[11].mxu0  ;;  %20967 = vst [vmem:[#allocation75_spill] sm:$0xff] %v14630_v41 }
 0x1ff   :  { %v20968_v46 = vsub.s32 1, %v14568_v33  ;;  %v14659_v56 = vsel %vm861_vm2, %v1116_v27, %v1120_v6  ;;  %v14662_v20 = vsel %vm861_vm2, %v1124_v19, %v1128_v36 }
 0x200   :  { %12014 = vtanh.f32 %v3716_v8  ;;  %v3717_v59 = vmul.f32 0.7978846, %v3647_v3  ;;  %v3508_v18 = vmul.f32 %v3438_v55, %v14616_v40  ;;  %v3439_v26 = vmul.f32 %v14627_v39, %v14627_v39  ;;  %20970 = vst [vmem:[#allocation77_spill] sm:$0xff] %v14659_v56  ;;  %20971 = vst [vmem:[#allocation78_spill] sm:$0xff] %v14662_v20 }
 0x201   :  { %v14642_v0 = vrot.slane %v320_v52, %v20968_v46  ;;  %v1134_v52 = vshll.u32 %v14635_v17, 16 }
 0x202   :  { %v12011_v57 = vpop.eup %12010  ;;  %12016 = vtanh.f32 %v3717_v59  ;;  %v3578_v35 = vmul.f32 0.044715, %v3508_v18  ;;  %v3509_v31 = vmul.f32 %v3439_v26, %v14627_v39  ;;  %v14656_v26 = vsel %vm861_vm2, %v1108_v2, %v1112_v21 }
 0x203   :  { %v3854_v3 = vadd.f32 1.0, %v12011_v57  ;;  %v3179_v55 = vpop.f32.mrb[12].mxu0  ;;  %20969 = vst [vmem:[#allocation76_spill] sm:$0xff] %v14656_v26  ;;  %v1136_v6 = vrot.slane %v1134_v52, 1 }
 0x204   :  { %v12013_v30 = vpop.eup %12012  ;;  %v3648_v10 = vadd.f32 %v3578_v35, %v14616_v40  ;;  %v3579_v9 = vmul.f32 0.044715, %v3509_v31  ;;  %v14653_v59 = vadd.f32 %v14556_v13, %v3179_v55  ;;  %v11033_v18 = vpop.f32.mrb[13].mxu0 }
 0x205   :  { %v3924_v46 = vmul.f32 0.5, %v3854_v3  ;;  %v3855_v57 = vadd.f32 1.0, %v12013_v30  ;;  %v3182_v8 = vpop.f32.mrb[14].mxu0  ;;  %v1132_v30 = vor.u32 %v1130_v28, %v1128_v36 }
 0x206   :  { %v3718_v49 = vmul.f32 0.7978846, %v3648_v10  ;;  %v3649_v35 = vadd.f32 %v3579_v9, %v14627_v39  ;;  %v3440_v31 = vmul.f32 %v14653_v59, %v14653_v59  ;;  %v14668_v55 = vadd.f32 %v14556_v13, %v3182_v8  ;;  %v11034_v2 = vpop.f32.mrb[15].mxu0 }
 0x207   :  { %v14671_v21 = vmul.f32 %v3924_v46, %v14559_v45  ;;  %v3925_v3 = vmul.f32 0.5, %v3855_v57  ;;  %v2738_v46 = vpop.permute.xlu0 %2737  ;;  %v1138_v2 = vshrl.u32 %v14635_v17, 16  ;;  %v14697_v18 = vsel %vm861_vm2, %v1132_v30, %v1136_v6 }
 0x208   :  { %12018 = vtanh.f32 %v3718_v49  ;;  %v3719_v27 = vmul.f32 0.7978846, %v3649_v35  ;;  %v3510_v19 = vmul.f32 %v3440_v31, %v14653_v59  ;;  %v3441_v10 = vmul.f32 %v14668_v55, %v14668_v55  ;;  %20973 = vst [vmem:[#allocation80_spill] sm:$0xff] %v14697_v18 }
 0x209   :  { %v4200_v9 = vmul.f32 %v14671_v21, %v14671_v21  ;;  %v14679_v8 = vmul.f32 %v3925_v3, %v14566_v4 }
 0x20a   :  { %v12015_v36 = vpop.eup %12014  ;;  %12020 = vtanh.f32 %v3719_v27  ;;  %v3580_v49 = vmul.f32 0.044715, %v3510_v19  ;;  %v3511_v52 = vmul.f32 %v3441_v10, %v14668_v55 }
 0x20b   :  { %20972 = vst [vmem:[#allocation79_spill] sm:$0xff] %v14679_v8  ;;  %v4270_v57 = vmul.f32 %v4200_v9, %v14671_v21  ;;  %v4201_v4 = vmul.f32 %v14679_v8, %v14679_v8  ;;  %v3856_v35 = vadd.f32 1.0, %v12015_v36  ;;  %v3187_v31 = vpop.f32.mrb[16].mxu0  ;;  %v2078_v61 = vpop.permute.xlu0 %2077 }
 0x20c   :  { %v12017_v3 = vpop.eup %12016  ;;  %v3650_v28 = vadd.f32 %v3580_v49, %v14653_v59  ;;  %v3581_v27 = vmul.f32 0.044715, %v3511_v52  ;;  %v14694_v19 = vadd.f32 %v14556_v13, %v3187_v31  ;;  %v11037_v10 = vpop.f32.mrb[17].mxu0 }
 0x20d   :  { %v4340_v45 = vmul.f32 0.044715, %v4270_v57  ;;  %v4271_v9 = vmul.f32 %v4201_v4, %v14679_v8  ;;  %v3926_v54 = vmul.f32 0.5, %v3856_v35  ;;  %v3857_v25 = vadd.f32 1.0, %v12017_v3  ;;  %v3190_v36 = vpop.f32.mrb[18].mxu0 }
 0x20e   :  { %v3720_v53 = vmul.f32 0.7978846, %v3650_v28  ;;  %v3651_v17 = vadd.f32 %v3581_v27, %v14668_v55  ;;  %v3442_v49 = vmul.f32 %v14694_v19, %v14694_v19  ;;  %v14704_v52 = vadd.f32 %v14556_v13, %v3190_v36  ;;  %v11038_v31 = vpop.f32.mrb[19].mxu0 }
 0x20f   :  { %v4410_v10 = vadd.f32 %v4340_v45, %v14671_v21  ;;  %v3996_v30 = vmul.f32 %v3926_v54, %v14586_v38  ;;  %v3927_v57 = vmul.f32 0.5, %v3857_v25  ;;  %v14708_v4 = vor.u32 %v1138_v2, %v1136_v6 }
 0x210   :  { %12022 = vtanh.f32 %v3720_v53  ;;  %v3721_v35 = vmul.f32 0.7978846, %v3651_v17  ;;  %v3512_v28 = vmul.f32 %v3442_v49, %v14694_v19  ;;  %v3443_v3 = vmul.f32 %v14704_v52, %v14704_v52 }
 0x211   :  { %20974 = vst [vmem:[#allocation81_spill] sm:$0xff] %v14708_v4  ;;  %v4341_v27 = vmul.f32 0.044715, %v4271_v9  ;;  %v4066_v36 = vmul.f32 %v14613_v48, %v3996_v30  ;;  %v3997_v31 = vmul.f32 %v3927_v57, %v14592_v5  ;;  %v2899_v25 = vsel %vm2842_vm7, %v14073_v23, %v2738_v46 }
 0x212   :  { %v12019_v54 = vpop.eup %12018  ;;  %12024 = vtanh.f32 %v3721_v35  ;;  %v3582_v53 = vmul.f32 0.044715, %v3512_v28  ;;  %v3513_v38 = vmul.f32 %v3443_v3, %v14704_v52  ;;  %v4480_v6 = vmul.f32 0.7978846, %v4410_v10 }
 0x213   :  { %v14721_v2 = vadd.f32 %v4066_v36, %v14642_v0  ;;  %v4067_v9 = vmul.f32 %v14613_v48, %v3997_v31  ;;  %v3195_v17 = vpop.f32.mrb[20].mxu0  ;;  %v3858_v30 = vadd.f32 1.0, %v12019_v54  ;;  %v4411_v10 = vadd.f32 %v4341_v27, %v14679_v8 }
 0x214   :  { %v12021_v49 = vpop.eup %12020  ;;  %v3652_v57 = vadd.f32 %v3582_v53, %v14694_v19  ;;  %v3583_v45 = vmul.f32 0.044715, %v3513_v38  ;;  %v14727_v23 = vadd.f32 %v14556_v13, %v3195_v17  ;;  %v11041_v46 = vpop.f32.mrb[21].mxu0 }
 0x215   :  { %20975 = vst [vmem:[#allocation82_spill] sm:$0xff] %v14721_v2  ;;  %v2809_v35 = vpop.permute.xlu1 %2808  ;;  %v4202_v28 = vmul.f32 %v14721_v2, %v14721_v2  ;;  %v14733_v3 = vadd.f32 %v4067_v9, %v14642_v0  ;;  %v3859_v36 = vadd.f32 1.0, %v12021_v49  ;;  %v2740_v31 = vpop.permute.xlu0 %2739  ;;  %v3928_v54 = vmul.f32 0.5, %v3858_v30 }
 0x216   :  { %v3198_v5 = vpop.f32.mrb[22].mxu0  ;;  %v3722_v33 = vmul.f32 0.7978846, %v3652_v57  ;;  %v3653_v53 = vadd.f32 %v3583_v45, %v14704_v52  ;;  %v3444_v38 = vmul.f32 %v14727_v23, %v14727_v23  ;;  %v2986_v9 = vsel %vm2948_vm8, %v2899_v25, %v2809_v35 }
 0x217   :  { %20976 = vst [vmem:[#allocation83_spill] sm:$0xff] %v14733_v3  ;;  %v11042_v17 = vpop.f32.mrb[23].mxu0  ;;  %v4272_v46 = vmul.f32 %v4202_v28, %v14721_v2  ;;  %v4203_v27 = vmul.f32 %v14733_v3, %v14733_v3  ;;  %v3929_v24 = vmul.f32 0.5, %v3859_v36  ;;  %v3998_v49 = vmul.f32 %v3928_v54, %v14616_v40  ;;  %11092 = vmatmul.mubr.msk.bf16.vlgmr.msra.gmra.mrb[0].mxu1 %vm3046_vm9, %v2986_v9 }
 0x218   :  { %12026 = vtanh.f32 %v3722_v33  ;;  %v3723_v47 = vmul.f32 0.7978846, %v3653_v53  ;;  %v3514_v30 = vmul.f32 %v3444_v38, %v14727_v23  ;;  %v4481_v57 = vmul.f32 0.7978846, %v4411_v10  ;;  %11095 = vmatprep.mubr.msk.bf16.mxu1 %vm12555_vm6, %v20928_v51 }
 0x219   :  { %v2258_v45 = vpop.permute.xlu1 %2257  ;;  %v4273_v17 = vmul.f32 %v4203_v27, %v14733_v3  ;;  %v3999_v28 = vmul.f32 %v3929_v24, %v14627_v39  ;;  %v2361_v36 = vsel %vm2271_vm3, %v20977_v60, %v2078_v61  ;;  %v2080_v25 = vpop.permute.xlu0 %2079  ;;  %v4068_v33 = vmul.f32 %v14613_v48, %v3998_v49 }
 0x21a   :  { %v12023_v40 = vpop.eup %12022  ;;  %12028 = vtanh.f32 %v3723_v47  ;;  %v3584_v35 = vmul.f32 0.044715, %v3514_v30  ;;  %v14755_v10 = vadd.f32 %v14556_v13, %v3198_v5  ;;  %v4342_v54 = vmul.f32 0.044715, %v4272_v46 }
 0x21b   :  { %12030 = vtanh.f32 %v4480_v6  ;;  %v4069_v24 = vmul.f32 %v14613_v48, %v3999_v28  ;;  %v3860_v39 = vadd.f32 1.0, %v12023_v40  ;;  %v3203_v44 = vpop.f32.mrb[24].mxu0  ;;  %v14759_v60 = vadd.f32 %v4068_v33, %v14642_v0 }
 0x21c   :  { %v12025_v53 = vpop.eup %12024  ;;  %v3654_v61 = vadd.f32 %v3584_v35, %v14727_v23  ;;  %v3445_v38 = vmul.f32 %v14755_v10, %v14755_v10  ;;  %v14765_v47 = vsel %vm2380_vm4, %v2361_v36, %v2258_v45  ;;  %v11045_v5 = vpop.f32.mrb[25].mxu0  ;;  %v4343_v6 = vmul.f32 0.044715, %v4273_v17 }
 0x21d   :  { %20978 = vst [vmem:[#allocation84_spill] sm:$0xff] %v14759_v60  ;;  %v2811_v27 = vpop.permute.xlu1 %2810  ;;  %v14768_v46 = vadd.f32 %v4069_v24, %v14642_v0  ;;  %v3930_v9 = vmul.f32 0.5, %v3860_v39  ;;  %v3861_v49 = vadd.f32 1.0, %v12025_v53  ;;  %v14770_v30 = vpop.permute.xlu0 %2741  ;;  %12032 = vtanh.f32 %v4481_v57 }
 0x21e   :  { %v3206_v28 = vpop.f32.mrb[26].mxu0  ;;  %v4204_v40 = vmul.f32 %v14759_v60, %v14759_v60  ;;  %v3724_v33 = vmul.f32 0.7978846, %v3654_v61  ;;  %v3515_v35 = vmul.f32 %v3445_v38, %v14755_v10  ;;  %v2652_v39 = vshrl.u32 %v14765_v47, 16 }
 0x21f   :  { %20979 = vst [vmem:[#allocation85_spill] sm:$0xff] %v14768_v46  ;;  %v11046_v45 = vpop.f32.mrb[27].mxu0  ;;  %v4205_v36 = vmul.f32 %v14768_v46, %v14768_v46  ;;  %v4000_v17 = vmul.f32 %v3930_v9, %v14653_v59  ;;  %v3931_v24 = vmul.f32 0.5, %v3861_v49  ;;  %v14780_v53 = vadd.f32 %v4342_v54, %v14721_v2 }
 0x220   :  { %12034 = vtanh.f32 %v3724_v33  ;;  %v2902_v57 = vsel %vm2842_vm7, %v14096_v58, %v2740_v31  ;;  %v3585_v5 = vmul.f32 0.044715, %v3515_v35  ;;  %v14785_v38 = vadd.f32 %v4343_v6, %v14733_v3 }
 0x221   :  { %v2260_v61 = vpop.permute.xlu1 %2259  ;;  %v4274_v45 = vmul.f32 %v4204_v40, %v14759_v60  ;;  %v4070_v62 = vmul.f32 %v14613_v48, %v4000_v17  ;;  %v4001_v59 = vmul.f32 %v3931_v24, %v14668_v55  ;;  %v14790_v9 = vpop.permute.xlu0 %2081  ;;  %v4275_v54 = vmul.f32 %v4205_v36, %v14768_v46 }
 0x222   :  { %v12027_v49 = vpop.eup %12026  ;;  %v3655_v33 = vadd.f32 %v3585_v5, %v14755_v10  ;;  %v2655_v58 = vshll.u32 %v14765_v47, 16  ;;  %v14796_v31 = vadd.f32 %v14556_v13, %v3203_v44  ;;  %v14802_v17 = vrot.slane %v2652_v39, 7 }
 0x223   :  { %v14799_v6 = vadd.f32 %v4070_v62, %v14642_v0  ;;  %v4071_v40 = vmul.f32 %v14613_v48, %v4001_v59  ;;  %v3862_v35 = vadd.f32 1.0, %v12027_v49  ;;  %v14804_v55 = vpop.f32.mrb[28].mxu0  ;;  %v20980_v36 = vmul.bf16 %v14630_v41, %v14051_v16 }
 0x224   :  { %v12029_v24 = vpop.eup %12028  ;;  %v3725_v12 = vmul.f32 0.7978846, %v3655_v33  ;;  %v3446_v44 = vmul.f32 %v14796_v31, %v14796_v31  ;;  %v2988_v62 = vsel %vm2948_vm8, %v2902_v57, %v2811_v27  ;;  %v11049_v5 = vpop.f32.mrb[29].mxu0  ;;  %v4344_v39 = vmul.f32 0.044715, %v4274_v45 }
 0x225   :  { %v2364_v47 = vsel %vm2271_vm3, %v20980_v36, %v2080_v25  ;;  %v14813_v32 = vpop.permute.xlu1 %2812  ;;  %v14815_v59 = vpop.eup %12030  ;;  %v4206_v49 = vmul.f32 %v14799_v6, %v14799_v6  ;;  %v14820_v33 = vadd.f32 %v4071_v40, %v14642_v0  ;;  %v3932_v16 = vmul.f32 0.5, %v3862_v35  ;;  %11096 = vmatmul.mubr.msk.bf16.gmra.mrb[4].mxu1 %vm3046_vm9, %v2988_v62 }
 0x226   :  { %v14823_v25 = vpop.permute.xlu0 %2743  ;;  %v14825_v36 = vpop.f32.mrb[30].mxu0  ;;  %v4345_v27 = vmul.f32 0.044715, %v4275_v54  ;;  %v3863_v57 = vadd.f32 1.0, %v12029_v24  ;;  %12036 = vtanh.f32 %v3725_v12  ;;  %v3516_v5 = vmul.f32 %v3446_v44, %v14796_v31  ;;  %11099 = vmatprep.mubr.msk.bf16.mxu1 %vm12555_vm6, %v20928_v51 }
 0x227   :  { %v11050_v45 = vpop.f32.mrb[31].mxu0  ;;  %v4276_v41 = vmul.f32 %v4206_v49, %v14799_v6  ;;  %v4207_v40 = vmul.f32 %v14820_v33, %v14820_v33  ;;  %v4002_v35 = vmul.f32 %v3932_v16, %v14694_v19  ;;  %v14835_v62 = vadd.f32 %v14556_v13, %v3206_v28  ;;  %v14837_v3 = vpop.eup %12032 }
 0x228   :  { %v3933_v54 = vmul.f32 0.5, %v3863_v57  ;;  %v2657_v12 = vor.u32 %v2655_v58, %v14802_v17  ;;  %v3586_v24 = vmul.f32 0.044715, %v3516_v5  ;;  %v14841_v44 = vsel %vm2380_vm4, %v2364_v47, %v2260_v61 }
 0x229   :  { %v14843_v45 = vpop.permute.xlu1 %2261  ;;  %v4346_v49 = vmul.f32 0.044715, %v4276_v41  ;;  %v4277_v2 = vmul.f32 %v4207_v40, %v14820_v33  ;;  %v4072_v22 = vmul.f32 %v14613_v48, %v4002_v35  ;;  %v3447_v19 = vmul.f32 %v14835_v62, %v14835_v62 }
 0x22a   :  { %v14849_v28 = vpop.permute.xlu0 %2083  ;;  %v12035_v16 = vpop.eup %12034  ;;  %v14852_v57 = vadd.f32 %v4344_v39, %v14759_v60  ;;  %v14855_v58 = vadd.f32 %v4345_v27, %v14768_v46  ;;  %v4003_v61 = vmul.f32 %v3933_v54, %v14704_v52  ;;  %v3656_v41 = vadd.f32 %v3586_v24, %v14796_v31 }
 0x22b   :  { %v4347_v47 = vmul.f32 0.044715, %v4277_v2  ;;  %v14860_v5 = vadd.f32 %v4072_v22, %v14642_v0  ;;  %v3864_v40 = vadd.f32 1.0, %v12035_v16  ;;  %v2659_v35 = vshrl.u32 %v14841_v44, 16  ;;  %v14863_v1 = vpop.f32.mrb[32].mxu0 }
 0x22c   :  { %v4073_v8 = vmul.f32 %v14613_v48, %v4003_v61  ;;  %v3726_v39 = vmul.f32 0.7978846, %v3656_v41  ;;  %v2905_v27 = vsel %vm2842_vm7, %v14244_v7, %v14770_v30  ;;  %v3517_v52 = vmul.f32 %v3447_v19, %v14835_v62  ;;  %v11053_v54 = vpop.f32.mrb[33].mxu0 }
 0x22d   :  { %20981 = vst [vmem:[#allocation86_spill] sm:$0xff] %v14860_v5  ;;  %v14870_v24 = vpop.permute.xlu1 %2814  ;;  %v4416_v22 = vadd.f32 %v4346_v49, %v14799_v6  ;;  %v4208_v2 = vmul.f32 %v14860_v5, %v14860_v5  ;;  %v3934_v16 = vmul.f32 0.5, %v3864_v40  ;;  %v20982_v61 = vmul.bf16 %v14656_v26, %v14132_v14  ;;  %v14882_v7 = vpop.f32.mrb[34].mxu0 }
 0x22e   :  { %v14880_v46 = vpop.permute.xlu0 %2745  ;;  %v14885_v30 = vadd.f32 %v4073_v8, %v14642_v0  ;;  %12038 = vtanh.f32 %v3726_v39  ;;  %v3587_v19 = vmul.f32 0.044715, %v3517_v52  ;;  %v2662_v49 = vshll.u32 %v14841_v44, 16  ;;  %v11054_v54 = vpop.f32.mrb[35].mxu0 }
 0x22f   :  { %v2367_v41 = vsel %vm2271_vm3, %v20982_v61, %v14790_v9  ;;  %v4417_v40 = vadd.f32 %v4347_v47, %v14820_v33  ;;  %v4278_v60 = vmul.f32 %v4208_v2, %v14860_v5  ;;  %v4004_v14 = vmul.f32 %v3934_v16, %v14727_v23 }
 0x230   :  { %20983 = vst [vmem:[#allocation87_spill] sm:$0xff] %v14885_v30  ;;  %v14891_v26 = vrot.slane %v2659_v35, 7  ;;  %v12037_v9 = vpop.eup %12036  ;;  %v4209_v61 = vmul.f32 %v14885_v30, %v14885_v30  ;;  %v3657_v8 = vadd.f32 %v3587_v19, %v14835_v62  ;;  %v14898_v39 = vsel %vm1388_vm0, %v14543_v29, %v2657_v12 }
 0x231   :  { %20984 = vst [vmem:[#allocation88_spill] sm:$0xff] %v14898_v39  ;;  %v14902_v44 = vadd.f32 %v14556_v13, %v14804_v55  ;;  %v14904_v47 = vpop.permute.xlu1 %2263  ;;  %v4486_v52 = vmul.f32 0.7978846, %v4416_v22  ;;  %v4348_v23 = vmul.f32 0.044715, %v4278_v60  ;;  %v4074_v35 = vmul.f32 %v14613_v48, %v4004_v14  ;;  %2757 = vrot.lane.b32.xlu0 %v14898_v39, %s12556_s20  ;;  %2826 = vrot.lane.b32.xlu1 %v14898_v39, %s12557_s28 }
 0x232   :  { %v3865_v2 = vadd.f32 1.0, %v12037_v9  ;;  %v14911_v16 = vpop.permute.xlu0 %2085  ;;  %v4279_v29 = vmul.f32 %v4209_v61, %v14885_v30  ;;  %v3727_v12 = vmul.f32 0.7978846, %v3657_v8  ;;  %v2990_v60 = vsel %vm2948_vm8, %v2905_v27, %v14813_v32 }
 0x233   :  { %v3448_v55 = vmul.f32 %v14902_v44, %v14902_v44  ;;  %v4487_v22 = vmul.f32 0.7978846, %v4417_v40  ;;  %v4418_v19 = vadd.f32 %v4348_v23, %v14860_v5  ;;  %v14920_v54 = vadd.f32 %v4074_v35, %v14642_v0  ;;  %11100 = vmatmul.mubr.msk.bf16.gmra.mrb[8].mxu1 %vm3046_vm9, %v2990_v60 }
 0x234   :  { %v3935_v14 = vmul.f32 0.5, %v3865_v2  ;;  %v4349_v9 = vmul.f32 0.044715, %v4279_v29  ;;  %12040 = vtanh.f32 %v3727_v12  ;;  %v14926_v8 = vadd.f32 %v14556_v13, %v14825_v36  ;;  %11103 = vmatprep.mubr.msk.bf16.mxu1 %vm12555_vm6, %v20928_v51 }
 0x235   :  { %v3518_v61 = vmul.f32 %v3448_v55, %v14902_v44  ;;  %v14930_v32 = vpop.permute.xlu1 %2816  ;;  %12042 = vtanh.f32 %v4486_v52  ;;  %v4210_v27 = vmul.f32 %v14920_v54, %v14920_v54  ;;  %v2444_v23 = vsel %vm2380_vm4, %v2367_v41, %v14843_v45 }
 0x236   :  { %v4005_v40 = vmul.f32 %v3935_v14, %v14755_v10  ;;  %v4488_v35 = vmul.f32 0.7978846, %v4418_v19  ;;  %v3449_v36 = vmul.f32 %v14926_v8, %v14926_v8  ;;  %v2666_v29 = vshrl.u32 %v2444_v23, 16  ;;  %v14939_v12 = vpop.permute.xlu0 %2747 }
 0x237   :  { %v3588_v2 = vmul.f32 0.044715, %v3518_v61  ;;  %12044 = vtanh.f32 %v4487_v22  ;;  %v4280_v55 = vmul.f32 %v4210_v27, %v14920_v54  ;;  %v2664_v60 = vor.u32 %v2662_v49, %v14891_v26 }
 0x238   :  { %v4075_v52 = vmul.f32 %v14613_v48, %v4005_v40  ;;  %v12039_v39 = vpop.eup %12038  ;;  %v4419_v10 = vadd.f32 %v4349_v9, %v14885_v30  ;;  %v2908_v41 = vsel %vm2842_vm7, %v14317_v34, %v14823_v25  ;;  %v3519_v19 = vmul.f32 %v3449_v36, %v14926_v8 }
 0x239   :  { %v3658_v45 = vadd.f32 %v3588_v2, %v14902_v44  ;;  %v14950_v14 = vpop.permute.xlu1 %2265  ;;  %v3866_v61 = vadd.f32 1.0, %v12039_v39  ;;  %v14955_v27 = vrot.slane %v2666_v29, 7  ;;  %v2669_v49 = vshll.u32 %v2444_v23, 16 }
 0x23a   :  { %v14953_v22 = vadd.f32 %v4075_v52, %v14642_v0  ;;  %12046 = vtanh.f32 %v4488_v35  ;;  %v4350_v40 = vmul.f32 0.044715, %v4280_v55  ;;  %v3589_v30 = vmul.f32 0.044715, %v3519_v19 }
 0x23b   :  { %v3728_v9 = vmul.f32 0.7978846, %v3658_v45  ;;  %v3936_v5 = vmul.f32 0.5, %v3866_v61  ;;  %v20985_v34 = vmul.bf16 %v14659_v56, %v14194_v37  ;;  %v14966_v39 = vsel %vm1388_vm0, %v14802_v17, %v2664_v60 }
 0x23c   :  { %v4211_v2 = vmul.f32 %v14953_v22, %v14953_v22  ;;  %v3659_v23 = vadd.f32 %v3589_v30, %v14926_v8  ;;  %2759 = vrot.lane.b32.xlu0 %v14966_v39, %s12556_s20  ;;  %2828 = vrot.lane.b32.xlu1 %v14966_v39, %s12557_s28  ;;  %v14975_v35 = vadd.f32 %v14556_v13, %v14863_v1  ;;  %v14981_v17 = vmul.f32 0.7978846, %v4419_v10 }
 0x23d   :  { %v2370_v25 = vsel %vm2271_vm3, %v20985_v34, %v14849_v28  ;;  %12048 = vtanh.f32 %v3728_v9  ;;  %v2992_v37 = vsel %vm2948_vm8, %v2908_v41, %v14870_v24  ;;  %v2088_v28 = vpop.permute.xlu0 %2087  ;;  %v14979_v36 = vpop.permute.xlu1 %2818  ;;  %v4006_v29 = vmul.f32 %v3936_v5, %v14796_v31 }
 0x23e   :  { %v4281_v30 = vmul.f32 %v4211_v2, %v14953_v22  ;;  %v2671_v55 = vor.u32 %v2669_v49, %v14955_v27  ;;  %11104 = vmatmul.mubr.msk.bf16.gmra.mrb[12].mxu1 %vm3046_vm9, %v2992_v37  ;;  %v12041_v52 = vpop.eup %12040  ;;  %v3729_v60 = vmul.f32 0.7978846, %v3659_v23  ;;  %v3450_v1 = vmul.f32 %v14975_v35, %v14975_v35 }
 0x23f   :  { %v14991_v24 = vadd.f32 %v14556_v13, %v14882_v7  ;;  %v2446_v10 = vsel %vm2380_vm4, %v2370_v25, %v14904_v47  ;;  %11107 = vmatprep.mubr.msk.bf16.mxu1 %vm12555_vm6, %v20928_v51  ;;  %v14997_v31 = vpop.eup %12042  ;;  %v4420_v5 = vadd.f32 %v4350_v40, %v14920_v54  ;;  %v4076_v41 = vmul.f32 %v14613_v48, %v4006_v29 }
 0x240   :  { %v4351_v45 = vmul.f32 0.044715, %v4281_v30  ;;  %v3867_v19 = vadd.f32 1.0, %v12041_v52  ;;  %12050 = vtanh.f32 %v3729_v60  ;;  %v3520_v61 = vmul.f32 %v3450_v1, %v14975_v35 }
 0x241   :  { %v3451_v13 = vmul.f32 %v14991_v24, %v14991_v24  ;;  %v2673_v7 = vshrl.u32 %v2446_v10, 16  ;;  %v15004_v49 = vpop.eup %12044  ;;  %v15008_v9 = vadd.f32 %v4076_v41, %v14642_v0  ;;  %v2911_v40 = vsel %vm2842_vm7, %v14375_v42, %v14880_v46  ;;  %v2268_v34 = vpop.permute.xlu1 %2267 }
 0x242   :  { %v4421_v47 = vadd.f32 %v4351_v45, %v14953_v22  ;;  %v3937_v2 = vmul.f32 0.5, %v3867_v19  ;;  %v3590_v25 = vmul.f32 0.044715, %v3520_v61  ;;  %v2676_v30 = vshll.u32 %v2446_v10, 16  ;;  %v15016_v29 = vpop.permute.xlu0 %2749 }
 0x243   :  { %v3521_v23 = vmul.f32 %v3451_v13, %v14991_v24  ;;  %v15014_v37 = vrot.slane %v2673_v7, 7  ;;  %v4212_v52 = vmul.f32 %v15008_v9, %v15008_v9  ;;  %v20986_v1 = vmul.bf16 %v14662_v20, %v14265_v11 }
 0x244   :  { %v4007_v60 = vmul.f32 %v3937_v2, %v14835_v62  ;;  %v15028_v46 = vsel %vm1388_vm0, %v14891_v26, %v2671_v55  ;;  %v15030_v45 = vpop.eup %12046  ;;  %v3660_v10 = vadd.f32 %v3590_v25, %v14975_v35  ;;  %v2994_v11 = vsel %vm2948_vm8, %v2911_v40, %v14930_v32 }
 0x245   :  { %v2373_v42 = vsel %vm2271_vm3, %v20986_v1, %v14911_v16  ;;  %v3591_v41 = vmul.f32 0.044715, %v3521_v23  ;;  %v2678_v19 = vor.u32 %v2676_v30, %v15014_v37  ;;  %2761 = vrot.lane.b32.xlu0 %v15028_v46, %s12556_s20  ;;  %2830 = vrot.lane.b32.xlu1 %v15028_v46, %s12557_s28  ;;  %v4490_v62 = vmul.f32 0.7978846, %v4420_v5  ;;  %v2821_v30 = vpop.permute.xlu1 %2820 }
 0x246   :  { %v4491_v16 = vmul.f32 0.7978846, %v4421_v47  ;;  %v4282_v26 = vmul.f32 %v4212_v52, %v15008_v9  ;;  %v4077_v55 = vmul.f32 %v14613_v48, %v4007_v60  ;;  %11108 = vmatmul.mubr.msk.bf16.gmra.mrb[16].mxu1 %vm3046_vm9, %v2994_v11  ;;  %v3730_v13 = vmul.f32 0.7978846, %v3660_v10 }
 0x247   :  { %v12049_v61 = vpop.eup %12048  ;;  %v3661_v7 = vadd.f32 %v3591_v41, %v14991_v24  ;;  %v2448_v2 = vsel %vm2380_vm4, %v2373_v42, %v14950_v14  ;;  %v20987_v25 = vmul.bf16 %v14697_v18, %v14330_v15  ;;  %11111 = vmatprep.mubr.msk.bf16.mxu1 %vm12555_vm6, %v20928_v51  ;;  %v2914_v14 = vsel %vm2842_vm7, %v14423_v43, %v14939_v12 }
 0x248   :  { %v4352_v5 = vmul.f32 0.044715, %v4282_v26  ;;  %v15053_v47 = vadd.f32 %v4077_v55, %v14642_v0  ;;  %v3868_v40 = vadd.f32 1.0, %v12049_v61  ;;  %v2680_v23 = vshrl.u32 %v2448_v2, 16 }
 0x249   :  { %v2376_v32 = vsel %vm2271_vm3, %v20987_v25, %v2088_v28  ;;  %12052 = vtanh.f32 %v3730_v13  ;;  %v3731_v52 = vmul.f32 0.7978846, %v3661_v7  ;;  %v15060_v15 = vsel %vm1388_vm0, %v14955_v27, %v2678_v19  ;;  %v2090_v28 = vpop.permute.xlu0 %2089 }
 0x24a   :  { %v4422_v60 = vadd.f32 %v4352_v5, %v15008_v9  ;;  %v4213_v1 = vmul.f32 %v15053_v47, %v15053_v47  ;;  %v3938_v42 = vmul.f32 0.5, %v3868_v40  ;;  %v2682_v10 = vrot.slane %v2680_v23, 7  ;;  %2763 = vrot.lane.b32.xlu0 %v15060_v15, %s12556_s20  ;;  %2832 = vrot.lane.b32.xlu1 %v15060_v15, %s12557_s28  ;;  %v12051_v41 = vpop.eup %12050 }
 0x24b   :  { %12054 = vtanh.f32 %v3731_v52  ;;  %v2683_v43 = vshll.u32 %v2448_v2, 16  ;;  %v2996_v12 = vsel %vm2948_vm8, %v2914_v14, %v14979_v36  ;;  %v2450_v27 = vsel %vm2380_vm4, %v2376_v32, %v2268_v34 }
 0x24c   :  { %12056 = vtanh.f32 %v14981_v17  ;;  %v4283_v19 = vmul.f32 %v4213_v1, %v15053_v47  ;;  %v4008_v11 = vmul.f32 %v3938_v42, %v14902_v44  ;;  %v3869_v26 = vadd.f32 1.0, %v12051_v41  ;;  %v2270_v17 = vpop.permute.xlu1 %2269 }
 0x24d   :  { %12058 = vtanh.f32 %v4490_v62  ;;  %v4492_v55 = vmul.f32 0.7978846, %v4422_v60  ;;  %v2685_v61 = vor.u32 %v2683_v43, %v2682_v10  ;;  %v2687_v13 = vshrl.u32 %v2450_v27, 16  ;;  %v2752_v62 = vpop.permute.xlu0 %2751 }
 0x24e   :  { %12060 = vtanh.f32 %v4491_v16  ;;  %v4078_v7 = vmul.f32 %v14613_v48, %v4008_v11  ;;  %v3939_v2 = vmul.f32 0.5, %v3869_v26  ;;  %11112 = vmatmul.mubr.msk.bf16.gmra.mrb[20].mxu1 %vm3046_vm9, %v2996_v12  ;;  %v20988_v36 = vmul.bf16 0.0|0.0, %v14708_v4 }
 0x24f   :  { %v4353_v25 = vmul.f32 0.044715, %v4283_v19  ;;  %v2689_v32 = vrot.slane %v2687_v13, 7  ;;  %v2690_v5 = vshll.u32 %v2450_v27, 16  ;;  %v15082_v44 = vsel %vm1388_vm0, %v15014_v37, %v2685_v61  ;;  %11115 = vmatprep.mubr.msk.bf16.mxu1 %vm12555_vm6, %v20928_v51 }
 0x250   :  { %v2379_v34 = vsel %vm2271_vm3, %v20988_v36, %v2090_v28  ;;  %v15087_v16 = vadd.f32 %v4078_v7, %v14642_v0  ;;  %v4009_v40 = vmul.f32 %v3939_v2, %v14926_v8  ;;  %v2917_v23 = vsel %vm2842_vm7, %v14464_v63, %v15016_v29  ;;  %2765 = vrot.lane.b32.xlu0 %v15082_v44, %s12556_s20 }
 0x251   :  { %2834 = vrot.lane.b32.xlu1 %v15082_v44, %s12557_s28  ;;  %v4482_v37 = vmul.f32 0.7978846, %v14780_v53  ;;  %12062 = vtanh.f32 %v4492_v55  ;;  %v2692_v52 = vor.u32 %v2690_v5, %v2689_v32  ;;  %v2998_v14 = vsel %vm2948_vm8, %v2917_v23, %v2821_v30  ;;  %v2754_v23 = vpop.permute.xlu0 %2753 }
 0x252   :  { %v2452_v28 = vsel %vm2380_vm4, %v2379_v34, %v2270_v17  ;;  %v4214_v8 = vmul.f32 %v15087_v16, %v15087_v16  ;;  %v4079_v60 = vmul.f32 %v14613_v48, %v4009_v40  ;;  %v2920_v63 = vsel %vm2842_vm7, %v14491_v50, %v2752_v62  ;;  %v2823_v50 = vpop.permute.xlu1 %2822 }
 0x253   :  { %v2694_v29 = vshrl.u32 %v2452_v28, 16  ;;  %v12053_v1 = vpop.eup %12052  ;;  %v4423_v42 = vadd.f32 %v4353_v25, %v15053_v47  ;;  %v15107_v53 = vsel %vm1388_vm0, %v2682_v10, %v2692_v52  ;;  %v4483_v41 = vmul.f32 0.7978846, %v14785_v38 }
 0x254   :  { %20989 = vst [vmem:[#allocation89_spill] sm:$0xff] %v15107_v53  ;;  %12064 = vtanh.f32 %v4482_v37  ;;  %v4284_v30 = vmul.f32 %v4214_v8, %v15087_v16  ;;  %v15112_v43 = vadd.f32 %v4079_v60, %v14642_v0  ;;  %v3870_v12 = vadd.f32 1.0, %v12053_v1  ;;  %2767 = vrot.lane.b32.xlu0 %v15107_v53, %s12556_s20  ;;  %v20990_v1 = vld [vmem:[#allocation79_spill] sm:$0xff] }
 0x255   :  { %v2697_v27 = vshll.u32 %v2452_v28, 16  ;;  %2836 = vrot.lane.b32.xlu1 %v15107_v53, %s12557_s28  ;;  %v12055_v19 = vpop.eup %12054  ;;  %v2696_v10 = vrot.slane %v2694_v29, 7  ;;  %12066 = vtanh.f32 %v4483_v41  ;;  %v4620_v38 = vadd.f32 1.0, %v14815_v59 }
 0x256   :  { %v4621_v11 = vadd.f32 1.0, %v14837_v3  ;;  %v15120_v26 = vpop.eup %12056  ;;  %v4354_v55 = vmul.f32 0.044715, %v4284_v30  ;;  %v4215_v61 = vmul.f32 %v15112_v43, %v15112_v43  ;;  %v3940_v13 = vmul.f32 0.5, %v3870_v12  ;;  %11116 = vmatmul.mubr.msk.bf16.gmra.mrb[24].mxu1 %vm3046_vm9, %v2998_v14  ;;  %v20991_v30 = vld [vmem:[#allocation70_spill] sm:$0xff] }
 0x257   :  { %v3871_v7 = vadd.f32 1.0, %v12055_v19  ;;  %v15125_v2 = vpop.eup %12058  ;;  %v4493_v36 = vmul.f32 0.7978846, %v4423_v42  ;;  %v2699_v34 = vor.u32 %v2697_v27, %v2696_v10  ;;  %v3000_v17 = vsel %vm2948_vm8, %v2920_v63, %v2823_v50  ;;  %11119 = vmatprep.mubr.msk.bf16.mxu1 %vm12555_vm6, %v20928_v51  ;;  %v2825_v27 = vpop.permute.xlu1 %2824 }
 0x258   :  { %v4690_v3 = vmul.f32 0.5, %v4620_v38  ;;  %v15130_v59 = vpop.eup %12060  ;;  %v4424_v25 = vadd.f32 %v4354_v55, %v15087_v16  ;;  %v4285_v5 = vmul.f32 %v4215_v61, %v15112_v43  ;;  %v4010_v62 = vmul.f32 %v3940_v13, %v14975_v35 }
 0x259   :  { %v3941_v40 = vmul.f32 0.5, %v3871_v7  ;;  %v2700_v37 = vsel %vm1388_vm0, %v2689_v32, %v2699_v34  ;;  %v4691_v52 = vmul.f32 0.5, %v4621_v11  ;;  %v4484_v28 = vmul.f32 0.7978846, %v14852_v57 }
 0x25a   :  { %v4760_v14 = vmul.f32 %v4690_v3, %v14671_v21  ;;  %v4494_v8 = vmul.f32 0.7978846, %v4424_v25  ;;  %v4355_v60 = vmul.f32 0.044715, %v4285_v5  ;;  %v4080_v63 = vmul.f32 %v14613_v48, %v4010_v62  ;;  %2769 = vrot.lane.b32.xlu0 %v2700_v37, %s12556_s20  ;;  %2838 = vrot.lane.b32.xlu1 %v2700_v37, %s12557_s28  ;;  %v20993_v62 = vld [vmem:[#allocation5_spill] sm:$0xff] }
 0x25b   :  { %v4011_v29 = vmul.f32 %v3941_v40, %v14991_v24  ;;  %v15142_v35 = vpop.eup %12062  ;;  %v4761_v42 = vmul.f32 %v4691_v52, %v20990_v1  ;;  %v4485_v32 = vmul.f32 0.7978846, %v14855_v58  ;;  %12068 = vtanh.f32 %v4484_v28 }
 0x25c   :  { %v4626_v21 = vadd.f32 1.0, %v14997_v31  ;;  %v4425_v57 = vadd.f32 %v4355_v60, %v15112_v43  ;;  %v15149_v41 = vadd.f32 %v4080_v63, %v14642_v0  ;;  %v2923_v12 = vsel %vm2842_vm7, %v20991_v30, %v2754_v23  ;;  %v20994_v60 = vld [vmem:[#allocation82_spill] sm:$0xff] }
 0x25d   :  { %v4081_v24 = vmul.f32 %v14613_v48, %v4011_v29  ;;  %v15154_v19 = vpack.c.bf16 %v4761_v42, %v4760_v14  ;;  %12070 = vtanh.f32 %v4485_v32  ;;  %v4627_v58 = vadd.f32 1.0, %v15004_v49  ;;  %v12430_v49 = vld [vmem:[%s20653_s3] sm:$0xff]  }
 0x25e   :  { %v12065_v50 = vpop.eup %12064  ;;  %v4696_v10 = vmul.f32 0.5, %v4626_v21  ;;  %12072 = vtanh.f32 %v4493_v36  ;;  %v4216_v31 = vmul.f32 %v15149_v41, %v15149_v41  ;;  %11120 = vmatmul.mubr.msk.bf16.gmra.mrb[28].mxu1 %vm3046_vm9, %v3000_v17  ;;  %v20992_v55 = vmov 0  }
 0x25f   :  { %v15160_v38 = vadd.f32 %v4081_v24, %v14642_v0  ;;  %v4622_v11 = vadd.f32 1.0, %v12065_v50  ;;  %2840 = vrot.lane.b32.xlu1 %v20992_v55, %s12557_s28  ;;  %v12067_v61 = vpop.eup %12066  ;;  %12074 = vtanh.f32 %v4494_v8  ;;  %v3002_v13 = vsel %vm2948_vm8, %v2923_v12, %v2825_v27  ;;  %11123 = vmatprep.mubr.msk.bf16.mxu1 %vm12555_vm6, %v20928_v51 }
 0x260   :  { %v4865_v7 = vmul.bf16 %v12430_v49, %v15154_v19  ;;  %v4697_v36 = vmul.f32 0.5, %v4627_v58  ;;  %v4495_v34 = vmul.f32 0.7978846, %v4425_v57  ;;  %v4286_v17 = vmul.f32 %v4216_v31, %v15149_v41  ;;  %v20995_v57 = vld [vmem:[#allocation83_spill] sm:$0xff]  ;;  %v20996_v49 = vld [vmem:[#allocation86_spill] sm:$0xff] }
 0x261   :  { %v4217_v3 = vmul.f32 %v15160_v38, %v15160_v38  ;;  %v4623_v25 = vadd.f32 1.0, %v12067_v61  ;;  %v4692_v5 = vmul.f32 0.5, %v4622_v11  ;;  %v4935_v40 = vmul.bf16 %v15154_v19, %v20993_v62  ;;  %v12431_v11 = vld [vmem:[%s20653_s3 + $0x18] sm:$0xff]  }
 0x262   :  { %v4971_v23 = vshll.u32 %v4865_v7, 16  ;;  %v4766_v37 = vmul.f32 %v4696_v10, %v14799_v6  ;;  %v4356_v52 = vmul.f32 0.044715, %v4286_v17  ;;  %v4767_v8 = vmul.f32 %v4697_v36, %v14820_v33 }
 0x263   :  { %v4287_v14 = vmul.f32 %v4217_v3, %v15160_v38  ;;  %v4693_v28 = vmul.f32 0.5, %v4623_v25  ;;  %v4762_v63 = vmul.f32 %v4692_v5, %v20994_v60  ;;  %v4628_v1 = vadd.f32 1.0, %v15030_v45  ;;  %v12432_v25 = vld [vmem:[%s20653_s3 + $0x8] sm:$0xff]  }
 0x264   :  { %v15181_v29 = vrot.slane %v4971_v23, 1  ;;  %v4629_v42 = vadd.f32 1.0, %v15120_v26  ;;  %v4426_v32 = vadd.f32 %v4356_v52, %v15149_v41  ;;  %v15187_v6 = vpack.c.bf16 %v4767_v8, %v4766_v37 }
 0x265   :  { %v4357_v21 = vmul.f32 0.044715, %v4287_v14  ;;  %v4763_v24 = vmul.f32 %v4693_v28, %v20995_v57  ;;  %v12069_v30 = vpop.eup %12068  ;;  %12076 = vtanh.f32 %v4495_v34  ;;  %v15189_v12 = vrot.slane %v4935_v40, 1  ;;  %v20997_v34 = vld [vmem:[#allocation87_spill] sm:$0xff] }
 0x266   :  { %v4698_v33 = vmul.f32 0.5, %v4628_v1  ;;  %v4699_v27 = vmul.f32 0.5, %v4629_v42  ;;  %11124 = vmatmul.mubr.msk.bf16.gmra.mrb[32].mxu1 %vm3046_vm9, %v3002_v13  ;;  %v4974_v45 = vshrl.u32 %v4865_v7, 16  ;;  %v4624_v26 = vadd.f32 1.0, %v12069_v30  ;;  %v20998_v13 = vld [vmem:[#allocation6_spill] sm:$0xff]  ;;  %v20999_v42 = vld [vmem:[#allocation8_spill] sm:$0xff] }
 0x267   :  { %v4427_v50 = vadd.f32 %v4357_v21, %v15160_v38  ;;  %v15192_v58 = vpack.c.bf16 %v4763_v24, %v4762_v63  ;;  %v12071_v10 = vpop.eup %12070  ;;  %v4496_v31 = vmul.f32 0.7978846, %v4426_v32  ;;  %v4868_v61 = vmul.bf16 %v12431_v11, %v15187_v6  ;;  %11127 = vmatprep.mubr.msk.bf16.mxu1 %vm12555_vm6, %v20928_v51 }
 0x268   :  { %v4768_v36 = vmul.f32 %v4698_v33, %v20996_v49  ;;  %v4769_v17 = vmul.f32 %v4699_v27, %v20997_v34  ;;  %v15203_v3 = vpop.eup %12072  ;;  %v4976_v40 = vor.u32 %v4974_v45, %v15181_v29  ;;  %v4630_v23 = vadd.f32 1.0, %v15125_v2  ;;  %v12433_v2 = vld [vmem:[%s20653_s3 + $0x20] sm:$0xff]  }
 0x269   :  { %v4936_v7 = vmul.bf16 %v15192_v58, %v20998_v13  ;;  %v4866_v5 = vmul.bf16 %v12432_v25, %v15192_v58  ;;  %v15213_v37 = vpop.eup %12074  ;;  %v4625_v52 = vadd.f32 1.0, %v12071_v10  ;;  %v4694_v14 = vmul.f32 0.5, %v4624_v26 }
 0x26a   :  { %v4994_v28 = vshll.u32 %v4868_v61, 16  ;;  %v15215_v8 = vpack.c.bf16 %v4769_v17, %v4768_v36  ;;  %v4497_v60 = vmul.f32 0.7978846, %v4427_v50  ;;  %v4938_v32 = vmul.bf16 %v15187_v6, %v20999_v42  ;;  %v3227_v30 = vpop.f32.mrb[36].mxu0  ;;  %v21000_v50 = vld [vmem:[#allocation84_spill] sm:$0xff] }
 0x26b   :  { %v5357_v63 = vrot.slane %v4936_v7, 1  ;;  %v4978_v1 = vshll.u32 %v4866_v5, 16  ;;  %12078 = vtanh.f32 %v4496_v31  ;;  %v4695_v21 = vmul.f32 0.5, %v4625_v52  ;;  %v11057_v10 = vpop.f32.mrb[37].mxu0  ;;  %v21001_v31 = vld [vmem:[#allocation85_spill] sm:$0xff] }
 0x26c   :  { %v4982_v57 = vshrl.u32 %v4866_v5, 16  ;;  %v15223_v24 = vmul.bf16 %v12433_v2, %v15215_v8  ;;  %v4764_v45 = vmul.f32 %v4694_v14, %v21000_v50  ;;  %v15228_v26 = vrot.slane %v4994_v28, 1  ;;  %v3230_v17 = vpop.f32.mrb[38].mxu0 }
 0x26d   :  { %v5358_v33 = vsel %vm2127_vm1, %v15189_v12, %v5357_v63  ;;  %v4980_v27 = vrot.slane %v4978_v1, 1  ;;  %v4765_v11 = vmul.f32 %v4695_v21, %v21001_v31  ;;  %v4631_v36 = vadd.f32 1.0, %v15130_v59  ;;  %v11058_v5 = vpop.f32.mrb[39].mxu0  ;;  %v15245_v59 = vld [vmem:[%s20655_s5] ss:$0 sm:$0xff] }
 0x26e   :  { %5428 = vrot.lane.b32.xlu0 %v5358_v33, %s12559_s19  ;;  %v5002_v49 = vshll.u32 %v15223_v24, 16  ;;  %v4700_v34 = vmul.f32 0.5, %v4630_v23  ;;  %12080 = vtanh.f32 %v4497_v60  ;;  %v4998_v7 = vshrl.u32 %v4868_v61, 16 }
 0x26f   :  { %v15234_v25 = vrot.slane %v4938_v32, 1  ;;  %v15236_v52 = vpop.eup %12076  ;;  %v4981_v14 = vsel %vm861_vm2, %v4976_v40, %v4980_v27  ;;  %v15239_v28 = vpack.c.bf16 %v4765_v11, %v4764_v45  ;;  %v4984_v1 = vor.u32 %v4982_v57, %v4980_v27  ;;  %v21002_v40 = vld [vmem:[#allocation7_spill] sm:$0xff] }
 0x270   :  { %v4701_v2 = vmul.f32 0.5, %v4631_v36  ;;  %v5000_v21 = vor.u32 %v4998_v7, %v15228_v26  ;;  %v5004_v33 = vrot.slane %v5002_v49, 1  ;;  %v15248_v61 = vadd.f32 %v15245_v59, %v3227_v30  ;;  %v12435_v32 = vld [vmem:[%s20653_s3 + $0x10] sm:$0xff]  }
 0x271   :  { %v15251_v23 = vadd.f32 %v15245_v59, %v3230_v17  ;;  %v4937_v60 = vmul.bf16 %v15239_v28, %v21002_v40  ;;  %v4867_v57 = vmul.bf16 %v12435_v32, %v15239_v28  ;;  %v4770_v27 = vmul.f32 %v4700_v34, %v14920_v54  ;;  %v21003_v17 = vld [vmem:[#allocation9_spill] sm:$0xff] }
 0x272   :  { %5251 = vrot.lane.b32.xlu0 %v4981_v14, %s12560_s22  ;;  %v4771_v30 = vmul.f32 %v4701_v2, %v14953_v22  ;;  %v5006_v50 = vshrl.u32 %v15223_v24, 16  ;;  %v3452_v45 = vmul.f32 %v15248_v61, %v15248_v61  ;;  %v4632_v31 = vadd.f32 1.0, %v15142_v35  ;;  %v3235_v54 = vpop.f32.mrb[40].mxu0 }
 0x273   :  { %v3453_v10 = vmul.f32 %v15251_v23, %v15251_v23  ;;  %v5359_v11 = vrot.slane %v4937_v60, 1  ;;  %v4986_v49 = vshll.u32 %v4867_v57, 16  ;;  %v4939_v7 = vmul.bf16 %v15215_v8, %v21003_v17  ;;  %v11061_v14 = vpop.f32.mrb[41].mxu0 }
 0x274   :  { %v15268_v36 = vpack.c.bf16 %v4771_v30, %v4770_v27  ;;  %v5005_v22 = vsel %vm861_vm2, %v5000_v21, %v5004_v33  ;;  %v3522_v24 = vmul.f32 %v3452_v45, %v15248_v61  ;;  %v4633_v5 = vadd.f32 1.0, %v15203_v3  ;;  %v12436_v27 = vld [vmem:[%s20653_s3 + $0x28] sm:$0xff]   ;;  %v3238_v30 = vpop.f32.mrb[42].mxu0 }
 0x275   :  { %v3523_v34 = vmul.f32 %v3453_v10, %v15251_v23  ;;  %v12079_v2 = vpop.eup %12078  ;;  %v5360_v35 = vsel %vm2127_vm1, %v5357_v63, %v5359_v11  ;;  %v4988_v60 = vrot.slane %v4986_v49, 1  ;;  %v4990_v32 = vshrl.u32 %v4867_v57, 16  ;;  %v11062_v49 = vpop.f32.mrb[43].mxu0 }
 0x276   :  { %5249 = vrot.lane.b32.xlu0 %v15181_v29, %s12560_s22  ;;  %v4870_v21 = vmul.bf16 %v12436_v27, %v15268_v36  ;;  %5430 = vrot.lane.b32.xlu1 %v5360_v35, %s12559_s19  ;;  %v3592_v45 = vmul.f32 0.044715, %v3522_v24  ;;  %v4702_v10 = vmul.f32 0.5, %v4632_v31  ;;  %v4703_v14 = vmul.f32 0.5, %v4633_v5 }
 0x277   :  { %v3593_v3 = vmul.f32 0.044715, %v3523_v34  ;;  %v4989_v63 = vsel %vm861_vm2, %v4984_v1, %v4988_v60  ;;  %v4992_v17 = vor.u32 %v4990_v32, %v4988_v60  ;;  %v5363_v29 = vrot.slane %v4939_v7, 1  ;;  %v21004_v34 = vld [vmem:[#allocation10_spill] sm:$0xff] }
 0x278   :  { %v5010_v42 = vshll.u32 %v4870_v21, 16  ;;  %v12081_v57 = vpop.eup %12080  ;;  %v3662_v40 = vadd.f32 %v3592_v45, %v15248_v61  ;;  %v4772_v27 = vmul.f32 %v4702_v10, %v15008_v9  ;;  %v4773_v62 = vmul.f32 %v4703_v14, %v15053_v47  ;;  %v21005_v10 = vld [vmem:[#allocation11_spill] sm:$0xff] }
 0x279   :  { %v3663_v13 = vadd.f32 %v3593_v3, %v15251_v23  ;;  %v4997_v24 = vsel %vm861_vm2, %v4992_v17, %v15228_v26  ;;  %v4940_v1 = vmul.bf16 %v15268_v36, %v21004_v34  ;;  %v4634_v5 = vadd.f32 1.0, %v15213_v37  ;;  %v12437_v37 = vld [vmem:[%s20653_s3 + $0x30] sm:$0xff]  }
 0x27a   :  { %v5012_v31 = vrot.slane %v5010_v42, 1  ;;  %5253 = vrot.lane.b32.xlu1 %v4989_v63, %s12560_s22  ;;  %5255 = vrot.lane.b32.xlu0 %v4997_v24, %s12560_s22  ;;  %v3732_v7 = vmul.f32 0.7978846, %v3662_v40  ;;  %v15296_v60 = vpack.c.bf16 %v4773_v62, %v4772_v27  ;;  %v4635_v9 = vadd.f32 1.0, %v15236_v52  ;;  %v3243_v32 = vpop.f32.mrb[44].mxu0 }
 0x27b   :  { %v3733_v35 = vmul.f32 0.7978846, %v3663_v13  ;;  %v5362_v47 = vsel %vm2127_vm1, %v5359_v11, %v15234_v25  ;;  %v5008_v26 = vor.u32 %v5006_v50, %v5004_v33  ;;  %v5364_v42 = vsel %vm2127_vm1, %v15234_v25, %v5363_v29  ;;  %v11065_v45 = vpop.f32.mrb[45].mxu0 }
 0x27c   :  { %v4704_v17 = vmul.f32 0.5, %v4634_v5  ;;  %12082 = vtanh.f32 %v3732_v7  ;;  %v4871_v13 = vmul.bf16 %v12437_v37, %v15296_v60  ;;  %v5014_v62 = vshrl.u32 %v4870_v21, 16  ;;  %v3246_v25 = vpop.f32.mrb[46].mxu0 }
 0x27d   :  { %v4705_v40 = vmul.f32 0.5, %v4635_v9  ;;  %v5013_v52 = vsel %vm861_vm2, %v5008_v26, %v5012_v31  ;;  %12084 = vtanh.f32 %v3733_v35  ;;  %v15308_v11 = vrot.slane %v4940_v1, 1  ;;  %v11066_v63 = vpop.f32.mrb[47].mxu0 }
 0x27e   :  { %v15311_v33 = vadd.f32 %v15245_v59, %v3235_v54  ;;  %5426 = vrot.lane.b32.xlu1 %v15189_v12, %s12559_s19  ;;  %5257 = vrot.lane.b32.xlu0 %v5005_v22, %s12560_s22  ;;  %v5018_v50 = vshll.u32 %v4871_v13, 16  ;;  %v4774_v3 = vmul.f32 %v4704_v17, %v15087_v16  ;;  %v4941_v14 = vmul.bf16 %v15296_v60, %v21005_v10 }
 0x27f   :  { %v4775_v21 = vmul.f32 %v4705_v40, %v15112_v43  ;;  %v15323_v54 = vadd.f32 %v15245_v59, %v3238_v30  ;;  %v4636_v27 = vadd.f32 1.0, %v12079_v2  ;;  %v4637_v24 = vadd.f32 1.0, %v12081_v57  ;;  %v12438_v30 = vld [vmem:[%s20653_s3 + $0x38] sm:$0xff]  }
 0x280   :  { %v3454_v49 = vmul.f32 %v15311_v33, %v15311_v33  ;;  %v5016_v12 = vor.u32 %v5014_v62, %v5012_v31  ;;  %v5020_v1 = vrot.slane %v5018_v50, 1  ;;  %v15328_v16 = vadd.f32 %v15245_v59, %v3243_v32  ;;  %v21007_v40 = vld [vmem:[#allocation12_spill] sm:$0xff] }
 0x281   :  { %v15325_v22 = vpack.c.bf16 %v4775_v21, %v4774_v3  ;;  %v3455_v5 = vmul.f32 %v15323_v54, %v15323_v54  ;;  %v4706_v7 = vmul.f32 0.5, %v4636_v27  ;;  %v4707_v35 = vmul.f32 0.5, %v4637_v24 }
 0x282   :  { %v3524_v43 = vmul.f32 %v3454_v49, %v15311_v33  ;;  %5432 = vrot.lane.b32.xlu1 %v5362_v47, %s12559_s19  ;;  %5259 = vrot.lane.b32.xlu0 %v5013_v52, %s12560_s22  ;;  %v5366_v2 = vsel %vm2127_vm1, %v5363_v29, %v15308_v11  ;;  %v5022_v31 = vshrl.u32 %v4871_v13, 16  ;;  %v15341_v9 = vrot.slane %v4941_v14, 1  ;;  %v3251_v37 = vpop.f32.mrb[48].mxu0 }
 0x283   :  { %21006 = vst [vmem:[#allocation79_spill] sm:$0xff] %v15325_v22  ;;  %v4872_v57 = vmul.bf16 %v12438_v30, %v15325_v22  ;;  %v3525_v17 = vmul.f32 %v3455_v5, %v15323_v54  ;;  %v4776_v32 = vmul.f32 %v4706_v7, %v15149_v41  ;;  %v4777_v47 = vmul.f32 %v4707_v35, %v15160_v38  ;;  %v11069_v13 = vpop.f32.mrb[49].mxu0 }
 0x284   :  { %v3594_v26 = vmul.f32 0.044715, %v3524_v43  ;;  %v5021_v62 = vsel %vm861_vm2, %v5016_v12, %v5020_v1  ;;  %v4942_v45 = vmul.bf16 %v15325_v22, %v21007_v40  ;;  %v3456_v52 = vmul.f32 %v15328_v16, %v15328_v16  ;;  %v3254_v41 = vpop.f32.mrb[50].mxu0 }
 0x285   :  { %v5026_v29 = vshll.u32 %v4872_v57, 16  ;;  %v5024_v50 = vor.u32 %v5022_v31, %v5020_v1  ;;  %v3595_v21 = vmul.f32 0.044715, %v3525_v17  ;;  %v15352_v14 = vpack.c.bf16 %v4777_v47, %v4776_v32  ;;  %v11070_v12 = vpop.f32.mrb[51].mxu0 }
 0x286   :  { %v3664_v3 = vadd.f32 %v3594_v26, %v15311_v33  ;;  %v12083_v63 = vpop.eup %12082  ;;  %5434 = vrot.lane.b32.xlu1 %v5364_v42, %s12559_s19  ;;  %5261 = vrot.lane.b32.xlu0 %v5021_v62, %s12560_s22  ;;  %v3526_v49 = vmul.f32 %v3456_v52, %v15328_v16  ;;  %v15358_v27 = vadd.f32 %v15245_v59, %v3246_v25  ;;  %v12439_v42 = vld [vmem:[%s20653_s3 + $0x40] sm:$0xff]   ;;  %v5030_v31 = vshrl.u32 %v4872_v57, 16 }
 0x287   :  { %21008 = vst [vmem:[#allocation70_spill] sm:$0xff] %v15352_v14  ;;  %v5028_v38 = vrot.slane %v5026_v29, 1  ;;  %v15361_v24 = vadd.f32 %v15245_v59, %v3251_v37  ;;  %v12085_v1 = vpop.eup %12084  ;;  %v3872_v43 = vadd.f32 1.0, %v12083_v63  ;;  %v3665_v7 = vadd.f32 %v3595_v21, %v15323_v54 }
 0x288   :  { %v3734_v5 = vmul.f32 0.7978846, %v3664_v3  ;;  %v15368_v35 = vmul.bf16 %v12439_v42, %v15352_v14  ;;  %v3873_v30 = vadd.f32 1.0, %v12085_v1  ;;  %v5369_v26 = vrot.slane %v4942_v45, 1 }
 0x289   :  { %v5029_v25 = vsel %vm861_vm2, %v5024_v50, %v5028_v38  ;;  %v3942_v17 = vmul.f32 0.5, %v3872_v43  ;;  %v3735_v32 = vmul.f32 0.7978846, %v3665_v7  ;;  %v5032_v62 = vor.u32 %v5030_v31, %v5028_v38 }
 0x28a   :  { %12086 = vtanh.f32 %v3734_v5  ;;  %v5034_v47 = vshll.u32 %v15368_v35, 16  ;;  %v3943_v37 = vmul.f32 0.5, %v3873_v30  ;;  %5436 = vrot.lane.b32.xlu1 %v5366_v2, %s12559_s19  ;;  %5263 = vrot.lane.b32.xlu0 %v5029_v25, %s12560_s22  ;;  %v3596_v29 = vmul.f32 0.044715, %v3526_v49  ;;  %v3259_v50 = vpop.f32.mrb[52].mxu0  ;;  %v21009_v49 = vld [vmem:[#allocation13_spill] sm:$0xff] }
 0x28b   :  { %v3457_v52 = vmul.f32 %v15358_v27, %v15358_v27  ;;  %v4012_v13 = vmul.f32 %v3942_v17, %v15248_v61  ;;  %12088 = vtanh.f32 %v3735_v32  ;;  %v3458_v45 = vmul.f32 %v15361_v24, %v15361_v24  ;;  %v11073_v38 = vpop.f32.mrb[53].mxu0 }
 0x28c   :  { %v15377_v57 = vrot.slane %v5034_v47, 1  ;;  %v4013_v3 = vmul.f32 %v3943_v37, %v15251_v23  ;;  %v5368_v2 = vsel %vm2127_vm1, %v15308_v11, %v15341_v9  ;;  %v3666_v21 = vadd.f32 %v3596_v29, %v15328_v16  ;;  %v3262_v23 = vpop.f32.mrb[54].mxu0 }
 0x28d   :  { %v3527_v63 = vmul.f32 %v3457_v52, %v15358_v27  ;;  %v4943_v12 = vmul.bf16 %v15352_v14, %v21009_v49  ;;  %v3528_v1 = vmul.f32 %v3458_v45, %v15361_v24  ;;  %v15393_v43 = vadd.f32 %v15245_v59, %v3254_v41  ;;  %v11074_v42 = vpop.f32.mrb[55].mxu0 }
 0x28e   :  { %v5037_v61 = vsel %vm861_vm2, %v5032_v62, %v15377_v57  ;;  %v4082_v5 = vmul.f32 %v14613_v48, %v4012_v13  ;;  %5438 = vrot.lane.b32.xlu1 %v5368_v2, %s12559_s19  ;;  %v3736_v11 = vmul.f32 0.7978846, %v3666_v21  ;;  %v5370_v30 = vsel %vm2127_vm1, %v15341_v9, %v5369_v26 }
 0x28f   :  { %5265 = vrot.lane.b32.xlu0 %v5037_v61, %s12560_s22  ;;  %v3597_v7 = vmul.f32 0.044715, %v3527_v63  ;;  %v3598_v25 = vmul.f32 0.044715, %v3528_v1  ;;  %v3459_v31 = vmul.f32 %v15393_v43, %v15393_v43  ;;  %v15403_v41 = vadd.f32 %v15245_v59, %v3259_v50 }
 0x290   :  { %v4083_v17 = vmul.f32 %v14613_v48, %v4013_v3  ;;  %12090 = vtanh.f32 %v3736_v11  ;;  %v15408_v47 = vadd.f32 %v15245_v59, %v3262_v23  ;;  %v15410_v37 = vrot.slane %v4943_v12, 1 }
 0x291   :  { %v3667_v32 = vadd.f32 %v3597_v7, %v15358_v27  ;;  %v3668_v62 = vadd.f32 %v3598_v25, %v15361_v24  ;;  %v3529_v9 = vmul.f32 %v3459_v31, %v15393_v43  ;;  %v3460_v29 = vmul.f32 %v15403_v41, %v15403_v41 }
 0x292   :  { %v15417_v52 = vadd.f32 %v4082_v5, %v14642_v0  ;;  %5440 = vrot.lane.b32.xlu1 %v5370_v30, %s12559_s19  ;;  %v3461_v45 = vmul.f32 %v15408_v47, %v15408_v47  ;;  %v3267_v63 = vpop.f32.mrb[56].mxu0  ;;  %v15424_v38 = vadd.f32 %v4083_v17, %v14642_v0  ;;  %v5372_v5 = vsel %vm2127_vm1, %v5369_v26, %v15410_v37 }
 0x293   :  { %v3737_v13 = vmul.f32 0.7978846, %v3667_v32  ;;  %v3738_v3 = vmul.f32 0.7978846, %v3668_v62  ;;  %v3599_v2 = vmul.f32 0.044715, %v3529_v9  ;;  %v3530_v21 = vmul.f32 %v3460_v29, %v15403_v41 }
 0x294   :  { %v12087_v50 = vpop.eup %12086  ;;  %v3531_v12 = vmul.f32 %v3461_v45, %v15408_v47  ;;  %v11077_v1 = vpop.f32.mrb[57].mxu0  ;;  %v4218_v30 = vmul.f32 %v15417_v52, %v15417_v52  ;;  %v15435_v9 = vadd.f32 %v15245_v59, %v3267_v63  ;;  %v4219_v29 = vmul.f32 %v15424_v38, %v15424_v38 }
 0x295   :  { %v3874_v61 = vadd.f32 1.0, %v12087_v50  ;;  %12092 = vtanh.f32 %v3737_v13  ;;  %v12089_v23 = vpop.eup %12088  ;;  %v3669_v11 = vadd.f32 %v3599_v2, %v15393_v43  ;;  %v3600_v7 = vmul.f32 0.044715, %v3530_v21  ;;  %v3270_v42 = vpop.f32.mrb[58].mxu0 }
 0x296   :  { %12094 = vtanh.f32 %v3738_v3  ;;  %v3875_v31 = vadd.f32 1.0, %v12089_v23  ;;  %5442 = vrot.lane.b32.xlu1 %v5372_v5, %s12559_s19  ;;  %v3601_v17 = vmul.f32 0.044715, %v3531_v12  ;;  %v11078_v26 = vpop.f32.mrb[59].mxu0  ;;  %v3462_v2 = vmul.f32 %v15435_v9, %v15435_v9  ;;  %v2756_v63 = vpop.permute.xlu0 %2755 }
 0x297   :  { %v3944_v25 = vmul.f32 0.5, %v3874_v61  ;;  %v3739_v32 = vmul.f32 0.7978846, %v3669_v11  ;;  %v3670_v62 = vadd.f32 %v3600_v7, %v15403_v41  ;;  %v15444_v21 = vadd.f32 %v15245_v59, %v3270_v42 }
 0x298   :  { %v3945_v45 = vmul.f32 0.5, %v3875_v31  ;;  %v3671_v50 = vadd.f32 %v3601_v17, %v15408_v47  ;;  %v4288_v12 = vmul.f32 %v4218_v30, %v15417_v52  ;;  %v3532_v11 = vmul.f32 %v3462_v2, %v15435_v9  ;;  %v21010_v17 = vld [vmem:[#allocation71_spill] sm:$0xff] }
 0x299   :  { %v4014_v13 = vmul.f32 %v3944_v25, %v15311_v33  ;;  %12096 = vtanh.f32 %v3739_v32  ;;  %v3740_v3 = vmul.f32 0.7978846, %v3670_v62  ;;  %v3463_v7 = vmul.f32 %v15444_v21, %v15444_v21 }
 0x29a   :  { %v12091_v61 = vpop.eup %12090  ;;  %v4015_v23 = vmul.f32 %v3945_v45, %v15323_v54  ;;  %v3741_v33 = vmul.f32 0.7978846, %v3671_v50  ;;  %v3275_v25 = vpop.f32.mrb[60].mxu0  ;;  %v2926_v32 = vsel %vm2842_vm7, %v21010_v17, %v2756_v63  ;;  %v3602_v62 = vmul.f32 0.044715, %v3532_v11 }
 0x29b   :  { %v4084_v1 = vmul.f32 %v14613_v48, %v4014_v13  ;;  %v3876_v5 = vadd.f32 1.0, %v12091_v61  ;;  %12098 = vtanh.f32 %v3740_v3  ;;  %v15454_v31 = vadd.f32 %v15245_v59, %v3275_v25  ;;  %v11081_v30 = vpop.f32.mrb[61].mxu0 }
 0x29c   :  { %v4085_v42 = vmul.f32 %v14613_v48, %v4015_v23  ;;  %12100 = vtanh.f32 %v3741_v33  ;;  %v3533_v26 = vmul.f32 %v3463_v7, %v15444_v21  ;;  %v3278_v13 = vpop.f32.mrb[62].mxu0  ;;  %v4358_v50 = vmul.f32 0.044715, %v4288_v12 }
 0x29d   :  { %v3946_v54 = vmul.f32 0.5, %v3876_v5  ;;  %v4289_v3 = vmul.f32 %v4219_v29, %v15424_v38  ;;  %v15461_v2 = vadd.f32 %v4084_v1, %v14642_v0  ;;  %v3464_v61 = vmul.f32 %v15454_v31, %v15454_v31  ;;  %v11082_v23 = vpop.f32.mrb[63].mxu0 }
 0x29e   :  { %v3672_v5 = vadd.f32 %v3602_v62, %v15435_v9  ;;  %v3603_v11 = vmul.f32 0.044715, %v3533_v26  ;;  %v15468_v7 = vadd.f32 %v4085_v42, %v14642_v0 }
 0x29f   :  { %v12093_v45 = vpop.eup %12092  ;;  %v4016_v25 = vmul.f32 %v3946_v54, %v15328_v16  ;;  %v3534_v29 = vmul.f32 %v3464_v61, %v15454_v31  ;;  %v4428_v16 = vadd.f32 %v4358_v50, %v15417_v52  ;;  %v4359_v54 = vmul.f32 0.044715, %v4289_v3 }
 0x2a0   :  { %v12095_v33 = vpop.eup %12094  ;;  %v3877_v63 = vadd.f32 1.0, %v12093_v45  ;;  %v3742_v49 = vmul.f32 0.7978846, %v3672_v5  ;;  %v3673_v23 = vadd.f32 %v3603_v11, %v15444_v21  ;;  %v4220_v62 = vmul.f32 %v15461_v2, %v15461_v2 }
 0x2a1   :  { %v3878_v12 = vadd.f32 1.0, %v12095_v33  ;;  %v4086_v30 = vmul.f32 %v14613_v48, %v4016_v25  ;;  %v3604_v11 = vmul.f32 0.044715, %v3534_v29 }
 0x2a2   :  { %v3947_v17 = vmul.f32 0.5, %v3877_v63  ;;  %12102 = vtanh.f32 %v3742_v49  ;;  %v3743_v33 = vmul.f32 0.7978846, %v3673_v23  ;;  %v3283_v25 = vpop.f32.mrb[64].mxu0  ;;  %v4221_v63 = vmul.f32 %v15468_v7, %v15468_v7 }
 0x2a3   :  { %v3948_v26 = vmul.f32 0.5, %v3878_v12  ;;  %v12097_v42 = vpop.eup %12096  ;;  %v15478_v45 = vadd.f32 %v4086_v30, %v14642_v0  ;;  %v2827_v3 = vpop.permute.xlu1 %2826  ;;  %v4429_v23 = vadd.f32 %v4359_v54, %v15424_v38  ;;  %v4290_v10 = vmul.f32 %v4220_v62, %v15461_v2 }
 0x2a4   :  { %v4017_v61 = vmul.f32 %v3947_v17, %v15358_v27  ;;  %v3879_v50 = vadd.f32 1.0, %v12097_v42  ;;  %v3004_v40 = vsel %vm2948_vm8, %v2926_v32, %v2827_v3  ;;  %v15489_v27 = vadd.f32 %v15245_v59, %v3278_v13  ;;  %v11085_v49 = vpop.f32.mrb[65].mxu0 }
 0x2a5   :  { %v4018_v5 = vmul.f32 %v3948_v26, %v15361_v24  ;;  %v12099_v1 = vpop.eup %12098  ;;  %v4222_v12 = vmul.f32 %v15478_v45, %v15478_v45  ;;  %11128 = vmatmul.mubr.msk.bf16.gmra.mrb[36].mxu1 %vm3046_vm9, %v3004_v40  ;;  %v15494_v29 = vpop.f32.mrb[66].mxu0  ;;  %12104 = vtanh.f32 %v3743_v33  ;;  %v4291_v54 = vmul.f32 %v4221_v63, %v15468_v7 }
 0x2a6   :  { %v4087_v30 = vmul.f32 %v14613_v48, %v4017_v61  ;;  %v12101_v17 = vpop.eup %12100  ;;  %v3949_v26 = vmul.f32 0.5, %v3879_v50  ;;  %v3880_v42 = vadd.f32 1.0, %v12099_v1  ;;  %11131 = vmatprep.mubr.msk.bf16.mxu1 %vm12555_vm6, %v20928_v51  ;;  %v11086_v13 = vpop.f32.mrb[67].mxu0  ;;  %v3674_v40 = vadd.f32 %v3604_v11, %v15454_v31 }
 0x2a7   :  { %v4088_v24 = vmul.f32 %v14613_v48, %v4018_v5  ;;  %v3881_v32 = vadd.f32 1.0, %v12101_v17  ;;  %v4292_v50 = vmul.f32 %v4222_v12, %v15478_v45  ;;  %v3465_v33 = vmul.f32 %v15489_v27, %v15489_v27 }
 0x2a8   :  { %v15498_v61 = vadd.f32 %v4087_v30, %v14642_v0  ;;  %v4019_v5 = vmul.f32 %v3949_v26, %v15393_v43  ;;  %v3950_v1 = vmul.f32 0.5, %v3880_v42  ;;  %v3744_v43 = vmul.f32 0.7978846, %v3674_v40 }
 0x2a9   :  { %v15507_v62 = vadd.f32 %v4088_v24, %v14642_v0  ;;  %v3951_v3 = vmul.f32 0.5, %v3881_v32  ;;  %v4360_v17 = vmul.f32 0.044715, %v4290_v10  ;;  %v3535_v12 = vmul.f32 %v3465_v33, %v15489_v27 }
 0x2aa   :  { %v4223_v30 = vmul.f32 %v15498_v61, %v15498_v61  ;;  %v4089_v49 = vmul.f32 %v14613_v48, %v4019_v5  ;;  %v4020_v63 = vmul.f32 %v3950_v1, %v15403_v41  ;;  %v3291_v26 = vpop.f32.mrb[68].mxu0  ;;  %v15517_v24 = vmul.f32 0.7978846, %v4428_v16 }
 0x2ab   :  { %v4021_v11 = vmul.f32 %v3951_v3, %v15408_v47  ;;  %v4361_v42 = vmul.f32 0.044715, %v4291_v54  ;;  %12106 = vtanh.f32 %v3744_v43  ;;  %v11089_v34 = vpop.f32.mrb[69].mxu0  ;;  %v4224_v41 = vmul.f32 %v15507_v62, %v15507_v62  ;;  %v2758_v47 = vpop.permute.xlu0 %2757 }
 0x2ac   :  { %v15520_v32 = vadd.f32 %v4089_v49, %v14642_v0  ;;  %v4090_v13 = vmul.f32 %v14613_v48, %v4020_v63  ;;  %v12103_v5 = vpop.eup %12102  ;;  %v3605_v1 = vmul.f32 0.044715, %v3535_v12  ;;  %v15527_v40 = vadd.f32 %v15245_v59, %v3283_v25  ;;  %v3294_v16 = vpop.f32.mrb[70].mxu0 }
 0x2ad   :  { %v4091_v10 = vmul.f32 %v14613_v48, %v4021_v11  ;;  %v4362_v54 = vmul.f32 0.044715, %v4292_v50  ;;  %v4293_v3 = vmul.f32 %v4223_v30, %v15498_v61  ;;  %v3882_v33 = vadd.f32 1.0, %v12103_v5  ;;  %v11090_v49 = vpop.f32.mrb[71].mxu0  ;;  %v21011_v5 = vld [vmem:[#allocation72_spill] sm:$0xff] }
 0x2ae   :  { %v15530_v63 = vmul.f32 0.7978846, %v4429_v23  ;;  %v15533_v34 = vadd.f32 %v4360_v17, %v15461_v2  ;;  %v4225_v43 = vmul.f32 %v15520_v32, %v15520_v32  ;;  %v2829_v11 = vpop.permute.xlu1 %2828  ;;  %v3675_v12 = vadd.f32 %v3605_v1, %v15489_v27 }
 0x2af   :  { %v3466_v25 = vmul.f32 %v15527_v40, %v15527_v40  ;;  %v15541_v50 = vadd.f32 %v4090_v13, %v14642_v0  ;;  %v15544_v30 = vadd.f32 %v4091_v10, %v14642_v0  ;;  %v3952_v23 = vmul.f32 0.5, %v3882_v33  ;;  %v12105_v49 = vpop.eup %12104 }
 0x2b0   :  { %v2929_v17 = vsel %vm2842_vm7, %v21011_v5, %v2758_v47  ;;  %v15549_v4 = vadd.f32 %v4361_v42, %v15468_v7  ;;  %v4294_v18 = vmul.f32 %v4224_v41, %v15507_v62  ;;  %v3745_v20 = vmul.f32 0.7978846, %v3675_v12  ;;  %v2760_v5 = vpop.permute.xlu0 %2759 }
 0x2b1   :  { %v3006_v1 = vsel %vm2948_vm8, %v2929_v17, %v2829_v11  ;;  %v15554_v56 = vadd.f32 %v4362_v54, %v15478_v45  ;;  %v15556_v13 = vmul.f32 0.044715, %v4293_v3  ;;  %v4022_v10 = vmul.f32 %v3952_v23, %v15435_v9 }
 0x2b2   :  { %v3883_v33 = vadd.f32 1.0, %v12105_v49  ;;  %11132 = vmatmul.mubr.msk.bf16.gmra.mrb[40].mxu1 %vm3046_vm9, %v3006_v1  ;;  %v4295_v47 = vmul.f32 %v4225_v43, %v15520_v32  ;;  %12108 = vtanh.f32 %v3745_v20  ;;  %v3536_v42 = vmul.f32 %v3466_v25, %v15527_v40  ;;  %v21012_v49 = vld [vmem:[#allocation88_spill] sm:$0xff] }
 0x2b3   :  { %v15564_v41 = vadd.f32 %v15245_v59, %v15494_v29  ;;  %11135 = vmatprep.mubr.msk.bf16.mxu1 %vm12555_vm6, %v20928_v51  ;;  %v4226_v54 = vmul.f32 %v15541_v50, %v15541_v50  ;;  %v4227_v9 = vmul.f32 %v15544_v30, %v15544_v30  ;;  %v4092_v3 = vmul.f32 %v14613_v48, %v4022_v10 }
 0x2b4   :  { %v3953_v43 = vmul.f32 0.5, %v3883_v33  ;;  %v15573_v11 = vmul.f32 0.044715, %v4294_v18  ;;  %v3606_v20 = vmul.f32 0.044715, %v3536_v42  ;;  %v15578_v29 = vadd.f32 %v15245_v59, %v3291_v26 }
 0x2b5   :  { %v3467_v12 = vmul.f32 %v15564_v41, %v15564_v41  ;;  %v12107_v25 = vpop.eup %12106  ;;  %v15581_v23 = vadd.f32 %v4092_v3, %v14642_v0  ;;  %v2932_v1 = vsel %vm2842_vm7, %v21012_v49, %v2760_v5  ;;  %v15587_v10 = vadd.f32 %v15245_v59, %v3294_v16 }
 0x2b6   :  { %v4023_v17 = vmul.f32 %v3953_v43, %v15444_v21  ;;  %v15589_v18 = vmul.f32 0.044715, %v4295_v47  ;;  %v3884_v33 = vadd.f32 1.0, %v12107_v25  ;;  %v3676_v42 = vadd.f32 %v3606_v20, %v15527_v40 }
 0x2b7   :  { %v2831_v14 = vpop.permute.xlu1 %2830  ;;  %v3537_v26 = vmul.f32 %v3467_v12, %v15564_v41  ;;  %v4296_v22 = vmul.f32 %v4226_v54, %v15541_v50  ;;  %v4297_v3 = vmul.f32 %v4227_v9, %v15544_v30  ;;  %v3468_v16 = vmul.f32 %v15578_v29, %v15578_v29  ;;  %v2762_v12 = vpop.permute.xlu0 %2761 }
 0x2b8   :  { %v4093_v21 = vmul.f32 %v14613_v48, %v4023_v17  ;;  %v3008_v43 = vsel %vm2948_vm8, %v2932_v1, %v2831_v14  ;;  %v3954_v5 = vmul.f32 0.5, %v3884_v33  ;;  %v3746_v49 = vmul.f32 0.7978846, %v3676_v42 }
 0x2b9   :  { %v3607_v59 = vmul.f32 0.044715, %v3537_v26  ;;  %v4228_v47 = vmul.f32 %v15581_v23, %v15581_v23  ;;  %v3469_v54 = vmul.f32 %v15587_v10, %v15587_v10  ;;  %12110 = vtanh.f32 %v15517_v24 }
 0x2ba   :  { %v15602_v20 = vadd.f32 %v4093_v21, %v14642_v0  ;;  %11136 = vmatmul.mubr.msk.bf16.gmra.mrb[44].mxu1 %vm3046_vm9, %v3008_v43  ;;  %v4024_v14 = vmul.f32 %v3954_v5, %v15454_v31  ;;  %12112 = vtanh.f32 %v3746_v49  ;;  %v3538_v25 = vmul.f32 %v3468_v16, %v15578_v29 }
 0x2bb   :  { %v3677_v9 = vadd.f32 %v3607_v59, %v15564_v41  ;;  %11139 = vmatprep.mubr.msk.bf16.mxu1 %vm12555_vm6, %v20928_v51  ;;  %v4366_v17 = vmul.f32 0.044715, %v4296_v22  ;;  %v3539_v42 = vmul.f32 %v3469_v54, %v15587_v10  ;;  %12114 = vtanh.f32 %v15530_v63 }
 0x2bc   :  { %v4229_v1 = vmul.f32 %v15602_v20, %v15602_v20  ;;  %v2833_v33 = vpop.permute.xlu1 %2832  ;;  %v12109_v24 = vpop.eup %12108  ;;  %v4094_v31 = vmul.f32 %v14613_v48, %v4024_v14  ;;  %v2935_v26 = vsel %vm2842_vm7, %v14966_v39, %v2762_v12  ;;  %v3608_v43 = vmul.f32 0.044715, %v3538_v25 }
 0x2bd   :  { %v3747_v21 = vmul.f32 0.7978846, %v3677_v9  ;;  %v4298_v5 = vmul.f32 %v4228_v47, %v15581_v23  ;;  %v3885_v49 = vadd.f32 1.0, %v12109_v24  ;;  %v3010_v59 = vsel %vm2948_vm8, %v2935_v26, %v2833_v33 }
 0x2be   :  { %v4299_v22 = vmul.f32 %v4229_v1, %v15602_v20  ;;  %v15624_v16 = vadd.f32 %v4094_v31, %v14642_v0  ;;  %v3678_v63 = vadd.f32 %v3608_v43, %v15578_v29  ;;  %v3609_v54 = vmul.f32 0.044715, %v3539_v42  ;;  %v2764_v1 = vpop.permute.xlu0 %2763 }
 0x2bf   :  { %12116 = vtanh.f32 %v3747_v21  ;;  %v4367_v14 = vmul.f32 0.044715, %v4297_v3  ;;  %v3955_v53 = vmul.f32 0.5, %v3885_v49  ;;  %v21013_v39 = vshrl.u32 %v15368_v35, 16 }
 0x2c0   :  { %v4500_v47 = vmul.f32 0.7978846, %v15533_v34  ;;  %v4230_v9 = vmul.f32 %v15624_v16, %v15624_v16  ;;  %v3748_v25 = vmul.f32 0.7978846, %v3678_v63  ;;  %v3679_v33 = vadd.f32 %v3609_v54, %v15587_v10 }
 0x2c1   :  { %v15630_v12 = vor.u32 %v21013_v39, %v15377_v57  ;;  %v4501_v24 = vmul.f32 0.7978846, %v15549_v4  ;;  %v4368_v31 = vmul.f32 0.044715, %v4298_v5  ;;  %v4369_v42 = vmul.f32 0.044715, %v4299_v22 }
 0x2c2   :  { %v4025_v3 = vmul.f32 %v3955_v53, %v15489_v27  ;;  %11140 = vmatmul.mubr.msk.bf16.gmra.mrb[48].mxu1 %vm3046_vm9, %v3010_v59  ;;  %12118 = vtanh.f32 %v4500_v47  ;;  %v4433_v35 = vadd.f32 %v15556_v13, %v15498_v61  ;;  %v4300_v57 = vmul.f32 %v4230_v9, %v15624_v16  ;;  %v2766_v49 = vpop.permute.xlu0 %2765 }
 0x2c3   :  { %12120 = vtanh.f32 %v3748_v25  ;;  %v3749_v34 = vmul.f32 0.7978846, %v3679_v33  ;;  %11143 = vmatprep.mubr.msk.bf16.mxu1 %vm12555_vm6, %v20928_v51  ;;  %v12111_v26 = vpop.eup %12110  ;;  %v15646_v4 = vadd.f32 %v15573_v11, %v15507_v62  ;;  %v15650_v53 = vadd.f32 %v15589_v18, %v15520_v32  ;;  %v2835_v21 = vpop.permute.xlu1 %2834 }
 0x2c4   :  { %v4095_v27 = vmul.f32 %v14613_v48, %v4025_v3  ;;  %12122 = vtanh.f32 %v4501_v24  ;;  %v12113_v13 = vpop.eup %12112  ;;  %v15654_v43 = vadd.f32 %v4366_v17, %v15541_v50  ;;  %v15657_v5 = vadd.f32 %v4367_v14, %v15544_v30  ;;  %v21014_v24 = vld [vmem:[#allocation16_spill] sm:$0xff] }
 0x2c5   :  { %12124 = vtanh.f32 %v3749_v34  ;;  %v4638_v22 = vadd.f32 1.0, %v12111_v26  ;;  %v12115_v11 = vpop.eup %12114  ;;  %v15660_v59 = vadd.f32 %v4368_v31, %v15581_v23  ;;  %v15663_v18 = vadd.f32 %v4369_v42, %v15602_v20  ;;  %v21015_v34 = vld [vmem:[#allocation18_spill] sm:$0xff]  ;;  %v21020_v31 = vld [vmem:[#allocation24_spill] sm:$0xff] }
 0x2c6   :  { %v3886_v63 = vadd.f32 1.0, %v12113_v13  ;;  %v2938_v54 = vsel %vm2842_vm7, %v15028_v46, %v2764_v1  ;;  %v4370_v39 = vmul.f32 0.044715, %v4300_v57  ;;  %v4639_v17 = vadd.f32 1.0, %v12115_v11  ;;  %v2768_v13 = vpop.permute.xlu0 %2767 }
 0x2c7   :  { %v4708_v47 = vmul.f32 0.5, %v4638_v22  ;;  %v3012_v14 = vsel %vm2948_vm8, %v2938_v54, %v2835_v21  ;;  %v15669_v9 = vadd.f32 %v4095_v27, %v14642_v0  ;;  %v2941_v33 = vsel %vm2842_vm7, %v15060_v15, %v2766_v49  ;;  %v2837_v27 = vpop.permute.xlu1 %2836  ;;  %v21016_v22 = vld [vmem:[#allocation19_spill] sm:$0xff]  ;;  %v21017_v49 = vld [vmem:[#allocation20_spill] sm:$0xff]  ;;  %v21018_v15 = vld [vmem:[#allocation22_spill] sm:$0xff] }
 0x2c8   :  { %v3956_v25 = vmul.f32 0.5, %v3886_v63  ;;  %v4709_v3 = vmul.f32 0.5, %v4639_v17  ;;  %v4502_v1 = vmul.f32 0.7978846, %v15554_v56  ;;  %v4503_v57 = vmul.f32 0.7978846, %v4433_v35 }
 0x2c9   :  { %v12117_v42 = vpop.eup %12116  ;;  %v15685_v63 = vadd.f32 %v4370_v39, %v15624_v16  ;;  %v4778_v54 = vmul.f32 %v4708_v47, %v15417_v52  ;;  %v4231_v35 = vmul.f32 %v15669_v9, %v15669_v9  ;;  %v3014_v52 = vsel %vm2948_vm8, %v2941_v33, %v2837_v27 }
 0x2ca   :  { %v4026_v26 = vmul.f32 %v3956_v25, %v15527_v40  ;;  %v3887_v21 = vadd.f32 1.0, %v12117_v42  ;;  %11144 = vmatmul.mubr.msk.bf16.gmra.mrb[52].mxu1 %vm3046_vm9, %v3012_v14  ;;  %v4779_v56 = vmul.f32 %v4709_v3, %v15424_v38  ;;  %12126 = vtanh.f32 %v4502_v1 }
 0x2cb   :  { %11147 = vmatprep.mubr.msk.bf16.mxu1 %vm12555_vm6, %v20928_v51  ;;  %12128 = vtanh.f32 %v4503_v57  ;;  %v2944_v38 = vsel %vm2842_vm7, %v15082_v44, %v2768_v13  ;;  %v11974_v57 = vld [vmem:[%s20656_s6] sm:$0xff]   ;;  %v12440_v44 = vld [vmem:[%s20653_s3 + $0x48] sm:$0xff]  }
 0x2cc   :  { %v12119_v40 = vpop.eup %12118  ;;  %v4096_v17 = vmul.f32 %v14613_v48, %v4026_v26  ;;  %v3957_v14 = vmul.f32 0.5, %v3887_v21  ;;  %v15694_v42 = vpack.c.bf16 %v4779_v56, %v4778_v54  ;;  %v21019_v54 = vld [vmem:[#allocation14_spill] sm:$0xff]  ;;  %v4301_v56 = vmul.f32 %v4231_v35, %v15669_v9  ;;  %6534 = vmatpush1.bf16.msra.mxu1 %v11974_v57 }
 0x2cd   :  { %v12121_v25 = vpop.eup %12120  ;;  %v4640_v39 = vadd.f32 1.0, %v12119_v40  ;;  %6535 = vmatprep.subr.bf16.mxu1 %v20992_v55 }
 0x2ce   :  { %v12123_v47 = vpop.eup %12122  ;;  %v15700_v3 = vadd.f32 %v4096_v17, %v14642_v0  ;;  %v4027_v1 = vmul.f32 %v3957_v14, %v15564_v41  ;;  %v3888_v11 = vadd.f32 1.0, %v12121_v25  ;;  %v4944_v33 = vmul.bf16 %v15694_v42, %v21019_v54 }
 0x2cf   :  { %v12125_v21 = vpop.eup %12124  ;;  %v4874_v27 = vmul.bf16 %v12440_v44, %v15694_v42  ;;  %v4641_v13 = vadd.f32 1.0, %v12123_v47  ;;  %v4710_v41 = vmul.f32 0.5, %v4640_v39 }
 0x2d0   :  { %v4097_v40 = vmul.f32 %v14613_v48, %v4027_v1  ;;  %v3958_v17 = vmul.f32 0.5, %v3888_v11  ;;  %v3889_v14 = vadd.f32 1.0, %v12125_v21  ;;  %v5373_v25 = vrot.slane %v4944_v33, 1  ;;  %v2839_v11 = vpop.permute.xlu1 %2838  ;;  %v2770_v33 = vpop.permute.xlu0 %2769 }
 0x2d1   :  { %v5042_v26 = vshll.u32 %v4874_v27, 16  ;;  %v4711_v46 = vmul.f32 0.5, %v4641_v13  ;;  %v4232_v44 = vmul.f32 %v15700_v3, %v15700_v3  ;;  %v4780_v57 = vmul.f32 %v4710_v41, %v15461_v2 }
 0x2d2   :  { %v15722_v39 = vadd.f32 %v4097_v40, %v14642_v0  ;;  %v15725_v35 = vmul.f32 %v3958_v17, %v15578_v29  ;;  %v3959_v48 = vmul.f32 0.5, %v3889_v14  ;;  %11148 = vmatmul.mubr.msk.bf16.gmra.mrb[56].mxu1 %vm3046_vm9, %v3014_v52  ;;  %v5374_v47 = vsel %vm2127_vm1, %v15410_v37, %v5373_v25  ;;  %v21021_v52 = vld [vmem:[#allocation26_spill] sm:$0xff] }
 0x2d3   :  { %v5044_v1 = vrot.slane %v5042_v26, 1  ;;  %v4781_v21 = vmul.f32 %v4711_v46, %v15468_v7  ;;  %11151 = vmatprep.mubr.msk.bf16.mxu1 %vm12555_vm6, %v20928_v51  ;;  %5444 = vrot.lane.b32.xlu1 %v5374_v47, %s12559_s19  ;;  %v4504_v37 = vmul.f32 0.7978846, %v15646_v4  ;;  %v4371_v2 = vmul.f32 0.044715, %v4301_v56  ;;  %v21023_v56 = vld [vmem:[#allocation15_spill] sm:$0xff] }
 0x2d4   :  { %v4234_v0 = vmul.f32 %v15725_v35, %v15725_v35  ;;  %v15737_v29 = vmul.f32 %v3959_v48, %v15587_v10  ;;  %v12127_v26 = vpop.eup %12126  ;;  %v3016_v13 = vsel %vm2948_vm8, %v2944_v38, %v2839_v11  ;;  %v4302_v10 = vmul.f32 %v4232_v44, %v15700_v3  ;;  %v12441_v38 = vld [vmem:[%s20653_s3 + $0x50] sm:$0xff]  }
 0x2d5   :  { %v5045_v7 = vsel %vm861_vm2, %v15630_v12, %v5044_v1  ;;  %v15745_v46 = vpack.c.bf16 %v4781_v21, %v4780_v57  ;;  %v12129_v41 = vpop.eup %12128  ;;  %v4233_v40 = vmul.f32 %v15722_v39, %v15722_v39  ;;  %v4642_v44 = vadd.f32 1.0, %v12127_v26 }
 0x2d6   :  { %v4304_v17 = vmul.f32 %v4234_v0, %v15725_v35  ;;  %v4235_v4 = vmul.f32 %v15737_v29, %v15737_v29  ;;  %5267 = vrot.lane.b32.xlu0 %v5045_v7, %s12560_s22  ;;  %v4643_v48 = vadd.f32 1.0, %v12129_v41  ;;  %v5046_v57 = vshrl.u32 %v4874_v27, 16 }
 0x2d7   :  { %21022 = vst [vmem:[#allocation82_spill] sm:$0xff] %v15745_v46  ;;  %v4945_v12 = vmul.bf16 %v15745_v46, %v21023_v56  ;;  %v15761_v14 = vmul.bf16 %v12441_v38, %v15745_v46  ;;  %v4505_v21 = vmul.f32 0.7978846, %v15650_v53  ;;  %v4712_v54 = vmul.f32 0.5, %v4642_v44  ;;  %v11975_v38 = vld [vmem:[%s20656_s6 + $0x8] sm:$0xff]  }
 0x2d8   :  { %v4374_v11 = vmul.f32 0.044715, %v4304_v17  ;;  %v4305_v47 = vmul.f32 %v4235_v4, %v15737_v29  ;;  %v4713_v56 = vmul.f32 0.5, %v4643_v48  ;;  %v4303_v26 = vmul.f32 %v4233_v40, %v15722_v39  ;;  %6536 = vmatpush1.bf16.msra.mxu1 %v11975_v38  ;;  %v11976_v40 = vld [vmem:[%s20656_s6 + $0x10] sm:$0xff]   ;;  %v12442_v38 = vld [vmem:[%s20653_s3 + $0x58] sm:$0xff]  }
 0x2d9   :  { %v5375_v0 = vrot.slane %v4945_v12, 1  ;;  %v5050_v7 = vshll.u32 %v15761_v14, 16  ;;  %v5048_v4 = vor.u32 %v5046_v57, %v5044_v1  ;;  %v4782_v12 = vmul.f32 %v4712_v54, %v15478_v45  ;;  %6537 = vmatprep.subr.bf16.mxu1 %v20992_v55  ;;  %v2841_v54 = vpop.permute.xlu1 %2840 }
 0x2da   :  { %v4444_v41 = vadd.f32 %v4374_v11, %v15725_v35  ;;  %v4375_v17 = vmul.f32 0.044715, %v4305_v47  ;;  %11152 = vmatmul.mubr.msk.bf16.gmra.mrb[60].mxu1 %vm3046_vm9, %v3016_v13  ;;  %v4783_v44 = vmul.f32 %v4713_v56, %v15498_v61  ;;  %v21024_v13 = vld [vmem:[#allocation89_spill] sm:$0xff]  ;;  %12130 = vtanh.f32 %v4504_v37 }
 0x2db   :  { %v5376_v53 = vsel %vm2127_vm1, %v5373_v25, %v5375_v0  ;;  %v5052_v27 = vrot.slane %v5050_v7, 1  ;;  %11155 = vmatprep.mubr.msk.bf16.mxu1 %vm12555_vm6, %v20928_v51  ;;  %v2947_v25 = vsel %vm2842_vm7, %v21024_v13, %v2770_v33  ;;  %v4441_v45 = vadd.f32 %v4371_v2, %v15669_v9  ;;  %v10576_v11 = vld [vmem:[%s20651_s1 + $0x2] sm:$0x3] }
 0x2dc   :  { %v4514_v48 = vmul.f32 0.7978846, %v4444_v41  ;;  %v4445_v1 = vadd.f32 %v4375_v17, %v15737_v29  ;;  %5446 = vrot.lane.b32.xlu1 %v5376_v53, %s12559_s19  ;;  %v15787_v56 = vpack.c.bf16 %v4783_v44, %v4782_v12  ;;  %12132 = vtanh.f32 %v4505_v21  ;;  %v21026_v37 = vld [vmem:[#allocation21_spill] sm:$0xff]  ;;  %6538 = vmatpush1.bf16.msra.mxu1 %v11976_v40 }
 0x2dd   :  { %v5053_v61 = vsel %vm861_vm2, %v5048_v4, %v5052_v27  ;;  %v4372_v47 = vmul.f32 0.044715, %v4302_v10  ;;  %v4373_v57 = vmul.f32 0.044715, %v4303_v26  ;;  %v4506_v41 = vmul.f32 0.7978846, %v15654_v43  ;;  %6539 = vmatprep.subr.bf16.mxu1 %v20992_v55 }
 0x2de   :  { %21025 = vst [vmem:[#allocation83_spill] sm:$0xff] %v15787_v56  ;;  %12134 = vtanh.f32 %v4514_v48  ;;  %v4515_v7 = vmul.f32 0.7978846, %v4445_v1  ;;  %5269 = vrot.lane.b32.xlu0 %v5053_v61, %s12560_s22  ;;  %v4946_v2 = vmul.bf16 %v15787_v56, %v21026_v37  ;;  %v4876_v21 = vmul.bf16 %v12442_v38, %v15787_v56  ;;  %v21027_v44 = vld [vmem:[#allocation73_spill] sm:$0xff]  ;;  %v11977_v43 = vld [vmem:[%s20656_s6 + $0x18] sm:$0xff]  }
 0x2df   :  { %v4507_v17 = vmul.f32 0.7978846, %v15657_v5  ;;  %v3018_v10 = vsel %vm2948_vm8, %v2947_v25, %v2841_v54  ;;  %v5054_v26 = vshrl.u32 %v15761_v14, 16  ;;  %v4508_v4 = vmul.f32 0.7978846, %v15660_v59  ;;  %v11978_v54 = vld [vmem:[%s20656_s6 + $0x20] sm:$0xff]  }
 0x2e0   :  { %v5429_v33 = vpop.permute.xlu0 %5428  ;;  %12136 = vtanh.f32 %v4515_v7  ;;  %v15805_v53 = vrot.slane %v4946_v2, 1  ;;  %v5058_v12 = vshll.u32 %v4876_v21, 16  ;;  %v21028_v48 = vsub.s32 0, %v21027_v44  ;;  %6540 = vmatpush1.bf16.msra.mxu1 %v11977_v43  ;;  %v21031_v7 = vld [vmem:[#allocation79_spill] sm:$0xff] }
 0x2e1   :  { %12138 = vtanh.f32 %v4506_v41  ;;  %v4442_v5 = vadd.f32 %v4372_v47, %v15700_v3  ;;  %v4443_v40 = vadd.f32 %v4373_v57, %v15722_v39  ;;  %v5056_v59 = vor.u32 %v5054_v26, %v5052_v27  ;;  %v21030_v57 = vld [vmem:[#allocation28_spill] sm:$0xff]  ;;  %6541 = vmatprep.subr.bf16.mxu1 %v20992_v55 }
 0x2e2   :  { %v403_v1 = vrot.slane %v10576_v11, %v21028_v48  ;;  %11156 = vmatmul.mubr.msk.bf16.gmra.mrb[64].mxu1 %vm3046_vm9, %v3018_v10  ;;  %12140 = vtanh.f32 %v4507_v17  ;;  %v15817_v13 = vsel %vm2127_vm1, %v5375_v0, %v15805_v53  ;;  %v5060_v25 = vrot.slane %v5058_v12, 1 }
 0x2e3   :  { %v4509_v61 = vmul.f32 0.7978846, %v15663_v18  ;;  %12142 = vtanh.f32 %v4508_v4  ;;  %v21029_v47 = vmul.bf16 %v15154_v19, %v21014_v24  ;;  %v21032_v0 = vsub.s32 1, %v21027_v44 }
 0x2e4   :  { %v5252_v14 = vpop.permute.xlu0 %5251  ;;  %v4510_v18 = vmul.f32 0.7978846, %v15685_v63  ;;  %v15837_v17 = vsel %vm861_vm2, %v5056_v59, %v5060_v25  ;;  %v15839_v10 = vadd.f32 1.0, %v403_v1  ;;  %v4511_v19 = vmul.f32 0.7978846, %v4441_v45  ;;  %v12131_v26 = vpop.eup %12130  ;;  %6542 = vmatpush1.bf16.msra.mxu1 %v11978_v54  ;;  %v11979_v63 = vld [vmem:[%s20656_s6 + $0x28] sm:$0xff]  }
 0x2e5   :  { %v5503_v27 = vsel %vm5498_vm10, %v21029_v47, %v5252_v14  ;;  %v15831_v38 = vrot.slane %v10576_v11, %v21032_v0  ;;  %v5062_v12 = vshrl.u32 %v4876_v21, 16  ;;  %v4512_v48 = vmul.f32 0.7978846, %v4442_v5  ;;  %v21034_v59 = vld [vmem:[#allocation70_spill] sm:$0xff]  ;;  %6543 = vmatprep.subr.bf16.mxu1 %v20992_v55 }
 0x2e6   :  { %v5610_v41 = vsel %vm5606_vm11, %v5503_v27, %v5429_v33  ;;  %v4513_v43 = vmul.f32 0.7978846, %v4443_v40  ;;  %v12133_v44 = vpop.eup %12132  ;;  %v4644_v14 = vadd.f32 1.0, %v12131_v26  ;;  %12144 = vtanh.f32 %v4509_v61  ;;  %v21033_v33 = vld [vmem:[#allocation29_spill] sm:$0xff] }
 0x2e7   :  { %v5682_v4 = vshrl.u32 %v5610_v41, 16  ;;  %v4645_v5 = vadd.f32 1.0, %v12133_v44  ;;  %v15850_v40 = vor.u32 %v5062_v12, %v5060_v25  ;;  %12146 = vtanh.f32 %v4510_v18  ;;  %v21038_v18 = vld [vmem:[#allocation17_spill] sm:$0xff] }
 0x2e8   :  { %v5250_v11 = vpop.permute.xlu0 %5249  ;;  %v12135_v27 = vpop.eup %12134  ;;  %v5685_v61 = vshll.u32 %v5610_v41, 16  ;;  %v4714_v54 = vmul.f32 0.5, %v4644_v14  ;;  %12148 = vtanh.f32 %v4511_v19  ;;  %6544 = vmatpush1.bf16.msra.mxu1 %v11979_v63  ;;  %v11980_v19 = vld [vmem:[%s20656_s6 + $0x30] sm:$0xff]   ;;  %v21040_v63 = vmul.bf16 %v15239_v28, %v21016_v22 }
 0x2e9   :  { %v5431_v0 = vpop.permute.xlu1 %5430  ;;  %v15848_v21 = vrot.slane %v5682_v4, 7  ;;  %v4654_v26 = vadd.f32 1.0, %v12135_v27  ;;  %v4715_v37 = vmul.f32 0.5, %v4645_v5  ;;  %12150 = vtanh.f32 %v4512_v48  ;;  %6545 = vmatprep.subr.bf16.mxu1 %v20992_v55 }
 0x2ea   :  { %v12137_v2 = vpop.eup %12136  ;;  %v5500_v12 = vsel %vm5498_vm10, %v21038_v18, %v5250_v11  ;;  %12152 = vtanh.f32 %v4513_v43  ;;  %v4784_v27 = vmul.f32 %v4714_v54, %v15507_v62  ;;  %v3299_v18 = vpop.f32.mrb[0].mxu1 }
 0x2eb   :  { %v12139_v1 = vpop.eup %12138  ;;  %v15858_v25 = vor.u32 %v5685_v61, %v15848_v21  ;;  %v4655_v41 = vadd.f32 1.0, %v12137_v2  ;;  %v4785_v5 = vmul.f32 %v4715_v37, %v15520_v32  ;;  %v15867_v61 = vmul.f32 0.5, %v4654_v26  ;;  %v11093_v26 = vpop.f32.mrb[1].mxu1 }
 0x2ec   :  { %v12141_v48 = vpop.eup %12140  ;;  %v5256_v14 = vpop.permute.xlu0 %5255  ;;  %v4646_v4 = vadd.f32 1.0, %v12139_v1  ;;  %v21039_v2 = vmul.bf16 %v15192_v58, %v21015_v34  ;;  %v15886_v1 = vld [vmem:[%s20655_s5] ss:$0 sm:$0xff]  ;;  %6546 = vmatpush1.bf16.msra.mxu1 %v11980_v19  ;;  %v21042_v26 = vmul.bf16 %v15187_v6, %v21017_v49 }
 0x2ed   :  { %v5254_v44 = vpop.permute.xlu1 %5253  ;;  %v12143_v11 = vpop.eup %12142  ;;  %v5509_v45 = vsel %vm5498_vm10, %v21040_v63, %v5256_v14  ;;  %v4647_v62 = vadd.f32 1.0, %v12141_v48  ;;  %v15878_v54 = vmul.f32 0.5, %v4655_v41  ;;  %v15881_v37 = vpack.c.bf16 %v4785_v5, %v4784_v27  ;;  %v21041_v27 = vld [vmem:[#allocation23_spill] sm:$0xff]  ;;  %6547 = vmatprep.subr.bf16.mxu1 %v20992_v55 }
 0x2ee   :  { %v5506_v43 = vsel %vm5498_vm10, %v21039_v2, %v5254_v44  ;;  %v15889_v58 = vadd.f32 %v15886_v1, %v3299_v18  ;;  %v4716_v28 = vmul.f32 0.5, %v4646_v4  ;;  %v3302_v2 = vpop.f32.mrb[2].mxu1  ;;  %v4648_v41 = vadd.f32 1.0, %v12143_v11 }
 0x2ef   :  { %v5612_v32 = vsel %vm5606_vm11, %v5506_v43, %v5431_v0  ;;  %v4717_v48 = vmul.f32 0.5, %v4647_v62  ;;  %v4947_v5 = vmul.bf16 %v15881_v37, %v21041_v27  ;;  %v12444_v43 = vld [vmem:[%s20653_s3 + $0x60] sm:$0xff]   ;;  %v11094_v22 = vpop.f32.mrb[3].mxu1 }
 0x2f0   :  { %v5689_v44 = vshrl.u32 %v5612_v32, 16  ;;  %v5692_v14 = vshll.u32 %v5612_v32, 16  ;;  %v5258_v0 = vpop.permute.xlu0 %5257  ;;  %v4877_v18 = vmul.bf16 %v12444_v43, %v15881_v37  ;;  %v3470_v4 = vmul.f32 %v15889_v58, %v15889_v58  ;;  %v12145_v19 = vpop.eup %12144 }
 0x2f1   :  { %v5427_v63 = vpop.permute.xlu1 %5426  ;;  %v15900_v32 = vadd.f32 %v15886_v1, %v3302_v2  ;;  %v5512_v27 = vsel %vm5498_vm10, %v21042_v26, %v5258_v0  ;;  %v4786_v43 = vmul.f32 %v4716_v28, %v15541_v50  ;;  %v12147_v34 = vpop.eup %12146  ;;  %v15911_v56 = vrot.slane %v4947_v5, 1 }
 0x2f2   :  { %v15903_v11 = vrot.slane %v5689_v44, 7  ;;  %v5608_v62 = vsel %vm5606_vm11, %v5500_v12, %v5427_v63  ;;  %v5066_v2 = vshll.u32 %v4877_v18, 16  ;;  %v3540_v47 = vmul.f32 %v3470_v4, %v15889_v58  ;;  %v15914_v46 = vpop.eup %12148 }
 0x2f3   :  { %v5679_v24 = vshrl.u32 %v5608_v62, 16  ;;  %v3471_v12 = vmul.f32 %v15900_v32, %v15900_v32  ;;  %v4787_v6 = vmul.f32 %v4717_v48, %v15544_v30  ;;  %v5070_v63 = vshrl.u32 %v4877_v18, 16  ;;  %v15920_v22 = vpop.eup %12150 }
 0x2f4   :  { %v5694_v44 = vor.u32 %v5692_v14, %v15903_v11  ;;  %v5260_v0 = vpop.permute.xlu0 %5259  ;;  %v15925_v5 = vsel %vm2127_vm1, %v15805_v53, %v15911_v56  ;;  %v5068_v4 = vrot.slane %v5066_v2, 1  ;;  %v3610_v62 = vmul.f32 0.044715, %v3540_v47  ;;  %v11981_v14 = vld [vmem:[%s20656_s6 + $0x38] sm:$0xff]   ;;  %v15930_v26 = vpop.eup %12152 }
 0x2f5   :  { %v5681_v50 = vrot.slane %v5679_v24, 7  ;;  %v5433_v28 = vpop.permute.xlu1 %5432  ;;  %v21044_v48 = vmul.bf16 %v15215_v8, %v21018_v15  ;;  %v3541_v18 = vmul.f32 %v3471_v12, %v15900_v32  ;;  %6548 = vmatpush1.bf16.msra.mxu1 %v11981_v14  ;;  %v11982_v8 = vld [vmem:[%s20656_s6 + $0x40] sm:$0xff]   ;;  %v15958_v12 = vpack.c.bf16 %v4787_v6, %v4786_v43 }
 0x2f6   :  { %v5614_v30 = vsel %vm5606_vm11, %v5509_v45, %v5433_v28  ;;  %v15935_v24 = vsel %vm1388_vm0, %v15848_v21, %v5694_v44  ;;  %v15950_v45 = vsel %vm861_vm2, %v15850_v40, %v5068_v4  ;;  %v3680_v21 = vadd.f32 %v3610_v62, %v15889_v58  ;;  %6549 = vmatprep.subr.bf16.mxu1 %v20992_v55 }
 0x2f7   :  { %21043 = vst [vmem:[#allocation86_spill] sm:$0xff] %v15935_v24  ;;  %v5515_v53 = vsel %vm5498_vm10, %v21044_v48, %v5260_v0  ;;  %v5696_v47 = vshrl.u32 %v5614_v30, 16  ;;  %v5699_v2 = vshll.u32 %v5614_v30, 16  ;;  %5997 = vrot.lane.b32.xlu1 %v15935_v24, %s12559_s19  ;;  %v15946_v49 = vsel %vm1388_vm0, %v5681_v50, %v15858_v25 }
 0x2f8   :  { %5927 = vrot.lane.b32.xlu0 %v15946_v49, %s12561_s21  ;;  %v3611_v44 = vmul.f32 0.044715, %v3541_v18  ;;  %v5072_v25 = vor.u32 %v5070_v63, %v5068_v4  ;;  %v5262_v28 = vpop.permute.xlu0 %5261  ;;  %v4649_v0 = vadd.f32 1.0, %v12145_v19  ;;  %v4718_v14 = vmul.f32 0.5, %v4648_v41  ;;  %v3307_v6 = vpop.f32.mrb[4].mxu1  ;;  %v21046_v41 = vld [vmem:[#allocation25_spill] sm:$0xff] }
 0x2f9   :  { %v5698_v50 = vrot.slane %v5696_v47, 7  ;;  %v5435_v40 = vpop.permute.xlu1 %5434  ;;  %v15961_v30 = vadd.f32 1.0, %v12147_v34  ;;  %v21045_v15 = vmul.bf16 %v15268_v36, %v21020_v31  ;;  %v3750_v18 = vmul.f32 0.7978846, %v3680_v21  ;;  %v11097_v19 = vpop.f32.mrb[5].mxu1  ;;  %6550 = vmatpush1.bf16.msra.mxu1 %v11982_v8  ;;  %v11983_v36 = vld [vmem:[%s20656_s6 + $0x48] sm:$0xff]  }
 0x2fa   :  { %v5616_v48 = vsel %vm5606_vm11, %v5512_v27, %v5435_v40  ;;  %v3681_v43 = vadd.f32 %v3611_v44, %v15900_v32  ;;  %v4948_v34 = vmul.bf16 %v15958_v12, %v21046_v41  ;;  %v12445_v27 = vld [vmem:[%s20653_s3 + $0x68] sm:$0xff]   ;;  %v3310_v21 = vpop.f32.mrb[6].mxu1  ;;  %6551 = vmatprep.subr.bf16.mxu1 %v20992_v55 }
 0x2fb   :  { %v5518_v62 = vsel %vm5498_vm10, %v21045_v15, %v5262_v28  ;;  %v5701_v63 = vor.u32 %v5699_v2, %v5698_v50  ;;  %v5703_v4 = vshrl.u32 %v5616_v48, 16  ;;  %v5706_v47 = vshll.u32 %v5616_v48, 16  ;;  %5448 = vrot.lane.b32.xlu1 %v15817_v13, %s12559_s19  ;;  %v11098_v19 = vpop.f32.mrb[7].mxu1 }
 0x2fc   :  { %5271 = vrot.lane.b32.xlu0 %v15837_v17, %s12560_s22  ;;  %12154 = vtanh.f32 %v3750_v18  ;;  %v3751_v15 = vmul.f32 0.7978846, %v3681_v43  ;;  %v4878_v13 = vmul.bf16 %v12445_v27, %v15958_v12  ;;  %v15983_v2 = vadd.f32 %v15886_v1, %v3307_v6  ;;  %v5264_v17 = vpop.permute.xlu0 %5263 }
 0x2fd   :  { %v5705_v8 = vrot.slane %v5703_v4, 7  ;;  %v5437_v44 = vpop.permute.xlu1 %5436  ;;  %v15988_v40 = vsel %vm1388_vm0, %v15903_v11, %v5701_v63  ;;  %v15990_v28 = vrot.slane %v4948_v34, 1  ;;  %v15993_v48 = vadd.f32 %v15886_v1, %v3310_v21  ;;  %6552 = vmatpush1.bf16.msra.mxu1 %v11983_v36 }
 0x2fe   :  { %v5618_v18 = vsel %vm5606_vm11, %v5515_v53, %v5437_v44  ;;  %v21047_v43 = vmul.bf16 %v15296_v60, %v21021_v52  ;;  %12156 = vtanh.f32 %v3751_v15  ;;  %v5074_v4 = vshll.u32 %v4878_v13, 16  ;;  %v11984_v60 = vld [vmem:[%s20656_s6 + $0x50] sm:$0xff]   ;;  %6553 = vmatprep.subr.bf16.mxu1 %v20992_v55 }
 0x2ff   :  { %v5708_v27 = vor.u32 %v5706_v47, %v5705_v8  ;;  %v5710_v41 = vshrl.u32 %v5618_v18, 16  ;;  %v5713_v11 = vshll.u32 %v5618_v18, 16  ;;  %5999 = vrot.lane.b32.xlu1 %v15988_v40, %s12559_s19  ;;  %v16005_v63 = vsel %vm2127_vm1, %v15911_v56, %v15990_v28 }
 0x300   :  { %v5521_v6 = vsel %vm5498_vm10, %v21047_v43, %v5264_v17  ;;  %5929 = vrot.lane.b32.xlu0 %v15935_v24, %s12561_s21  ;;  %v5076_v53 = vrot.slane %v5074_v4, 1  ;;  %v3472_v47 = vmul.f32 %v15983_v2, %v15983_v2  ;;  %v3473_v34 = vmul.f32 %v15993_v48, %v15993_v48 }
 0x301   :  { %v4719_v15 = vmul.f32 0.5, %v4649_v0  ;;  %v16017_v56 = vrot.slane %v5710_v41, 7  ;;  %v5439_v36 = vpop.permute.xlu1 %5438  ;;  %v5266_v21 = vpop.permute.xlu0 %5265  ;;  %v16020_v44 = vsel %vm1388_vm0, %v5698_v50, %v5708_v27  ;;  %v4788_v17 = vmul.f32 %v4718_v14, %v15581_v23  ;;  %6554 = vmatpush1.bf16.msra.mxu1 %v11984_v60 }
 0x302   :  { %v5078_v18 = vshrl.u32 %v4878_v13, 16  ;;  %v5620_v43 = vsel %vm5606_vm11, %v5518_v62, %v5439_v36  ;;  %v21048_v4 = vmul.bf16 %v21031_v7, %v21030_v57  ;;  %v5077_v0 = vsel %vm861_vm2, %v5072_v25, %v5076_v53  ;;  %v11985_v7 = vld [vmem:[%s20656_s6 + $0x58] sm:$0xff]   ;;  %6555 = vmatprep.subr.bf16.mxu1 %v20992_v55 }
 0x303   :  { %v3542_v41 = vmul.f32 %v3472_v47, %v15983_v2  ;;  %v5715_v52 = vor.u32 %v5713_v11, %v16017_v56  ;;  %v5717_v31 = vshrl.u32 %v5620_v43, 16  ;;  %v5720_v24 = vshll.u32 %v5620_v43, 16  ;;  %5450 = vrot.lane.b32.xlu1 %v15925_v5, %s12559_s19 }
 0x304   :  { %v5524_v19 = vsel %vm5498_vm10, %v21048_v4, %v5266_v21  ;;  %v3543_v23 = vmul.f32 %v3473_v34, %v15993_v48  ;;  %5273 = vrot.lane.b32.xlu0 %v15950_v45, %s12560_s22  ;;  %v4789_v50 = vmul.f32 %v4719_v15, %v15602_v20  ;;  %v16040_v14 = vor.u32 %v5078_v18, %v5076_v53  ;;  %v21049_v21 = vld [vmem:[#allocation27_spill] sm:$0xff] }
 0x305   :  { %v3612_v25 = vmul.f32 0.044715, %v3542_v41  ;;  %v4651_v62 = vadd.f32 1.0, %v15914_v46  ;;  %v16044_v5 = vrot.slane %v5717_v31, 7  ;;  %v5441_v13 = vpop.permute.xlu1 %5440  ;;  %v16047_v27 = vsel %vm1388_vm0, %v5705_v8, %v5715_v52  ;;  %6556 = vmatpush1.bf16.msra.mxu1 %v11985_v7  ;;  %v11986_v52 = vld [vmem:[%s20656_s6 + $0x60] sm:$0xff]  }
 0x306   :  { %v3613_v11 = vmul.f32 0.044715, %v3543_v23  ;;  %v4720_v60 = vmul.f32 0.5, %v15961_v30  ;;  %v12155_v47 = vpop.eup %12154  ;;  %v5622_v45 = vsel %vm5606_vm11, %v5521_v6, %v5441_v13  ;;  %v16052_v53 = vpack.c.bf16 %v4789_v50, %v4788_v17  ;;  %v12446_v17 = vld [vmem:[%s20653_s3 + $0x70] sm:$0xff]   ;;  %v3315_v43 = vpop.f32.mrb[8].mxu1  ;;  %6557 = vmatprep.subr.bf16.mxu1 %v20992_v55 }
 0x307   :  { %v3682_v20 = vadd.f32 %v3612_v25, %v15983_v2  ;;  %v4721_v34 = vmul.f32 0.5, %v4651_v62  ;;  %v5722_v46 = vor.u32 %v5720_v24, %v16044_v5  ;;  %v5724_v15 = vshrl.u32 %v5622_v45, 16  ;;  %6001 = vrot.lane.b32.xlu1 %v16020_v44, %s12559_s19  ;;  %v11101_v50 = vpop.f32.mrb[9].mxu1 }
 0x308   :  { %v5727_v31 = vshll.u32 %v5622_v45, 16  ;;  %v3890_v36 = vadd.f32 1.0, %v12155_v47  ;;  %v12157_v30 = vpop.eup %12156  ;;  %5931 = vrot.lane.b32.xlu0 %v15988_v40, %s12561_s21  ;;  %v3683_v6 = vadd.f32 %v3613_v11, %v15993_v48  ;;  %v4949_v24 = vmul.bf16 %v16052_v53, %v21049_v21  ;;  %v3318_v47 = vpop.f32.mrb[10].mxu1  ;;  %v11988_v50 = vld [vmem:[%s20656_s6 + $0x70] sm:$0xff]  }
 0x309   :  { %v3752_v8 = vmul.f32 0.7978846, %v3682_v20  ;;  %v4879_v18 = vmul.bf16 %v12446_v17, %v16052_v53  ;;  %v16070_v4 = vrot.slane %v5724_v15, 7  ;;  %v3891_v23 = vadd.f32 1.0, %v12157_v30  ;;  %v5443_v7 = vpop.permute.xlu1 %5442  ;;  %6558 = vmatpush1.bf16.msra.mxu1 %v11986_v52 }
 0x30a   :  { %v3960_v41 = vmul.f32 0.5, %v3890_v36  ;;  %v16073_v25 = vadd.f32 %v15886_v1, %v3315_v43  ;;  %v5624_v62 = vsel %vm5606_vm11, %v5524_v19, %v5443_v7  ;;  %v3753_v13 = vmul.f32 0.7978846, %v3683_v6  ;;  %v11102_v36 = vpop.f32.mrb[11].mxu1  ;;  %6559 = vmatprep.subr.bf16.mxu1 %v20992_v55 }
 0x30b   :  { %12158 = vtanh.f32 %v3752_v8  ;;  %v16076_v11 = vrot.slane %v4949_v24, 1  ;;  %v5729_v45 = vor.u32 %v5727_v31, %v16070_v4  ;;  %v3961_v15 = vmul.f32 0.5, %v3891_v23  ;;  %5452 = vrot.lane.b32.xlu1 %v16005_v63, %s12559_s19 }
 0x30c   :  { %v4030_v20 = vmul.f32 %v3960_v41, %v15889_v58  ;;  %v5731_v17 = vshrl.u32 %v5624_v62, 16  ;;  %v5734_v30 = vshll.u32 %v5624_v62, 16  ;;  %5275 = vrot.lane.b32.xlu0 %v5077_v0, %s12560_s22  ;;  %12160 = vtanh.f32 %v3753_v13  ;;  %v11987_v58 = vld [vmem:[%s20656_s6 + $0x68] sm:$0xff]  }
 0x30d   :  { %v5384_v19 = vsel %vm2127_vm1, %v15990_v28, %v16076_v11  ;;  %v5082_v8 = vshll.u32 %v4879_v18, 16  ;;  %v4031_v63 = vmul.f32 %v3961_v15, %v15900_v32  ;;  %v3474_v0 = vmul.f32 %v16073_v25, %v16073_v25  ;;  %6560 = vmatpush1.bf16.msra.mxu1 %v11987_v58 }
 0x30e   :  { %v4098_v31 = vmul.f32 %v15839_v10, %v4030_v20  ;;  %v16092_v52 = vrot.slane %v5731_v17, 7  ;;  %v16098_v28 = vsel %vm1388_vm0, %v16017_v56, %v5722_v46  ;;  %v16101_v24 = vadd.f32 %v15886_v1, %v3318_v47  ;;  %6561 = vmatprep.subr.bf16.mxu1 %v20992_v55 }
 0x30f   :  { %v5084_v6 = vrot.slane %v5082_v8, 1  ;;  %21050 = vst [vmem:[#allocation87_spill] sm:$0xff] %v16098_v28  ;;  %v4790_v43 = vmul.f32 %v4720_v60, %v15624_v16  ;;  %v4099_v32 = vmul.f32 %v15839_v10, %v4031_v63  ;;  %6003 = vrot.lane.b32.xlu1 %v16047_v27, %s12559_s19  ;;  %v3544_v7 = vmul.f32 %v3474_v0, %v16073_v25  ;;  %v12447_v63 = vld [vmem:[%s20653_s3 + $0x78] sm:$0xff]  }
 0x310   :  { %v16105_v41 = vadd.f32 %v4098_v31, %v15831_v38  ;;  %v16109_v23 = vor.u32 %v5734_v30, %v16092_v52  ;;  %5933 = vrot.lane.b32.xlu0 %v16020_v44, %s12561_s21  ;;  %v3475_v16 = vmul.f32 %v16101_v24, %v16101_v24  ;;  %v4791_v60 = vmul.f32 %v4721_v34, %v15669_v9  ;;  %v21052_v31 = vld [vmem:[#allocation31_spill] sm:$0xff] }
 0x311   :  { %v5085_v56 = vsel %vm861_vm2, %v16040_v14, %v5084_v6  ;;  %v5086_v46 = vshrl.u32 %v4879_v18, 16  ;;  %v16127_v13 = vadd.f32 %v4099_v32, %v15831_v38  ;;  %v3614_v47 = vmul.f32 0.044715, %v3544_v7  ;;  %v3323_v20 = vpop.f32.mrb[12].mxu1  ;;  %6562 = vmatpush1.bf16.msra.mxu1 %v11988_v50 }
 0x312   :  { %v4236_v62 = vmul.f32 %v16105_v41, %v16105_v41  ;;  %v16131_v14 = vsel %vm1388_vm0, %v16044_v5, %v5729_v45  ;;  %v3545_v9 = vmul.f32 %v3475_v16, %v16101_v24  ;;  %v16135_v34 = vpack.c.bf16 %v4791_v60, %v4790_v43  ;;  %v11105_v30 = vpop.f32.mrb[13].mxu1  ;;  %v11989_v43 = vld [vmem:[%s20656_s6 + $0x78] sm:$0xff]   ;;  %6563 = vmatprep.subr.bf16.mxu1 %v20992_v55 }
 0x313   :  { %21051 = vst [vmem:[#allocation84_spill] sm:$0xff] %v16131_v14  ;;  %v5088_v18 = vor.u32 %v5086_v46, %v5084_v6  ;;  %v4652_v15 = vadd.f32 1.0, %v15920_v22  ;;  %v4237_v36 = vmul.f32 %v16127_v13, %v16127_v13  ;;  %5454 = vrot.lane.b32.xlu1 %v5384_v19, %s12559_s19  ;;  %v3684_v5 = vadd.f32 %v3614_v47, %v16073_v25  ;;  %v3326_v19 = vpop.f32.mrb[14].mxu1 }
 0x314   :  { %v4306_v17 = vmul.f32 %v4236_v62, %v16105_v41  ;;  %v16144_v45 = vadd.f32 %v15886_v1, %v3323_v20  ;;  %5277 = vrot.lane.b32.xlu0 %v5085_v56, %s12560_s22  ;;  %v3615_v58 = vmul.f32 0.044715, %v3545_v9  ;;  %v4950_v22 = vmul.bf16 %v16135_v34, %v21052_v31  ;;  %v11106_v60 = vpop.f32.mrb[15].mxu1 }
 0x315   :  { %v12159_v8 = vpop.eup %12158  ;;  %v4880_v0 = vmul.bf16 %v12447_v63, %v16135_v34  ;;  %v4653_v6 = vadd.f32 1.0, %v15930_v26  ;;  %v4307_v7 = vmul.f32 %v4237_v36, %v16127_v13  ;;  %v3754_v16 = vmul.f32 0.7978846, %v3684_v5  ;;  %6564 = vmatpush1.bf16.msra.mxu1 %v11989_v43 }
 0x316   :  { %v4376_v32 = vmul.f32 0.044715, %v4306_v17  ;;  %v3892_v56 = vadd.f32 1.0, %v12159_v8  ;;  %v12161_v46 = vpop.eup %12160  ;;  %v3685_v62 = vadd.f32 %v3615_v58, %v16101_v24  ;;  %v16160_v47 = vrot.slane %v4950_v22, 1  ;;  %11159 = vmatprep.subr.bf16.mxu1 %v20928_v51 }
 0x317   :  { %v5090_v9 = vshll.u32 %v4880_v0, 16  ;;  %v3476_v26 = vmul.f32 %v16144_v45, %v16144_v45  ;;  %v4377_v20 = vmul.f32 0.044715, %v4307_v7  ;;  %v3893_v30 = vadd.f32 1.0, %v12161_v46  ;;  %6005 = vrot.lane.b32.xlu1 %v16098_v28, %s12559_s19 }
 0x318   :  { %v4446_v50 = vadd.f32 %v4376_v32, %v16105_v41  ;;  %v3962_v17 = vmul.f32 0.5, %v3892_v56  ;;  %12162 = vtanh.f32 %v3754_v16  ;;  %5935 = vrot.lane.b32.xlu0 %v16047_v27, %s12561_s21  ;;  %v3755_v36 = vmul.f32 0.7978846, %v3685_v62 }
 0x319   :  { %v5386_v5 = vsel %vm2127_vm1, %v16076_v11, %v16160_v47  ;;  %v5092_v8 = vrot.slane %v5090_v9, 1  ;;  %v4447_v22 = vadd.f32 %v4377_v20, %v16127_v13  ;;  %v3963_v32 = vmul.f32 0.5, %v3893_v30  ;;  %v3331_v60 = vpop.f32.mrb[16].mxu1 }
 0x31a   :  { %v4516_v58 = vmul.f32 0.7978846, %v4446_v50  ;;  %v4032_v63 = vmul.f32 %v3962_v17, %v15983_v2  ;;  %12164 = vtanh.f32 %v3755_v36  ;;  %v3546_v56 = vmul.f32 %v3476_v26, %v16144_v45  ;;  %v11109_v2 = vpop.f32.mrb[17].mxu1 }
 0x31b   :  { %v5093_v7 = vsel %vm861_vm2, %v5088_v18, %v5092_v8  ;;  %v16178_v16 = vadd.f32 %v15886_v1, %v3326_v19  ;;  %v4517_v11 = vmul.f32 0.7978846, %v4447_v22  ;;  %v4033_v46 = vmul.f32 %v3963_v32, %v15993_v48  ;;  %5456 = vrot.lane.b32.xlu1 %v5386_v5, %s12559_s19  ;;  %v3334_v19 = vpop.f32.mrb[18].mxu1 }
 0x31c   :  { %12166 = vtanh.f32 %v4516_v58  ;;  %v4100_v43 = vmul.f32 %v15839_v10, %v4032_v63  ;;  %5279 = vrot.lane.b32.xlu0 %v5093_v7, %s12560_s22  ;;  %v3616_v62 = vmul.f32 0.044715, %v3546_v56  ;;  %v4722_v9 = vmul.f32 0.5, %v4652_v15  ;;  %v11110_v48 = vpop.f32.mrb[19].mxu1 }
 0x31d   :  { %v3477_v18 = vmul.f32 %v16178_v16, %v16178_v16  ;;  %v4723_v26 = vmul.f32 0.5, %v4653_v6  ;;  %12168 = vtanh.f32 %v4517_v11  ;;  %v4101_v20 = vmul.f32 %v15839_v10, %v4033_v46  ;;  %v21055_v46 = vld [vmem:[#allocation32_spill] sm:$0xff] }
 0x31e   :  { %v16187_v50 = vadd.f32 %v4100_v43, %v15831_v38  ;;  %v5094_v17 = vshrl.u32 %v4880_v0, 16  ;;  %v3686_v30 = vadd.f32 %v3616_v62, %v16144_v45  ;;  %v4792_v5 = vmul.f32 %v4722_v9, %v15700_v3 }
 0x31f   :  { %v3547_v36 = vmul.f32 %v3477_v18, %v16178_v16  ;;  %v4793_v58 = vmul.f32 %v4723_v26, %v15722_v39  ;;  %v16197_v6 = vadd.f32 %v4101_v20, %v15831_v38  ;;  %6007 = vrot.lane.b32.xlu1 %v16131_v14, %s12559_s19  ;;  %v16202_v0 = vadd.f32 %v15886_v1, %v3331_v60 }
 0x320   :  { %v4238_v15 = vmul.f32 %v16187_v50, %v16187_v50  ;;  %v5096_v22 = vor.u32 %v5094_v17, %v5092_v8  ;;  %v3756_v63 = vmul.f32 0.7978846, %v3686_v30  ;;  %5937 = vrot.lane.b32.xlu0 %v16098_v28, %s12561_s21  ;;  %v16211_v39 = vsel %vm1388_vm0, %v16070_v4, %v16109_v23  ;;  %v12448_v4 = vld [vmem:[%s20653_s3 + $0x80] sm:$0xff]  }
 0x321   :  { %v3617_v3 = vmul.f32 0.044715, %v3547_v36  ;;  %v16206_v32 = vpack.c.bf16 %v4793_v58, %v4792_v5  ;;  %21054 = vst [vmem:[#allocation71_spill] sm:$0xff] %v16211_v39  ;;  %v4239_v8 = vmul.f32 %v16197_v6, %v16197_v6  ;;  %v3478_v56 = vmul.f32 %v16202_v0, %v16202_v0  ;;  %v3339_v62 = vpop.f32.mrb[20].mxu1 }
 0x322   :  { %v4308_v7 = vmul.f32 %v4238_v15, %v16187_v50  ;;  %v16219_v60 = vadd.f32 %v15886_v1, %v3334_v19  ;;  %v12163_v11 = vpop.eup %12162  ;;  %12170 = vtanh.f32 %v3756_v63  ;;  %v11113_v20 = vpop.f32.mrb[21].mxu1 }
 0x323   :  { %21053 = vst [vmem:[#allocation85_spill] sm:$0xff] %v16206_v32  ;;  %v3687_v43 = vadd.f32 %v3617_v3, %v16178_v16  ;;  %v4951_v2 = vmul.bf16 %v16206_v32, %v21055_v46  ;;  %v4881_v23 = vmul.bf16 %v12448_v4, %v16206_v32  ;;  %v4309_v9 = vmul.f32 %v4239_v8, %v16197_v6  ;;  %v3342_v58 = vpop.f32.mrb[22].mxu1 }
 0x324   :  { %v4378_v18 = vmul.f32 0.044715, %v4308_v7  ;;  %v3894_v26 = vadd.f32 1.0, %v12163_v11  ;;  %v3548_v19 = vmul.f32 %v3478_v56, %v16202_v0  ;;  %v12165_v17 = vpop.eup %12164  ;;  %v3479_v5 = vmul.f32 %v16219_v60, %v16219_v60  ;;  %v11114_v11 = vpop.f32.mrb[23].mxu1 }
 0x325   :  { %v3757_v48 = vmul.f32 0.7978846, %v3687_v43  ;;  %v16230_v30 = vrot.slane %v4951_v2, 1  ;;  %v5098_v36 = vshll.u32 %v4881_v23, 16  ;;  %v4379_v3 = vmul.f32 0.044715, %v4309_v9 }
 0x326   :  { %v16234_v15 = vpop.eup %12166  ;;  %v4448_v63 = vadd.f32 %v4378_v18, %v16187_v50  ;;  %v3964_v7 = vmul.f32 0.5, %v3894_v26  ;;  %v3895_v8 = vadd.f32 1.0, %v12165_v17  ;;  %v3618_v2 = vmul.f32 0.044715, %v3548_v19 }
 0x327   :  { %12172 = vtanh.f32 %v3757_v48  ;;  %v5388_v56 = vsel %vm2127_vm1, %v16160_v47, %v16230_v30  ;;  %v5100_v43 = vrot.slane %v5098_v36, 1  ;;  %v16240_v4 = vpop.eup %12168  ;;  %v4449_v46 = vadd.f32 %v4379_v3, %v16197_v6 }
 0x328   :  { %v4518_v20 = vmul.f32 0.7978846, %v4448_v63  ;;  %v4034_v31 = vmul.f32 %v3964_v7, %v16073_v25  ;;  %v3965_v21 = vmul.f32 0.5, %v3895_v8  ;;  %5458 = vrot.lane.b32.xlu1 %v5388_v56, %s12559_s19  ;;  %v3688_v9 = vadd.f32 %v3618_v2, %v16202_v0  ;;  %v21057_v2 = vld [vmem:[#allocation33_spill] sm:$0xff] }
 0x329   :  { %v5101_v18 = vsel %vm861_vm2, %v5096_v22, %v5100_v43  ;;  %v3549_v26 = vmul.f32 %v3479_v5, %v16219_v60  ;;  %v4794_v47 = vmul.f32 %v15867_v61, %v15725_v35  ;;  %v4519_v19 = vmul.f32 0.7978846, %v4449_v46  ;;  %v3347_v3 = vpop.f32.mrb[24].mxu1 }
 0x32a   :  { %12174 = vtanh.f32 %v4518_v20  ;;  %v4102_v17 = vmul.f32 %v15839_v10, %v4034_v31  ;;  %v4035_v48 = vmul.f32 %v3965_v21, %v16101_v24  ;;  %5281 = vrot.lane.b32.xlu0 %v5101_v18, %s12560_s22  ;;  %v3758_v25 = vmul.f32 0.7978846, %v3688_v9  ;;  %v11117_v21 = vpop.f32.mrb[25].mxu1 }
 0x32b   :  { %v3619_v36 = vmul.f32 0.044715, %v3549_v26  ;;  %v4795_v22 = vmul.f32 %v15878_v54, %v15737_v29  ;;  %v5102_v63 = vshrl.u32 %v4881_v23, 16  ;;  %12176 = vtanh.f32 %v4519_v19  ;;  %v3350_v46 = vpop.f32.mrb[26].mxu1 }
 0x32c   :  { %v16256_v5 = vadd.f32 %v4102_v17, %v15831_v38  ;;  %v4103_v35 = vmul.f32 %v15839_v10, %v4035_v48  ;;  %6009 = vrot.lane.b32.xlu1 %v16211_v39, %s12559_s19  ;;  %v16262_v61 = vadd.f32 %v15886_v1, %v3339_v62  ;;  %v12171_v24 = vpop.eup %12170  ;;  %12178 = vtanh.f32 %v3758_v25  ;;  %v11118_v11 = vpop.f32.mrb[27].mxu1 }
 0x32d   :  { %v3689_v31 = vadd.f32 %v3619_v36, %v16219_v60  ;;  %v16265_v29 = vpack.c.bf16 %v4795_v22, %v4794_v47  ;;  %v5104_v54 = vor.u32 %v5102_v63, %v5100_v43  ;;  %v3896_v8 = vadd.f32 1.0, %v12171_v24  ;;  %v12449_v43 = vld [vmem:[%s20653_s3 + $0x88] sm:$0xff]  }
 0x32e   :  { %v4240_v23 = vmul.f32 %v16256_v5, %v16256_v5  ;;  %v16270_v7 = vadd.f32 %v4103_v35, %v15831_v38  ;;  %5939 = vrot.lane.b32.xlu0 %v16131_v14, %s12561_s21  ;;  %v3480_v62 = vmul.f32 %v16262_v61, %v16262_v61  ;;  %v16285_v9 = vadd.f32 %v15886_v1, %v3342_v58 }
 0x32f   :  { %21056 = vst [vmem:[#allocation72_spill] sm:$0xff] %v16265_v29  ;;  %v3759_v56 = vmul.f32 0.7978846, %v3689_v31  ;;  %v4952_v20 = vmul.bf16 %v16265_v29, %v21057_v2  ;;  %v16282_v18 = vmul.bf16 %v12449_v43, %v16265_v29  ;;  %v3966_v19 = vmul.f32 0.5, %v3896_v8 }
 0x330   :  { %v4310_v26 = vmul.f32 %v4240_v23, %v16256_v5  ;;  %v4241_v47 = vmul.f32 %v16270_v7, %v16270_v7  ;;  %v3550_v17 = vmul.f32 %v3480_v62, %v16262_v61  ;;  %v3481_v22 = vmul.f32 %v16285_v9, %v16285_v9 }
 0x331   :  { %v12173_v48 = vpop.eup %12172  ;;  %12180 = vtanh.f32 %v3759_v56  ;;  %v16291_v25 = vrot.slane %v4952_v20, 1  ;;  %v5106_v36 = vshll.u32 %v16282_v18, 16  ;;  %v4036_v35 = vmul.f32 %v3966_v19, %v16144_v45  ;;  %v3355_v62 = vpop.f32.mrb[28].mxu1 }
 0x332   :  { %v4380_v63 = vmul.f32 0.044715, %v4310_v26  ;;  %v4311_v58 = vmul.f32 %v4241_v47, %v16270_v7  ;;  %v3897_v21 = vadd.f32 1.0, %v12173_v48  ;;  %v3620_v23 = vmul.f32 0.044715, %v3550_v17  ;;  %v11121_v45 = vpop.f32.mrb[29].mxu1 }
 0x333   :  { %v5390_v24 = vsel %vm2127_vm1, %v16230_v30, %v16291_v25  ;;  %v16301_v31 = vrot.slane %v5106_v36, 1  ;;  %v3551_v8 = vmul.f32 %v3481_v22, %v16285_v9  ;;  %v4104_v43 = vmul.f32 %v15839_v10, %v4036_v35  ;;  %v3358_v48 = vpop.f32.mrb[30].mxu1 }
 0x334   :  { %v16304_v11 = vpop.eup %12174  ;;  %v4450_v56 = vadd.f32 %v4380_v63, %v16256_v5  ;;  %v4381_v20 = vmul.f32 0.044715, %v4311_v58  ;;  %v3967_v26 = vmul.f32 0.5, %v3897_v21  ;;  %5460 = vrot.lane.b32.xlu1 %v5390_v24, %s12559_s19  ;;  %v3690_v47 = vadd.f32 %v3620_v23, %v16262_v61 }
 0x335   :  { %v5109_v30 = vsel %vm861_vm2, %v5104_v54, %v16301_v31  ;;  %v3621_v19 = vmul.f32 0.044715, %v3551_v8  ;;  %v16313_v17 = vadd.f32 %v15886_v1, %v3347_v3  ;;  %v16315_v36 = vpop.eup %12176  ;;  %v16319_v58 = vadd.f32 %v4104_v43, %v15831_v38  ;;  %v11122_v54 = vpop.f32.mrb[31].mxu1 }
 0x336   :  { %v4520_v22 = vmul.f32 0.7978846, %v4450_v56  ;;  %v4451_v63 = vadd.f32 %v4381_v20, %v16270_v7  ;;  %v4037_v35 = vmul.f32 %v3967_v26, %v16178_v16  ;;  %5283 = vrot.lane.b32.xlu0 %v5109_v30, %s12560_s22  ;;  %v12179_v21 = vpop.eup %12178  ;;  %v3760_v24 = vmul.f32 0.7978846, %v3690_v47 }
 0x337   :  { %v3691_v23 = vadd.f32 %v3621_v19, %v16285_v9  ;;  %v3482_v3 = vmul.f32 %v16313_v17, %v16313_v17  ;;  %v16327_v8 = vadd.f32 %v15886_v1, %v3350_v46  ;;  %v4242_v20 = vmul.f32 %v16319_v58, %v16319_v58 }
 0x338   :  { %12182 = vtanh.f32 %v4520_v22  ;;  %v4521_v56 = vmul.f32 0.7978846, %v4451_v63  ;;  %v4105_v16 = vmul.f32 %v15839_v10, %v4037_v35  ;;  %v3898_v43 = vadd.f32 1.0, %v12179_v21 }
 0x339   :  { %12184 = vtanh.f32 %v3760_v24  ;;  %v3761_v26 = vmul.f32 0.7978846, %v3691_v23  ;;  %v3552_v45 = vmul.f32 %v3482_v3, %v16313_v17  ;;  %v4312_v30 = vmul.f32 %v4242_v20, %v16319_v58  ;;  %v3363_v54 = vpop.f32.mrb[32].mxu1 }
 0x33a   :  { %12186 = vtanh.f32 %v4521_v56  ;;  %v16335_v47 = vadd.f32 %v4105_v16, %v15831_v38  ;;  %5941 = vrot.lane.b32.xlu0 %v16211_v39, %s12561_s21  ;;  %v3483_v46 = vmul.f32 %v16327_v8, %v16327_v8  ;;  %v3968_v22 = vmul.f32 0.5, %v3898_v43  ;;  %v11125_v56 = vpop.f32.mrb[33].mxu1 }
 0x33b   :  { %v12181_v19 = vpop.eup %12180  ;;  %12188 = vtanh.f32 %v3761_v26  ;;  %v3622_v63 = vmul.f32 0.044715, %v3552_v45  ;;  %v16342_v35 = vadd.f32 %v15886_v1, %v3355_v62  ;;  %v4382_v21 = vmul.f32 0.044715, %v4312_v30  ;;  %v3366_v62 = vpop.f32.mrb[34].mxu1 }
 0x33c   :  { %v4243_v24 = vmul.f32 %v16335_v47, %v16335_v47  ;;  %v3899_v23 = vadd.f32 1.0, %v12181_v19  ;;  %v3553_v3 = vmul.f32 %v3483_v46, %v16327_v8  ;;  %v4038_v20 = vmul.f32 %v3968_v22, %v16202_v0  ;;  %v11126_v57 = vpop.f32.mrb[35].mxu1 }
 0x33d   :  { %v3692_v16 = vadd.f32 %v3622_v63, %v16313_v17  ;;  %v3484_v43 = vmul.f32 %v16342_v35, %v16342_v35  ;;  %v16352_v26 = vadd.f32 %v15886_v1, %v3358_v48  ;;  %v4452_v45 = vadd.f32 %v4382_v21, %v16319_v58 }
 0x33e   :  { %v4313_v30 = vmul.f32 %v4243_v24, %v16335_v47  ;;  %v3969_v2 = vmul.f32 0.5, %v3899_v23  ;;  %v3623_v19 = vmul.f32 0.044715, %v3553_v3  ;;  %v4106_v46 = vmul.f32 %v15839_v10, %v4038_v20 }
 0x33f   :  { %v3762_v56 = vmul.f32 0.7978846, %v3692_v16  ;;  %v3554_v0 = vmul.f32 %v3484_v43, %v16342_v35  ;;  %v3485_v22 = vmul.f32 %v16352_v26, %v16352_v26  ;;  %v4522_v63 = vmul.f32 0.7978846, %v4452_v45 }
 0x340   :  { %v4383_v55 = vmul.f32 0.044715, %v4313_v30  ;;  %v4039_v48 = vmul.f32 %v3969_v2, %v16219_v60  ;;  %v3693_v39 = vadd.f32 %v3623_v19, %v16327_v8  ;;  %v16363_v21 = vadd.f32 %v4106_v46, %v15831_v38 }
 0x341   :  { %12190 = vtanh.f32 %v3762_v56  ;;  %v3624_v24 = vmul.f32 0.044715, %v3554_v0  ;;  %v3555_v57 = vmul.f32 %v3485_v22, %v16352_v26  ;;  %v16374_v30 = vadd.f32 %v15886_v1, %v3363_v54 }
 0x342   :  { %v16366_v23 = vpop.eup %12182  ;;  %12192 = vtanh.f32 %v4522_v63  ;;  %v4453_v3 = vadd.f32 %v4383_v55, %v16335_v47  ;;  %v4107_v20 = vmul.f32 %v15839_v10, %v4039_v48  ;;  %v3763_v16 = vmul.f32 0.7978846, %v3693_v39 }
 0x343   :  { %v12185_v43 = vpop.eup %12184  ;;  %v4244_v60 = vmul.f32 %v16363_v21, %v16363_v21  ;;  %v3694_v2 = vadd.f32 %v3624_v24, %v16342_v35  ;;  %v3625_v45 = vmul.f32 0.044715, %v3555_v57  ;;  %v3486_v48 = vmul.f32 %v16374_v30, %v16374_v30 }
 0x344   :  { %v16376_v19 = vpop.eup %12186  ;;  %v4523_v46 = vmul.f32 0.7978846, %v4453_v3  ;;  %v16379_v56 = vadd.f32 %v4107_v20, %v15831_v38  ;;  %v3900_v55 = vadd.f32 1.0, %v12185_v43  ;;  %12194 = vtanh.f32 %v3763_v16 }
 0x345   :  { %v12189_v0 = vpop.eup %12188  ;;  %v4314_v39 = vmul.f32 %v4244_v60, %v16363_v21  ;;  %v3764_v22 = vmul.f32 0.7978846, %v3694_v2  ;;  %v3695_v63 = vadd.f32 %v3625_v45, %v16352_v26  ;;  %v3556_v16 = vmul.f32 %v3486_v48, %v16374_v30 }
 0x346   :  { %12196 = vtanh.f32 %v4523_v46  ;;  %v4245_v54 = vmul.f32 %v16379_v56, %v16379_v56  ;;  %v3970_v24 = vmul.f32 0.5, %v3900_v55  ;;  %v3901_v57 = vadd.f32 1.0, %v12189_v0 }
 0x347   :  { %v4384_v3 = vmul.f32 0.044715, %v4314_v39  ;;  %12198 = vtanh.f32 %v3764_v22  ;;  %v3765_v20 = vmul.f32 0.7978846, %v3695_v63  ;;  %v16391_v45 = vadd.f32 %v15886_v1, %v3366_v62 }
 0x348   :  { %v4315_v43 = vmul.f32 %v4245_v54, %v16379_v56  ;;  %v4040_v60 = vmul.f32 %v3970_v24, %v16262_v61  ;;  %v3971_v2 = vmul.f32 0.5, %v3901_v57  ;;  %v3626_v29 = vmul.f32 0.044715, %v3556_v16  ;;  %v5268_v63 = vpop.permute.xlu0 %5267 }
 0x349   :  { %v4454_v46 = vadd.f32 %v4384_v3, %v16363_v21  ;;  %12200 = vtanh.f32 %v3765_v20  ;;  %v4656_v55 = vadd.f32 1.0, %v16234_v15  ;;  %v3487_v48 = vmul.f32 %v16391_v45, %v16391_v45 }
 0x34a   :  { %v4385_v0 = vmul.f32 0.044715, %v4315_v43  ;;  %v4108_v39 = vmul.f32 %v15839_v10, %v4040_v60  ;;  %v4041_v22 = vmul.f32 %v3971_v2, %v16285_v9  ;;  %v21058_v1 = vmul.bf16 %v21034_v59, %v21033_v33  ;;  %v5445_v43 = vpop.permute.xlu1 %5444 }
 0x34b   :  { %v12191_v61 = vpop.eup %12190  ;;  %v4524_v54 = vmul.f32 0.7978846, %v4454_v46  ;;  %v3696_v24 = vadd.f32 %v3626_v29, %v16374_v30  ;;  %v16405_v15 = vadd.f32 1.0, %v16240_v4  ;;  %v3557_v29 = vmul.f32 %v3487_v48, %v16391_v45 }
 0x34c   :  { %v5527_v62 = vsel %vm5498_vm10, %v21058_v1, %v5268_v63  ;;  %v16407_v57 = vpop.eup %12192  ;;  %v4455_v9 = vadd.f32 %v4385_v0, %v16379_v56  ;;  %v16411_v3 = vadd.f32 %v4108_v39, %v15831_v38  ;;  %v4109_v20 = vmul.f32 %v15839_v10, %v4041_v22 }
 0x34d   :  { %v3902_v16 = vadd.f32 1.0, %v12191_v61  ;;  %12202 = vtanh.f32 %v4524_v54  ;;  %v5626_v59 = vsel %vm5606_vm11, %v5527_v62, %v5445_v43  ;;  %v3766_v60 = vmul.f32 0.7978846, %v3696_v24 }
 0x34e   :  { %v12195_v2 = vpop.eup %12194  ;;  %v4525_v4 = vmul.f32 0.7978846, %v4455_v9  ;;  %v4246_v46 = vmul.f32 %v16411_v3, %v16411_v3  ;;  %v16419_v0 = vadd.f32 %v4109_v20, %v15831_v38  ;;  %v5738_v1 = vshrl.u32 %v5626_v59, 16 }
 0x34f   :  { %v3972_v39 = vmul.f32 0.5, %v3902_v16  ;;  %v3903_v63 = vadd.f32 1.0, %v12195_v2  ;;  %v5741_v22 = vshll.u32 %v5626_v59, 16  ;;  %12204 = vtanh.f32 %v3766_v60 }
 0x350   :  { %v16421_v61 = vpop.eup %12196  ;;  %12206 = vtanh.f32 %v4525_v4  ;;  %v4316_v54 = vmul.f32 %v4246_v46, %v16411_v3  ;;  %v4247_v48 = vmul.f32 %v16419_v0, %v16419_v0  ;;  %v16427_v43 = vrot.slane %v5738_v1, 7  ;;  %v5270_v4 = vpop.permute.xlu0 %5269 }
 0x351   :  { %v4042_v62 = vmul.f32 %v3972_v39, %v16313_v17  ;;  %v12199_v24 = vpop.eup %12198  ;;  %v3973_v9 = vmul.f32 0.5, %v3903_v63  ;;  %v3627_v20 = vmul.f32 0.044715, %v3557_v29  ;;  %v4726_v16 = vmul.f32 0.5, %v4656_v55  ;;  %v21059_v39 = vld [vmem:[#allocation30_spill] sm:$0xff] }
 0x352   :  { %v4386_v2 = vmul.f32 0.044715, %v4316_v54  ;;  %v4317_v59 = vmul.f32 %v4247_v48, %v16419_v0  ;;  %v3904_v33 = vadd.f32 1.0, %v12199_v24  ;;  %v5743_v32 = vor.u32 %v5741_v22, %v16427_v43 }
 0x353   :  { %v4110_v60 = vmul.f32 %v15839_v10, %v4042_v62  ;;  %v12201_v14 = vpop.eup %12200  ;;  %v4043_v46 = vmul.f32 %v3973_v9, %v16327_v8  ;;  %v3697_v17 = vadd.f32 %v3627_v20, %v16391_v45  ;;  %v21060_v63 = vmul.bf16 %v15694_v42, %v21059_v39  ;;  %v5447_v62 = vpop.permute.xlu1 %5446 }
 0x354   :  { %v4456_v55 = vadd.f32 %v4386_v2, %v16411_v3  ;;  %v4387_v1 = vmul.f32 0.044715, %v4317_v59  ;;  %v3974_v48 = vmul.f32 0.5, %v3904_v33  ;;  %v3905_v8 = vadd.f32 1.0, %v12201_v14 }
 0x355   :  { %v5530_v29 = vsel %vm5498_vm10, %v21060_v63, %v5270_v4  ;;  %v16440_v54 = vadd.f32 %v4110_v60, %v15831_v38  ;;  %v4111_v24 = vmul.f32 %v15839_v10, %v4043_v46  ;;  %v3767_v9 = vmul.f32 0.7978846, %v3697_v17 }
 0x356   :  { %v5628_v22 = vsel %vm5606_vm11, %v5530_v29, %v5447_v62  ;;  %v4526_v20 = vmul.f32 0.7978846, %v4456_v55  ;;  %v4457_v28 = vadd.f32 %v4387_v1, %v16419_v0  ;;  %v4044_v2 = vmul.f32 %v3974_v48, %v16342_v35 }
 0x357   :  { %v4248_v42 = vmul.f32 %v16440_v54, %v16440_v54  ;;  %v16448_v59 = vpop.eup %12202  ;;  %v16451_v60 = vadd.f32 %v4111_v24, %v15831_v38  ;;  %v3975_v33 = vmul.f32 0.5, %v3905_v8  ;;  %12208 = vtanh.f32 %v3767_v9 }
 0x358   :  { %v5745_v4 = vshrl.u32 %v5628_v22, 16  ;;  %12210 = vtanh.f32 %v4526_v20  ;;  %v4527_v14 = vmul.f32 0.7978846, %v4457_v28  ;;  %v4112_v17 = vmul.f32 %v15839_v10, %v4044_v2 }
 0x359   :  { %v4318_v46 = vmul.f32 %v4248_v42, %v16440_v54  ;;  %v12205_v63 = vpop.eup %12204  ;;  %v4249_v29 = vmul.f32 %v16451_v60, %v16451_v60  ;;  %v4045_v35 = vmul.f32 %v3975_v33, %v16352_v26  ;;  %v5748_v1 = vshll.u32 %v5628_v22, 16 }
 0x35a   :  { %v16458_v55 = vrot.slane %v5745_v4, 7  ;;  %v16460_v48 = vpop.eup %12206  ;;  %12212 = vtanh.f32 %v4527_v14  ;;  %v16463_v24 = vadd.f32 %v4112_v17, %v15831_v38  ;;  %v3906_v28 = vadd.f32 1.0, %v12205_v63 }
 0x35b   :  { %v4388_v62 = vmul.f32 0.044715, %v4318_v46  ;;  %v4319_v8 = vmul.f32 %v4249_v29, %v16451_v60  ;;  %v4113_v9 = vmul.f32 %v15839_v10, %v4045_v35  ;;  %v16470_v26 = vsel %vm1388_vm0, %v16092_v52, %v5743_v32 }
 0x35c   :  { %v5750_v20 = vor.u32 %v5748_v1, %v16458_v55  ;;  %v4250_v42 = vmul.f32 %v16463_v24, %v16463_v24  ;;  %v3976_v2 = vmul.f32 0.5, %v3906_v28  ;;  %6011 = vrot.lane.b32.xlu1 %v16470_v26, %s12559_s19  ;;  %v4727_v33 = vmul.f32 0.5, %v16405_v15 }
 0x35d   :  { %v4458_v22 = vadd.f32 %v4388_v62, %v16440_v54  ;;  %v4389_v4 = vmul.f32 0.044715, %v4319_v8  ;;  %v16479_v14 = vadd.f32 %v4113_v9, %v15831_v38  ;;  %v4796_v46 = vmul.f32 %v4726_v16, %v16105_v41 }
 0x35e   :  { %v5110_v52 = vshrl.u32 %v16282_v18, 16  ;;  %v4320_v17 = vmul.f32 %v4250_v42, %v16463_v24  ;;  %v4046_v63 = vmul.f32 %v3976_v2, %v16374_v30  ;;  %v4797_v29 = vmul.f32 %v4727_v33, %v16127_v13  ;;  %v12450_v42 = vld [vmem:[%s20653_s3 + $0x90] sm:$0xff]  }
 0x35f   :  { %v4528_v32 = vmul.f32 0.7978846, %v4458_v22  ;;  %v4459_v35 = vadd.f32 %v4389_v4, %v16451_v60  ;;  %v4251_v15 = vmul.f32 %v16479_v14, %v16479_v14  ;;  %v16492_v62 = vsel %vm1388_vm0, %v16427_v43, %v5750_v20  ;;  %v21061_v4 = vld [vmem:[#allocation34_spill] sm:$0xff] }
 0x360   :  { %v5112_v1 = vor.u32 %v5110_v52, %v16301_v31  ;;  %v4390_v41 = vmul.f32 0.044715, %v4320_v17  ;;  %v4114_v18 = vmul.f32 %v15839_v10, %v4046_v63  ;;  %v16495_v16 = vpack.c.bf16 %v4797_v29, %v4796_v46 }
 0x361   :  { %12214 = vtanh.f32 %v4528_v32  ;;  %v12209_v30 = vpop.eup %12208  ;;  %v4529_v28 = vmul.f32 0.7978846, %v4459_v35  ;;  %v4321_v13 = vmul.f32 %v4251_v15, %v16479_v14  ;;  %v4658_v8 = vadd.f32 1.0, %v16304_v11 }
 0x362   :  { %v4659_v9 = vadd.f32 1.0, %v16315_v36  ;;  %v16500_v22 = vpop.eup %12210  ;;  %v4460_v31 = vadd.f32 %v4390_v41, %v16463_v24  ;;  %v16504_v43 = vadd.f32 %v4114_v18, %v15831_v38  ;;  %v3907_v20 = vadd.f32 1.0, %v12209_v30 }
 0x363   :  { %v4883_v2 = vmul.bf16 %v12450_v42, %v16495_v16  ;;  %12216 = vtanh.f32 %v4529_v28  ;;  %v4391_v33 = vmul.f32 0.044715, %v4321_v13  ;;  %v4953_v11 = vmul.bf16 %v16495_v16, %v21061_v4 }
 0x364   :  { %v4728_v36 = vmul.f32 0.5, %v4658_v8  ;;  %v16512_v46 = vpop.eup %12212  ;;  %v4530_v52 = vmul.f32 0.7978846, %v4460_v31  ;;  %v4252_v32 = vmul.f32 %v16504_v43, %v16504_v43  ;;  %v3977_v17 = vmul.f32 0.5, %v3907_v20 }
 0x365   :  { %v5114_v63 = vshll.u32 %v4883_v2, 16  ;;  %v4461_v29 = vadd.f32 %v4391_v33, %v16479_v14  ;;  %v5391_v35 = vrot.slane %v4953_v11, 1  ;;  %v4729_v15 = vmul.f32 0.5, %v4659_v9 }
 0x366   :  { %v4798_v41 = vmul.f32 %v4728_v36, %v16187_v50  ;;  %12218 = vtanh.f32 %v4530_v52  ;;  %v4322_v18 = vmul.f32 %v4252_v32, %v16504_v43  ;;  %v4047_v30 = vmul.f32 %v3977_v17, %v16391_v45  ;;  %v21063_v17 = vld [vmem:[#allocation35_spill] sm:$0xff] }
 0x367   :  { %v5116_v28 = vrot.slane %v5114_v63, 1  ;;  %v4531_v13 = vmul.f32 0.7978846, %v4461_v29  ;;  %v5392_v8 = vsel %vm2127_vm1, %v16291_v25, %v5391_v35  ;;  %v4799_v31 = vmul.f32 %v4729_v15, %v16197_v6 }
 0x368   :  { %v5118_v20 = vshrl.u32 %v4883_v2, 16  ;;  %v4392_v42 = vmul.f32 0.044715, %v4322_v18  ;;  %v4115_v33 = vmul.f32 %v15839_v10, %v4047_v30  ;;  %5462 = vrot.lane.b32.xlu1 %v5392_v8, %s12559_s19  ;;  %v4660_v50 = vadd.f32 1.0, %v16366_v23  ;;  %v12451_v23 = vld [vmem:[%s20653_s3 + $0x98] sm:$0xff]  }
 0x369   :  { %v5117_v9 = vsel %vm861_vm2, %v5112_v1, %v5116_v28  ;;  %12220 = vtanh.f32 %v4531_v13  ;;  %v16528_v45 = vpack.c.bf16 %v4799_v31, %v4798_v41  ;;  %v4661_v25 = vadd.f32 1.0, %v16376_v19  ;;  %v16537_v52 = vpop.permute.xlu1 %5997 }
 0x36a   :  { %5285 = vrot.lane.b32.xlu0 %v5117_v9, %s12560_s22  ;;  %v5120_v11 = vor.u32 %v5118_v20, %v5116_v28  ;;  %v4462_v6 = vadd.f32 %v4392_v42, %v16504_v43  ;;  %v16535_v2 = vadd.f32 %v4115_v33, %v15831_v38  ;;  %v4730_v1 = vmul.f32 0.5, %v4660_v50  ;;  %21062 = vst [vmem:[#allocation88_spill] sm:$0xff] %v16537_v52  ;;  %v5928_v29 = vpop.permute.xlu0 %5927 }
 0x36b   :  { %v16531_v36 = vpop.eup %12214  ;;  %v4884_v32 = vmul.bf16 %v12451_v23, %v16528_v45  ;;  %v4954_v19 = vmul.bf16 %v16528_v45, %v21063_v17  ;;  %v4731_v63 = vmul.f32 0.5, %v4661_v25  ;;  %v21064_v15 = vmov 0 }
 0x36c   :  { %v21065_v15 = vsel %vm16546_vm13, 4294967295, %v21064_v15  ;;  %v4662_v41 = vadd.f32 1.0, %v16407_v57  ;;  %v4532_v18 = vmul.f32 0.7978846, %v4462_v6  ;;  %v4253_v30 = vmul.f32 %v16535_v2, %v16535_v2  ;;  %6013 = vrot.lane.b32.xlu1 %v16492_v62, %s12559_s19 }
 0x36d   :  { %21066 = vst [vmem:[#allocation89_spill] sm:$0xff] %v21065_v15  ;;  %v4800_v28 = vmul.f32 %v4730_v1, %v16256_v5  ;;  %v6208_v13 = vsel %vm5606_vm11, %v5928_v29, %v16537_v52  ;;  %v16558_v8 = vpop.eup %12216  ;;  %v5122_v31 = vshll.u32 %v4884_v32, 16  ;;  %v5393_v20 = vrot.slane %v4954_v19, 1  ;;  %v5449_v9 = vpop.permute.xlu1 %5448  ;;  %v21067_v19 = vld [vmem:[#allocation39_spill] sm:$0xff] }
 0x36e   :  { %5943 = vrot.lane.b32.xlu0 %v16470_v26, %s12561_s21  ;;  %v4801_v57 = vmul.f32 %v4731_v63, %v16270_v7  ;;  %v5126_v42 = vshrl.u32 %v4884_v32, 16  ;;  %6565 = vmatprep.mubr.bf16.mxu1 %v6208_v13  ;;  %12222 = vtanh.f32 %v4532_v18  ;;  %v4323_v33 = vmul.f32 %v4253_v30, %v16535_v2  ;;  %v5272_v23 = vpop.permute.xlu0 %5271  ;;  %v21068_v18 = vld [vmem:[#allocation82_spill] sm:$0xff]  ;;  %v21069_v30 = vld [vmem:[#allocation36_spill] sm:$0xff] }
 0x36f   :  { %10741 = vmatmul.mubr.msk.bf16.vlgmr.msra.gmra.mrb[68].mxu1 %vm16546_vm13, %v5928_v29  ;;  %v4663_v5 = vadd.f32 1.0, %v16421_v61  ;;  %v4732_v50 = vmul.f32 0.5, %v4662_v41  ;;  %v5124_v25 = vrot.slane %v5122_v31, 1  ;;  %v5394_v6 = vsel %vm2127_vm1, %v5391_v35, %v5393_v20 }
 0x370   :  { %v16568_v1 = vpack.c.bf16 %v4801_v57, %v4800_v28  ;;  %v16572_v32 = vpop.eup %12218  ;;  %v4393_v63 = vmul.f32 0.044715, %v4323_v33  ;;  %5464 = vrot.lane.b32.xlu1 %v5394_v6, %s12559_s19  ;;  %v21070_v29 = vmul.bf16 %v21068_v18, %v21069_v30  ;;  %v12452_v28 = vld [vmem:[%s20653_s3 + $0xa0] sm:$0xff]   ;;  %v4669_v39 = vadd.f32 1.0, %v16558_v8 }
 0x371   :  { %v4733_v41 = vmul.f32 0.5, %v4663_v5  ;;  %v4802_v13 = vmul.f32 %v4732_v50, %v16319_v58  ;;  %v5125_v35 = vsel %vm861_vm2, %v5120_v11, %v5124_v25  ;;  %v5128_v57 = vor.u32 %v5126_v42, %v5124_v25  ;;  %v16588_v5 = vpop.permute.xlu1 %5999  ;;  %v21072_v30 = vld [vmem:[#allocation37_spill] sm:$0xff] }
 0x372   :  { %v5533_v61 = vsel %vm5498_vm10, %v21070_v29, %v5272_v23  ;;  %v4885_v31 = vmul.bf16 %v12452_v28, %v16568_v1  ;;  %v4463_v6 = vadd.f32 %v4393_v63, %v16535_v2  ;;  %5287 = vrot.lane.b32.xlu0 %v5125_v35, %s12560_s22  ;;  %21071 = vst [vmem:[#allocation73_spill] sm:$0xff] %v16588_v5  ;;  %v5930_v29 = vpop.permute.xlu0 %5929 }
 0x373   :  { %v5630_v33 = vsel %vm5606_vm11, %v5533_v61, %v5449_v9  ;;  %v4803_v58 = vmul.f32 %v4733_v41, %v16335_v47  ;;  %v16591_v11 = vpop.eup %12220  ;;  %v4955_v42 = vmul.bf16 %v16568_v1, %v21072_v30  ;;  %v4664_v9 = vadd.f32 1.0, %v16448_v59 }
 0x374   :  { %v5752_v18 = vshrl.u32 %v5630_v33, 16  ;;  %v5755_v23 = vshll.u32 %v5630_v33, 16  ;;  %v5130_v50 = vshll.u32 %v4885_v31, 16  ;;  %v5134_v7 = vshrl.u32 %v4885_v31, 16 }
 0x375   :  { %v4533_v25 = vmul.f32 0.7978846, %v4463_v6  ;;  %v6211_v61 = vsel %vm5606_vm11, %v5930_v29, %v16588_v5  ;;  %v6073_v35 = vsel %vm6067_vm12, %v15946_v49, %v5930_v29  ;;  %v16602_v41 = vpack.c.bf16 %v4803_v58, %v4802_v13  ;;  %v5451_v33 = vpop.permute.xlu1 %5450  ;;  %v12453_v13 = vld [vmem:[%s20653_s3 + $0xa8] sm:$0xff]  }
 0x376   :  { %v16596_v63 = vrot.slane %v5752_v18, 7  ;;  %v5132_v47 = vrot.slane %v5130_v50, 1  ;;  %6573 = vmatprep.mubr.bf16.mxu1 %v6211_v61  ;;  %v5395_v28 = vrot.slane %v4955_v42, 1  ;;  %v4665_v31 = vadd.f32 1.0, %v16460_v48  ;;  %5945 = vrot.lane.b32.xlu0 %v16492_v62, %s12561_s21  ;;  %v21073_v18 = vld [vmem:[#allocation41_spill] sm:$0xff]  ;;  %v5274_v50 = vpop.permute.xlu0 %5273 }
 0x377   :  { %12224 = vtanh.f32 %v4533_v25  ;;  %6574 = vmatmul.mubr.bf16.gmra.mrb[72].mxu1 %v6073_v35  ;;  %v4734_v6 = vmul.f32 0.5, %v4664_v9  ;;  %v4886_v48 = vmul.bf16 %v12453_v13, %v16602_v41  ;;  %v21075_v25 = vld [vmem:[#allocation38_spill] sm:$0xff] }
 0x378   :  { %v5757_v59 = vor.u32 %v5755_v23, %v16596_v63  ;;  %v5133_v49 = vsel %vm861_vm2, %v5128_v57, %v5132_v47  ;;  %v5136_v58 = vor.u32 %v5134_v7, %v5132_v47  ;;  %v5396_v29 = vsel %vm2127_vm1, %v5393_v20, %v5395_v28  ;;  %v16616_v42 = vpop.eup %12222  ;;  %v21074_v23 = vld [vmem:[#allocation83_spill] sm:$0xff]  ;;  %v21077_v47 = vld [vmem:[#allocation40_spill] sm:$0xff] }
 0x379   :  { %v21076_v9 = vmul.bf16 %v21074_v23, %v21075_v25  ;;  %v4735_v35 = vmul.f32 0.5, %v4665_v31  ;;  %v4804_v15 = vmul.f32 %v4734_v6, %v16363_v21  ;;  %v5138_v20 = vshll.u32 %v4886_v48, 16  ;;  %v3371_v6 = vpop.f32.mrb[36].mxu1 }
 0x37a   :  { %v16624_v57 = vsel %vm1388_vm0, %v16458_v55, %v5757_v59  ;;  %v5142_v7 = vshrl.u32 %v4886_v48, 16  ;;  %v4956_v13 = vmul.bf16 %v16602_v41, %v21077_v47  ;;  %5289 = vrot.lane.b32.xlu0 %v5133_v49, %s12560_s22  ;;  %v4666_v21 = vadd.f32 1.0, %v16500_v22  ;;  %v5932_v31 = vpop.permute.xlu0 %5931  ;;  %v21080_v49 = vld [vmem:[#allocation86_spill] sm:$0xff]  ;;  %v11129_v22 = vpop.f32.mrb[37].mxu1 }
 0x37b   :  { %v5536_v61 = vsel %vm5498_vm10, %v21076_v9, %v5274_v50  ;;  %6015 = vrot.lane.b32.xlu1 %v16624_v57, %s12559_s19  ;;  %v16633_v9 = vpop.permute.xlu1 %6001  ;;  %v4805_v55 = vmul.f32 %v4735_v35, %v16379_v56  ;;  %v5140_v59 = vrot.slane %v5138_v20, 1  ;;  %v4667_v48 = vadd.f32 1.0, %v16512_v46 }
 0x37c   :  { %v5632_v30 = vsel %vm5606_vm11, %v5536_v61, %v5451_v33  ;;  %21078 = vst [vmem:[#allocation79_spill] sm:$0xff] %v16633_v9  ;;  %v16637_v33 = vrot.slane %v4956_v13, 1  ;;  %v21079_v61 = vld [vmem:[#allocation43_spill] sm:$0xff]  ;;  %v6077_v56 = vsel %vm6067_vm12, %v21080_v49, %v5932_v31  ;;  %v4736_v25 = vmul.f32 0.5, %v4666_v21 }
 0x37d   :  { %v5759_v50 = vshrl.u32 %v5632_v30, 16  ;;  %v5762_v23 = vshll.u32 %v5632_v30, 16  ;;  %v6214_v30 = vsel %vm5606_vm11, %v5932_v31, %v16633_v9  ;;  %v16648_v35 = vpack.c.bf16 %v4805_v55, %v4804_v15  ;;  %v12454_v15 = vld [vmem:[%s20653_s3 + $0xb0] sm:$0xff]  }
 0x37e   :  { %v5141_v20 = vsel %vm861_vm2, %v5136_v58, %v5140_v59  ;;  %6581 = vmatprep.mubr.bf16.mxu1 %v6214_v30  ;;  %v5144_v46 = vor.u32 %v5142_v7, %v5140_v59  ;;  %v5398_v13 = vsel %vm2127_vm1, %v5395_v28, %v16637_v33  ;;  %5947 = vrot.lane.b32.xlu0 %v16624_v57, %s12561_s21  ;;  %v5276_v55 = vpop.permute.xlu0 %5275  ;;  %v21081_v30 = vld [vmem:[#allocation42_spill] sm:$0xff] }
 0x37f   :  { %v16642_v47 = vrot.slane %v5759_v50, 7  ;;  %5466 = vrot.lane.b32.xlu1 %v5396_v29, %s12559_s19  ;;  %v3374_v50 = vpop.f32.mrb[38].mxu1  ;;  %v5453_v31 = vpop.permute.xlu1 %5452  ;;  %6582 = vmatmul.mubr.bf16.gmra.mrb[76].mxu1 %v6077_v56  ;;  %v4887_v58 = vmul.bf16 %v12454_v15, %v16648_v35  ;;  %v16664_v29 = vld [vmem:[%s20655_s5] ss:$0 sm:$0xff]  ;;  %v4806_v59 = vmul.f32 %v4736_v25, %v16411_v3  ;;  %v4957_v49 = vmul.bf16 %v16648_v35, %v21081_v30 }
 0x380   :  { %v16667_v28 = vadd.f32 %v16664_v29, %v3371_v6  ;;  %v11130_v7 = vpop.f32.mrb[39].mxu1  ;;  %v16670_v21 = vadd.f32 %v16664_v29, %v3374_v50  ;;  %v4668_v56 = vadd.f32 1.0, %v16531_v36  ;;  %v21082_v15 = vmul.bf16 %v15881_v37, %v21067_v19 }
 0x381   :  { %v5764_v17 = vor.u32 %v5762_v23, %v16642_v47  ;;  %v4737_v23 = vmul.f32 0.5, %v4667_v48  ;;  %v16676_v22 = vpop.eup %12224  ;;  %v5146_v50 = vshll.u32 %v4887_v58, 16  ;;  %v5150_v7 = vshrl.u32 %v4887_v58, 16 }
 0x382   :  { %v5539_v6 = vsel %vm5498_vm10, %v21082_v15, %v5276_v55  ;;  %v3488_v3 = vmul.f32 %v16667_v28, %v16667_v28  ;;  %v3489_v36 = vmul.f32 %v16670_v21, %v16670_v21  ;;  %5291 = vrot.lane.b32.xlu0 %v5141_v20, %s12560_s22  ;;  %v5934_v30 = vpop.permute.xlu0 %5933  ;;  %v16701_v4 = vrot.slane %v4957_v49, 1  ;;  %v12456_v49 = vld [vmem:[%s20653_s3 + $0xb8] sm:$0xff]  }
 0x383   :  { %v16684_v48 = vsel %vm1388_vm0, %v16596_v63, %v5764_v17  ;;  %v5634_v25 = vsel %vm5606_vm11, %v5539_v6, %v5453_v31  ;;  %v4807_v37 = vmul.f32 %v4737_v23, %v16419_v0  ;;  %v16695_v63 = vpop.permute.xlu1 %6003  ;;  %v5148_v15 = vrot.slane %v5146_v50, 1 }
 0x384   :  { %6017 = vrot.lane.b32.xlu1 %v16684_v48, %s12559_s19  ;;  %v5766_v55 = vshrl.u32 %v5634_v25, 16  ;;  %v5769_v17 = vshll.u32 %v5634_v25, 16  ;;  %21083 = vst [vmem:[#allocation70_spill] sm:$0xff] %v16695_v63  ;;  %v3558_v19 = vmul.f32 %v3488_v3, %v16667_v28  ;;  %v3559_v31 = vmul.f32 %v3489_v36, %v16670_v21 }
 0x385   :  { %v16699_v6 = vpack.c.bf16 %v4807_v37, %v4806_v59  ;;  %v5149_v20 = vsel %vm861_vm2, %v5144_v46, %v5148_v15  ;;  %v6217_v58 = vsel %vm5606_vm11, %v5934_v30, %v16695_v63  ;;  %v6081_v23 = vsel %vm6067_vm12, %v15988_v40, %v5934_v30 }
 0x386   :  { %v16704_v0 = vrot.slane %v5766_v55, 7  ;;  %6589 = vmatprep.mubr.bf16.mxu1 %v6217_v58  ;;  %v3628_v50 = vmul.f32 0.044715, %v3558_v19  ;;  %v3629_v59 = vmul.f32 0.044715, %v3559_v31  ;;  %v5152_v3 = vor.u32 %v5150_v7, %v5148_v15  ;;  %5949 = vrot.lane.b32.xlu0 %v16684_v48, %s12561_s21  ;;  %v5278_v36 = vpop.permute.xlu0 %5277  ;;  %v3379_v7 = vpop.f32.mrb[40].mxu1 }
 0x387   :  { %v4888_v8 = vmul.bf16 %v12456_v49, %v16699_v6  ;;  %v5455_v25 = vpop.permute.xlu1 %5454  ;;  %6590 = vmatmul.mubr.bf16.gmra.mrb[80].mxu1 %v6081_v23  ;;  %v5400_v40 = vsel %vm2127_vm1, %v16637_v33, %v16701_v4  ;;  %v4738_v19 = vmul.f32 0.5, %v4668_v56  ;;  %v16733_v33 = vadd.f32 %v16664_v29, %v3379_v7 }
 0x388   :  { %5468 = vrot.lane.b32.xlu1 %v5398_v13, %s12559_s19  ;;  %v5771_v46 = vor.u32 %v5769_v17, %v16704_v0  ;;  %v4739_v13 = vmul.f32 0.5, %v4669_v39  ;;  %v3698_v30 = vadd.f32 %v3628_v50, %v16667_v28  ;;  %v3699_v37 = vadd.f32 %v3629_v59, %v16670_v21  ;;  %v11133_v39 = vpop.f32.mrb[41].mxu1 }
 0x389   :  { %v5154_v55 = vshll.u32 %v4888_v8, 16  ;;  %v5158_v15 = vshrl.u32 %v4888_v8, 16  ;;  %v21084_v17 = vmul.bf16 %v15958_v12, %v21073_v18  ;;  %v4808_v56 = vmul.f32 %v4738_v19, %v16440_v54  ;;  %v3382_v49 = vpop.f32.mrb[42].mxu1 }
 0x38a   :  { %v16730_v58 = vsel %vm1388_vm0, %v16642_v47, %v5771_v46  ;;  %v3768_v23 = vmul.f32 0.7978846, %v3698_v30  ;;  %v3769_v59 = vmul.f32 0.7978846, %v3699_v37  ;;  %5293 = vrot.lane.b32.xlu0 %v5149_v20, %s12560_s22  ;;  %v16745_v54 = vadd.f32 %v16664_v29, %v3382_v49  ;;  %v11134_v19 = vpop.f32.mrb[43].mxu1 }
 0x38b   :  { %v5542_v31 = vsel %vm5498_vm10, %v21084_v17, %v5278_v36  ;;  %v5156_v12 = vrot.slane %v5154_v55, 1  ;;  %v16740_v46 = vpop.permute.xlu1 %6005  ;;  %v3490_v36 = vmul.f32 %v16733_v33, %v16733_v33  ;;  %v4809_v37 = vmul.f32 %v4739_v13, %v16451_v60 }
 0x38c   :  { %v5636_v50 = vsel %vm5606_vm11, %v5542_v31, %v5455_v25  ;;  %6019 = vrot.lane.b32.xlu1 %v16730_v58, %s12559_s19  ;;  %21085 = vst [vmem:[#allocation82_spill] sm:$0xff] %v16740_v46  ;;  %12226 = vtanh.f32 %v3768_v23  ;;  %v5936_v25 = vpop.permute.xlu0 %5935  ;;  %v4670_v60 = vadd.f32 1.0, %v16572_v32  ;;  %v21088_v23 = vld [vmem:[#allocation45_spill] sm:$0xff]  ;;  %v21089_v19 = vmul.bf16 %v16052_v53, %v21079_v61 }
 0x38d   :  { %v5773_v8 = vshrl.u32 %v5636_v50, 16  ;;  %v5776_v47 = vshll.u32 %v5636_v50, 16  ;;  %v5157_v30 = vsel %vm861_vm2, %v5152_v3, %v5156_v12  ;;  %v5160_v55 = vor.u32 %v5158_v15, %v5156_v12  ;;  %v12457_v32 = vld [vmem:[%s20653_s3 + $0xc0] sm:$0xff]  }
 0x38e   :  { %12228 = vtanh.f32 %v3769_v59  ;;  %v6220_v20 = vsel %vm5606_vm11, %v5936_v25, %v16740_v46  ;;  %v6085_v17 = vsel %vm6067_vm12, %v16020_v44, %v5936_v25  ;;  %v3560_v31 = vmul.f32 %v3490_v36, %v16733_v33  ;;  %5951 = vrot.lane.b32.xlu0 %v16730_v58, %s12561_s21  ;;  %v21087_v44 = vld [vmem:[#allocation44_spill] sm:$0xff] }
 0x38f   :  { %v16749_v7 = vrot.slane %v5773_v8, 7  ;;  %6597 = vmatprep.mubr.bf16.mxu1 %v6220_v20  ;;  %v3491_v3 = vmul.f32 %v16745_v54, %v16745_v54  ;;  %v16759_v39 = vpack.c.bf16 %v4809_v37, %v4808_v56  ;;  %v5457_v15 = vpop.permute.xlu1 %5456  ;;  %v4671_v59 = vadd.f32 1.0, %v16591_v11 }
 0x390   :  { %5470 = vrot.lane.b32.xlu1 %v5400_v40, %s12559_s19  ;;  %6598 = vmatmul.mubr.bf16.gmra.mrb[84].mxu1 %v6085_v17  ;;  %v4958_v40 = vmul.bf16 %v16699_v6, %v21087_v44  ;;  %v3630_v12 = vmul.f32 0.044715, %v3560_v31  ;;  %v5280_v56 = vpop.permute.xlu0 %5279  ;;  %v4740_v36 = vmul.f32 0.5, %v4670_v60 }
 0x391   :  { %21086 = vst [vmem:[#allocation83_spill] sm:$0xff] %v16759_v39  ;;  %v5778_v13 = vor.u32 %v5776_v47, %v16749_v7  ;;  %v3561_v49 = vmul.f32 %v3491_v3, %v16745_v54  ;;  %v16775_v8 = vmul.bf16 %v12457_v32, %v16759_v39  ;;  %v3387_v47 = vpop.f32.mrb[44].mxu1  ;;  %v5545_v25 = vsel %vm5498_vm10, %v21089_v19, %v5280_v56 }
 0x392   :  { %v16785_v37 = vrot.slane %v4958_v40, 1  ;;  %v16788_v20 = vadd.f32 %v16664_v29, %v3387_v47  ;;  %v11137_v17 = vpop.f32.mrb[45].mxu1  ;;  %v3700_v31 = vadd.f32 %v3630_v12, %v16733_v33  ;;  %v5638_v3 = vsel %vm5606_vm11, %v5545_v25, %v5457_v15  ;;  %5295 = vrot.lane.b32.xlu0 %v5157_v30, %s12560_s22 }
 0x393   :  { %v16783_v11 = vsel %vm1388_vm0, %v16704_v0, %v5778_v13  ;;  %v3631_v60 = vmul.f32 0.044715, %v3561_v49  ;;  %v5162_v53 = vshll.u32 %v16775_v8, 16  ;;  %v3390_v56 = vpop.f32.mrb[46].mxu1  ;;  %v5780_v0 = vshrl.u32 %v5638_v3, 16  ;;  %v16796_v40 = vpop.permute.xlu1 %6007 }
 0x394   :  { %6021 = vrot.lane.b32.xlu1 %v16783_v11, %s12559_s19  ;;  %v5783_v13 = vshll.u32 %v5638_v3, 16  ;;  %21090 = vst [vmem:[#allocation86_spill] sm:$0xff] %v16796_v40  ;;  %v5402_v32 = vsel %vm2127_vm1, %v16701_v4, %v16785_v37  ;;  %v3492_v15 = vmul.f32 %v16788_v20, %v16788_v20  ;;  %v11138_v12 = vpop.f32.mrb[47].mxu1  ;;  %v3770_v49 = vmul.f32 0.7978846, %v3700_v31  ;;  %v5938_v19 = vpop.permute.xlu0 %5937 }
 0x395   :  { %v3701_v47 = vadd.f32 %v3631_v60, %v16745_v54  ;;  %v5164_v25 = vrot.slane %v5162_v53, 1  ;;  %v16805_v17 = vadd.f32 %v16664_v29, %v3390_v56  ;;  %v16807_v30 = vrot.slane %v5780_v0, 7 }
 0x396   :  { %v6223_v3 = vsel %vm5606_vm11, %v5938_v19, %v16796_v40  ;;  %v6089_v4 = vsel %vm6067_vm12, %v16047_v27, %v5938_v19  ;;  %v3562_v50 = vmul.f32 %v3492_v15, %v16788_v20  ;;  %v12227_v61 = vpop.eup %12226  ;;  %12230 = vtanh.f32 %v3770_v49  ;;  %5953 = vrot.lane.b32.xlu0 %v16783_v11, %s12561_s21 }
 0x397   :  { %v3771_v31 = vmul.f32 0.7978846, %v3701_v47  ;;  %v5165_v60 = vsel %vm861_vm2, %v5160_v55, %v5164_v25  ;;  %6605 = vmatprep.mubr.bf16.mxu1 %v6223_v3  ;;  %v3493_v53 = vmul.f32 %v16805_v17, %v16805_v17  ;;  %v3908_v0 = vadd.f32 1.0, %v12227_v61  ;;  %v3395_v47 = vpop.f32.mrb[48].mxu1 }
 0x398   :  { %5472 = vrot.lane.b32.xlu1 %v5402_v32, %s12559_s19  ;;  %v12229_v56 = vpop.eup %12228  ;;  %v5785_v12 = vor.u32 %v5783_v13, %v16807_v30  ;;  %6606 = vmatmul.mubr.bf16.gmra.mrb[88].mxu1 %v6089_v4  ;;  %v3632_v27 = vmul.f32 0.044715, %v3562_v50  ;;  %v4741_v15 = vmul.f32 0.5, %v4671_v59  ;;  %v4810_v32 = vmul.f32 %v4740_v36, %v16463_v24  ;;  %v11141_v18 = vpop.f32.mrb[49].mxu1 }
 0x399   :  { %v3909_v49 = vadd.f32 1.0, %v12229_v56  ;;  %12232 = vtanh.f32 %v3771_v31  ;;  %v3563_v55 = vmul.f32 %v3493_v53, %v16805_v17  ;;  %v3978_v19 = vmul.f32 0.5, %v3908_v0  ;;  %v21092_v31 = vld [vmem:[#allocation46_spill] sm:$0xff]  ;;  %v16834_v36 = vpop.f32.mrb[50].mxu1 }
 0x39a   :  { %v3702_v3 = vadd.f32 %v3632_v27, %v16788_v20  ;;  %v16826_v61 = vsel %vm1388_vm0, %v16749_v7, %v5785_v12  ;;  %v4811_v13 = vmul.f32 %v4741_v15, %v16479_v14  ;;  %v5166_v59 = vshrl.u32 %v16775_v8, 16  ;;  %v11990_v7 = vld [vmem:[%s20656_s6 + $0x80] sm:$0xff]   ;;  %5297 = vrot.lane.b32.xlu0 %v5165_v60, %s12560_s22  ;;  %v5459_v14 = vpop.permute.xlu1 %5458  ;;  %v11142_v8 = vpop.f32.mrb[51].mxu1 }
 0x39b   :  { %21091 = vst [vmem:[#allocation90_spill] sm:$0xff] %v16826_v61  ;;  %v3979_v4 = vmul.f32 0.5, %v3909_v49  ;;  %v3633_v50 = vmul.f32 0.044715, %v3563_v55  ;;  %v4959_v24 = vmul.bf16 %v16759_v39, %v21092_v31  ;;  %v4048_v53 = vmul.f32 %v3978_v19, %v16667_v28  ;;  %11160 = vmatpush3.bf16.msra.mxu1 %v11990_v7  ;;  %v12458_v55 = vld [vmem:[%s20653_s3 + $0xc8] sm:$0xff]   ;;  %v21114_v39 = vld [vmem:[#allocation71_spill] sm:$0xff] }
 0x39c   :  { %6023 = vrot.lane.b32.xlu1 %v16826_v61, %s12559_s19  ;;  %v3772_v18 = vmul.f32 0.7978846, %v3702_v3  ;;  %v16841_v56 = vpack.c.bf16 %v4811_v13, %v4810_v32  ;;  %v16844_v0 = vadd.f32 %v16664_v29, %v3395_v47  ;;  %v5168_v15 = vor.u32 %v5166_v59, %v5164_v25  ;;  %v5282_v60 = vpop.permute.xlu0 %5281  ;;  %11161 = vmatprep.subr.bf16.mxu1 %v20928_v51 }
 0x39d   :  { %v4049_v12 = vmul.f32 %v3979_v4, %v16670_v21  ;;  %v3703_v27 = vadd.f32 %v3633_v50, %v16805_v17  ;;  %v16848_v49 = vrot.slane %v4959_v24, 1  ;;  %v4116_v28 = vmul.f32 %v15839_v10, %v4048_v53  ;;  %v16882_v8 = vpop.f32.mrb[52].mxu1 }
 0x39e   :  { %21093 = vst [vmem:[#allocation91_spill] sm:$0xff] %v16841_v56  ;;  %12234 = vtanh.f32 %v3772_v18  ;;  %v16855_v32 = vmul.bf16 %v12458_v55, %v16841_v56  ;;  %v3494_v21 = vmul.f32 %v16844_v0, %v16844_v0  ;;  %v21094_v47 = vmul.bf16 %v16135_v34, %v21088_v23  ;;  %5955 = vrot.lane.b32.xlu0 %v16826_v61, %s12561_s21  ;;  %v16874_v59 = vpop.permute.xlu1 %6009  ;;  %v11145_v55 = vpop.f32.mrb[53].mxu1 }
 0x39f   :  { %v4117_v25 = vmul.f32 %v15839_v10, %v4049_v12  ;;  %v3773_v3 = vmul.f32 0.7978846, %v3703_v27  ;;  %v5404_v13 = vsel %vm2127_vm1, %v16785_v37, %v16848_v49  ;;  %v16869_v4 = vadd.f32 %v4116_v28, %v15831_v38  ;;  %21095 = vst [vmem:[#allocation92_spill] sm:$0xff] %v16874_v59 }
 0x3a0   :  { %v5548_v19 = vsel %vm5498_vm10, %v21094_v47, %v5282_v60  ;;  %v5170_v24 = vshll.u32 %v16855_v32, 16  ;;  %5474 = vrot.lane.b32.xlu1 %v5404_v13, %s12559_s19  ;;  %v3564_v34 = vmul.f32 %v3494_v21, %v16844_v0  ;;  %v12231_v7 = vpop.eup %12230  ;;  %v5940_v27 = vpop.permute.xlu0 %5939 }
 0x3a1   :  { %v5640_v50 = vsel %vm5606_vm11, %v5548_v19, %v5459_v14  ;;  %v16880_v53 = vadd.f32 %v4117_v25, %v15831_v38  ;;  %12236 = vtanh.f32 %v3773_v3  ;;  %v4254_v14 = vmul.f32 %v16869_v4, %v16869_v4  ;;  %v21096_v3 = vld [vmem:[#allocation87_spill] sm:$0xff] }
 0x3a2   :  { %v5787_v37 = vshrl.u32 %v5640_v50, 16  ;;  %v5790_v18 = vshll.u32 %v5640_v50, 16  ;;  %v3910_v12 = vadd.f32 1.0, %v12231_v7  ;;  %v16886_v28 = vrot.slane %v5170_v24, 1  ;;  %v16896_v50 = vpop.f32.mrb[54].mxu1 }
 0x3a3   :  { %v3634_v60 = vmul.f32 0.044715, %v3564_v34  ;;  %v12233_v47 = vpop.eup %12232  ;;  %v4255_v21 = vmul.f32 %v16880_v53, %v16880_v53  ;;  %v6226_v19 = vsel %vm5606_vm11, %v5940_v27, %v16874_v59  ;;  %v6093_v13 = vsel %vm6067_vm12, %v21096_v3, %v5940_v27  ;;  %v11146_v55 = vpop.f32.mrb[55].mxu1 }
 0x3a4   :  { %v16890_v25 = vrot.slane %v5787_v37, 7  ;;  %v4324_v7 = vmul.f32 %v4254_v14, %v16869_v4  ;;  %v3980_v24 = vmul.f32 0.5, %v3910_v12  ;;  %v3911_v23 = vadd.f32 1.0, %v12233_v47  ;;  %6613 = vmatprep.mubr.bf16.mxu1 %v6226_v19 }
 0x3a5   :  { %v5173_v34 = vsel %vm861_vm2, %v5168_v15, %v16886_v28  ;;  %v4325_v37 = vmul.f32 %v4255_v21, %v16880_v53  ;;  %6614 = vmatmul.mubr.bf16.gmra.mrb[92].mxu1 %v6093_v13  ;;  %v3704_v27 = vadd.f32 %v3634_v60, %v16844_v0  ;;  %v16908_v15 = vadd.f32 %v16664_v29, %v16834_v36  ;;  %v21098_v36 = vld [vmem:[#allocation47_spill] sm:$0xff] }
 0x3a6   :  { %v5792_v31 = vor.u32 %v5790_v18, %v16890_v25  ;;  %5299 = vrot.lane.b32.xlu0 %v5173_v34, %s12560_s22  ;;  %v4394_v3 = vmul.f32 0.044715, %v4324_v7  ;;  %v4050_v44 = vmul.f32 %v3980_v24, %v16733_v33  ;;  %v3981_v14 = vmul.f32 0.5, %v3911_v23  ;;  %v21099_v7 = vld [vmem:[#allocation85_spill] sm:$0xff] }
 0x3a7   :  { %v4395_v12 = vmul.f32 0.044715, %v4325_v37  ;;  %v3774_v47 = vmul.f32 0.7978846, %v3704_v27  ;;  %v4672_v33 = vadd.f32 1.0, %v16616_v42  ;;  %v4916_v24 = vmul.bf16 %v21099_v7, %v21098_v36 }
 0x3a8   :  { %v16912_v21 = vsel %vm1388_vm0, %v16807_v30, %v5792_v31  ;;  %v12235_v18 = vpop.eup %12234  ;;  %v4464_v19 = vadd.f32 %v4394_v3, %v16869_v4  ;;  %v4118_v13 = vmul.f32 %v15839_v10, %v4050_v44  ;;  %v4051_v60 = vmul.f32 %v3981_v14, %v16745_v54  ;;  %v16926_v31 = vpop.f32.mrb[56].mxu1 }
 0x3a9   :  { %21097 = vst [vmem:[#allocation87_spill] sm:$0xff] %v16912_v21  ;;  %6025 = vrot.lane.b32.xlu1 %v16912_v21, %s12559_s19  ;;  %v3912_v23 = vadd.f32 1.0, %v12235_v18  ;;  %12238 = vtanh.f32 %v3774_v47  ;;  %v3495_v30 = vmul.f32 %v16908_v15, %v16908_v15  ;;  %v5284_v34 = vpop.permute.xlu0 %5283  ;;  %v4673_v42 = vadd.f32 1.0, %v16676_v22  ;;  %v11149_v55 = vpop.f32.mrb[57].mxu1 }
 0x3aa   :  { %5957 = vrot.lane.b32.xlu0 %v16912_v21, %s12561_s21  ;;  %v16929_v54 = vadd.f32 %v4118_v13, %v15831_v38  ;;  %v4119_v44 = vmul.f32 %v15839_v10, %v4051_v60  ;;  %v4465_v27 = vadd.f32 %v4395_v12, %v16880_v53  ;;  %v5551_v14 = vsel %vm5498_vm10, %v4916_v24, %v5284_v34  ;;  %v16936_v18 = vpop.f32.mrb[58].mxu1  ;;  %v5461_v22 = vpop.permute.xlu1 %5460 }
 0x3ab   :  { %v12237_v37 = vpop.eup %12236  ;;  %v3982_v3 = vmul.f32 0.5, %v3912_v23  ;;  %v3565_v47 = vmul.f32 %v3495_v30, %v16908_v15  ;;  %v4534_v7 = vmul.f32 0.7978846, %v4464_v19  ;;  %v11150_v55 = vpop.f32.mrb[59].mxu1  ;;  %v5642_v12 = vsel %vm5606_vm11, %v5551_v14, %v5461_v22 }
 0x3ac   :  { %v4256_v13 = vmul.f32 %v16929_v54, %v16929_v54  ;;  %v16941_v60 = vadd.f32 %v4119_v44, %v15831_v38  ;;  %v3913_v36 = vadd.f32 1.0, %v12237_v37  ;;  %v4742_v24 = vmul.f32 0.5, %v4672_v33 }
 0x3ad   :  { %v4052_v59 = vmul.f32 %v3982_v3, %v16788_v20  ;;  %v3635_v23 = vmul.f32 0.044715, %v3565_v47  ;;  %v5794_v40 = vshrl.u32 %v5642_v12, 16  ;;  %v4535_v46 = vmul.f32 0.7978846, %v4465_v27 }
 0x3ae   :  { %v4326_v30 = vmul.f32 %v4256_v13, %v16929_v54  ;;  %v4257_v19 = vmul.f32 %v16941_v60, %v16941_v60  ;;  %v3983_v34 = vmul.f32 0.5, %v3913_v36  ;;  %v4743_v63 = vmul.f32 0.5, %v4673_v42  ;;  %v16959_v13 = vpop.f32.mrb[60].mxu1 }
 0x3af   :  { %v4120_v44 = vmul.f32 %v15839_v10, %v4052_v59  ;;  %v3705_v37 = vadd.f32 %v3635_v23, %v16908_v15  ;;  %v16952_v14 = vrot.slane %v5794_v40, 7  ;;  %v4812_v36 = vmul.f32 %v4742_v24, %v16504_v43  ;;  %v11153_v23 = vpop.f32.mrb[61].mxu1 }
 0x3b0   :  { %v4396_v55 = vmul.f32 0.044715, %v4326_v30  ;;  %v4327_v20 = vmul.f32 %v4257_v19, %v16941_v60  ;;  %v4053_v3 = vmul.f32 %v3983_v34, %v16805_v17  ;;  %v4813_v27 = vmul.f32 %v4743_v63, %v16535_v2  ;;  %v16967_v43 = vpop.f32.mrb[62].mxu1 }
 0x3b1   :  { %v16955_v33 = vadd.f32 %v4120_v44, %v15831_v38  ;;  %v3775_v47 = vmul.f32 0.7978846, %v3705_v37  ;;  %12240 = vtanh.f32 %v4534_v7  ;;  %v5797_v30 = vshll.u32 %v5642_v12, 16  ;;  %v11154_v24 = vpop.f32.mrb[63].mxu1  ;;  %v12459_v12 = vld [vmem:[%s20653_s3 + $0xd0] sm:$0xff]  }
 0x3b2   :  { %v4466_v59 = vadd.f32 %v4396_v55, %v16929_v54  ;;  %v4397_v42 = vmul.f32 0.044715, %v4327_v20  ;;  %v4121_v22 = vmul.f32 %v15839_v10, %v4053_v3  ;;  %v16965_v19 = vpack.c.bf16 %v4813_v27, %v4812_v36  ;;  %v21101_v55 = vld [vmem:[#allocation48_spill] sm:$0xff] }
 0x3b3   :  { %v12239_v17 = vpop.eup %12238  ;;  %v4258_v40 = vmul.f32 %v16955_v33, %v16955_v33  ;;  %12242 = vtanh.f32 %v3775_v47  ;;  %v5799_v44 = vor.u32 %v5797_v30, %v16952_v14  ;;  %v5174_v36 = vshrl.u32 %v16855_v32, 16 }
 0x3b4   :  { %21100 = vst [vmem:[#allocation85_spill] sm:$0xff] %v16965_v19  ;;  %12244 = vtanh.f32 %v4535_v46  ;;  %v4467_v2 = vadd.f32 %v4397_v42, %v16941_v60  ;;  %v16971_v63 = vadd.f32 %v4121_v22, %v15831_v38  ;;  %v3914_v7 = vadd.f32 1.0, %v12239_v17 }
 0x3b5   :  { %v4328_v34 = vmul.f32 %v4258_v40, %v16955_v33  ;;  %v16979_v37 = vmul.bf16 %v12459_v12, %v16965_v19  ;;  %v4960_v46 = vmul.bf16 %v16841_v56, %v21101_v55  ;;  %v4536_v20 = vmul.f32 0.7978846, %v4466_v59 }
 0x3b6   :  { %v4259_v3 = vmul.f32 %v16971_v63, %v16971_v63  ;;  %v3984_v47 = vmul.f32 0.5, %v3914_v7  ;;  %v16989_v23 = vadd.f32 %v16664_v29, %v16882_v8  ;;  %v4537_v17 = vmul.f32 0.7978846, %v4467_v2 }
 0x3b7   :  { %v4398_v27 = vmul.f32 0.044715, %v4328_v34  ;;  %v5178_v42 = vshll.u32 %v16979_v37, 16  ;;  %v5405_v22 = vrot.slane %v4960_v46, 1  ;;  %v5176_v30 = vor.u32 %v5174_v36, %v16886_v28  ;;  %v3427_v34 = vpop.f32.mrb[64].mxu1  ;;  %v21103_v36 = vld [vmem:[#allocation50_spill] sm:$0xff] }
 0x3b8   :  { %v4054_v40 = vmul.f32 %v3984_v47, %v16844_v0  ;;  %v16995_v59 = vadd.f32 %v16664_v29, %v16896_v50  ;;  %v3496_v8 = vmul.f32 %v16989_v23, %v16989_v23  ;;  %v4329_v2 = vmul.f32 %v4259_v3, %v16971_v63  ;;  %v11157_v12 = vpop.f32.mrb[65].mxu1 }
 0x3b9   :  { %v4468_v7 = vadd.f32 %v4398_v27, %v16955_v33  ;;  %v16998_v32 = vrot.slane %v5178_v42, 1  ;;  %v5406_v24 = vsel %vm2127_vm1, %v16848_v49, %v5405_v22  ;;  %v17011_v50 = vsel %vm1388_vm0, %v16890_v25, %v5799_v44  ;;  %v3430_v27 = vpop.f32.mrb[66].mxu1 }
 0x3ba   :  { %v4122_v0 = vmul.f32 %v15839_v10, %v4054_v40  ;;  %5476 = vrot.lane.b32.xlu1 %v5406_v24, %s12559_s19  ;;  %v3497_v28 = vmul.f32 %v16995_v59, %v16995_v59  ;;  %21102 = vst [vmem:[#allocation93_spill] sm:$0xff] %v17011_v50  ;;  %v3566_v47 = vmul.f32 %v3496_v8, %v16989_v23  ;;  %12246 = vtanh.f32 %v4536_v20 }
 0x3bb   :  { %v4538_v46 = vmul.f32 0.7978846, %v4468_v7  ;;  %v5181_v49 = vsel %vm861_vm2, %v5176_v30, %v16998_v32  ;;  %v4961_v3 = vmul.bf16 %v16965_v19, %v21103_v36  ;;  %v17018_v42 = vpop.eup %12240  ;;  %v17027_v44 = vadd.f32 %v16664_v29, %v16926_v31  ;;  %v11158_v30 = vpop.f32.mrb[67].mxu1 }
 0x3bc   :  { %v17021_v40 = vadd.f32 %v4122_v0, %v15831_v38  ;;  %5301 = vrot.lane.b32.xlu0 %v5181_v49, %s12560_s22  ;;  %v3567_v25 = vmul.f32 %v3497_v28, %v16995_v59  ;;  %12248 = vtanh.f32 %v4537_v17  ;;  %v3636_v24 = vmul.f32 0.044715, %v3566_v47 }
 0x3bd   :  { %v12243_v7 = vpop.eup %12242  ;;  %v17029_v8 = vrot.slane %v4961_v3, 1  ;;  %v17033_v20 = vadd.f32 %v16664_v29, %v16936_v18  ;;  %v4399_v12 = vmul.f32 0.044715, %v4329_v2  ;;  %12250 = vtanh.f32 %v4538_v46 }
 0x3be   :  { %v17035_v0 = vpop.eup %12244  ;;  %v4260_v28 = vmul.f32 %v17021_v40, %v17021_v40  ;;  %v3915_v49 = vadd.f32 1.0, %v12243_v7  ;;  %v3637_v36 = vmul.f32 0.044715, %v3567_v25  ;;  %6027 = vrot.lane.b32.xlu1 %v17011_v50, %s12559_s19  ;;  %v3706_v31 = vadd.f32 %v3636_v24, %v16989_v23 }
 0x3bf   :  { %v3498_v17 = vmul.f32 %v17027_v44, %v17027_v44  ;;  %v3499_v18 = vmul.f32 %v17033_v20, %v17033_v20  ;;  %v5408_v25 = vsel %vm2127_vm1, %v5405_v22, %v17029_v8  ;;  %v17056_v24 = vadd.f32 %v16664_v29, %v16959_v13 }
 0x3c0   :  { %v4330_v47 = vmul.f32 %v4260_v28, %v17021_v40  ;;  %v3985_v2 = vmul.f32 0.5, %v3915_v49  ;;  %v3707_v3 = vadd.f32 %v3637_v36, %v16995_v59  ;;  %5959 = vrot.lane.b32.xlu0 %v17011_v50, %s12561_s21  ;;  %v3776_v46 = vmul.f32 0.7978846, %v3706_v31 }
 0x3c1   :  { %v3568_v30 = vmul.f32 %v3498_v17, %v17027_v44  ;;  %v3569_v7 = vmul.f32 %v3499_v18, %v17033_v20  ;;  %v17062_v36 = vadd.f32 %v16664_v29, %v16967_v43  ;;  %v3500_v17 = vmul.f32 %v17056_v24, %v17056_v24 }
 0x3c2   :  { %v4400_v55 = vmul.f32 0.044715, %v4330_v47  ;;  %v4055_v28 = vmul.f32 %v3985_v2, %v16908_v15  ;;  %v3777_v49 = vmul.f32 0.7978846, %v3707_v3  ;;  %5478 = vrot.lane.b32.xlu1 %v5408_v25, %s12559_s19  ;;  %12252 = vtanh.f32 %v3776_v46 }
 0x3c3   :  { %v3638_v22 = vmul.f32 0.044715, %v3568_v30  ;;  %v3639_v31 = vmul.f32 0.044715, %v3569_v7  ;;  %v4469_v18 = vadd.f32 %v4399_v12, %v16971_v63  ;;  %v3501_v15 = vmul.f32 %v17062_v36, %v17062_v36 }
 0x3c4   :  { %v4123_v13 = vmul.f32 %v15839_v10, %v4055_v28  ;;  %12254 = vtanh.f32 %v3777_v49  ;;  %v3570_v43 = vmul.f32 %v3500_v17, %v17056_v24  ;;  %v17074_v3 = vadd.f32 %v16664_v29, %v3427_v34  ;;  %v17076_v25 = vpop.eup %12246 }
 0x3c5   :  { %v3708_v47 = vadd.f32 %v3638_v22, %v17027_v44  ;;  %v3709_v2 = vadd.f32 %v3639_v31, %v17033_v20  ;;  %v4470_v46 = vadd.f32 %v4400_v55, %v17021_v40  ;;  %v3571_v30 = vmul.f32 %v3501_v15, %v17062_v36 }
 0x3c6   :  { %v17080_v12 = vadd.f32 %v4123_v13, %v15831_v38  ;;  %v17084_v7 = vadd.f32 %v16664_v29, %v3430_v27  ;;  %v17086_v28 = vpop.eup %12248  ;;  %v3640_v31 = vmul.f32 0.044715, %v3570_v43  ;;  %v3502_v34 = vmul.f32 %v17074_v3, %v17074_v3 }
 0x3c7   :  { %v3778_v49 = vmul.f32 0.7978846, %v3708_v47  ;;  %v3779_v22 = vmul.f32 0.7978846, %v3709_v2  ;;  %v4539_v17 = vmul.f32 0.7978846, %v4469_v18  ;;  %v17094_v15 = vpop.eup %12250 }
 0x3c8   :  { %v4261_v55 = vmul.f32 %v17080_v12, %v17080_v12  ;;  %v3641_v9 = vmul.f32 0.044715, %v3571_v30  ;;  %v3503_v13 = vmul.f32 %v17084_v7, %v17084_v7  ;;  %v3710_v29 = vadd.f32 %v3640_v31, %v17056_v24 }
 0x3c9   :  { %12256 = vtanh.f32 %v3778_v49  ;;  %v3572_v27 = vmul.f32 %v3502_v34, %v17074_v3  ;;  %v4540_v43 = vmul.f32 0.7978846, %v4470_v46  ;;  %v5942_v49 = vpop.permute.xlu0 %5941  ;;  %v4674_v34 = vadd.f32 1.0, %v17018_v42 }
 0x3ca   :  { %v4331_v47 = vmul.f32 %v4261_v55, %v17080_v12  ;;  %12258 = vtanh.f32 %v3779_v22  ;;  %v3711_v2 = vadd.f32 %v3641_v9, %v17062_v36  ;;  %v3573_v18 = vmul.f32 %v3503_v13, %v17084_v7 }
 0x3cb   :  { %v3780_v5 = vmul.f32 0.7978846, %v3710_v29  ;;  %v3642_v30 = vmul.f32 0.044715, %v3572_v27  ;;  %12260 = vtanh.f32 %v4539_v17  ;;  %v4675_v22 = vadd.f32 1.0, %v17035_v0 }
 0x3cc   :  { %v4401_v52 = vmul.f32 0.044715, %v4331_v47  ;;  %v3781_v51 = vmul.f32 0.7978846, %v3711_v2  ;;  %v3643_v50 = vmul.f32 0.044715, %v3573_v18  ;;  %v12253_v21 = vpop.eup %12252 }
 0x3cd   :  { %12262 = vtanh.f32 %v3780_v5  ;;  %v3712_v31 = vadd.f32 %v3642_v30, %v17074_v3  ;;  %v3916_v13 = vadd.f32 1.0, %v12253_v21  ;;  %v4744_v27 = vmul.f32 0.5, %v4674_v34  ;;  %v21105_v30 = vld [vmem:[#allocation84_spill] sm:$0xff]  ;;  %v21106_v21 = vld [vmem:[#allocation49_spill] sm:$0xff] }
 0x3ce   :  { %v12255_v55 = vpop.eup %12254  ;;  %v4471_v9 = vadd.f32 %v4401_v52, %v17080_v12  ;;  %12264 = vtanh.f32 %v3781_v51  ;;  %v3713_v46 = vadd.f32 %v3643_v50, %v17084_v7  ;;  %v4745_v47 = vmul.f32 0.5, %v4675_v22  ;;  %v17106_v5 = vpop.permute.xlu1 %6011  ;;  %v21107_v50 = vld [vmem:[#allocation72_spill] sm:$0xff] }
 0x3cf   :  { %v3917_v17 = vadd.f32 1.0, %v12255_v55  ;;  %v3782_v29 = vmul.f32 0.7978846, %v3712_v31  ;;  %12266 = vtanh.f32 %v4540_v43  ;;  %v3986_v2 = vmul.f32 0.5, %v3916_v13  ;;  %21104 = vst [vmem:[#allocation94_spill] sm:$0xff] %v17106_v5 }
 0x3d0   :  { %v3783_v18 = vmul.f32 0.7978846, %v3713_v46  ;;  %v6097_v42 = vsel %vm6067_vm12, %v21105_v30, %v5942_v49  ;;  %v4541_v0 = vmul.f32 0.7978846, %v4471_v9  ;;  %v6229_v51 = vsel %vm5606_vm11, %v5942_v49, %v17106_v5  ;;  %v21108_v9 = vld [vmem:[#allocation51_spill] sm:$0xff]  ;;  %v21109_v46 = vld [vmem:[#allocation54_spill] sm:$0xff] }
 0x3d1   :  { %v3987_v19 = vmul.f32 0.5, %v3917_v17  ;;  %12268 = vtanh.f32 %v3782_v29  ;;  %v4056_v52 = vmul.f32 %v3986_v2, %v16989_v23  ;;  %6621 = vmatprep.mubr.bf16.mxu1 %v6229_v51  ;;  %v4814_v43 = vmul.f32 %v4744_v27, %v16869_v4  ;;  %v12460_v30 = vld [vmem:[%s20653_s3 + $0xd8] sm:$0xff]  }
 0x3d2   :  { %v4815_v34 = vmul.f32 %v4745_v47, %v16880_v53  ;;  %12270 = vtanh.f32 %v3783_v18  ;;  %6622 = vmatmul.mubr.bf16.gmra.mrb[96].mxu1 %v6097_v42  ;;  %v5182_v4 = vshrl.u32 %v16979_v37, 16 }
 0x3d3   :  { %v12257_v22 = vpop.eup %12256  ;;  %v4057_v55 = vmul.f32 %v3987_v19, %v16995_v59  ;;  %v4124_v17 = vmul.f32 %v15839_v10, %v4056_v52  ;;  %12272 = vtanh.f32 %v4541_v0  ;;  %v4676_v59 = vadd.f32 1.0, %v17076_v25 }
 0x3d4   :  { %v12259_v23 = vpop.eup %12258  ;;  %v3918_v29 = vadd.f32 1.0, %v12257_v22  ;;  %v17123_v2 = vpack.c.bf16 %v4815_v34, %v4814_v43  ;;  %v5184_v37 = vor.u32 %v5182_v4, %v16998_v32  ;;  %v4677_v52 = vadd.f32 1.0, %v17086_v28 }
 0x3d5   :  { %v4125_v53 = vmul.f32 %v15839_v10, %v4057_v55  ;;  %v3919_v19 = vadd.f32 1.0, %v12259_v23  ;;  %v17128_v27 = vpop.eup %12260  ;;  %v17131_v47 = vadd.f32 %v4124_v17, %v15831_v38  ;;  %v17145_v43 = vadd.f32 1.0, %v17094_v15 }
 0x3d6   :  { %21110 = vst [vmem:[#allocation84_spill] sm:$0xff] %v17123_v2  ;;  %v3988_v18 = vmul.f32 0.5, %v3918_v29  ;;  %v17137_v42 = vmul.bf16 %v12460_v30, %v17123_v2  ;;  %v4747_v31 = vmul.f32 0.5, %v4677_v52 }
 0x3d7   :  { %v12263_v0 = vpop.eup %12262  ;;  %v17141_v51 = vadd.f32 %v4125_v53, %v15831_v38  ;;  %v3989_v25 = vmul.f32 0.5, %v3919_v19  ;;  %v4262_v22 = vmul.f32 %v17131_v47, %v17131_v47  ;;  %v4746_v53 = vmul.f32 0.5, %v4676_v59 }
 0x3d8   :  { %v12265_v34 = vpop.eup %12264  ;;  %v4058_v55 = vmul.f32 %v3988_v18, %v17027_v44  ;;  %v3920_v23 = vadd.f32 1.0, %v12263_v0  ;;  %v5186_v17 = vshll.u32 %v17137_v42, 16 }
 0x3d9   :  { %v4263_v32 = vmul.f32 %v17141_v51, %v17141_v51  ;;  %v4059_v29 = vmul.f32 %v3989_v25, %v17033_v20  ;;  %v3921_v4 = vadd.f32 1.0, %v12265_v34  ;;  %v17154_v28 = vpop.eup %12266  ;;  %v4332_v15 = vmul.f32 %v4262_v22, %v17131_v47 }
 0x3da   :  { %v4126_v19 = vmul.f32 %v15839_v10, %v4058_v55  ;;  %v3990_v30 = vmul.f32 0.5, %v3920_v23  ;;  %v17158_v49 = vrot.slane %v5186_v17, 1  ;;  %v5463_v34 = vpop.permute.xlu1 %5462 }
 0x3db   :  { %v12269_v44 = vpop.eup %12268  ;;  %v4333_v18 = vmul.f32 %v4263_v32, %v17141_v51  ;;  %v4127_v0 = vmul.f32 %v15839_v10, %v4059_v29  ;;  %v3991_v13 = vmul.f32 0.5, %v3921_v4  ;;  %v4402_v5 = vmul.f32 0.044715, %v4332_v15 }
 0x3dc   :  { %v17163_v20 = vadd.f32 %v4126_v19, %v15831_v38  ;;  %v4060_v59 = vmul.f32 %v3990_v30, %v17056_v24  ;;  %v3922_v25 = vadd.f32 1.0, %v12269_v44  ;;  %v12271_v22 = vpop.eup %12270  ;;  %v5286_v32 = vpop.permute.xlu0 %5285  ;;  %v5189_v29 = vsel %vm861_vm2, %v5184_v37, %v17158_v49 }
 0x3dd   :  { %v4403_v55 = vmul.f32 0.044715, %v4333_v18  ;;  %v17167_v23 = vadd.f32 %v4127_v0, %v15831_v38  ;;  %v4061_v17 = vmul.f32 %v3991_v13, %v17062_v36  ;;  %v4472_v52 = vadd.f32 %v4402_v5, %v17131_v47  ;;  %5303 = vrot.lane.b32.xlu0 %v5189_v29, %s12560_s22  ;;  %v17177_v19 = vpop.eup %12272  ;;  %v21111_v0 = vld [vmem:[#allocation52_spill] sm:$0xff] }
 0x3de   :  { %v4264_v4 = vmul.f32 %v17163_v20, %v17163_v20  ;;  %v4128_v24 = vmul.f32 %v15839_v10, %v4060_v59  ;;  %v3992_v15 = vmul.f32 0.5, %v3922_v25  ;;  %v3923_v37 = vadd.f32 1.0, %v12271_v22 }
 0x3df   :  { %v4473_v30 = vadd.f32 %v4403_v55, %v17141_v51  ;;  %v4265_v36 = vmul.f32 %v17167_v23, %v17167_v23  ;;  %v4129_v13 = vmul.f32 %v15839_v10, %v4061_v17  ;;  %v4962_v59 = vmul.bf16 %v17123_v2, %v21111_v0 }
 0x3e0   :  { %v4334_v5 = vmul.f32 %v4264_v4, %v17163_v20  ;;  %v17185_v44 = vadd.f32 %v4128_v24, %v15831_v38  ;;  %v17188_v18 = vmul.f32 %v3992_v15, %v17074_v3  ;;  %v3993_v29 = vmul.f32 0.5, %v3923_v37  ;;  %v5944_v61 = vpop.permute.xlu0 %5943  ;;  %v17201_v24 = vpop.permute.xlu1 %6013 }
 0x3e1   :  { %v4335_v25 = vmul.f32 %v4265_v36, %v17167_v23  ;;  %v17194_v55 = vadd.f32 %v4129_v13, %v15831_v38  ;;  %v4816_v10 = vmul.f32 %v4746_v53, %v16929_v54  ;;  %v4542_v22 = vmul.f32 0.7978846, %v4472_v52  ;;  %21112 = vst [vmem:[#allocation72_spill] sm:$0xff] %v17201_v24 }
 0x3e2   :  { %v4404_v17 = vmul.f32 0.044715, %v4334_v5  ;;  %v4266_v4 = vmul.f32 %v17185_v44, %v17185_v44  ;;  %v4268_v3 = vmul.f32 %v17188_v18, %v17188_v18  ;;  %v4543_v15 = vmul.f32 0.7978846, %v4473_v30 }
 0x3e3   :  { %v4405_v0 = vmul.f32 0.044715, %v4335_v25  ;;  %v4267_v38 = vmul.f32 %v17194_v55, %v17194_v55  ;;  %v17206_v36 = vmul.f32 %v3993_v29, %v17084_v7  ;;  %v21113_v13 = vmul.bf16 %v21107_v50, %v21106_v21 }
 0x3e4   :  { %v4474_v54 = vadd.f32 %v4404_v17, %v17163_v20  ;;  %v4336_v53 = vmul.f32 %v4266_v4, %v17185_v44  ;;  %v4338_v52 = vmul.f32 %v4268_v3, %v17188_v18  ;;  %v6232_v4 = vsel %vm5606_vm11, %v5944_v61, %v17201_v24  ;;  %v5288_v3 = vpop.permute.xlu0 %5287  ;;  %v5465_v21 = vpop.permute.xlu1 %5464 }
 0x3e5   :  { %v5554_v37 = vsel %vm5498_vm10, %v21113_v13, %v5286_v32  ;;  %v4475_v30 = vadd.f32 %v4405_v0, %v17167_v23  ;;  %v4337_v5 = vmul.f32 %v4267_v38, %v17194_v55  ;;  %v4269_v25 = vmul.f32 %v17206_v36, %v17206_v36  ;;  %6629 = vmatprep.mubr.bf16.mxu1 %v6232_v4 }
 0x3e6   :  { %v5644_v7 = vsel %vm5606_vm11, %v5554_v37, %v5463_v34  ;;  %v4544_v29 = vmul.f32 0.7978846, %v4474_v54  ;;  %v4408_v17 = vmul.f32 0.044715, %v4338_v52  ;;  %v4817_v2 = vmul.f32 %v4747_v31, %v16941_v60 }
 0x3e7   :  { %12274 = vtanh.f32 %v4542_v22  ;;  %v4406_v50 = vmul.f32 0.044715, %v4336_v53  ;;  %v4339_v32 = vmul.f32 %v4269_v25, %v17206_v36  ;;  %v5801_v0 = vshrl.u32 %v5644_v7, 16 }
 0x3e8   :  { %12276 = vtanh.f32 %v4543_v15  ;;  %v4545_v38 = vmul.f32 0.7978846, %v4475_v30  ;;  %v4478_v13 = vadd.f32 %v4408_v17, %v17188_v18  ;;  %v5409_v34 = vrot.slane %v4962_v59, 1  ;;  %v5946_v15 = vpop.permute.xlu0 %5945 }
 0x3e9   :  { %v4407_v54 = vmul.f32 0.044715, %v4337_v5  ;;  %v4409_v52 = vmul.f32 0.044715, %v4339_v32  ;;  %v5803_v37 = vrot.slane %v5801_v0, 7  ;;  %v5804_v56 = vshll.u32 %v5644_v7, 16 }
 0x3ea   :  { %12278 = vtanh.f32 %v4544_v29  ;;  %v4548_v24 = vmul.f32 0.7978846, %v4478_v13  ;;  %v6101_v60 = vsel %vm6067_vm12, %v21114_v39, %v5944_v61  ;;  %v21115_v31 = vmul.bf16 %v16495_v16, %v21108_v9 }
 0x3eb   :  { %v4476_v53 = vadd.f32 %v4406_v50, %v17185_v44  ;;  %v4479_v30 = vadd.f32 %v4409_v52, %v17206_v36  ;;  %v5806_v59 = vor.u32 %v5804_v56, %v5803_v37  ;;  %6630 = vmatmul.mubr.bf16.gmra.mrb[100].mxu1 %v6101_v60  ;;  %12280 = vtanh.f32 %v4545_v38 }
 0x3ec   :  { %v5557_v22 = vsel %vm5498_vm10, %v21115_v31, %v5288_v3  ;;  %v5410_v7 = vsel %vm2127_vm1, %v17029_v8, %v5409_v34  ;;  %v17236_v39 = vpack.c.bf16 %v4817_v2, %v4816_v10  ;;  %v4477_v16 = vadd.f32 %v4407_v54, %v17194_v55  ;;  %v12461_v8 = vld [vmem:[%s20653_s3 + $0xe0] sm:$0xff]  }
 0x3ed   :  { %v5646_v5 = vsel %vm5606_vm11, %v5557_v22, %v5465_v21  ;;  %v4549_v61 = vmul.f32 0.7978846, %v4479_v30  ;;  %v17241_v17 = vsel %vm1388_vm0, %v16952_v14, %v5806_v59  ;;  %v17243_v4 = vpop.permute.xlu1 %6015  ;;  %12282 = vtanh.f32 %v4548_v24  ;;  %v5290_v21 = vpop.permute.xlu0 %5289  ;;  %v21116_v14 = vld [vmem:[#allocation53_spill] sm:$0xff] }
 0x3ee   :  { %v5808_v25 = vshrl.u32 %v5646_v5, 16  ;;  %v5811_v29 = vshll.u32 %v5646_v5, 16  ;;  %6029 = vrot.lane.b32.xlu1 %v17241_v17, %s12559_s19  ;;  %5961 = vrot.lane.b32.xlu0 %v17241_v17, %s12561_s21  ;;  %v4893_v2 = vmul.bf16 %v12461_v8, %v17236_v39  ;;  %v4963_v10 = vmul.bf16 %v17236_v39, %v21116_v14 }
 0x3ef   :  { %v4546_v3 = vmul.f32 0.7978846, %v4476_v53  ;;  %12284 = vtanh.f32 %v4549_v61  ;;  %v5190_v24 = vshrl.u32 %v17137_v42, 16  ;;  %v4679_v50 = vadd.f32 1.0, %v17128_v27 }
 0x3f0   :  { %v17245_v56 = vrot.slane %v5808_v25, 7  ;;  %v5194_v0 = vshll.u32 %v4893_v2, 16  ;;  %v17260_v38 = vrot.slane %v4963_v10, 1  ;;  %v4748_v13 = vmul.f32 0.5, %v17145_v43 }
 0x3f1   :  { %v12275_v54 = vpop.eup %12274  ;;  %v4547_v52 = vmul.f32 0.7978846, %v4477_v16  ;;  %v21117_v60 = vmul.bf16 %v16528_v45, %v21109_v46  ;;  %v4749_v22 = vmul.f32 0.5, %v4679_v50  ;;  %v6235_v42 = vsel %vm5606_vm11, %v5946_v15, %v17243_v4  ;;  %v5467_v53 = vpop.permute.xlu1 %5466  ;;  %v12462_v50 = vld [vmem:[%s20653_s3 + $0xe8] sm:$0xff]  }
 0x3f2   :  { %v5813_v32 = vor.u32 %v5811_v29, %v17245_v56  ;;  %v12277_v27 = vpop.eup %12276  ;;  %5480 = vrot.lane.b32.xlu1 %v5410_v7, %s12559_s19  ;;  %v5192_v30 = vor.u32 %v5190_v24, %v17158_v49  ;;  %v5196_v59 = vrot.slane %v5194_v0, 1  ;;  %v5412_v43 = vsel %vm2127_vm1, %v5409_v34, %v17260_v38  ;;  %v5948_v5 = vpop.permute.xlu0 %5947  ;;  %6637 = vmatprep.mubr.bf16.mxu1 %v6235_v42 }
 0x3f3   :  { %v5560_v31 = vsel %vm5498_vm10, %v21117_v60, %v5290_v21  ;;  %v6105_v45 = vsel %vm6067_vm12, %v16470_v26, %v5946_v15  ;;  %v4818_v16 = vmul.f32 %v4748_v13, %v16955_v33  ;;  %v4819_v61 = vmul.f32 %v4749_v22, %v16971_v63 }
 0x3f4   :  { %v17276_v25 = vsel %vm1388_vm0, %v5803_v37, %v5813_v32  ;;  %6638 = vmatmul.mubr.bf16.gmra.mrb[104].mxu1 %v6105_v45  ;;  %v5648_v7 = vsel %vm5606_vm11, %v5560_v31, %v5467_v53  ;;  %v17281_v49 = vpop.eup %12278  ;;  %12286 = vtanh.f32 %v4546_v3  ;;  %v5197_v34 = vsel %vm861_vm2, %v5192_v30, %v5196_v59  ;;  %v21119_v31 = vld [vmem:[#allocation55_spill] sm:$0xff] }
 0x3f5   :  { %v5815_v29 = vshrl.u32 %v5648_v7, 16  ;;  %12288 = vtanh.f32 %v4547_v52  ;;  %5305 = vrot.lane.b32.xlu0 %v5197_v34, %s12560_s22  ;;  %v17285_v26 = vpack.c.bf16 %v4819_v61, %v4818_v16  ;;  %v4680_v33 = vadd.f32 1.0, %v17154_v28  ;;  %v17291_v15 = vpop.eup %12280 }
 0x3f6   :  { %v17287_v37 = vpop.permute.xlu1 %6017  ;;  %v4681_v63 = vadd.f32 1.0, %v17177_v19  ;;  %6031 = vrot.lane.b32.xlu1 %v17276_v25, %s12559_s19  ;;  %v5198_v21 = vshrl.u32 %v4893_v2, 16  ;;  %v5818_v10 = vshll.u32 %v5648_v7, 16  ;;  %v5292_v3 = vpop.permute.xlu0 %5291  ;;  %v21118_v19 = vld [vmem:[#allocation56_spill] sm:$0xff]  ;;  %v6109_v60 = vsel %vm6067_vm12, %v16492_v62, %v5948_v5 }
 0x3f7   :  { %v17295_v8 = vrot.slane %v5815_v29, 7  ;;  %v6238_v24 = vsel %vm5606_vm11, %v5948_v5, %v17287_v37  ;;  %v4894_v28 = vmul.bf16 %v12462_v50, %v17285_v26  ;;  %v4920_v32 = vmul.bf16 %v16568_v1, %v21118_v19  ;;  %v12283_v2 = vpop.eup %12282 }
 0x3f8   :  { %6645 = vmatprep.mubr.bf16.mxu1 %v6238_v24  ;;  %v4750_v0 = vmul.f32 0.5, %v4680_v33  ;;  %v4751_v13 = vmul.f32 0.5, %v4681_v63  ;;  %v4964_v22 = vmul.bf16 %v17285_v26, %v21119_v31  ;;  %v4682_v42 = vadd.f32 1.0, %v12275_v54 }
 0x3f9   :  { %v5820_v52 = vor.u32 %v5818_v10, %v17295_v8  ;;  %v12285_v53 = vpop.eup %12284  ;;  %5963 = vrot.lane.b32.xlu0 %v17276_v25, %s12561_s21  ;;  %v5200_v30 = vor.u32 %v5198_v21, %v5196_v59  ;;  %v5202_v45 = vshll.u32 %v4894_v28, 16  ;;  %v5563_v1 = vsel %vm5498_vm10, %v4920_v32, %v5292_v3  ;;  %v21120_v21 = vld [vmem:[#allocation57_spill] sm:$0xff] }
 0x3fa   :  { %v5469_v16 = vpop.permute.xlu1 %5468  ;;  %v4821_v61 = vmul.f32 %v4751_v13, %v17080_v12  ;;  %v4688_v7 = vadd.f32 1.0, %v12283_v2  ;;  %5482 = vrot.lane.b32.xlu1 %v5412_v43, %s12559_s19  ;;  %v5950_v34 = vpop.permute.xlu0 %5949  ;;  %v4820_v5 = vmul.f32 %v4750_v0, %v17021_v40  ;;  %v4683_v54 = vadd.f32 1.0, %v12277_v27 }
 0x3fb   :  { %v5650_v62 = vsel %vm5606_vm11, %v5563_v1, %v5469_v16  ;;  %v4689_v29 = vadd.f32 1.0, %v12285_v53  ;;  %v5204_v33 = vrot.slane %v5202_v45, 1  ;;  %v17319_v59 = vsel %vm1388_vm0, %v17245_v56, %v5820_v52 }
 0x3fc   :  { %6646 = vmatmul.mubr.bf16.gmra.mrb[108].mxu1 %v6109_v60  ;;  %v5822_v63 = vshrl.u32 %v5650_v62, 16  ;;  %v4921_v12 = vmul.bf16 %v16602_v41, %v21120_v21  ;;  %v17323_v10 = vpack.c.bf16 %v4821_v61, %v4820_v5  ;;  %v5413_v43 = vrot.slane %v4964_v22, 1  ;;  %v12463_v41 = vld [vmem:[%s20653_s3 + $0xf0] sm:$0xff]   ;;  %v21121_v61 = vld [vmem:[#allocation58_spill] sm:$0xff] }
 0x3fd   :  { %v4752_v3 = vmul.f32 0.5, %v4682_v42  ;;  %v5205_v24 = vsel %vm861_vm2, %v5200_v30, %v5204_v33  ;;  %v5825_v40 = vshll.u32 %v5650_v62, 16  ;;  %v5206_v32 = vshrl.u32 %v4894_v28, 16 }
 0x3fe   :  { %v17326_v50 = vrot.slane %v5822_v63, 7  ;;  %v17328_v27 = vpop.permute.xlu1 %6019  ;;  %v12287_v0 = vpop.eup %12286  ;;  %v4758_v13 = vmul.f32 0.5, %v4688_v7  ;;  %5307 = vrot.lane.b32.xlu0 %v5205_v24, %s12560_s22  ;;  %6033 = vrot.lane.b32.xlu1 %v17319_v59, %s12559_s19  ;;  %v4895_v2 = vmul.bf16 %v12463_v41, %v17323_v10  ;;  %v5414_v52 = vsel %vm2127_vm1, %v17260_v38, %v5413_v43 }
 0x3ff   :  { %v5294_v56 = vpop.permute.xlu0 %5293  ;;  %v4753_v60 = vmul.f32 0.5, %v4683_v54  ;;  %v12289_v22 = vpop.eup %12288  ;;  %v4759_v28 = vmul.f32 0.5, %v4689_v29  ;;  %v6241_v53 = vsel %vm5606_vm11, %v5950_v34, %v17328_v27  ;;  %v6113_v30 = vsel %vm6067_vm12, %v16624_v57, %v5950_v34 }
 0x400   :  { %v5827_v42 = vor.u32 %v5825_v40, %v17326_v50  ;;  %v5210_v45 = vshll.u32 %v4895_v2, 16  ;;  %6653 = vmatprep.mubr.bf16.mxu1 %v6241_v53  ;;  %v4822_v1 = vmul.f32 %v4752_v3, %v17131_v47  ;;  %v4965_v38 = vmul.bf16 %v17323_v10, %v21121_v61 }
 0x401   :  { %v4823_v16 = vmul.f32 %v4753_v60, %v17141_v51  ;;  %v5566_v7 = vsel %vm5498_vm10, %v4921_v12, %v5294_v56  ;;  %v5208_v62 = vor.u32 %v5206_v32, %v5204_v33  ;;  %v4684_v54 = vadd.f32 1.0, %v17281_v49  ;;  %v21122_v33 = vld [vmem:[#allocation59_spill] sm:$0xff]  ;;  %v12464_v32 = vld [vmem:[%s20653_s3 + $0xf8] sm:$0xff]  }
 0x402   :  { %v5471_v5 = vpop.permute.xlu1 %5470  ;;  %v4685_v29 = vadd.f32 1.0, %v17291_v15  ;;  %5965 = vrot.lane.b32.xlu0 %v17319_v59, %s12561_s21  ;;  %v5212_v34 = vrot.slane %v5210_v45, 1  ;;  %5484 = vrot.lane.b32.xlu1 %v5414_v52, %s12559_s19  ;;  %v5415_v63 = vrot.slane %v4965_v38, 1  ;;  %v4922_v3 = vmul.bf16 %v16648_v35, %v21122_v33 }
 0x403   :  { %v5952_v57 = vpop.permute.xlu0 %5951  ;;  %v5652_v47 = vsel %vm5606_vm11, %v5566_v7, %v5471_v5  ;;  %v17355_v51 = vpack.c.bf16 %v4823_v16, %v4822_v1  ;;  %v17361_v49 = vsel %vm1388_vm0, %v17295_v8, %v5827_v42  ;;  %v4754_v15 = vmul.f32 0.5, %v4684_v54  ;;  %v21123_v42 = vld [vmem:[#allocation60_spill] sm:$0xff] }
 0x404   :  { %6654 = vmatmul.mubr.bf16.gmra.mrb[112].mxu1 %v6113_v30  ;;  %v5829_v12 = vshrl.u32 %v5652_v47, 16  ;;  %v4829_v24 = vmul.f32 %v4759_v28, %v17206_v36  ;;  %v5213_v40 = vsel %vm861_vm2, %v5208_v62, %v5212_v34  ;;  %v5416_v41 = vsel %vm2127_vm1, %v5413_v43, %v5415_v63 }
 0x405   :  { %v4896_v56 = vmul.bf16 %v12464_v32, %v17355_v51  ;;  %v5832_v35 = vshll.u32 %v5652_v47, 16  ;;  %v4755_v8 = vmul.f32 0.5, %v4685_v29  ;;  %v4966_v53 = vmul.bf16 %v17355_v51, %v21123_v42 }
 0x406   :  { %v17370_v52 = vrot.slane %v5829_v12, 7  ;;  %v17372_v60 = vpop.permute.xlu1 %6021  ;;  %v4828_v36 = vmul.f32 %v4758_v13, %v17188_v18  ;;  %5309 = vrot.lane.b32.xlu0 %v5213_v40, %s12560_s22  ;;  %6035 = vrot.lane.b32.xlu1 %v17361_v49, %s12559_s19  ;;  %v5214_v30 = vshrl.u32 %v4895_v2, 16  ;;  %v4824_v16 = vmul.f32 %v4754_v15, %v17163_v20  ;;  %v12465_v15 = vld [vmem:[%s20653_s3 + $0x100] sm:$0xff]  }
 0x407   :  { %v5296_v28 = vpop.permute.xlu0 %5295  ;;  %v5218_v45 = vshll.u32 %v4896_v56, 16  ;;  %v6244_v43 = vsel %vm5606_vm11, %v5952_v57, %v17372_v60  ;;  %v4825_v38 = vmul.f32 %v4755_v8, %v17167_v23  ;;  %v5417_v7 = vrot.slane %v4966_v53, 1 }
 0x408   :  { %v5834_v1 = vor.u32 %v5832_v35, %v17370_v52  ;;  %6661 = vmatprep.mubr.bf16.mxu1 %v6244_v43  ;;  %v5216_v18 = vor.u32 %v5214_v30, %v5212_v34  ;;  %v4686_v62 = vadd.f32 1.0, %v12287_v0  ;;  %v4687_v5 = vadd.f32 1.0, %v12289_v22 }
 0x409   :  { %v5220_v13 = vrot.slane %v5218_v45, 1  ;;  %v5569_v54 = vsel %vm5498_vm10, %v4922_v3, %v5296_v28  ;;  %v17386_v2 = vpack.c.bf16 %v4825_v38, %v4824_v16  ;;  %v5418_v47 = vsel %vm2127_vm1, %v5415_v63, %v5417_v7 }
 0x40a   :  { %v5473_v29 = vpop.permute.xlu1 %5472  ;;  %v17389_v12 = vpack.c.bf16 %v4829_v24, %v4828_v36  ;;  %5967 = vrot.lane.b32.xlu0 %v17361_v49, %s12561_s21  ;;  %5486 = vrot.lane.b32.xlu1 %v5416_v41, %s12559_s19  ;;  %v6117_v0 = vsel %vm6067_vm12, %v16684_v48, %v5952_v57  ;;  %v4756_v34 = vmul.f32 0.5, %v4686_v62  ;;  %v17400_v63 = vsel %vm1388_vm0, %v17326_v50, %v5834_v1  ;;  %v21124_v41 = vld [vmem:[#allocation62_spill] sm:$0xff]  ;;  %v12466_v50 = vld [vmem:[%s20653_s3 + $0x110] sm:$0xff]  }
 0x40b   :  { %v5954_v20 = vpop.permute.xlu0 %5953  ;;  %v5221_v23 = vsel %vm861_vm2, %v5216_v18, %v5220_v13  ;;  %v5654_v22 = vsel %vm5606_vm11, %v5569_v54, %v5473_v29  ;;  %v4897_v24 = vmul.bf16 %v12465_v15, %v17386_v2  ;;  %v5222_v40 = vshrl.u32 %v4896_v56, 16  ;;  %v21125_v18 = vld [vmem:[#allocation66_spill] sm:$0xff] }
 0x40c   :  { %6662 = vmatmul.mubr.bf16.gmra.mrb[116].mxu1 %v6117_v0  ;;  %v5836_v3 = vshrl.u32 %v5654_v22, 16  ;;  %v4757_v32 = vmul.f32 0.5, %v4687_v5  ;;  %v4967_v48 = vmul.bf16 %v17386_v2, %v21124_v41  ;;  %v5839_v35 = vshll.u32 %v5654_v22, 16  ;;  %v21126_v5 = vld [vmem:[#allocation61_spill] sm:$0xff] }
 0x40d   :  { %v5226_v53 = vshll.u32 %v4897_v24, 16  ;;  %v17414_v36 = vmul.bf16 %v12466_v50, %v17389_v12  ;;  %v4826_v28 = vmul.f32 %v4756_v34, %v17185_v44  ;;  %v5224_v16 = vor.u32 %v5222_v40, %v5220_v13  ;;  %v21127_v34 = vld [vmem:[#allocation64_spill] sm:$0xff] }
 0x40e   :  { %v5838_v57 = vrot.slane %v5836_v3, 7  ;;  %v17408_v8 = vpop.permute.xlu1 %6023  ;;  %5311 = vrot.lane.b32.xlu0 %v5221_v23, %s12560_s22  ;;  %6037 = vrot.lane.b32.xlu1 %v17400_v63, %s12559_s19  ;;  %v4827_v30 = vmul.f32 %v4757_v32, %v17194_v55  ;;  %v5419_v45 = vrot.slane %v4967_v48, 1  ;;  %v4969_v62 = vmul.bf16 %v17389_v12, %v21125_v18 }
 0x40f   :  { %v6247_v56 = vsel %vm5606_vm11, %v5954_v20, %v17408_v8  ;;  %v5298_v1 = vpop.permute.xlu0 %5297  ;;  %v5228_v38 = vrot.slane %v5226_v53, 1  ;;  %v4923_v54 = vmul.bf16 %v16699_v6, %v21126_v5  ;;  %v6121_v55 = vsel %vm6067_vm12, %v16730_v58, %v5954_v20  ;;  %v12467_v6 = vld [vmem:[%s20653_s3 + $0x108] sm:$0xff]  }
 0x410   :  { %v5841_v43 = vor.u32 %v5839_v35, %v5838_v57  ;;  %6669 = vmatprep.mubr.bf16.mxu1 %v6247_v56  ;;  %v17427_v29 = vpack.c.bf16 %v4827_v30, %v4826_v28  ;;  %v5420_v23 = vsel %vm2127_vm1, %v5417_v7, %v5419_v45  ;;  %v5242_v0 = vshll.u32 %v17414_v36, 16 }
 0x411   :  { %v5229_v44 = vsel %vm861_vm2, %v5224_v16, %v5228_v38  ;;  %v5572_v13 = vsel %vm5498_vm10, %v4923_v54, %v5298_v1  ;;  %v5230_v15 = vshrl.u32 %v4897_v24, 16  ;;  %v17449_v40 = vrot.slane %v4969_v62, 1 }
 0x412   :  { %5969 = vrot.lane.b32.xlu0 %v17400_v63, %s12561_s21  ;;  %5488 = vrot.lane.b32.xlu1 %v5418_v47, %s12559_s19  ;;  %v5475_v22 = vpop.permute.xlu1 %5474  ;;  %v4898_v7 = vmul.bf16 %v12467_v6, %v17427_v29  ;;  %v4968_v3 = vmul.bf16 %v17427_v29, %v21127_v34  ;;  %v17447_v20 = vsel %vm1388_vm0, %v17370_v52, %v5841_v43  ;;  %v5244_v35 = vrot.slane %v5242_v0, 1  ;;  %v21129_v0 = vld [vmem:[#allocation83_spill] sm:$0xff] }
 0x413   :  { %v5656_v58 = vsel %vm5606_vm11, %v5572_v13, %v5475_v22  ;;  %v5232_v48 = vor.u32 %v5230_v15, %v5228_v38  ;;  %v5956_v38 = vpop.permute.xlu0 %5955 }
 0x414   :  { %6670 = vmatmul.mubr.bf16.gmra.mrb[120].mxu1 %v6121_v55  ;;  %v5843_v47 = vshrl.u32 %v5656_v58, 16  ;;  %v5234_v32 = vshll.u32 %v4898_v7, 16  ;;  %v5421_v53 = vrot.slane %v4968_v3, 1  ;;  %v5846_v56 = vshll.u32 %v5656_v58, 16 }
 0x415   :  { %v5238_v30 = vshrl.u32 %v4898_v7, 16  ;;  %v6125_v55 = vsel %vm6067_vm12, %v16783_v11, %v5956_v38 }
 0x416   :  { %5313 = vrot.lane.b32.xlu0 %v5229_v44, %s12560_s22  ;;  %v5845_v50 = vrot.slane %v5843_v47, 7  ;;  %6039 = vrot.lane.b32.xlu1 %v17447_v20, %s12559_s19  ;;  %v5236_v28 = vrot.slane %v5234_v32, 1  ;;  %v5422_v52 = vsel %vm2127_vm1, %v5419_v45, %v5421_v53  ;;  %v5424_v24 = vsel %vm2127_vm1, %v5421_v53, %v17449_v40 }
 0x418   :  { %v5848_v43 = vor.u32 %v5846_v56, %v5845_v50  ;;  %v5237_v1 = vsel %vm861_vm2, %v5232_v48, %v5236_v28  ;;  %v5240_v16 = vor.u32 %v5238_v30, %v5236_v28  ;;  %v21130_v56 = vld [vmem:[#allocation65_spill] sm:$0xff]  ;;  %v21131_v28 = vld [vmem:[#allocation91_spill] sm:$0xff] }
 0x419   :  { %v4925_v30 = vmul.bf16 %v21131_v28, %v21130_v56 }
 0x41a   :  { %5971 = vrot.lane.b32.xlu0 %v17447_v20, %s12561_s21  ;;  %5490 = vrot.lane.b32.xlu1 %v5420_v23, %s12559_s19  ;;  %v5245_v54 = vsel %vm861_vm2, %v5240_v16, %v5244_v35  ;;  %v17467_v44 = vsel %vm1388_vm0, %v5838_v57, %v5848_v43  ;;  %v5300_v23 = vpop.permute.xlu0 %5299  ;;  %v21128_v57 = vld [vmem:[#allocation63_spill] sm:$0xff] }
 0x41b   :  { %v17460_v62 = vpop.permute.xlu1 %6025  ;;  %v4924_v13 = vmul.bf16 %v21129_v0, %v21128_v57  ;;  %v21182_v57 = vld [vmem:[#allocation23_spill] sm:$0xff] }
 0x41c   :  { %v6250_v45 = vsel %vm5606_vm11, %v5956_v38, %v17460_v62 }
 0x41d   :  { %6677 = vmatprep.mubr.bf16.mxu1 %v6250_v45  ;;  %v5575_v11 = vsel %vm5498_vm10, %v4924_v13, %v5300_v23  ;;  %v5246_v45 = vshrl.u32 %v17414_v36, 16  ;;  %v21133_v36 = vld [vmem:[#allocation68_spill] sm:$0xff] }
 0x41e   :  { %6678 = vmatmul.mubr.bf16.gmra.mrb[124].mxu1 %v6125_v55  ;;  %5315 = vrot.lane.b32.xlu0 %v5237_v1, %s12560_s22  ;;  %v5958_v22 = vpop.permute.xlu0 %5957 }
 0x41f   :  { %6041 = vrot.lane.b32.xlu1 %v17467_v44, %s12559_s19  ;;  %v5248_v23 = vor.u32 %v5246_v45, %v5244_v35  ;;  %v5425_v35 = vsel %vm2127_vm1, %v17449_v40, %v21133_v36  ;;  %v21181_v36 = vld [vmem:[#allocation26_spill] sm:$0xff] }
 0x422   :  { %5973 = vrot.lane.b32.xlu0 %v17467_v44, %s12561_s21 }
 0x423   :  { %5492 = vrot.lane.b32.xlu1 %v5422_v52, %s12559_s19  ;;  %v21132_v52 = vld [vmem:[#allocation90_spill] sm:$0xff] }
 0x424   :  { %v6129_v43 = vsel %vm6067_vm12, %v21132_v52, %v5958_v22 }
 0x426   :  { %5317 = vrot.lane.b32.xlu0 %v5245_v54, %s12560_s22 }
 0x42c   :  { %v5477_v6 = vpop.permute.xlu1 %5476 }
 0x42d   :  { %v5658_v7 = vsel %vm5606_vm11, %v5575_v11, %v5477_v6 }
 0x42e   :  { %v5850_v3 = vshrl.u32 %v5658_v7, 16  ;;  %v5853_v15 = vshll.u32 %v5658_v7, 16  ;;  %v5302_v32 = vpop.permute.xlu0 %5301 }
 0x42f   :  { %v5578_v1 = vsel %vm5498_vm10, %v4925_v30, %v5302_v32 }
 0x430   :  { %v5852_v58 = vrot.slane %v5850_v3, 7  ;;  %v17482_v47 = vpop.permute.xlu1 %6027  ;;  %v21134_v3 = vld [vmem:[#allocation67_spill] sm:$0xff] }
 0x431   :  { %v6253_v48 = vsel %vm5606_vm11, %v5958_v22, %v17482_v47 }
 0x432   :  { %v5855_v53 = vor.u32 %v5853_v15, %v5852_v58  ;;  %6685 = vmatprep.mubr.bf16.mxu1 %v6253_v48  ;;  %v21135_v15 = vld [vmem:[#allocation85_spill] sm:$0xff] }
 0x433   :  { %6686 = vmatmul.mubr.bf16.gmra.mrb[128].mxu1 %v6129_v43 }
 0x434   :  { %v5479_v16 = vpop.permute.xlu1 %5478  ;;  %v17492_v38 = vsel %vm1388_vm0, %v5845_v50, %v5855_v53  ;;  %v11991_v50 = vld [vmem:[%s20656_s6 + $0x88] sm:$0xff]   ;;  %v21136_v53 = vld [vmem:[#allocation87_spill] sm:$0xff] }
 0x435   :  { %v5660_v54 = vsel %vm5606_vm11, %v5578_v1, %v5479_v16  ;;  %5975 = vrot.lane.b32.xlu0 %v17492_v38, %s12561_s21  ;;  %6043 = vrot.lane.b32.xlu1 %v17492_v38, %s12559_s19 }
 0x436   :  { %v5857_v55 = vshrl.u32 %v5660_v54, 16  ;;  %v5860_v13 = vshll.u32 %v5660_v54, 16  ;;  %11162 = vmatpush3.bf16.msra.mxu1 %v11991_v50 }
 0x438   :  { %v5859_v0 = vrot.slane %v5857_v55, 7  ;;  %v21137_v55 = vld [vmem:[#allocation69_spill] sm:$0xff] }
 0x439   :  { %5319 = vrot.lane.b32.xlu0 %v5248_v23, %s12560_s22  ;;  %5494 = vrot.lane.b32.xlu1 %v5424_v24, %s12559_s19  ;;  %v5960_v24 = vpop.permute.xlu0 %5959  ;;  %v21138_v23 = vld [vmem:[#allocation84_spill] sm:$0xff] }
 0x43a   :  { %v5862_v22 = vor.u32 %v5860_v13, %v5859_v0  ;;  %v6133_v28 = vsel %vm6067_vm12, %v21136_v53, %v5960_v24  ;;  %v4927_v13 = vmul.bf16 %v21138_v23, %v21137_v55 }
 0x43c   :  { %v17506_v11 = vsel %vm1388_vm0, %v5852_v58, %v5862_v22  ;;  %v4926_v58 = vmul.bf16 %v21135_v15, %v21134_v3 }
 0x43d   :  { %5977 = vrot.lane.b32.xlu0 %v17506_v11, %s12561_s21  ;;  %6045 = vrot.lane.b32.xlu1 %v17506_v11, %s12559_s19 }
 0x441   :  { %5496 = vrot.lane.b32.xlu1 %v5425_v35, %s12559_s19  ;;  %v21139_v35 = vld [vmem:[#allocation93_spill] sm:$0xff] }
 0x44f   :  { %v5304_v6 = vpop.permute.xlu0 %5303 }
 0x450   :  { %v5581_v30 = vsel %vm5498_vm10, %v4926_v58, %v5304_v6 }
 0x460   :  { %v17516_v7 = vpop.permute.xlu1 %6029  ;;  %v5962_v48 = vpop.permute.xlu0 %5961 }
 0x461   :  { %v6256_v32 = vsel %vm5606_vm11, %v5960_v24, %v17516_v7  ;;  %v6137_v24 = vsel %vm6067_vm12, %v21139_v35, %v5962_v48 }
 0x462   :  { %6693 = vmatprep.mubr.bf16.mxu1 %v6256_v32 }
 0x463   :  { %6694 = vmatmul.mubr.bf16.gmra.mrb[132].mxu1 %v6133_v28 }
 0x464   :  { %v5481_v40 = vpop.permute.xlu1 %5480 }
 0x465   :  { %v5662_v52 = vsel %vm5606_vm11, %v5581_v30, %v5481_v40 }
 0x466   :  { %v5864_v43 = vshrl.u32 %v5662_v52, 16  ;;  %v5867_v54 = vshll.u32 %v5662_v52, 16 }
 0x467   :  { %v5306_v1 = vpop.permute.xlu0 %5305 }
 0x468   :  { %v5866_v16 = vrot.slane %v5864_v43, 7  ;;  %v17526_v45 = vpop.permute.xlu1 %6031  ;;  %v5584_v6 = vsel %vm5498_vm10, %v4927_v13, %v5306_v1 }
 0x469   :  { %v6259_v50 = vsel %vm5606_vm11, %v5962_v48, %v17526_v45 }
 0x46a   :  { %v5869_v22 = vor.u32 %v5867_v54, %v5866_v16  ;;  %6701 = vmatprep.mubr.bf16.mxu1 %v6259_v50 }
 0x46b   :  { %6702 = vmatmul.mubr.bf16.gmra.mrb[136].mxu1 %v6137_v24  ;;  %v5964_v15 = vpop.permute.xlu0 %5963 }
 0x46c   :  { %v5483_v58 = vpop.permute.xlu1 %5482  ;;  %v17536_v32 = vsel %vm1388_vm0, %v5859_v0, %v5869_v22  ;;  %v21140_v0 = vld [vmem:[#allocation74_spill] sm:$0xff]  ;;  %v6141_v23 = vsel %vm6067_vm12, %v17241_v17, %v5964_v15 }
 0x46d   :  { %v5664_v53 = vsel %vm5606_vm11, %v5584_v6, %v5483_v58  ;;  %5979 = vrot.lane.b32.xlu0 %v17536_v32, %s12561_s21  ;;  %6047 = vrot.lane.b32.xlu1 %v17536_v32, %s12559_s19  ;;  %v4928_v54 = vmul.bf16 %v17236_v39, %v21140_v0  ;;  %v21179_v0 = vld [vmem:[#allocation22_spill] sm:$0xff] }
 0x46e   :  { %v5871_v28 = vshrl.u32 %v5664_v53, 16  ;;  %v5874_v40 = vshll.u32 %v5664_v53, 16 }
 0x470   :  { %v5873_v30 = vrot.slane %v5871_v28, 7  ;;  %v5308_v48 = vpop.permute.xlu0 %5307  ;;  %v17543_v52 = vpop.permute.xlu1 %6033  ;;  %v21141_v28 = vld [vmem:[#allocation75_spill] sm:$0xff] }
 0x471   :  { %v6262_v43 = vsel %vm5606_vm11, %v5964_v15, %v17543_v52  ;;  %v5587_v13 = vsel %vm5498_vm10, %v4928_v54, %v5308_v48 }
 0x472   :  { %v5876_v1 = vor.u32 %v5874_v40, %v5873_v30  ;;  %6709 = vmatprep.mubr.bf16.mxu1 %v6262_v43  ;;  %v4929_v40 = vmul.bf16 %v17285_v26, %v21141_v28 }
 0x473   :  { %6710 = vmatmul.mubr.bf16.gmra.mrb[140].mxu1 %v6141_v23 }
 0x474   :  { %v17553_v50 = vsel %vm1388_vm0, %v5866_v16, %v5876_v1  ;;  %v5966_v22 = vpop.permute.xlu0 %5965  ;;  %v5485_v35 = vpop.permute.xlu1 %5484 }
 0x475   :  { %5981 = vrot.lane.b32.xlu0 %v17553_v50, %s12561_s21  ;;  %6049 = vrot.lane.b32.xlu1 %v17553_v50, %s12559_s19  ;;  %v5666_v39 = vsel %vm5606_vm11, %v5587_v13, %v5485_v35  ;;  %v6145_v48 = vsel %vm6067_vm12, %v17276_v25, %v5966_v22 }
 0x476   :  { %v5878_v24 = vshrl.u32 %v5666_v39, 16  ;;  %v5881_v58 = vshll.u32 %v5666_v39, 16 }
 0x478   :  { %v5880_v6 = vrot.slane %v5878_v24, 7  ;;  %v5310_v17 = vpop.permute.xlu0 %5309  ;;  %v17560_v15 = vpop.permute.xlu1 %6035 }
 0x479   :  { %v6265_v16 = vsel %vm5606_vm11, %v5966_v22, %v17560_v15  ;;  %v5590_v43 = vsel %vm5498_vm10, %v4929_v40, %v5310_v17 }
 0x47a   :  { %v5883_v53 = vor.u32 %v5881_v58, %v5880_v6  ;;  %6717 = vmatprep.mubr.bf16.mxu1 %v6265_v16 }
 0x47b   :  { %6718 = vmatmul.mubr.bf16.gmra.mrb[144].mxu1 %v6145_v48 }
 0x47c   :  { %v5968_v1 = vpop.permute.xlu0 %5967  ;;  %v5487_v54 = vpop.permute.xlu1 %5486  ;;  %v17570_v23 = vsel %vm1388_vm0, %v5873_v30, %v5883_v53  ;;  %v21142_v30 = vld [vmem:[#allocation76_spill] sm:$0xff] }
 0x47d   :  { %v5668_v13 = vsel %vm5606_vm11, %v5590_v43, %v5487_v54  ;;  %5983 = vrot.lane.b32.xlu0 %v17570_v23, %s12561_s21  ;;  %6051 = vrot.lane.b32.xlu1 %v17570_v23, %s12559_s19  ;;  %v4930_v17 = vmul.bf16 %v17323_v10, %v21142_v30  ;;  %v6149_v16 = vsel %vm6067_vm12, %v17319_v59, %v5968_v1 }
 0x47e   :  { %v5885_v26 = vshrl.u32 %v5668_v13, 16  ;;  %v5888_v39 = vshll.u32 %v5668_v13, 16 }
 0x480   :  { %v5887_v35 = vrot.slane %v5885_v26, 7  ;;  %v5312_v25 = vpop.permute.xlu0 %5311  ;;  %v17577_v22 = vpop.permute.xlu1 %6037 }
 0x481   :  { %v6268_v24 = vsel %vm5606_vm11, %v5968_v1, %v17577_v22  ;;  %v5593_v53 = vsel %vm5498_vm10, %v4930_v17, %v5312_v25 }
 0x482   :  { %v5890_v58 = vor.u32 %v5888_v39, %v5887_v35  ;;  %6725 = vmatprep.mubr.bf16.mxu1 %v6268_v24 }
 0x483   :  { %6726 = vmatmul.mubr.bf16.gmra.mrb[148].mxu1 %v6149_v16 }
 0x484   :  { %v5970_v40 = vpop.permute.xlu0 %5969  ;;  %v5489_v48 = vpop.permute.xlu1 %5488  ;;  %v17587_v43 = vsel %vm1388_vm0, %v5880_v6, %v5890_v58  ;;  %v21143_v6 = vld [vmem:[#allocation77_spill] sm:$0xff] }
 0x485   :  { %v5670_v54 = vsel %vm5606_vm11, %v5593_v53, %v5489_v48  ;;  %5985 = vrot.lane.b32.xlu0 %v17587_v43, %s12561_s21  ;;  %6053 = vrot.lane.b32.xlu1 %v17587_v43, %s12559_s19  ;;  %v4931_v24 = vmul.bf16 %v17355_v51, %v21143_v6  ;;  %v6153_v58 = vsel %vm6067_vm12, %v17361_v49, %v5970_v40 }
 0x486   :  { %v5892_v10 = vshrl.u32 %v5670_v54, 16  ;;  %v5895_v26 = vshll.u32 %v5670_v54, 16 }
 0x488   :  { %v5894_v13 = vrot.slane %v5892_v10, 7  ;;  %v5314_v59 = vpop.permute.xlu0 %5313  ;;  %v17594_v1 = vpop.permute.xlu1 %6039 }
 0x489   :  { %v6271_v39 = vsel %vm5606_vm11, %v5970_v40, %v17594_v1  ;;  %v5596_v17 = vsel %vm5498_vm10, %v4931_v24, %v5314_v59 }
 0x48a   :  { %v5897_v25 = vor.u32 %v5895_v26, %v5894_v13  ;;  %6733 = vmatprep.mubr.bf16.mxu1 %v6271_v39 }
 0x48b   :  { %6734 = vmatmul.mubr.bf16.gmra.mrb[152].mxu1 %v6153_v58 }
 0x48c   :  { %v5972_v16 = vpop.permute.xlu0 %5971  ;;  %v5491_v53 = vpop.permute.xlu1 %5490  ;;  %v17604_v48 = vsel %vm1388_vm0, %v5887_v35, %v5897_v25  ;;  %v21144_v35 = vld [vmem:[#allocation78_spill] sm:$0xff] }
 0x48d   :  { %v5672_v54 = vsel %vm5606_vm11, %v5596_v17, %v5491_v53  ;;  %5987 = vrot.lane.b32.xlu0 %v17604_v48, %s12561_s21  ;;  %6055 = vrot.lane.b32.xlu1 %v17604_v48, %s12559_s19  ;;  %v4932_v25 = vmul.bf16 %v17386_v2, %v21144_v35  ;;  %v6157_v24 = vsel %vm6067_vm12, %v17400_v63, %v5972_v16 }
 0x48e   :  { %v5899_v51 = vshrl.u32 %v5672_v54, 16  ;;  %v5902_v26 = vshll.u32 %v5672_v54, 16 }
 0x490   :  { %v5901_v10 = vrot.slane %v5899_v51, 7  ;;  %v5316_v40 = vpop.permute.xlu0 %5315 }
 0x491   :  { %v17611_v49 = vpop.permute.xlu1 %6041  ;;  %v5599_v58 = vsel %vm5498_vm10, %v4932_v25, %v5316_v40  ;;  %v21145_v25 = vld [vmem:[#allocation80_spill] sm:$0xff] }
 0x492   :  { %v6274_v59 = vsel %vm5606_vm11, %v5972_v16, %v17611_v49  ;;  %v5904_v39 = vor.u32 %v5902_v26, %v5901_v10 }
 0x493   :  { %6741 = vmatprep.mubr.bf16.mxu1 %v6274_v59 }
 0x494   :  { %6742 = vmatmul.mubr.bf16.gmra.mrb[156].mxu1 %v6157_v24  ;;  %v17621_v53 = vsel %vm1388_vm0, %v5894_v13, %v5904_v39  ;;  %v5974_v13 = vpop.permute.xlu0 %5973  ;;  %v4933_v24 = vmul.bf16 %v17427_v29, %v21145_v25  ;;  %v21146_v25 = vld [vmem:[#allocation81_spill] sm:$0xff] }
 0x495   :  { %v5493_v17 = vpop.permute.xlu1 %5492  ;;  %5989 = vrot.lane.b32.xlu0 %v17621_v53, %s12561_s21  ;;  %6057 = vrot.lane.b32.xlu1 %v17621_v53, %s12559_s19 }
 0x496   :  { %v5674_v54 = vsel %vm5606_vm11, %v5599_v58, %v5493_v17 }
 0x497   :  { %v5906_v2 = vshrl.u32 %v5674_v54, 16  ;;  %v5909_v26 = vshll.u32 %v5674_v54, 16 }
 0x498   :  { %v5318_v16 = vpop.permute.xlu0 %5317 }
 0x499   :  { %v5908_v51 = vrot.slane %v5906_v2, 7  ;;  %v5602_v17 = vsel %vm5498_vm10, %v4933_v24, %v5318_v16 }
 0x49b   :  { %v5911_v59 = vor.u32 %v5909_v26, %v5908_v51 }
 0x49d   :  { %v17629_v63 = vsel %vm1388_vm0, %v5901_v10, %v5911_v59  ;;  %v6161_v10 = vsel %vm6067_vm12, %v17447_v20, %v5974_v13  ;;  %v4934_v20 = vmul.bf16 %v17389_v12, %v21146_v25 }
 0x49e   :  { %5991 = vrot.lane.b32.xlu0 %v17629_v63, %s12561_s21  ;;  %6059 = vrot.lane.b32.xlu1 %v17629_v63, %s12559_s19 }
 0x4a7   :  { %v17635_v40 = vpop.permute.xlu1 %6043  ;;  %v5976_v58 = vpop.permute.xlu0 %5975 }
 0x4a8   :  { %v6277_v39 = vsel %vm5606_vm11, %v5974_v13, %v17635_v40  ;;  %v6165_v13 = vsel %vm6067_vm12, %v17467_v44, %v5976_v58 }
 0x4a9   :  { %6749 = vmatprep.mubr.bf16.mxu1 %v6277_v39 }
 0x4aa   :  { %6750 = vmatmul.mubr.bf16.gmra.mrb[160].mxu1 %v6161_v10 }
 0x4ab   :  { %v5495_v54 = vpop.permute.xlu1 %5494  ;;  %v5320_v30 = vpop.permute.xlu0 %5319 }
 0x4ac   :  { %v5676_v2 = vsel %vm5606_vm11, %v5602_v17, %v5495_v54  ;;  %v5605_v16 = vsel %vm5498_vm10, %v4934_v20, %v5320_v30  ;;  %v21147_v30 = vmov 0  }
 0x4ad   :  { %v5913_v26 = vshrl.u32 %v5676_v2, 16  ;;  %v5916_v35 = vshll.u32 %v5676_v2, 16 }
 0x4af   :  { %v5915_v59 = vrot.slane %v5913_v26, 7  ;;  %v17645_v6 = vpop.permute.xlu1 %6045 }
 0x4b0   :  { %v6280_v29 = vsel %vm5606_vm11, %v5976_v58, %v17645_v6 }
 0x4b1   :  { %v5918_v39 = vor.u32 %v5916_v35, %v5915_v59  ;;  %6757 = vmatprep.mubr.bf16.mxu1 %v6280_v29 }
 0x4b2   :  { %6758 = vmatmul.mubr.bf16.gmra.mrb[164].mxu1 %v6165_v13 }
 0x4b3   :  { %v5497_v24 = vpop.permute.xlu1 %5496  ;;  %v17655_v10 = vsel %vm1388_vm0, %v5908_v51, %v5918_v39  ;;  %v5978_v51 = vpop.permute.xlu0 %5977 }
 0x4b4   :  { %v5678_v17 = vsel %vm5606_vm11, %v5605_v16, %v5497_v24  ;;  %5993 = vrot.lane.b32.xlu0 %v17655_v10, %s12561_s21  ;;  %6061 = vrot.lane.b32.xlu1 %v17655_v10, %s12559_s19  ;;  %v6169_v29 = vsel %vm6067_vm12, %v17492_v38, %v5978_v51 }
 0x4b5   :  { %v5920_v12 = vshrl.u32 %v5678_v17, 16  ;;  %v5923_v54 = vshll.u32 %v5678_v17, 16 }
 0x4b7   :  { %v5922_v35 = vrot.slane %v5920_v12, 7 }
 0x4b9   :  { %v5925_v2 = vor.u32 %v5923_v54, %v5922_v35 }
 0x4bb   :  { %v5926_v44 = vsel %vm1388_vm0, %v5915_v59, %v5925_v2 }
 0x4bc   :  { %5995 = vrot.lane.b32.xlu0 %v5926_v44, %s12561_s21  ;;  %6063 = vrot.lane.b32.xlu1 %v5926_v44, %s12559_s19 }
 0x4c0   :  { %6065 = vrot.lane.b32.xlu1 %v21147_v30, %s12559_s19 }
 0x4df   :  { %v17667_v58 = vpop.permute.xlu1 %6047  ;;  %v5980_v39 = vpop.permute.xlu0 %5979 }
 0x4e0   :  { %v6283_v26 = vsel %vm5606_vm11, %v5978_v51, %v17667_v58  ;;  %v6173_v13 = vsel %vm6067_vm12, %v17506_v11, %v5980_v39 }
 0x4e1   :  { %6765 = vmatprep.mubr.bf16.mxu1 %v6283_v26 }
 0x4e2   :  { %6766 = vmatmul.mubr.bf16.gmra.mrb[168].mxu1 %v6169_v29 }
 0x4e7   :  { %v17673_v59 = vpop.permute.xlu1 %6049  ;;  %v5982_v16 = vpop.permute.xlu0 %5981 }
 0x4e8   :  { %v6286_v20 = vsel %vm5606_vm11, %v5980_v39, %v17673_v59  ;;  %v6177_v38 = vsel %vm6067_vm12, %v17536_v32, %v5982_v16 }
 0x4e9   :  { %6773 = vmatprep.mubr.bf16.mxu1 %v6286_v20 }
 0x4ea   :  { %6774 = vmatmul.mubr.bf16.gmra.mrb[172].mxu1 %v6173_v13 }
 0x4ef   :  { %v17679_v24 = vpop.permute.xlu1 %6051  ;;  %v5984_v12 = vpop.permute.xlu0 %5983 }
 0x4f0   :  { %v6289_v17 = vsel %vm5606_vm11, %v5982_v16, %v17679_v24  ;;  %v6181_v11 = vsel %vm6067_vm12, %v17553_v50, %v5984_v12 }
 0x4f1   :  { %6781 = vmatprep.mubr.bf16.mxu1 %v6289_v17 }
 0x4f2   :  { %6782 = vmatmul.mubr.bf16.gmra.mrb[176].mxu1 %v6177_v38 }
 0x4f7   :  { %v17685_v35 = vpop.permute.xlu1 %6053  ;;  %v5986_v2 = vpop.permute.xlu0 %5985 }
 0x4f8   :  { %v6292_v54 = vsel %vm5606_vm11, %v5984_v12, %v17685_v35  ;;  %v6185_v32 = vsel %vm6067_vm12, %v17570_v23, %v5986_v2 }
 0x4f9   :  { %6789 = vmatprep.mubr.bf16.mxu1 %v6292_v54 }
 0x4fa   :  { %6790 = vmatmul.mubr.bf16.gmra.mrb[180].mxu1 %v6181_v11 }
 0x4ff   :  { %v17691_v44 = vpop.permute.xlu1 %6055  ;;  %v5988_v26 = vpop.permute.xlu0 %5987 }
 0x500   :  { %v6295_v51 = vsel %vm5606_vm11, %v5986_v2, %v17691_v44  ;;  %v6189_v50 = vsel %vm6067_vm12, %v17587_v43, %v5988_v26 }
 0x501   :  { %6797 = vmatprep.mubr.bf16.mxu1 %v6295_v51 }
 0x502   :  { %6798 = vmatmul.mubr.bf16.gmra.mrb[184].mxu1 %v6185_v32 }
 0x507   :  { %v17697_v29 = vpop.permute.xlu1 %6057  ;;  %v5990_v20 = vpop.permute.xlu0 %5989 }
 0x508   :  { %v6298_v39 = vsel %vm5606_vm11, %v5988_v26, %v17697_v29  ;;  %v6193_v23 = vsel %vm6067_vm12, %v17604_v48, %v5990_v20 }
 0x509   :  { %6805 = vmatprep.mubr.bf16.mxu1 %v6298_v39  ;;  %v21149_v39 = vmov 0.0  }
 0x50a   :  { %6806 = vmatmul.mubr.bf16.gmra.mrb[188].mxu1 %v6189_v50  ;;  %v21150_v50 = vld [vmem:[#allocation88_spill] sm:$0xff] }
 0x510   :  { %v17703_v13 = vpop.permute.xlu1 %6059  ;;  %v5992_v17 = vpop.permute.xlu0 %5991 }
 0x511   :  { %v6301_v16 = vsel %vm5606_vm11, %v5990_v20, %v17703_v13  ;;  %v6197_v43 = vsel %vm6067_vm12, %v17621_v53, %v5992_v17  ;;  %v21152_v20 = vld [vmem:[#allocation79_spill] sm:$0xff] }
 0x512   :  { %6813 = vmatprep.mubr.bf16.mxu1 %v6301_v16  ;;  %v21154_v16 = vld [vmem:[#allocation82_spill] sm:$0xff] }
 0x513   :  { %6814 = vmatmul.mubr.bf16.gmra.mrb[192].mxu1 %v6193_v23  ;;  %v21155_v23 = vld [vmem:[#allocation86_spill] sm:$0xff] }
 0x526   :  { %v17709_v38 = vpop.permute.xlu1 %6061  ;;  %v5994_v54 = vpop.permute.xlu0 %5993 }
 0x527   :  { %v6304_v12 = vsel %vm5606_vm11, %v5992_v17, %v17709_v38  ;;  %v6201_v48 = vsel %vm6067_vm12, %v17629_v63, %v5994_v54  ;;  %v21151_v63 = vld [vmem:[#allocation73_spill] sm:$0xff]  ;;  %v21156_v17 = vld [vmem:[#allocation92_spill] sm:$0xff] }
 0x528   :  { %6821 = vmatprep.mubr.bf16.mxu1 %v6304_v12  ;;  %v21157_v12 = vld [vmem:[#allocation94_spill] sm:$0xff] }
 0x529   :  { %6822 = vmatmul.mubr.bf16.gmra.mrb[196].mxu1 %v6197_v43  ;;  %v21158_v43 = vld [vmem:[#allocation72_spill] sm:$0xff] }
 0x52e   :  { %v17715_v11 = vpop.permute.xlu1 %6063  ;;  %v5996_v51 = vpop.permute.xlu0 %5995 }
 0x52f   :  { %v6307_v2 = vsel %vm5606_vm11, %v5994_v54, %v17715_v11  ;;  %v6205_v53 = vsel %vm6067_vm12, %v17655_v10, %v5996_v51  ;;  %v21153_v10 = vld [vmem:[#allocation70_spill] sm:$0xff] }
 0x530   :  { %6829 = vmatprep.mubr.bf16.mxu1 %v6307_v2 }
 0x531   :  { %6830 = vmatmul.mubr.bf16.gmra.mrb[200].mxu1 %v6201_v48 }
 0x532   :  { %v17721_v32 = vpop.permute.xlu1 %6065 }
 0x533   :  { %21148 = vst [vmem:[#allocation71_spill] sm:$0xff] %v17721_v32  ;;  %v6310_v26 = vsel %vm5606_vm11, %v5996_v51, %v17721_v32 }
 0x534   :  { %6837 = vmatprep.mubr.bf16.mxu1 %v6310_v26 }
 0x539   :  { %6838 = vmatmul.mubr.bf16.gmra.mrb[204].mxu1 %v6205_v53 }
 0x53a   :  { %11163 = vmatprep.mubr.msk.bf16.mxu1 %vm12555_vm6, %v21149_v39 }
 0x541   :  { %11164 = vmatmul.mubr.msk.bf16.vlgmr.msra.gmra.mrb[68].mxu1 %vm5498_vm10, %v21150_v50 }
 0x542   :  { %11167 = vmatprep.mubr.msk.bf16.mxu1 %vm12555_vm6, %v21149_v39 }
 0x549   :  { %11168 = vmatmul.mubr.msk.bf16.gmra.mrb[72].mxu1 %vm5498_vm10, %v21151_v63 }
 0x54a   :  { %11171 = vmatprep.mubr.msk.bf16.mxu1 %vm12555_vm6, %v21149_v39 }
 0x551   :  { %11172 = vmatmul.mubr.msk.bf16.gmra.mrb[76].mxu1 %vm5498_vm10, %v21152_v20 }
 0x552   :  { %11175 = vmatprep.mubr.msk.bf16.mxu1 %vm12555_vm6, %v21149_v39 }
 0x559   :  { %11176 = vmatmul.mubr.msk.bf16.gmra.mrb[80].mxu1 %vm5498_vm10, %v21153_v10 }
 0x55a   :  { %11179 = vmatprep.mubr.msk.bf16.mxu1 %vm12555_vm6, %v21149_v39 }
 0x561   :  { %11180 = vmatmul.mubr.msk.bf16.gmra.mrb[84].mxu1 %vm5498_vm10, %v21154_v16 }
 0x562   :  { %11183 = vmatprep.mubr.msk.bf16.mxu1 %vm12555_vm6, %v21149_v39 }
 0x569   :  { %11184 = vmatmul.mubr.msk.bf16.gmra.mrb[88].mxu1 %vm5498_vm10, %v21155_v23 }
 0x56a   :  { %11187 = vmatprep.mubr.msk.bf16.mxu1 %vm12555_vm6, %v21149_v39 }
 0x571   :  { %11188 = vmatmul.mubr.msk.bf16.gmra.mrb[92].mxu1 %vm5498_vm10, %v21156_v17 }
 0x572   :  { %11191 = vmatprep.mubr.msk.bf16.mxu1 %vm12555_vm6, %v21149_v39 }
 0x579   :  { %11192 = vmatmul.mubr.msk.bf16.gmra.mrb[96].mxu1 %vm5498_vm10, %v21157_v12 }
 0x57a   :  { %11195 = vmatprep.mubr.msk.bf16.mxu1 %vm12555_vm6, %v21149_v39 }
 0x581   :  { %11196 = vmatmul.mubr.msk.bf16.gmra.mrb[100].mxu1 %vm5498_vm10, %v21158_v43 }
 0x582   :  { %11199 = vmatprep.mubr.msk.bf16.mxu1 %vm12555_vm6, %v21149_v39 }
 0x589   :  { %11200 = vmatmul.mubr.msk.bf16.gmra.mrb[104].mxu1 %vm5498_vm10, %v17243_v4  ;;  %v17838_v4 = vld [vmem:[%s20657_s7] ss:$0 sm:$0xff] }
 0x58a   :  { %11203 = vmatprep.mubr.msk.bf16.mxu1 %vm12555_vm6, %v21149_v39 }
 0x591   :  { %11204 = vmatmul.mubr.msk.bf16.gmra.mrb[108].mxu1 %vm5498_vm10, %v17287_v37 }
 0x592   :  { %11207 = vmatprep.mubr.msk.bf16.mxu1 %vm12555_vm6, %v21149_v39 }
 0x599   :  { %11208 = vmatmul.mubr.msk.bf16.gmra.mrb[112].mxu1 %vm5498_vm10, %v17328_v27 }
 0x59a   :  { %11211 = vmatprep.mubr.msk.bf16.mxu1 %vm12555_vm6, %v21149_v39 }
 0x5a1   :  { %11212 = vmatmul.mubr.msk.bf16.gmra.mrb[116].mxu1 %vm5498_vm10, %v17372_v60 }
 0x5a2   :  { %11215 = vmatprep.mubr.msk.bf16.mxu1 %vm12555_vm6, %v21149_v39 }
 0x5a9   :  { %11216 = vmatmul.mubr.msk.bf16.gmra.mrb[120].mxu1 %vm5498_vm10, %v17408_v8 }
 0x5aa   :  { %11219 = vmatprep.mubr.msk.bf16.mxu1 %vm12555_vm6, %v21149_v39 }
 0x5b1   :  { %11220 = vmatmul.mubr.msk.bf16.gmra.mrb[124].mxu1 %vm5498_vm10, %v17460_v62 }
 0x5b2   :  { %11223 = vmatprep.mubr.msk.bf16.mxu1 %vm12555_vm6, %v21149_v39 }
 0x5b9   :  { %11224 = vmatmul.mubr.msk.bf16.gmra.mrb[128].mxu1 %vm5498_vm10, %v17482_v47 }
 0x5ba   :  { %11227 = vmatprep.mubr.msk.bf16.mxu1 %vm12555_vm6, %v21149_v39 }
 0x5c1   :  { %11228 = vmatmul.mubr.msk.bf16.gmra.mrb[132].mxu1 %vm5498_vm10, %v17516_v7 }
 0x5c2   :  { %11231 = vmatprep.mubr.msk.bf16.mxu1 %vm12555_vm6, %v21149_v39 }
 0x5c9   :  { %11232 = vmatmul.mubr.msk.bf16.gmra.mrb[136].mxu1 %vm5498_vm10, %v17526_v45 }
 0x5ca   :  { %11235 = vmatprep.mubr.msk.bf16.mxu1 %vm12555_vm6, %v21149_v39 }
 0x5d1   :  { %11236 = vmatmul.mubr.msk.bf16.gmra.mrb[140].mxu1 %vm5498_vm10, %v17543_v52 }
 0x5d2   :  { %11239 = vmatprep.mubr.msk.bf16.mxu1 %vm12555_vm6, %v21149_v39 }
 0x5d9   :  { %11240 = vmatmul.mubr.msk.bf16.gmra.mrb[144].mxu1 %vm5498_vm10, %v17560_v15 }
 0x5da   :  { %11243 = vmatprep.mubr.msk.bf16.mxu1 %vm12555_vm6, %v21149_v39 }
 0x5e1   :  { %11244 = vmatmul.mubr.msk.bf16.gmra.mrb[148].mxu1 %vm5498_vm10, %v17577_v22 }
 0x5e2   :  { %11247 = vmatprep.mubr.msk.bf16.mxu1 %vm12555_vm6, %v21149_v39 }
 0x5e9   :  { %11248 = vmatmul.mubr.msk.bf16.gmra.mrb[152].mxu1 %vm5498_vm10, %v17594_v1 }
 0x5ea   :  { %11251 = vmatprep.mubr.msk.bf16.mxu1 %vm12555_vm6, %v21149_v39 }
 0x5f1   :  { %11252 = vmatmul.mubr.msk.bf16.gmra.mrb[156].mxu1 %vm5498_vm10, %v17611_v49 }
 0x5f2   :  { %11255 = vmatprep.mubr.msk.bf16.mxu1 %vm12555_vm6, %v21149_v39 }
 0x5f9   :  { %11256 = vmatmul.mubr.msk.bf16.gmra.mrb[160].mxu1 %vm5498_vm10, %v17635_v40 }
 0x5fa   :  { %11259 = vmatprep.mubr.msk.bf16.mxu1 %vm12555_vm6, %v21149_v39 }
 0x601   :  { %11260 = vmatmul.mubr.msk.bf16.gmra.mrb[164].mxu1 %vm5498_vm10, %v17645_v6 }
 0x602   :  { %11263 = vmatprep.mubr.msk.bf16.mxu1 %vm12555_vm6, %v21149_v39 }
 0x609   :  { %11264 = vmatmul.mubr.msk.bf16.gmra.mrb[168].mxu1 %vm5498_vm10, %v17667_v58 }
 0x60a   :  { %11267 = vmatprep.mubr.msk.bf16.mxu1 %vm12555_vm6, %v21149_v39 }
 0x611   :  { %11268 = vmatmul.mubr.msk.bf16.gmra.mrb[172].mxu1 %vm5498_vm10, %v17673_v59 }
 0x612   :  { %11271 = vmatprep.mubr.msk.bf16.mxu1 %vm12555_vm6, %v21149_v39 }
 0x614   :  { %v6880_v37 = vpop.f32.mrb[68].mxu1 }
 0x615   :  { %v17843_v27 = vadd.f32 %v17838_v4, %v6880_v37  ;;  %v11165_v60 = vpop.f32.mrb[69].mxu1 }
 0x616   :  { %v6883_v8 = vpop.f32.mrb[70].mxu1 }
 0x617   :  { %v7159_v62 = vmul.f32 %v17843_v27, %v17843_v27  ;;  %v17848_v47 = vadd.f32 %v17838_v4, %v6883_v8  ;;  %v11166_v7 = vpop.f32.mrb[71].mxu1 }
 0x619   :  { %v7229_v45 = vmul.f32 %v17843_v27, %v7159_v62  ;;  %v7160_v52 = vmul.f32 %v17848_v47, %v17848_v47  ;;  %11272 = vmatmul.mubr.msk.bf16.gmra.mrb[176].mxu1 %vm5498_vm10, %v17679_v24 }
 0x61a   :  { %11275 = vmatprep.mubr.msk.bf16.mxu1 %vm12555_vm6, %v21149_v39 }
 0x61b   :  { %v7299_v15 = vmul.f32 0.044715, %v7229_v45  ;;  %v7230_v22 = vmul.f32 %v17848_v47, %v7160_v52 }
 0x61c   :  { %v6888_v1 = vpop.f32.mrb[72].mxu1 }
 0x61d   :  { %v7369_v6 = vadd.f32 %v17843_v27, %v7299_v15  ;;  %v7300_v49 = vmul.f32 0.044715, %v7230_v22  ;;  %v17860_v40 = vadd.f32 %v17838_v4, %v6888_v1  ;;  %v11169_v58 = vpop.f32.mrb[73].mxu1 }
 0x61e   :  { %v6891_v59 = vpop.f32.mrb[74].mxu1 }
 0x61f   :  { %v7439_v54 = vmul.f32 0.7978846, %v7369_v6  ;;  %v7370_v2 = vadd.f32 %v17848_v47, %v7300_v49  ;;  %v7161_v24 = vmul.f32 %v17860_v40, %v17860_v40  ;;  %v17866_v48 = vadd.f32 %v17838_v4, %v6891_v59  ;;  %v11170_v51 = vpop.f32.mrb[75].mxu1 }
 0x621   :  { %12290 = vtanh.f32 %v7439_v54  ;;  %v7440_v26 = vmul.f32 0.7978846, %v7370_v2  ;;  %v7231_v53 = vmul.f32 %v17860_v40, %v7161_v24  ;;  %v7162_v50 = vmul.f32 %v17866_v48, %v17866_v48  ;;  %11276 = vmatmul.mubr.msk.bf16.gmra.mrb[180].mxu1 %vm5498_vm10, %v17685_v35 }
 0x622   :  { %11279 = vmatprep.mubr.msk.bf16.mxu1 %vm12555_vm6, %v21149_v39 }
 0x623   :  { %12292 = vtanh.f32 %v7440_v26  ;;  %v7301_v63 = vmul.f32 0.044715, %v7231_v53  ;;  %v7232_v20 = vmul.f32 %v17866_v48, %v7162_v50 }
 0x624   :  { %v6896_v10 = vpop.f32.mrb[76].mxu1 }
 0x625   :  { %v7371_v16 = vadd.f32 %v17860_v40, %v7301_v63  ;;  %v7302_v23 = vmul.f32 0.044715, %v7232_v20  ;;  %v17878_v17 = vadd.f32 %v17838_v4, %v6896_v10  ;;  %v11173_v12 = vpop.f32.mrb[77].mxu1 }
 0x626   :  { %v6899_v43 = vpop.f32.mrb[78].mxu1 }
 0x627   :  { %v7441_v37 = vmul.f32 0.7978846, %v7371_v16  ;;  %v7372_v60 = vadd.f32 %v17866_v48, %v7302_v23  ;;  %v7163_v35 = vmul.f32 %v17878_v17, %v17878_v17  ;;  %v17884_v8 = vadd.f32 %v17838_v4, %v6899_v43  ;;  %v11174_v62 = vpop.f32.mrb[79].mxu1 }
 0x629   :  { %12294 = vtanh.f32 %v7441_v37  ;;  %v7442_v7 = vmul.f32 0.7978846, %v7372_v60  ;;  %v7233_v45 = vmul.f32 %v17878_v17, %v7163_v35  ;;  %v7164_v52 = vmul.f32 %v17884_v8, %v17884_v8  ;;  %11280 = vmatmul.mubr.msk.bf16.gmra.mrb[184].mxu1 %vm5498_vm10, %v17691_v44 }
 0x62a   :  { %11283 = vmatprep.mubr.msk.bf16.mxu1 %vm12555_vm6, %v21149_v39 }
 0x62b   :  { %v12291_v15 = vpop.eup %12290  ;;  %12296 = vtanh.f32 %v7442_v7  ;;  %v7303_v22 = vmul.f32 0.044715, %v7233_v45  ;;  %v7234_v1 = vmul.f32 %v17884_v8, %v7164_v52 }
 0x62c   :  { %v7579_v6 = vadd.f32 1.0, %v12291_v15  ;;  %v6904_v49 = vpop.f32.mrb[80].mxu1 }
 0x62d   :  { %v12293_v58 = vpop.eup %12292  ;;  %v7373_v59 = vadd.f32 %v17878_v17, %v7303_v22  ;;  %v7304_v54 = vmul.f32 0.044715, %v7234_v1  ;;  %v17896_v2 = vadd.f32 %v17838_v4, %v6904_v49  ;;  %v11177_v24 = vpop.f32.mrb[81].mxu1 }
 0x62e   :  { %v7649_v51 = vmul.f32 0.5, %v7579_v6  ;;  %v7580_v44 = vadd.f32 1.0, %v12293_v58  ;;  %v6907_v26 = vpop.f32.mrb[82].mxu1 }
 0x62f   :  { %v7443_v53 = vmul.f32 0.7978846, %v7373_v59  ;;  %v7374_v50 = vadd.f32 %v17884_v8, %v7304_v54  ;;  %v7165_v63 = vmul.f32 %v17896_v2, %v17896_v2  ;;  %v17902_v20 = vadd.f32 %v17838_v4, %v6907_v26  ;;  %v11178_v10 = vpop.f32.mrb[83].mxu1  ;;  %v12468_v59 = vld [vmem:[%s20653_s3] sm:$0xff]  }
 0x630   :  { %v7650_v16 = vmul.f32 0.5, %v7580_v44  ;;  %v7719_v37 = vmul.f32 %v17843_v27, %v7649_v51 }
 0x631   :  { %12298 = vtanh.f32 %v7443_v53  ;;  %v7444_v23 = vmul.f32 0.7978846, %v7374_v50  ;;  %v7235_v12 = vmul.f32 %v17896_v2, %v7165_v63  ;;  %v7166_v43 = vmul.f32 %v17902_v20, %v17902_v20  ;;  %11284 = vmatmul.mubr.msk.bf16.gmra.mrb[188].mxu1 %vm5498_vm10, %v17697_v29  ;;  %v21159_v63 = vld [vmem:[#allocation5_spill] sm:$0xff] }
 0x632   :  { %v7720_v60 = vmul.f32 %v17848_v47, %v7650_v16  ;;  %11287 = vmatprep.mubr.msk.bf16.mxu1 %vm12555_vm6, %v21149_v39 }
 0x633   :  { %v12295_v35 = vpop.eup %12294  ;;  %12300 = vtanh.f32 %v7444_v23  ;;  %v7305_v62 = vmul.f32 0.044715, %v7235_v12  ;;  %v7236_v7 = vmul.f32 %v17902_v20, %v7166_v43 }
 0x634   :  { %v17914_v45 = vpack.c.bf16 %v7720_v60, %v7719_v37  ;;  %v7581_v52 = vadd.f32 1.0, %v12295_v35  ;;  %v6912_v15 = vpop.f32.mrb[84].mxu1 }
 0x635   :  { %v12297_v22 = vpop.eup %12296  ;;  %v7375_v1 = vadd.f32 %v17896_v2, %v7305_v62  ;;  %v7306_v29 = vmul.f32 0.044715, %v7236_v7  ;;  %v17918_v27 = vadd.f32 %v17838_v4, %v6912_v15  ;;  %v11181_v47 = vpop.f32.mrb[85].mxu1 }
 0x636   :  { %v7651_v6 = vmul.f32 0.5, %v7581_v52  ;;  %v7582_v49 = vadd.f32 1.0, %v12297_v22  ;;  %v6915_v58 = vpop.f32.mrb[86].mxu1  ;;  %v7824_v54 = vmul.bf16 %v12468_v59, %v17914_v45  ;;  %v7894_v10 = vmul.bf16 %v17914_v45, %v21159_v63 }
 0x637   :  { %v7445_v24 = vmul.f32 0.7978846, %v7375_v1  ;;  %v7376_v51 = vadd.f32 %v17902_v20, %v7306_v29  ;;  %v7167_v44 = vmul.f32 %v17918_v27, %v17918_v27  ;;  %v17928_v26 = vadd.f32 %v17838_v4, %v6915_v58  ;;  %v11182_v53 = vpop.f32.mrb[87].mxu1 }
 0x638   :  { %v7652_v50 = vmul.f32 0.5, %v7582_v49  ;;  %v7930_v16 = vshll.u32 %v7824_v54, 16  ;;  %v7721_v37 = vmul.f32 %v17860_v40, %v7651_v6  ;;  %v17944_v1 = vrot.slane %v7894_v10, 1  ;;  %v12469_v53 = vld [vmem:[%s20653_s3 + $0x8] sm:$0xff]  }
 0x639   :  { %12302 = vtanh.f32 %v7445_v24  ;;  %v7446_v23 = vmul.f32 0.7978846, %v7376_v51  ;;  %v7237_v12 = vmul.f32 %v17918_v27, %v7167_v44  ;;  %v7168_v43 = vmul.f32 %v17928_v26, %v17928_v26  ;;  %11288 = vmatmul.mubr.msk.bf16.gmra.mrb[192].mxu1 %vm5498_vm10, %v17703_v13  ;;  %v21160_v51 = vld [vmem:[#allocation6_spill] sm:$0xff] }
 0x63a   :  { %v7722_v60 = vmul.f32 %v17866_v48, %v7652_v50  ;;  %11291 = vmatprep.mubr.msk.bf16.mxu1 %vm12555_vm6, %v21149_v39  ;;  %v17946_v29 = vrot.slane %v7930_v16, 1  ;;  %v7933_v49 = vshrl.u32 %v7824_v54, 16 }
 0x63b   :  { %v12299_v35 = vpop.eup %12298  ;;  %12304 = vtanh.f32 %v7446_v23  ;;  %v7307_v62 = vmul.f32 0.044715, %v7237_v12  ;;  %v7238_v7 = vmul.f32 %v17928_v26, %v7168_v43 }
 0x63c   :  { %v17942_v52 = vpack.c.bf16 %v7722_v60, %v7721_v37  ;;  %v7583_v15 = vadd.f32 1.0, %v12299_v35  ;;  %v6920_v22 = vpop.f32.mrb[88].mxu1  ;;  %v7935_v37 = vor.u32 %v7933_v49, %v17946_v29 }
 0x63d   :  { %v12301_v13 = vpop.eup %12300  ;;  %v7377_v40 = vadd.f32 %v17918_v27, %v7307_v62  ;;  %v7308_v48 = vmul.f32 0.044715, %v7238_v7  ;;  %v17950_v47 = vadd.f32 %v17838_v4, %v6920_v22  ;;  %v11185_v6 = vpop.f32.mrb[89].mxu1 }
 0x63e   :  { %v7653_v58 = vmul.f32 0.5, %v7583_v15  ;;  %v7584_v59 = vadd.f32 1.0, %v12301_v13  ;;  %v6923_v24 = vpop.f32.mrb[90].mxu1  ;;  %v7895_v44 = vmul.bf16 %v17942_v52, %v21160_v51  ;;  %v7825_v50 = vmul.bf16 %v12469_v53, %v17942_v52 }
 0x63f   :  { %v7447_v63 = vmul.f32 0.7978846, %v7377_v40  ;;  %v7378_v10 = vadd.f32 %v17928_v26, %v7308_v48  ;;  %v7169_v16 = vmul.f32 %v17950_v47, %v17950_v47  ;;  %v17962_v54 = vadd.f32 %v17838_v4, %v6923_v24  ;;  %v11186_v23 = vpop.f32.mrb[91].mxu1 }
 0x640   :  { %v7654_v12 = vmul.f32 0.5, %v7584_v59  ;;  %v8316_v43 = vrot.slane %v7895_v44, 1  ;;  %v7937_v60 = vshll.u32 %v7825_v50, 16  ;;  %v7723_v15 = vmul.f32 %v17878_v17, %v7653_v58 }
 0x641   :  { %12306 = vtanh.f32 %v7447_v63  ;;  %v7448_v35 = vmul.f32 0.7978846, %v7378_v10  ;;  %v7239_v62 = vmul.f32 %v17950_v47, %v7169_v16  ;;  %v7170_v7 = vmul.f32 %v17962_v54, %v17962_v54  ;;  %11292 = vmatmul.mubr.msk.bf16.gmra.mrb[196].mxu1 %vm5498_vm10, %v17709_v38 }
 0x642   :  { %v7724_v22 = vmul.f32 %v17884_v8, %v7654_v12  ;;  %v8317_v13 = vsel %vm2127_vm1, %v17944_v1, %v8316_v43  ;;  %v7939_v40 = vrot.slane %v7937_v60, 1  ;;  %11295 = vmatprep.mubr.msk.bf16.mxu1 %vm12555_vm6, %v21149_v39  ;;  %v7941_v63 = vshrl.u32 %v7825_v50, 16  ;;  %v21161_v12 = vld [vmem:[#allocation7_spill] sm:$0xff] }
 0x643   :  { %v12303_v48 = vpop.eup %12302  ;;  %12308 = vtanh.f32 %v7448_v35  ;;  %v7309_v6 = vmul.f32 0.044715, %v7239_v62  ;;  %v7240_v49 = vmul.f32 %v17962_v54, %v7170_v7  ;;  %8387 = vrot.lane.b32.xlu0 %v8317_v13, %s12559_s19  ;;  %v12470_v35 = vld [vmem:[%s20653_s3 + $0x10] sm:$0xff]  }
 0x644   :  { %v17978_v59 = vpack.c.bf16 %v7724_v22, %v7723_v15  ;;  %v7585_v38 = vadd.f32 1.0, %v12303_v48  ;;  %v6928_v17 = vpop.f32.mrb[92].mxu1  ;;  %v7940_v8 = vsel %vm861_vm2, %v7935_v37, %v7939_v40 }
 0x645   :  { %v12305_v58 = vpop.eup %12304  ;;  %v7379_v24 = vadd.f32 %v17950_v47, %v7309_v6  ;;  %v7310_v51 = vmul.f32 0.044715, %v7240_v49  ;;  %v17983_v44 = vadd.f32 %v17838_v4, %v6928_v17  ;;  %v11189_v53 = vpop.f32.mrb[93].mxu1  ;;  %v7943_v6 = vor.u32 %v7941_v63, %v7939_v40 }
 0x646   :  { %v7655_v10 = vmul.f32 0.5, %v7585_v38  ;;  %v7586_v16 = vadd.f32 1.0, %v12305_v58  ;;  %v6931_v23 = vpop.f32.mrb[94].mxu1  ;;  %v7896_v60 = vmul.bf16 %v17978_v59, %v21161_v12  ;;  %v7826_v37 = vmul.bf16 %v12470_v35, %v17978_v59 }
 0x647   :  { %v7449_v62 = vmul.f32 0.7978846, %v7379_v24  ;;  %v7380_v7 = vadd.f32 %v17962_v54, %v7310_v51  ;;  %v7171_v15 = vmul.f32 %v17983_v44, %v17983_v44  ;;  %v17995_v50 = vadd.f32 %v17838_v4, %v6931_v23  ;;  %8210 = vrot.lane.b32.xlu0 %v7940_v8, %s12560_s22  ;;  %v11190_v22 = vpop.f32.mrb[95].mxu1 }
 0x648   :  { %v7656_v13 = vmul.f32 0.5, %v7586_v16  ;;  %v8318_v48 = vrot.slane %v7896_v60, 1  ;;  %v7945_v49 = vshll.u32 %v7826_v37, 16  ;;  %v7725_v24 = vmul.f32 %v17896_v2, %v7655_v10  ;;  %v12471_v22 = vld [vmem:[%s20653_s3 + $0x18] sm:$0xff]  }
 0x649   :  { %12310 = vtanh.f32 %v7449_v62  ;;  %v7450_v38 = vmul.f32 0.7978846, %v7380_v7  ;;  %v7241_v17 = vmul.f32 %v17983_v44, %v7171_v15  ;;  %v7172_v58 = vmul.f32 %v17995_v50, %v17995_v50  ;;  %11296 = vmatmul.mubr.msk.bf16.gmra.mrb[200].mxu1 %vm5498_vm10, %v17715_v11 }
 0x64a   :  { %v7726_v51 = vmul.f32 %v17902_v20, %v7656_v13  ;;  %v8319_v8 = vsel %vm2127_vm1, %v8316_v43, %v8318_v48  ;;  %v7947_v53 = vrot.slane %v7945_v49, 1  ;;  %11299 = vmatprep.mubr.msk.bf16.mxu1 %vm12555_vm6, %v21149_v39  ;;  %v7949_v62 = vshrl.u32 %v7826_v37, 16  ;;  %v21162_v49 = vld [vmem:[#allocation8_spill] sm:$0xff] }
 0x64b   :  { %v12307_v40 = vpop.eup %12306  ;;  %12312 = vtanh.f32 %v7450_v38  ;;  %v7311_v63 = vmul.f32 0.044715, %v7241_v17  ;;  %v7242_v16 = vmul.f32 %v17995_v50, %v7172_v58  ;;  %8208 = vrot.lane.b32.xlu0 %v17946_v29, %s12560_s22  ;;  %8389 = vrot.lane.b32.xlu1 %v8319_v8, %s12559_s19 }
 0x64c   :  { %v18012_v11 = vpack.c.bf16 %v7726_v51, %v7725_v24  ;;  %v7587_v2 = vadd.f32 1.0, %v12307_v40  ;;  %v6936_v20 = vpop.f32.mrb[96].mxu1  ;;  %v7948_v43 = vsel %vm861_vm2, %v7943_v6, %v7947_v53  ;;  %v7951_v8 = vor.u32 %v7949_v62, %v7947_v53 }
 0x64d   :  { %v12309_v10 = vpop.eup %12308  ;;  %v7381_v23 = vadd.f32 %v17983_v44, %v7311_v63  ;;  %v7312_v12 = vmul.f32 0.044715, %v7242_v16  ;;  %v18017_v60 = vadd.f32 %v17838_v4, %v6936_v20  ;;  %v11193_v35 = vpop.f32.mrb[97].mxu1 }
 0x64e   :  { %v7657_v7 = vmul.f32 0.5, %v7587_v2  ;;  %v7588_v15 = vadd.f32 1.0, %v12309_v10  ;;  %v6939_v29 = vpop.f32.mrb[98].mxu1  ;;  %v7827_v13 = vmul.bf16 %v12471_v22, %v18012_v11  ;;  %v7897_v6 = vmul.bf16 %v18012_v11, %v21162_v49 }
 0x64f   :  { %v7451_v38 = vmul.f32 0.7978846, %v7381_v23  ;;  %v7382_v17 = vadd.f32 %v17995_v50, %v7312_v12  ;;  %v7173_v58 = vmul.f32 %v18017_v60, %v18017_v60  ;;  %v18029_v37 = vadd.f32 %v17838_v4, %v6939_v29  ;;  %8212 = vrot.lane.b32.xlu1 %v7948_v43, %s12560_s22  ;;  %v11194_v24 = vpop.f32.mrb[99].mxu1 }
 0x650   :  { %v7658_v51 = vmul.f32 0.5, %v7588_v15  ;;  %v7953_v40 = vshll.u32 %v7827_v13, 16  ;;  %v8320_v63 = vrot.slane %v7897_v6, 1  ;;  %v7727_v10 = vmul.f32 %v17918_v27, %v7657_v7  ;;  %v21163_v24 = vld [vmem:[#allocation9_spill] sm:$0xff] }
 0x651   :  { %12314 = vtanh.f32 %v7451_v38  ;;  %v7452_v16 = vmul.f32 0.7978846, %v7382_v17  ;;  %v7243_v2 = vmul.f32 %v18017_v60, %v7173_v58  ;;  %v7174_v20 = vmul.f32 %v18029_v37, %v18029_v37  ;;  %11300 = vmatmul.mubr.msk.bf16.gmra.mrb[204].mxu1 %vm5498_vm10, %v17721_v32 }
 0x652   :  { %v7728_v23 = vmul.f32 %v17928_v26, %v7658_v51  ;;  %v7955_v43 = vrot.slane %v7953_v40, 1  ;;  %v8321_v12 = vsel %vm2127_vm1, %v8318_v48, %v8320_v63  ;;  %v7957_v38 = vshrl.u32 %v7827_v13, 16 }
 0x653   :  { %v12311_v53 = vpop.eup %12310  ;;  %12316 = vtanh.f32 %v7452_v16  ;;  %v7313_v35 = vmul.f32 0.044715, %v7243_v2  ;;  %v7244_v62 = vmul.f32 %v18029_v37, %v7174_v20  ;;  %8385 = vrot.lane.b32.xlu1 %v17944_v1, %s12559_s19 }
 0x654   :  { %v18043_v15 = vpack.c.bf16 %v7728_v23, %v7727_v10  ;;  %v7589_v29 = vadd.f32 1.0, %v12311_v53  ;;  %v6944_v22 = vpop.f32.mrb[100].mxu1  ;;  %v7956_v49 = vsel %vm861_vm2, %v7951_v8, %v7955_v43  ;;  %v12472_v8 = vld [vmem:[%s20653_s3 + $0x20] sm:$0xff]  }
 0x655   :  { %v12313_v27 = vpop.eup %12312  ;;  %v7383_v26 = vadd.f32 %v18017_v60, %v7313_v35  ;;  %v7314_v7 = vmul.f32 0.044715, %v7244_v62  ;;  %v18048_v48 = vadd.f32 %v17838_v4, %v6944_v22  ;;  %8214 = vrot.lane.b32.xlu0 %v7956_v49, %s12560_s22  ;;  %v11197_v6 = vpop.f32.mrb[101].mxu1  ;;  %v7959_v35 = vor.u32 %v7957_v38, %v7955_v43 }
 0x656   :  { %v7659_v17 = vmul.f32 0.5, %v7589_v29  ;;  %v7590_v58 = vadd.f32 1.0, %v12313_v27  ;;  %v6947_v1 = vpop.f32.mrb[102].mxu1  ;;  %v7898_v51 = vmul.bf16 %v18043_v15, %v21163_v24  ;;  %v7828_v40 = vmul.bf16 %v12472_v8, %v18043_v15 }
 0x657   :  { %v7453_v16 = vmul.f32 0.7978846, %v7383_v26  ;;  %v7384_v2 = vadd.f32 %v18029_v37, %v7314_v7  ;;  %v7175_v20 = vmul.f32 %v18048_v48, %v18048_v48  ;;  %v18061_v13 = vadd.f32 %v17838_v4, %v6947_v1  ;;  %8391 = vrot.lane.b32.xlu1 %v8321_v12, %s12559_s19  ;;  %v11198_v10 = vpop.f32.mrb[103].mxu1 }
 0x658   :  { %v7660_v23 = vmul.f32 0.5, %v7590_v58  ;;  %v8322_v53 = vrot.slane %v7898_v51, 1  ;;  %v7961_v62 = vshll.u32 %v7828_v40, 16  ;;  %v7729_v27 = vmul.f32 %v17950_v47, %v7659_v17 }
 0x659   :  { %12318 = vtanh.f32 %v7453_v16  ;;  %v7454_v29 = vmul.f32 0.7978846, %v7384_v2  ;;  %v7245_v22 = vmul.f32 %v18048_v48, %v7175_v20  ;;  %v7176_v49 = vmul.f32 %v18061_v13, %v18061_v13 }
 0x65a   :  { %v7730_v26 = vmul.f32 %v17962_v54, %v7660_v23  ;;  %v8323_v7 = vsel %vm2127_vm1, %v8320_v63, %v8322_v53  ;;  %v7963_v6 = vrot.slane %v7961_v62, 1  ;;  %v7965_v16 = vshrl.u32 %v7828_v40, 16  ;;  %v21164_v23 = vld [vmem:[#allocation10_spill] sm:$0xff] }
 0x65b   :  { %v12315_v12 = vpop.eup %12314  ;;  %12320 = vtanh.f32 %v7454_v29  ;;  %v7315_v58 = vmul.f32 0.044715, %v7245_v22  ;;  %v7246_v43 = vmul.f32 %v18061_v13, %v7176_v49  ;;  %8393 = vrot.lane.b32.xlu1 %v8323_v7, %s12559_s19 }
 0x65c   :  { %v18072_v38 = vpack.c.bf16 %v7730_v26, %v7729_v27  ;;  %v7591_v1 = vadd.f32 1.0, %v12315_v12  ;;  %v6952_v24 = vpop.f32.mrb[104].mxu1  ;;  %v7964_v51 = vsel %vm861_vm2, %v7959_v35, %v7963_v6  ;;  %v12473_v35 = vld [vmem:[%s20653_s3 + $0x28] sm:$0xff]  }
 0x65d   :  { %v12317_v8 = vpop.eup %12316  ;;  %v7385_v47 = vadd.f32 %v18048_v48, %v7315_v58  ;;  %v7316_v54 = vmul.f32 0.044715, %v7246_v43  ;;  %v18077_v63 = vadd.f32 %v17838_v4, %v6952_v24  ;;  %8216 = vrot.lane.b32.xlu0 %v7964_v51, %s12560_s22  ;;  %v11201_v17 = vpop.f32.mrb[105].mxu1  ;;  %v7967_v58 = vor.u32 %v7965_v16, %v7963_v6 }
 0x65e   :  { %v7661_v2 = vmul.f32 0.5, %v7591_v1  ;;  %v7592_v20 = vadd.f32 1.0, %v12317_v8  ;;  %v6955_v10 = vpop.f32.mrb[106].mxu1  ;;  %v7899_v62 = vmul.bf16 %v18072_v38, %v21164_v23  ;;  %v7829_v29 = vmul.bf16 %v12473_v35, %v18072_v38 }
 0x65f   :  { %v7455_v22 = vmul.f32 0.7978846, %v7385_v47  ;;  %v7386_v49 = vadd.f32 %v18061_v13, %v7316_v54  ;;  %v7177_v27 = vmul.f32 %v18077_v63, %v18077_v63  ;;  %v18090_v40 = vadd.f32 %v17838_v4, %v6955_v10  ;;  %v11202_v26 = vpop.f32.mrb[107].mxu1 }
 0x660   :  { %v7662_v7 = vmul.f32 0.5, %v7592_v20  ;;  %v8324_v12 = vrot.slane %v7899_v62, 1  ;;  %v7969_v43 = vshll.u32 %v7829_v29, 16  ;;  %v7731_v8 = vmul.f32 %v17983_v44, %v7661_v2 }
 0x661   :  { %12322 = vtanh.f32 %v7455_v22  ;;  %v7456_v1 = vmul.f32 0.7978846, %v7386_v49  ;;  %v7247_v24 = vmul.f32 %v18077_v63, %v7177_v27  ;;  %v7178_v51 = vmul.f32 %v18090_v40, %v18090_v40 }
 0x662   :  { %v7732_v47 = vmul.f32 %v17995_v50, %v7662_v7  ;;  %v8325_v54 = vsel %vm2127_vm1, %v8322_v53, %v8324_v12  ;;  %v7971_v17 = vrot.slane %v7969_v43, 1  ;;  %v7973_v49 = vshrl.u32 %v7829_v29, 16  ;;  %v21165_v43 = vld [vmem:[#allocation11_spill] sm:$0xff] }
 0x663   :  { %v12319_v10 = vpop.eup %12318  ;;  %12324 = vtanh.f32 %v7456_v1  ;;  %v7317_v20 = vmul.f32 0.044715, %v7247_v24  ;;  %v7248_v6 = vmul.f32 %v18090_v40, %v7178_v51  ;;  %8395 = vrot.lane.b32.xlu1 %v8325_v54, %s12559_s19 }
 0x664   :  { %v18100_v16 = vpack.c.bf16 %v7732_v47, %v7731_v8  ;;  %v7593_v23 = vadd.f32 1.0, %v12319_v10  ;;  %v6960_v62 = vpop.f32.mrb[108].mxu1  ;;  %v7972_v35 = vsel %vm861_vm2, %v7967_v58, %v7971_v17  ;;  %v12474_v58 = vld [vmem:[%s20653_s3 + $0x30] sm:$0xff]  }
 0x665   :  { %v12321_v22 = vpop.eup %12320  ;;  %v7387_v44 = vadd.f32 %v18077_v63, %v7317_v20  ;;  %v7318_v50 = vmul.f32 0.044715, %v7248_v6  ;;  %v18105_v53 = vadd.f32 %v17838_v4, %v6960_v62  ;;  %8218 = vrot.lane.b32.xlu0 %v7972_v35, %s12560_s22  ;;  %v11205_v2 = vpop.f32.mrb[109].mxu1  ;;  %v7975_v6 = vor.u32 %v7973_v49, %v7971_v17 }
 0x666   :  { %v7663_v27 = vmul.f32 0.5, %v7593_v23  ;;  %v7594_v26 = vadd.f32 1.0, %v12321_v22  ;;  %v6963_v7 = vpop.f32.mrb[110].mxu1  ;;  %v7900_v1 = vmul.bf16 %v18100_v16, %v21165_v43  ;;  %v7830_v24 = vmul.bf16 %v12474_v58, %v18100_v16 }
 0x667   :  { %v7457_v51 = vmul.f32 0.7978846, %v7387_v44  ;;  %v7388_v8 = vadd.f32 %v18090_v40, %v7318_v50  ;;  %v7179_v47 = vmul.f32 %v18105_v53, %v18105_v53  ;;  %v18118_v29 = vadd.f32 %v17838_v4, %v6963_v7  ;;  %v11206_v54 = vpop.f32.mrb[111].mxu1 }
 0x668   :  { %v7664_v10 = vmul.f32 0.5, %v7594_v26  ;;  %v8326_v20 = vrot.slane %v7900_v1, 1  ;;  %v7977_v23 = vshll.u32 %v7830_v24, 16  ;;  %v7733_v44 = vmul.f32 %v18017_v60, %v7663_v27 }
 0x669   :  { %12326 = vtanh.f32 %v7457_v51  ;;  %v7458_v62 = vmul.f32 0.7978846, %v7388_v8  ;;  %v7249_v35 = vmul.f32 %v18105_v53, %v7179_v47  ;;  %v7180_v22 = vmul.f32 %v18118_v29, %v18118_v29 }
 0x66a   :  { %v7734_v50 = vmul.f32 %v18029_v37, %v7664_v10  ;;  %v8327_v2 = vsel %vm2127_vm1, %v8324_v12, %v8326_v20  ;;  %v7979_v7 = vrot.slane %v7977_v23, 1  ;;  %v7981_v47 = vshrl.u32 %v7830_v24, 16 }
 0x66b   :  { %v12323_v43 = vpop.eup %12322  ;;  %12328 = vtanh.f32 %v7458_v62  ;;  %v7319_v26 = vmul.f32 0.044715, %v7249_v35  ;;  %v7250_v17 = vmul.f32 %v18118_v29, %v7180_v22  ;;  %8397 = vrot.lane.b32.xlu1 %v8327_v2, %s12559_s19  ;;  %v21166_v62 = vld [vmem:[#allocation12_spill] sm:$0xff] }
 0x66c   :  { %v18128_v49 = vpack.c.bf16 %v7734_v50, %v7733_v44  ;;  %v7595_v1 = vadd.f32 1.0, %v12323_v43  ;;  %v6968_v58 = vpop.f32.mrb[112].mxu1  ;;  %v7980_v51 = vsel %vm861_vm2, %v7975_v6, %v7979_v7  ;;  %v12475_v6 = vld [vmem:[%s20653_s3 + $0x38] sm:$0xff]  }
 0x66d   :  { %v12325_v8 = vpop.eup %12324  ;;  %v7389_v60 = vadd.f32 %v18105_v53, %v7319_v26  ;;  %v7320_v37 = vmul.f32 0.044715, %v7250_v17  ;;  %v18133_v12 = vadd.f32 %v17838_v4, %v6968_v58  ;;  %8220 = vrot.lane.b32.xlu0 %v7980_v51, %s12560_s22  ;;  %v11209_v27 = vpop.f32.mrb[113].mxu1 }
 0x66e   :  { %v7665_v54 = vmul.f32 0.5, %v7595_v1  ;;  %v7596_v10 = vadd.f32 1.0, %v12325_v8  ;;  %v6971_v23 = vpop.f32.mrb[114].mxu1  ;;  %v7901_v35 = vmul.bf16 %v18128_v49, %v21166_v62  ;;  %v7831_v22 = vmul.bf16 %v12475_v6, %v18128_v49 }
 0x66f   :  { %v7459_v44 = vmul.f32 0.7978846, %v7389_v60  ;;  %v7390_v50 = vadd.f32 %v18118_v29, %v7320_v37  ;;  %v7181_v2 = vmul.f32 %v18133_v12, %v18133_v12  ;;  %v18146_v24 = vadd.f32 %v17838_v4, %v6971_v23  ;;  %v11210_v43 = vpop.f32.mrb[115].mxu1 }
 0x670   :  { %v7666_v26 = vmul.f32 0.5, %v7596_v10  ;;  %v8328_v17 = vrot.slane %v7901_v35, 1  ;;  %v7983_v1 = vor.u32 %v7981_v47, %v7979_v7  ;;  %v7985_v58 = vshll.u32 %v7831_v22, 16 }
 0x671   :  { %12330 = vtanh.f32 %v7459_v44  ;;  %v7460_v51 = vmul.f32 0.7978846, %v7390_v50  ;;  %v7251_v8 = vmul.f32 %v18133_v12, %v7181_v2  ;;  %v7182_v60 = vmul.f32 %v18146_v24, %v18146_v24 }
 0x672   :  { %v7735_v37 = vmul.f32 %v18048_v48, %v7665_v54  ;;  %v7736_v27 = vmul.f32 %v18061_v13, %v7666_v26  ;;  %v8329_v62 = vsel %vm2127_vm1, %v8326_v20, %v8328_v17  ;;  %v7987_v23 = vrot.slane %v7985_v58, 1 }
 0x673   :  { %v12327_v6 = vpop.eup %12326  ;;  %12332 = vtanh.f32 %v7460_v51  ;;  %v7321_v10 = vmul.f32 0.044715, %v7251_v8  ;;  %v7252_v7 = vmul.f32 %v18146_v24, %v7182_v60  ;;  %8399 = vrot.lane.b32.xlu1 %v8329_v62, %s12559_s19  ;;  %v7989_v43 = vshrl.u32 %v7831_v22, 16  ;;  %v21167_v8 = vld [vmem:[#allocation13_spill] sm:$0xff] }
 0x674   :  { %v18156_v47 = vpack.c.bf16 %v7736_v27, %v7735_v37  ;;  %v7597_v35 = vadd.f32 1.0, %v12327_v6  ;;  %v6976_v44 = vpop.f32.mrb[116].mxu1  ;;  %v7988_v50 = vsel %vm861_vm2, %v7983_v1, %v7987_v23  ;;  %v12476_v1 = vld [vmem:[%s20653_s3 + $0x40] sm:$0xff]  }
 0x675   :  { %v12329_v2 = vpop.eup %12328  ;;  %v7391_v48 = vadd.f32 %v18133_v12, %v7321_v10  ;;  %v7322_v13 = vmul.f32 0.044715, %v7252_v7  ;;  %v18161_v20 = vadd.f32 %v17838_v4, %v6976_v44  ;;  %8222 = vrot.lane.b32.xlu0 %v7988_v50, %s12560_s22  ;;  %v11213_v54 = vpop.f32.mrb[117].mxu1  ;;  %v7991_v44 = vor.u32 %v7989_v43, %v7987_v23 }
 0x676   :  { %v7667_v26 = vmul.f32 0.5, %v7597_v35  ;;  %v7598_v58 = vadd.f32 1.0, %v12329_v2  ;;  %v6979_v51 = vpop.f32.mrb[118].mxu1  ;;  %v7902_v60 = vmul.bf16 %v18156_v47, %v21167_v8  ;;  %v7832_v37 = vmul.bf16 %v12476_v1, %v18156_v47 }
 0x677   :  { %v7461_v27 = vmul.f32 0.7978846, %v7391_v48  ;;  %v7392_v62 = vadd.f32 %v18146_v24, %v7322_v13  ;;  %v7183_v6 = vmul.f32 %v18161_v20, %v18161_v20  ;;  %v18174_v22 = vadd.f32 %v17838_v4, %v6979_v51  ;;  %v11214_v10 = vpop.f32.mrb[119].mxu1 }
 0x678   :  { %v7668_v7 = vmul.f32 0.5, %v7598_v58  ;;  %v8330_v35 = vrot.slane %v7902_v60, 1  ;;  %v7993_v50 = vshll.u32 %v7832_v37, 16  ;;  %v7737_v13 = vmul.f32 %v18077_v63, %v7667_v26 }
 0x679   :  { %12334 = vtanh.f32 %v7461_v27  ;;  %v7462_v2 = vmul.f32 0.7978846, %v7392_v62  ;;  %v7253_v54 = vmul.f32 %v18161_v20, %v7183_v6  ;;  %v7184_v48 = vmul.f32 %v18174_v22, %v18174_v22 }
 0x67a   :  { %v7738_v8 = vmul.f32 %v18090_v40, %v7668_v7  ;;  %v8331_v1 = vsel %vm2127_vm1, %v8328_v17, %v8330_v35  ;;  %v7995_v51 = vrot.slane %v7993_v50, 1  ;;  %v7997_v10 = vshrl.u32 %v7832_v37, 16 }
 0x67b   :  { %v12331_v32 = vpop.eup %12330  ;;  %12336 = vtanh.f32 %v7462_v2  ;;  %v7323_v58 = vmul.f32 0.044715, %v7253_v54  ;;  %v7254_v23 = vmul.f32 %v18174_v22, %v7184_v48  ;;  %8401 = vrot.lane.b32.xlu1 %v8331_v1, %s12559_s19  ;;  %v21169_v54 = vld [vmem:[#allocation14_spill] sm:$0xff] }
 0x67c   :  { %v18184_v43 = vpack.c.bf16 %v7738_v8, %v7737_v13  ;;  %v7599_v60 = vadd.f32 1.0, %v12331_v32  ;;  %v6984_v27 = vpop.f32.mrb[120].mxu1  ;;  %v7996_v62 = vsel %vm861_vm2, %v7991_v44, %v7995_v51  ;;  %v12477_v44 = vld [vmem:[%s20653_s3 + $0x48] sm:$0xff]  }
 0x67d   :  { %v12333_v6 = vpop.eup %12332  ;;  %v7393_v63 = vadd.f32 %v18161_v20, %v7323_v58  ;;  %v7324_v40 = vmul.f32 0.044715, %v7254_v23  ;;  %v18189_v17 = vadd.f32 %v17838_v4, %v6984_v27  ;;  %8224 = vrot.lane.b32.xlu0 %v7996_v62, %s12560_s22  ;;  %v11217_v26 = vpop.f32.mrb[121].mxu1  ;;  %v7999_v27 = vor.u32 %v7997_v10, %v7995_v51 }
 0x67e   :  { %21168 = vst [vmem:[#allocation83_spill] sm:$0xff] %v18184_v43  ;;  %v7669_v7 = vmul.f32 0.5, %v7599_v60  ;;  %v7600_v50 = vadd.f32 1.0, %v12333_v6  ;;  %v6987_v2 = vpop.f32.mrb[122].mxu1  ;;  %v7903_v32 = vmul.bf16 %v18184_v43, %v21169_v54  ;;  %v7833_v48 = vmul.bf16 %v12477_v44, %v18184_v43  ;;  %v21198_v43 = vld [vmem:[#allocation33_spill] sm:$0xff] }
 0x67f   :  { %v7463_v13 = vmul.f32 0.7978846, %v7393_v63  ;;  %v7394_v8 = vadd.f32 %v18174_v22, %v7324_v40  ;;  %v7185_v1 = vmul.f32 %v18189_v17, %v18189_v17  ;;  %v18202_v37 = vadd.f32 %v17838_v4, %v6987_v2  ;;  %v11218_v58 = vpop.f32.mrb[123].mxu1 }
 0x680   :  { %v7670_v23 = vmul.f32 0.5, %v7600_v50  ;;  %v8332_v60 = vrot.slane %v7903_v32, 1  ;;  %v8001_v62 = vshll.u32 %v7833_v48, 16  ;;  %v7739_v40 = vmul.f32 %v18105_v53, %v7669_v7 }
 0x681   :  { %12338 = vtanh.f32 %v7463_v13  ;;  %v7464_v6 = vmul.f32 0.7978846, %v7394_v8  ;;  %v7255_v26 = vmul.f32 %v18189_v17, %v7185_v1  ;;  %v7186_v63 = vmul.f32 %v18202_v37, %v18202_v37 }
 0x682   :  { %v7740_v54 = vmul.f32 %v18118_v29, %v7670_v23  ;;  %v8333_v44 = vsel %vm2127_vm1, %v8330_v35, %v8332_v60  ;;  %v8003_v2 = vrot.slane %v8001_v62, 1  ;;  %v8005_v10 = vshrl.u32 %v7833_v48, 16 }
 0x683   :  { %v12335_v25 = vpop.eup %12334  ;;  %12340 = vtanh.f32 %v7464_v6  ;;  %v7325_v50 = vmul.f32 0.044715, %v7255_v26  ;;  %v7256_v51 = vmul.f32 %v18202_v37, %v7186_v63  ;;  %8403 = vrot.lane.b32.xlu1 %v8333_v44, %s12559_s19  ;;  %v21171_v26 = vld [vmem:[#allocation15_spill] sm:$0xff] }
 0x684   :  { %v18212_v32 = vpack.c.bf16 %v7740_v54, %v7739_v40  ;;  %v7601_v13 = vadd.f32 1.0, %v12335_v25  ;;  %v6992_v8 = vpop.f32.mrb[124].mxu1  ;;  %v8004_v1 = vsel %vm861_vm2, %v7999_v27, %v8003_v2  ;;  %v8007_v23 = vor.u32 %v8005_v10, %v8003_v2  ;;  %v12478_v27 = vld [vmem:[%s20653_s3 + $0x50] sm:$0xff]  }
 0x685   :  { %v12337_v53 = vpop.eup %12336  ;;  %v7395_v29 = vadd.f32 %v18189_v17, %v7325_v50  ;;  %v7326_v7 = vmul.f32 0.044715, %v7256_v51  ;;  %v18217_v35 = vadd.f32 %v17838_v4, %v6992_v8  ;;  %8226 = vrot.lane.b32.xlu0 %v8004_v1, %s12560_s22  ;;  %v11221_v58 = vpop.f32.mrb[125].mxu1 }
 0x686   :  { %21170 = vst [vmem:[#allocation91_spill] sm:$0xff] %v18212_v32  ;;  %v7671_v62 = vmul.f32 0.5, %v7601_v13  ;;  %v7602_v6 = vadd.f32 1.0, %v12337_v53  ;;  %v6995_v48 = vpop.f32.mrb[126].mxu1  ;;  %v7904_v25 = vmul.bf16 %v18212_v32, %v21171_v26  ;;  %v7834_v63 = vmul.bf16 %v12478_v27, %v18212_v32 }
 0x687   :  { %v7465_v40 = vmul.f32 0.7978846, %v7395_v29  ;;  %v7396_v54 = vadd.f32 %v18202_v37, %v7326_v7  ;;  %v7187_v44 = vmul.f32 %v18217_v35, %v18217_v35  ;;  %v18230_v2 = vadd.f32 %v17838_v4, %v6995_v48  ;;  %v11222_v50 = vpop.f32.mrb[127].mxu1 }
 0x688   :  { %v7741_v51 = vmul.f32 %v18133_v12, %v7671_v62  ;;  %v7672_v10 = vmul.f32 0.5, %v7602_v6  ;;  %v18233_v13 = vrot.slane %v7904_v25, 1  ;;  %v8009_v8 = vshll.u32 %v7834_v63, 16 }
 0x689   :  { %12342 = vtanh.f32 %v7465_v40  ;;  %v7466_v1 = vmul.f32 0.7978846, %v7396_v54  ;;  %v7257_v53 = vmul.f32 %v18217_v35, %v7187_v44  ;;  %v7188_v29 = vmul.f32 %v18230_v2, %v18230_v2 }
 0x68a   :  { %v7742_v7 = vmul.f32 %v18146_v24, %v7672_v10  ;;  %v8335_v4 = vsel %vm2127_vm1, %v8332_v60, %v18233_v13  ;;  %v8011_v58 = vrot.slane %v8009_v8, 1  ;;  %v8013_v48 = vshrl.u32 %v7834_v63, 16  ;;  %v18252_v63 = vld [vmem:[%s20657_s7] ss:$0 sm:$0xff] }
 0x68b   :  { %v12339_v26 = vpop.eup %12338  ;;  %12344 = vtanh.f32 %v7466_v1  ;;  %v7327_v12 = vmul.f32 0.044715, %v7257_v53  ;;  %v7258_v62 = vmul.f32 %v18230_v2, %v7188_v29  ;;  %8405 = vrot.lane.b32.xlu1 %v8335_v4, %s12559_s19 }
 0x68c   :  { %v18243_v6 = vpack.c.bf16 %v7742_v7, %v7741_v51  ;;  %v7603_v25 = vadd.f32 1.0, %v12339_v26  ;;  %v7000_v27 = vpop.f32.mrb[128].mxu1  ;;  %v8012_v40 = vsel %vm861_vm2, %v8007_v23, %v8011_v58  ;;  %v18246_v54 = vor.u32 %v8013_v48, %v8011_v58  ;;  %v21173_v48 = vld [vmem:[#allocation16_spill] sm:$0xff] }
 0x68d   :  { %v12341_v24 = vpop.eup %12340  ;;  %v7397_v60 = vadd.f32 %v18217_v35, %v7327_v12  ;;  %v7328_v44 = vmul.f32 0.044715, %v7258_v62  ;;  %v18255_v50 = vadd.f32 %v18252_v63, %v7000_v27  ;;  %8228 = vrot.lane.b32.xlu0 %v8012_v40, %s12560_s22  ;;  %v11225_v51 = vpop.f32.mrb[129].mxu1 }
 0x68e   :  { %21172 = vst [vmem:[#allocation90_spill] sm:$0xff] %v18243_v6  ;;  %v7673_v10 = vmul.f32 0.5, %v7603_v25  ;;  %v7604_v8 = vadd.f32 1.0, %v12341_v24  ;;  %v7003_v23 = vpop.f32.mrb[130].mxu1  ;;  %v21174_v24 = vld [vmem:[#allocation18_spill] sm:$0xff] }
 0x68f   :  { %v7467_v1 = vmul.f32 0.7978846, %v7397_v60  ;;  %v7398_v53 = vadd.f32 %v18230_v2, %v7328_v44  ;;  %v7189_v29 = vmul.f32 %v18255_v50, %v18255_v50  ;;  %v18262_v7 = vadd.f32 %v18252_v63, %v7003_v23  ;;  %v11226_v4 = vpop.f32.mrb[131].mxu1  ;;  %v12480_v44 = vld [vmem:[%s20653_s3 + $0x58] sm:$0xff]   ;;  %v21178_v60 = vld [vmem:[#allocation21_spill] sm:$0xff] }
 0x690   :  { %v7674_v58 = vmul.f32 0.5, %v7604_v8  ;;  %v7743_v27 = vmul.f32 %v18161_v20, %v7673_v10  ;;  %v18277_v51 = vmul.bf16 %v12480_v44, %v18243_v6  ;;  %v21177_v4 = vld [vmem:[#allocation20_spill] sm:$0xff]  ;;  %v7905_v26 = vmul.bf16 %v18243_v6, %v21178_v60 }
 0x691   :  { %12346 = vtanh.f32 %v7467_v1  ;;  %v7468_v12 = vmul.f32 0.7978846, %v7398_v53  ;;  %v7259_v62 = vmul.f32 %v18255_v50, %v7189_v29  ;;  %v7190_v25 = vmul.f32 %v18262_v7, %v18262_v7  ;;  %v21175_v53 = vld [vmem:[#allocation19_spill] sm:$0xff] }
 0x692   :  { %v7744_v40 = vmul.f32 %v18174_v22, %v7674_v58  ;;  %v8017_v55 = vshll.u32 %v18277_v51, 16  ;;  %v21180_v58 = vld [vmem:[#allocation24_spill] sm:$0xff] }
 0x693   :  { %v12343_v8 = vpop.eup %12342  ;;  %12348 = vtanh.f32 %v7468_v12  ;;  %v7329_v23 = vmul.f32 0.044715, %v7259_v62  ;;  %v7260_v1 = vmul.f32 %v18262_v7, %v7190_v25 }
 0x694   :  { %v18282_v10 = vpack.c.bf16 %v7744_v40, %v7743_v27  ;;  %v7605_v22 = vadd.f32 1.0, %v12343_v8  ;;  %v7008_v29 = vpop.f32.mrb[132].mxu1  ;;  %v8336_v27 = vrot.slane %v7905_v26, 1 }
 0x695   :  { %v12345_v44 = vpop.eup %12344  ;;  %v7399_v28 = vadd.f32 %v18255_v50, %v7329_v23  ;;  %v7330_v12 = vmul.f32 0.044715, %v7260_v1  ;;  %v18290_v62 = vadd.f32 %v18252_v63, %v7008_v29  ;;  %v11229_v25 = vpop.f32.mrb[133].mxu1 }
 0x696   :  { %21176 = vst [vmem:[#allocation85_spill] sm:$0xff] %v18282_v10  ;;  %v7675_v40 = vmul.f32 0.5, %v7605_v22  ;;  %v7606_v8 = vadd.f32 1.0, %v12345_v44  ;;  %v7011_v20 = vpop.f32.mrb[134].mxu1  ;;  %v12481_v22 = vld [vmem:[%s20653_s3 + $0x60] sm:$0xff]   ;;  %v7906_v5 = vmul.bf16 %v18282_v10, %v21182_v57 }
 0x697   :  { %v7469_v60 = vmul.f32 0.7978846, %v7399_v28  ;;  %v7400_v3 = vadd.f32 %v18262_v7, %v7330_v12  ;;  %v7191_v23 = vmul.f32 %v18290_v62, %v18290_v62  ;;  %v18301_v1 = vadd.f32 %v18252_v63, %v7011_v20  ;;  %v11230_v29 = vpop.f32.mrb[135].mxu1 }
 0x698   :  { %v7676_v25 = vmul.f32 0.5, %v7606_v8  ;;  %v18307_v44 = vmul.bf16 %v12481_v22, %v18282_v10  ;;  %v7745_v8 = vmul.f32 %v18189_v17, %v7675_v40  ;;  %v8019_v29 = vrot.slane %v8017_v55, 1 }
 0x699   :  { %12350 = vtanh.f32 %v7469_v60  ;;  %v7470_v12 = vmul.f32 0.7978846, %v7400_v3  ;;  %v7261_v56 = vmul.f32 %v18290_v62, %v7191_v23  ;;  %v7192_v20 = vmul.f32 %v18301_v1, %v18301_v1  ;;  %v21183_v60 = vld [vmem:[#allocation28_spill] sm:$0xff] }
 0x69a   :  { %v7746_v26 = vmul.f32 %v18202_v37, %v7676_v25  ;;  %v18325_v17 = vsel %vm2127_vm1, %v18233_v13, %v8336_v27  ;;  %v8025_v55 = vshll.u32 %v18307_v44, 16  ;;  %v18340_v3 = vrot.slane %v7906_v5, 1 }
 0x69b   :  { %v12347_v22 = vpop.eup %12346  ;;  %12352 = vtanh.f32 %v7470_v12  ;;  %v7331_v33 = vmul.f32 0.044715, %v7261_v56  ;;  %v7262_v28 = vmul.f32 %v18301_v1, %v7192_v20  ;;  %v8021_v12 = vshrl.u32 %v18277_v51, 16  ;;  %v11992_v20 = vld [vmem:[%s20658_s8] sm:$0xff]  }
 0x69c   :  { %v18321_v23 = vpack.c.bf16 %v7746_v26, %v7745_v8  ;;  %v7607_v21 = vadd.f32 1.0, %v12347_v22  ;;  %v7016_v19 = vpop.f32.mrb[136].mxu1  ;;  %v18338_v22 = vsel %vm861_vm2, %v18246_v54, %v8019_v29  ;;  %9485 = vmatpush1.bf16.msra.mxu0 %v11992_v20  ;;  %v8027_v46 = vrot.slane %v8025_v55, 1  ;;  %v12482_v54 = vld [vmem:[%s20653_s3 + $0x68] sm:$0xff]   ;;  %v21185_v55 = vld [vmem:[#allocation25_spill] sm:$0xff] }
 0x69d   :  { %v12349_v37 = vpop.eup %12348  ;;  %v7401_v57 = vadd.f32 %v18290_v62, %v7331_v33  ;;  %v7332_v40 = vmul.f32 0.044715, %v7262_v28  ;;  %v18330_v56 = vadd.f32 %v18252_v63, %v7016_v19  ;;  %v11233_v25 = vpop.f32.mrb[137].mxu1  ;;  %9486 = vmatprep.subr.bf16.mxu0 %v21147_v30 }
 0x69e   :  { %21184 = vst [vmem:[#allocation87_spill] sm:$0xff] %v18321_v23  ;;  %v7677_v8 = vmul.f32 0.5, %v7607_v21  ;;  %v7608_v26 = vadd.f32 1.0, %v12349_v37  ;;  %v7019_v13 = vpop.f32.mrb[138].mxu1  ;;  %v8023_v37 = vor.u32 %v8021_v12, %v8019_v29  ;;  %v18352_v5 = vmul.bf16 %v12482_v54, %v18321_v23 }
 0x69f   :  { %v7471_v33 = vmul.f32 0.7978846, %v7401_v57  ;;  %v7402_v19 = vadd.f32 %v18301_v1, %v7332_v40  ;;  %v7193_v28 = vmul.f32 %v18330_v56, %v18330_v56  ;;  %v18346_v51 = vadd.f32 %v18252_v63, %v7019_v13  ;;  %v11234_v25 = vpop.f32.mrb[139].mxu1 }
 0x6a0   :  { %v7678_v21 = vmul.f32 0.5, %v7608_v26  ;;  %v7747_v20 = vmul.f32 %v18217_v35, %v7677_v8  ;;  %v7907_v12 = vmul.bf16 %v18321_v23, %v21185_v55  ;;  %v21186_v26 = vld [vmem:[#allocation29_spill] sm:$0xff] }
 0x6a1   :  { %12354 = vtanh.f32 %v7471_v33  ;;  %v7472_v57 = vmul.f32 0.7978846, %v7402_v19  ;;  %v7263_v40 = vmul.f32 %v18330_v56, %v7193_v28  ;;  %v7194_v13 = vmul.f32 %v18346_v51, %v18346_v51 }
 0x6a2   :  { %v7748_v29 = vmul.f32 %v18230_v2, %v7678_v21  ;;  %v18367_v19 = vsel %vm2127_vm1, %v8336_v27, %v18340_v3  ;;  %v8029_v2 = vshrl.u32 %v18307_v44, 16  ;;  %v8033_v21 = vshll.u32 %v18352_v5, 16  ;;  %v11993_v27 = vld [vmem:[%s20658_s8 + $0x8] sm:$0xff]  }
 0x6a3   :  { %v12351_v54 = vpop.eup %12350  ;;  %12356 = vtanh.f32 %v7472_v57  ;;  %v7333_v9 = vmul.f32 0.044715, %v7263_v40  ;;  %v7264_v33 = vmul.f32 %v18346_v51, %v7194_v13  ;;  %v18378_v13 = vsel %vm861_vm2, %v8023_v37, %v8027_v46  ;;  %9487 = vmatpush1.bf16.msra.mxu0 %v11993_v27 }
 0x6a4   :  { %v18369_v28 = vpack.c.bf16 %v7748_v29, %v7747_v20  ;;  %v7609_v35 = vadd.f32 1.0, %v12351_v54  ;;  %v7024_v8 = vpop.f32.mrb[140].mxu1  ;;  %v18383_v54 = vrot.slane %v7907_v12, 1  ;;  %v11994_v12 = vld [vmem:[%s20658_s8 + $0x10] sm:$0xff]   ;;  %v8031_v41 = vor.u32 %v8029_v2, %v8027_v46  ;;  %9488 = vmatprep.subr.bf16.mxu0 %v21147_v30 }
 0x6a5   :  { %v12353_v55 = vpop.eup %12352  ;;  %v7403_v25 = vadd.f32 %v18330_v56, %v7333_v9  ;;  %v7334_v18 = vmul.f32 0.044715, %v7264_v33  ;;  %v18375_v57 = vadd.f32 %v18252_v63, %v7024_v8  ;;  %v11237_v40 = vpop.f32.mrb[141].mxu1  ;;  %v12483_v9 = vld [vmem:[%s20653_s3 + $0x70] sm:$0xff]   ;;  %v8035_v42 = vrot.slane %v8033_v21, 1 }
 0x6a6   :  { %21187 = vst [vmem:[#allocation84_spill] sm:$0xff] %v18369_v28  ;;  %v7679_v20 = vmul.f32 0.5, %v7609_v35  ;;  %v7610_v29 = vadd.f32 1.0, %v12353_v55  ;;  %v7027_v44 = vpop.f32.mrb[142].mxu1  ;;  %v18389_v33 = vmul.bf16 %v12483_v9, %v18369_v28  ;;  %v21188_v9 = vld [vmem:[#allocation27_spill] sm:$0xff] }
 0x6a7   :  { %v7473_v8 = vmul.f32 0.7978846, %v7403_v25  ;;  %v7404_v37 = vadd.f32 %v18346_v51, %v7334_v18  ;;  %v7195_v40 = vmul.f32 %v18375_v57, %v18375_v57  ;;  %v18395_v34 = vadd.f32 %v18252_v63, %v7027_v44  ;;  %v11238_v35 = vpop.f32.mrb[143].mxu1  ;;  %9489 = vmatpush1.bf16.msra.mxu0 %v11994_v12 }
 0x6a8   :  { %v7680_v55 = vmul.f32 0.5, %v7610_v29  ;;  %v7908_v25 = vmul.bf16 %v18369_v28, %v21188_v9  ;;  %v7749_v27 = vmul.f32 %v18255_v50, %v7679_v20  ;;  %v8041_v29 = vshll.u32 %v18389_v33, 16  ;;  %9490 = vmatprep.subr.bf16.mxu0 %v21147_v30 }
 0x6a9   :  { %12358 = vtanh.f32 %v7473_v8  ;;  %v7474_v18 = vmul.f32 0.7978846, %v7404_v37  ;;  %v7265_v23 = vmul.f32 %v18375_v57, %v7195_v40  ;;  %v7196_v44 = vmul.f32 %v18395_v34, %v18395_v34 }
 0x6aa   :  { %v7750_v35 = vmul.f32 %v18262_v7, %v7680_v55  ;;  %v18415_v37 = vsel %vm2127_vm1, %v18340_v3, %v18383_v54  ;;  %v18420_v20 = vsel %vm861_vm2, %v8031_v41, %v8035_v42  ;;  %v8037_v55 = vshrl.u32 %v18352_v5, 16  ;;  %v21191_v5 = vld [vmem:[#allocation31_spill] sm:$0xff] }
 0x6ab   :  { %v12355_v21 = vpop.eup %12354  ;;  %12360 = vtanh.f32 %v7474_v18  ;;  %v7335_v9 = vmul.f32 0.044715, %v7265_v23  ;;  %v7266_v8 = vmul.f32 %v18395_v34, %v7196_v44  ;;  %v11995_v23 = vld [vmem:[%s20658_s8 + $0x18] sm:$0xff]   ;;  %v8043_v28 = vrot.slane %v8041_v29, 1 }
 0x6ac   :  { %v18417_v40 = vpack.c.bf16 %v7750_v35, %v7749_v27  ;;  %v7611_v50 = vadd.f32 1.0, %v12355_v21  ;;  %v7032_v7 = vpop.f32.mrb[144].mxu1  ;;  %v8342_v35 = vrot.slane %v7908_v25, 1  ;;  %9491 = vmatpush1.bf16.msra.mxu0 %v11995_v23  ;;  %v11996_v25 = vld [vmem:[%s20658_s8 + $0x20] sm:$0xff]   ;;  %v8039_v29 = vor.u32 %v8037_v55, %v8035_v42 }
 0x6ad   :  { %v12357_v18 = vpop.eup %12356  ;;  %v7405_v3 = vadd.f32 %v18375_v57, %v7335_v9  ;;  %v7336_v44 = vmul.f32 0.044715, %v7266_v8  ;;  %v18429_v12 = vadd.f32 %v18252_v63, %v7032_v7  ;;  %v11241_v27 = vpop.f32.mrb[145].mxu1  ;;  %9492 = vmatprep.subr.bf16.mxu0 %v21147_v30 }
 0x6ae   :  { %21190 = vst [vmem:[#allocation93_spill] sm:$0xff] %v18417_v40  ;;  %v7681_v21 = vmul.f32 0.5, %v7611_v50  ;;  %v7612_v41 = vadd.f32 1.0, %v12357_v18  ;;  %v7035_v2 = vpop.f32.mrb[146].mxu1  ;;  %v7909_v61 = vmul.bf16 %v18417_v40, %v21191_v5  ;;  %v12484_v18 = vld [vmem:[%s20653_s3 + $0x78] sm:$0xff]   ;;  %v18458_v55 = vsel %vm2127_vm1, %v18383_v54, %v8342_v35 }
 0x6af   :  { %v7475_v10 = vmul.f32 0.7978846, %v7405_v3  ;;  %v7406_v31 = vadd.f32 %v18395_v34, %v7336_v44  ;;  %v7197_v6 = vmul.f32 %v18429_v12, %v18429_v12  ;;  %v18437_v9 = vadd.f32 %v18252_v63, %v7035_v2  ;;  %v11242_v8 = vpop.f32.mrb[147].mxu1 }
 0x6b0   :  { %v7682_v50 = vmul.f32 0.5, %v7612_v41  ;;  %v18442_v7 = vrot.slane %v7909_v61, 1  ;;  %v18448_v3 = vmul.bf16 %v12484_v18, %v18417_v40  ;;  %v7751_v42 = vmul.f32 %v18290_v62, %v7681_v21  ;;  %9493 = vmatpush1.bf16.msra.mxu0 %v11996_v25 }
 0x6b1   :  { %12362 = vtanh.f32 %v7475_v10  ;;  %v7476_v2 = vmul.f32 0.7978846, %v7406_v31  ;;  %v7267_v23 = vmul.f32 %v18429_v12, %v7197_v6  ;;  %v7198_v44 = vmul.f32 %v18437_v9, %v18437_v9  ;;  %9494 = vmatprep.subr.bf16.mxu0 %v21147_v30 }
 0x6b2   :  { %v7752_v61 = vmul.f32 %v18301_v1, %v7682_v50  ;;  %v8045_v27 = vshrl.u32 %v18389_v33, 16  ;;  %v18463_v6 = vsel %vm861_vm2, %v8039_v29, %v8043_v28  ;;  %v8049_v8 = vshll.u32 %v18448_v3, 16 }
 0x6b3   :  { %v12359_v41 = vpop.eup %12358  ;;  %12364 = vtanh.f32 %v7476_v2  ;;  %v7337_v5 = vmul.f32 0.044715, %v7267_v23  ;;  %v7268_v31 = vmul.f32 %v18437_v9, %v7198_v44  ;;  %v18475_v25 = vsel %vm2127_vm1, %v8342_v35, %v18442_v7 }
 0x6b4   :  { %v18465_v10 = vpack.c.bf16 %v7752_v61, %v7751_v42  ;;  %v7613_v62 = vadd.f32 1.0, %v12359_v41  ;;  %v7040_v21 = vpop.f32.mrb[148].mxu1  ;;  %v8047_v1 = vor.u32 %v8045_v27, %v8043_v28  ;;  %v11997_v28 = vld [vmem:[%s20658_s8 + $0x28] sm:$0xff]   ;;  %v21193_v61 = vld [vmem:[#allocation32_spill] sm:$0xff]  ;;  %v12485_v41 = vld [vmem:[%s20653_s3 + $0x80] sm:$0xff]   ;;  %v8051_v40 = vrot.slane %v8049_v8, 1 }
 0x6b5   :  { %v12361_v54 = vpop.eup %12360  ;;  %v7407_v33 = vadd.f32 %v18429_v12, %v7337_v5  ;;  %v7338_v50 = vmul.f32 0.044715, %v7268_v31  ;;  %v18471_v18 = vadd.f32 %v18252_v63, %v7040_v21  ;;  %v8388_v2 = vpop.permute.xlu0 %8387  ;;  %9495 = vmatpush1.bf16.msra.mxu0 %v11997_v28  ;;  %v21194_v8 = vmul.bf16 %v17914_v45, %v21173_v48  ;;  %v11999_v45 = vld [vmem:[%s20658_s8 + $0x38] sm:$0xff]  }
 0x6b6   :  { %21192 = vst [vmem:[#allocation88_spill] sm:$0xff] %v18465_v10  ;;  %v11245_v29 = vpop.f32.mrb[149].mxu1  ;;  %v7683_v23 = vmul.f32 0.5, %v7613_v62  ;;  %v7614_v44 = vadd.f32 1.0, %v12361_v54  ;;  %v7910_v27 = vmul.bf16 %v18465_v10, %v21193_v61  ;;  %v18486_v5 = vmul.bf16 %v12485_v41, %v18465_v10  ;;  %9496 = vmatprep.subr.bf16.mxu0 %v21147_v30 }
 0x6b7   :  { %v7043_v42 = vpop.f32.mrb[150].mxu1  ;;  %v7477_v31 = vmul.f32 0.7978846, %v7407_v33  ;;  %v7408_v35 = vadd.f32 %v18437_v9, %v7338_v50  ;;  %v7199_v21 = vmul.f32 %v18471_v18, %v18471_v18  ;;  %v11998_v29 = vld [vmem:[%s20658_s8 + $0x30] sm:$0xff]   ;;  %v8053_v41 = vshrl.u32 %v18448_v3, 16 }
 0x6b8   :  { %v18492_v62 = vadd.f32 %v18252_v63, %v7043_v42  ;;  %v11246_v54 = vpop.f32.mrb[151].mxu1  ;;  %v7684_v61 = vmul.f32 0.5, %v7614_v44  ;;  %v8057_v33 = vshll.u32 %v18486_v5, 16  ;;  %v18509_v44 = vrot.slane %v7910_v27, 1 }
 0x6b9   :  { %12366 = vtanh.f32 %v7477_v31  ;;  %v7478_v50 = vmul.f32 0.7978846, %v7408_v35  ;;  %v7269_v10 = vmul.f32 %v18471_v18, %v7199_v21  ;;  %v8211_v28 = vpop.permute.xlu0 %8210  ;;  %v7753_v54 = vmul.f32 %v18330_v56, %v7683_v23  ;;  %9497 = vmatpush1.bf16.msra.mxu0 %v11998_v29 }
 0x6ba   :  { %v7200_v42 = vmul.f32 %v18492_v62, %v18492_v62  ;;  %v7754_v32 = vmul.f32 %v18346_v51, %v7684_v61  ;;  %v8461_v3 = vsel %vm5498_vm10, %v21194_v8, %v8211_v28  ;;  %v18515_v61 = vrot.slane %v8057_v33, 1  ;;  %9498 = vmatprep.subr.bf16.mxu0 %v21147_v30 }
 0x6bb   :  { %v12363_v14 = vpop.eup %12362  ;;  %12368 = vtanh.f32 %v7478_v50  ;;  %v7339_v31 = vmul.f32 0.044715, %v7269_v10  ;;  %v8567_v21 = vsel %vm5606_vm11, %v8461_v3, %v8388_v2  ;;  %v18531_v28 = vsel %vm2127_vm1, %v18442_v7, %v18509_v44 }
 0x6bc   :  { %v7270_v35 = vmul.f32 %v18492_v62, %v7200_v42  ;;  %v18513_v46 = vpack.c.bf16 %v7754_v32, %v7753_v54  ;;  %v7615_v56 = vadd.f32 1.0, %v12363_v14  ;;  %v8639_v23 = vshrl.u32 %v8567_v21, 16  ;;  %v7048_v51 = vpop.f32.mrb[152].mxu1 }
 0x6bd   :  { %v12365_v48 = vpop.eup %12364  ;;  %v7409_v10 = vadd.f32 %v18471_v18, %v7339_v31  ;;  %v18523_v2 = vadd.f32 %v18252_v63, %v7048_v51  ;;  %v8390_v32 = vpop.permute.xlu1 %8389  ;;  %v18526_v14 = vsel %vm861_vm2, %v8047_v1, %v8051_v40  ;;  %v8055_v54 = vor.u32 %v8053_v41, %v8051_v40  ;;  %9499 = vmatpush1.bf16.msra.mxu0 %v11999_v45  ;;  %v12000_v1 = vld [vmem:[%s20658_s8 + $0x40] sm:$0xff]  }
 0x6be   :  { %v7340_v27 = vmul.f32 0.044715, %v7270_v35  ;;  %v7685_v29 = vmul.f32 0.5, %v7615_v56  ;;  %v7616_v33 = vadd.f32 1.0, %v12365_v48  ;;  %v8209_v50 = vpop.permute.xlu0 %8208  ;;  %v11249_v42 = vpop.f32.mrb[153].mxu1  ;;  %v8642_v31 = vshll.u32 %v8567_v21, 16  ;;  %9500 = vmatprep.subr.bf16.mxu0 %v21147_v30 }
 0x6bf   :  { %v7479_v8 = vmul.f32 0.7978846, %v7409_v10  ;;  %v7201_v35 = vmul.f32 %v18523_v2, %v18523_v2  ;;  %v7051_v51 = vpop.f32.mrb[154].mxu1  ;;  %v8641_v48 = vrot.slane %v8639_v23, 7  ;;  %v18544_v40 = vsel %vm861_vm2, %v8055_v54, %v18515_v61  ;;  %v21196_v45 = vld [vmem:[#allocation17_spill] sm:$0xff] }
 0x6c0   :  { %v7410_v3 = vadd.f32 %v18492_v62, %v7340_v27  ;;  %v7686_v56 = vmul.f32 0.5, %v7616_v33  ;;  %v18540_v42 = vadd.f32 %v18252_v63, %v7051_v51  ;;  %v11250_v7 = vpop.f32.mrb[155].mxu1  ;;  %21195 = vst [vmem:[#allocation73_spill] sm:$0xff] %v18544_v40  ;;  %v8458_v10 = vsel %vm5498_vm10, %v21196_v45, %v8209_v50 }
 0x6c1   :  { %12370 = vtanh.f32 %v7479_v8  ;;  %v7271_v21 = vmul.f32 %v18523_v2, %v7201_v35  ;;  %v8213_v27 = vpop.permute.xlu1 %8212  ;;  %v7755_v23 = vmul.f32 %v18375_v57, %v7685_v29  ;;  %v21197_v54 = vmul.bf16 %v17942_v52, %v21174_v24  ;;  %9501 = vmatpush1.bf16.msra.mxu0 %v12000_v1  ;;  %v12001_v52 = vld [vmem:[%s20658_s8 + $0x48] sm:$0xff]  }
 0x6c2   :  { %v7480_v41 = vmul.f32 0.7978846, %v7410_v3  ;;  %v7756_v33 = vmul.f32 %v18395_v34, %v7686_v56  ;;  %v7202_v51 = vmul.f32 %v18540_v42, %v18540_v42  ;;  %9502 = vmatprep.subr.bf16.mxu0 %v21147_v30 }
 0x6c3   :  { %v8464_v7 = vsel %vm5498_vm10, %v21197_v54, %v8213_v27  ;;  %v12367_v8 = vpop.eup %12366  ;;  %v7341_v3 = vmul.f32 0.044715, %v7271_v21 }
 0x6c4   :  { %12372 = vtanh.f32 %v7480_v41  ;;  %v8569_v35 = vsel %vm5606_vm11, %v8464_v7, %v8390_v32  ;;  %v18561_v57 = vpack.c.bf16 %v7756_v33, %v7755_v23  ;;  %v7617_v34 = vadd.f32 1.0, %v12367_v8  ;;  %v7056_v45 = vpop.f32.mrb[156].mxu1 }
 0x6c5   :  { %v7272_v29 = vmul.f32 %v18540_v42, %v7202_v51  ;;  %v8646_v56 = vshrl.u32 %v8569_v35, 16  ;;  %v12369_v24 = vpop.eup %12368  ;;  %v8644_v41 = vor.u32 %v8642_v31, %v8641_v48  ;;  %v7411_v32 = vadd.f32 %v18523_v2, %v7341_v3  ;;  %v8386_v27 = vpop.permute.xlu1 %8385  ;;  %9503 = vmatpush1.bf16.msra.mxu0 %v12001_v52 }
 0x6c6   :  { %v8649_v21 = vshll.u32 %v8569_v35, 16  ;;  %v18570_v1 = vadd.f32 %v18252_v63, %v7056_v45  ;;  %v11253_v23 = vpop.f32.mrb[157].mxu1  ;;  %v7687_v33 = vmul.f32 0.5, %v7617_v34  ;;  %v7618_v51 = vadd.f32 1.0, %v12369_v24  ;;  %v12002_v34 = vld [vmem:[%s20658_s8 + $0x50] sm:$0xff]   ;;  %9504 = vmatprep.subr.bf16.mxu0 %v21147_v30 }
 0x6c7   :  { %v7342_v54 = vmul.f32 0.044715, %v7272_v29  ;;  %v18572_v7 = vrot.slane %v8646_v56, 7  ;;  %v7059_v8 = vpop.f32.mrb[158].mxu1  ;;  %v7481_v50 = vmul.f32 0.7978846, %v7411_v32  ;;  %v8565_v31 = vsel %vm5606_vm11, %v8458_v10, %v8386_v27  ;;  %v8215_v35 = vpop.permute.xlu0 %8214 }
 0x6c8   :  { %v7203_v40 = vmul.f32 %v18570_v1, %v18570_v1  ;;  %v18578_v3 = vadd.f32 %v18252_v63, %v7059_v8  ;;  %v11254_v45 = vpop.f32.mrb[159].mxu1  ;;  %v7757_v29 = vmul.f32 %v18429_v12, %v7687_v33  ;;  %v7688_v56 = vmul.f32 0.5, %v7618_v51 }
 0x6c9   :  { %v7412_v24 = vadd.f32 %v18540_v42, %v7342_v54  ;;  %v8651_v32 = vor.u32 %v8649_v21, %v18572_v7  ;;  %12374 = vtanh.f32 %v7481_v50  ;;  %v8636_v27 = vshrl.u32 %v8565_v31, 16  ;;  %v8392_v23 = vpop.permute.xlu1 %8391  ;;  %9505 = vmatpush1.bf16.msra.mxu0 %v12002_v34 }
 0x6ca   :  { %v7273_v10 = vmul.f32 %v18570_v1, %v7203_v40  ;;  %v7204_v52 = vmul.f32 %v18578_v3, %v18578_v3  ;;  %v7758_v8 = vmul.f32 %v18437_v9, %v7688_v56  ;;  %v21199_v12 = vmul.bf16 %v17978_v59, %v21175_v53  ;;  %v12003_v59 = vld [vmem:[%s20658_s8 + $0x58] sm:$0xff]   ;;  %9506 = vmatprep.subr.bf16.mxu0 %v21147_v30 }
 0x6cb   :  { %v7482_v45 = vmul.f32 0.7978846, %v7412_v24  ;;  %v18596_v21 = vsel %vm1388_vm0, %v8641_v48, %v8651_v32  ;;  %v12371_v51 = vpop.eup %12370  ;;  %v8638_v54 = vrot.slane %v8636_v27, 7 }
 0x6cc   :  { %v8467_v33 = vsel %vm5498_vm10, %v21199_v12, %v8215_v35  ;;  %v7343_v50 = vmul.f32 0.044715, %v7273_v10  ;;  %v7274_v40 = vmul.f32 %v18578_v3, %v7204_v52  ;;  %8954 = vrot.lane.b32.xlu1 %v18596_v21, %s12559_s19  ;;  %v18605_v53 = vpack.c.bf16 %v7758_v8, %v7757_v29  ;;  %v7064_v35 = vpop.f32.mrb[160].mxu1 }
 0x6cd   :  { %v8571_v31 = vsel %vm5606_vm11, %v8467_v33, %v8392_v23  ;;  %v7619_v9 = vadd.f32 1.0, %v12371_v51  ;;  %12376 = vtanh.f32 %v7482_v45  ;;  %v18610_v27 = vsel %vm1388_vm0, %v8638_v54, %v8644_v41  ;;  %v11257_v34 = vpop.f32.mrb[161].mxu1  ;;  %9507 = vmatpush1.bf16.msra.mxu0 %v12003_v59 }
 0x6ce   :  { %v8653_v48 = vshrl.u32 %v8571_v31, 16  ;;  %v12373_v56 = vpop.eup %12372  ;;  %v7413_v24 = vadd.f32 %v18570_v1, %v7343_v50  ;;  %v7344_v32 = vmul.f32 0.044715, %v7274_v40  ;;  %v8656_v10 = vshll.u32 %v8571_v31, 16  ;;  %8884 = vrot.lane.b32.xlu0 %v18610_v27, %s12561_s21  ;;  %v7067_v8 = vpop.f32.mrb[162].mxu1  ;;  %v12004_v31 = vld [vmem:[%s20658_s8 + $0x60] sm:$0xff]   ;;  %9508 = vmatprep.subr.bf16.mxu0 %v21147_v30 }
 0x6cf   :  { %v7689_v52 = vmul.f32 0.5, %v7619_v9  ;;  %v7620_v23 = vadd.f32 1.0, %v12373_v56  ;;  %v18617_v29 = vadd.f32 %v18252_v63, %v7064_v35  ;;  %v18621_v51 = vadd.f32 %v18252_v63, %v7067_v8  ;;  %v8217_v41 = vpop.permute.xlu0 %8216  ;;  %v11258_v50 = vpop.f32.mrb[163].mxu1 }
 0x6d0   :  { %v18612_v12 = vrot.slane %v8653_v48, 7  ;;  %v7483_v45 = vmul.f32 0.7978846, %v7413_v24  ;;  %v7414_v33 = vadd.f32 %v18578_v3, %v7344_v32  ;;  %8407 = vrot.lane.b32.xlu1 %v18325_v17, %s12559_s19  ;;  %v21200_v54 = vmul.bf16 %v18513_v46, %v21198_v43  ;;  %v8394_v43 = vpop.permute.xlu1 %8393 }
 0x6d1   :  { %v7759_v9 = vmul.f32 %v18471_v18, %v7689_v52  ;;  %v7690_v48 = vmul.f32 0.5, %v7620_v23  ;;  %v7205_v56 = vmul.f32 %v18617_v29, %v18617_v29  ;;  %v7206_v59 = vmul.f32 %v18621_v51, %v18621_v51  ;;  %9509 = vmatpush1.bf16.msra.mxu0 %v12004_v31 }
 0x6d2   :  { %v18628_v40 = vrot.slane %v21200_v54, 1  ;;  %v8658_v35 = vor.u32 %v8656_v10, %v18612_v12  ;;  %12378 = vtanh.f32 %v7483_v45  ;;  %v7484_v17 = vmul.f32 0.7978846, %v7414_v33  ;;  %8230 = vrot.lane.b32.xlu0 %v18338_v22, %s12560_s22  ;;  %v12005_v22 = vld [vmem:[%s20658_s8 + $0x68] sm:$0xff]   ;;  %9510 = vmatprep.subr.bf16.mxu0 %v21147_v30 }
 0x6d3   :  { %v21201_v24 = vmul.bf16 %v18012_v11, %v21177_v4  ;;  %v7760_v18 = vmul.f32 %v18492_v62, %v7690_v48  ;;  %v7275_v10 = vmul.f32 %v18617_v29, %v7205_v56  ;;  %v12375_v23 = vpop.eup %12374  ;;  %v7276_v8 = vmul.f32 %v18621_v51, %v7206_v59  ;;  %v12486_v4 = vld [vmem:[%s20653_s3 + $0x88] sm:$0xff]  }
 0x6d4   :  { %v18651_v52 = vsel %vm1388_vm0, %v18572_v7, %v8658_v35  ;;  %12380 = vtanh.f32 %v7484_v17  ;;  %v18660_v62 = vmul.bf16 %v12486_v4, %v18513_v46  ;;  %v7621_v45 = vadd.f32 1.0, %v12375_v23 }
 0x6d5   :  { %v8470_v32 = vsel %vm5498_vm10, %v21201_v24, %v8217_v41  ;;  %8956 = vrot.lane.b32.xlu1 %v18651_v52, %s12559_s19  ;;  %v18665_v7 = vpack.c.bf16 %v7760_v18, %v7759_v9  ;;  %v7345_v33 = vmul.f32 0.044715, %v7275_v10  ;;  %v7072_v41 = vpop.f32.mrb[164].mxu1  ;;  %v8061_v50 = vshrl.u32 %v18486_v5, 16  ;;  %9511 = vmatpush1.bf16.msra.mxu0 %v12005_v22 }
 0x6d6   :  { %v8573_v34 = vsel %vm5606_vm11, %v8470_v32, %v8394_v43  ;;  %v7346_v54 = vmul.f32 0.044715, %v7276_v8  ;;  %v18672_v56 = vadd.f32 %v18252_v63, %v7072_v41  ;;  %v11261_v31 = vpop.f32.mrb[165].mxu1  ;;  %v7691_v43 = vmul.f32 0.5, %v7621_v45  ;;  %8886 = vrot.lane.b32.xlu0 %v18596_v21, %s12561_s21  ;;  %9512 = vmatprep.subr.bf16.mxu0 %v21147_v30 }
 0x6d7   :  { %v8660_v11 = vshrl.u32 %v8573_v34, 16  ;;  %v8663_v35 = vshll.u32 %v8573_v34, 16  ;;  %v12377_v17 = vpop.eup %12376  ;;  %v7415_v9 = vadd.f32 %v18617_v29, %v7345_v33  ;;  %v7075_v59 = vpop.f32.mrb[166].mxu1  ;;  %v18680_v5 = vsel %vm2127_vm1, %v18509_v44, %v18628_v40  ;;  %v12006_v44 = vld [vmem:[%s20658_s8 + $0x70] sm:$0xff]  }
 0x6d8   :  { %v18683_v24 = vor.u32 %v8061_v50, %v18515_v61  ;;  %v7622_v32 = vadd.f32 1.0, %v12377_v17  ;;  %v7416_v18 = vadd.f32 %v18621_v51, %v7346_v54  ;;  %v7207_v34 = vmul.f32 %v18672_v56, %v18672_v56  ;;  %v8219_v23 = vpop.permute.xlu0 %8218  ;;  %v11262_v8 = vpop.f32.mrb[167].mxu1 }
 0x6d9   :  { %v18669_v48 = vrot.slane %v8660_v11, 7  ;;  %8409 = vrot.lane.b32.xlu1 %v18367_v19, %s12559_s19  ;;  %v7485_v61 = vmul.f32 0.7978846, %v7415_v9  ;;  %v8396_v11 = vpop.permute.xlu1 %8395  ;;  %v18695_v4 = vadd.f32 %v18252_v63, %v7075_v59  ;;  %v21202_v45 = vmul.bf16 %v18043_v15, %v21179_v0  ;;  %9513 = vmatpush1.bf16.msra.mxu0 %v12006_v44 }
 0x6da   :  { %v8065_v41 = vshll.u32 %v18660_v62, 16  ;;  %v7692_v19 = vmul.f32 0.5, %v7622_v32  ;;  %v7486_v22 = vmul.f32 0.7978846, %v7416_v18  ;;  %v7277_v50 = vmul.f32 %v18672_v56, %v7207_v34  ;;  %8232 = vrot.lane.b32.xlu0 %v18378_v13, %s12560_s22  ;;  %9514 = vmatprep.subr.bf16.mxu0 %v21147_v30 }
 0x6db   :  { %v8665_v10 = vor.u32 %v8663_v35, %v18669_v48  ;;  %v8473_v33 = vsel %vm5498_vm10, %v21202_v45, %v8219_v23  ;;  %v7761_v35 = vmul.f32 %v18523_v2, %v7691_v43  ;;  %12382 = vtanh.f32 %v7485_v61  ;;  %v12007_v2 = vld [vmem:[%s20658_s8 + $0x78] sm:$0xff]  }
 0x6dc   :  { %v8575_v54 = vsel %vm5606_vm11, %v8473_v33, %v8396_v11  ;;  %v7208_v31 = vmul.f32 %v18695_v4, %v18695_v4  ;;  %v12379_v0 = vpop.eup %12378  ;;  %v7762_v15 = vmul.f32 %v18540_v42, %v7692_v19  ;;  %12384 = vtanh.f32 %v7486_v22  ;;  %v7080_v13 = vpop.f32.mrb[168].mxu1  ;;  %v21203_v42 = vld [vmem:[#allocation34_spill] sm:$0xff] }
 0x6dd   :  { %v8667_v17 = vshrl.u32 %v8575_v54, 16  ;;  %v7347_v9 = vmul.f32 0.044715, %v7277_v50  ;;  %v18713_v59 = vsel %vm1388_vm0, %v18612_v12, %v8665_v10  ;;  %v7623_v43 = vadd.f32 1.0, %v12379_v0  ;;  %v11265_v61 = vpop.f32.mrb[169].mxu1  ;;  %9515 = vmatpush1.bf16.msra.mxu0 %v12007_v2 }
 0x6de   :  { %v7278_v32 = vmul.f32 %v18695_v4, %v7208_v31  ;;  %8958 = vrot.lane.b32.xlu1 %v18713_v59, %s12559_s19  ;;  %v7912_v34 = vmul.bf16 %v18561_v57, %v21203_v42  ;;  %v12381_v12 = vpop.eup %12380  ;;  %v18726_v10 = vpack.c.bf16 %v7762_v15, %v7761_v35  ;;  %v8670_v8 = vshll.u32 %v8575_v54, 16  ;;  %8888 = vrot.lane.b32.xlu0 %v18651_v52, %s12561_s21  ;;  %v7083_v19 = vpop.f32.mrb[170].mxu1 }
 0x6df   :  { %v18719_v18 = vrot.slane %v8667_v17, 7  ;;  %v7417_v23 = vadd.f32 %v18672_v56, %v7347_v9  ;;  %v18730_v44 = vadd.f32 %v18252_v63, %v7080_v13  ;;  %v7693_v11 = vmul.f32 0.5, %v7623_v43  ;;  %v8221_v31 = vpop.permute.xlu0 %8220  ;;  %v11266_v17 = vpop.f32.mrb[171].mxu1  ;;  %11303 = vmatprep.subr.bf16.mxu0 %v21149_v39 }
 0x6e0   :  { %v7624_v45 = vadd.f32 1.0, %v12381_v12  ;;  %v7348_v33 = vmul.f32 0.044715, %v7278_v32  ;;  %v18734_v22 = vrot.slane %v8065_v41, 1  ;;  %v18740_v54 = vadd.f32 %v18252_v63, %v7083_v19  ;;  %v8398_v9 = vpop.permute.xlu1 %8397  ;;  %v12487_v32 = vld [vmem:[%s20653_s3 + $0x90] sm:$0xff]  }
 0x6e1   :  { %v7487_v30 = vmul.f32 0.7978846, %v7417_v23  ;;  %v8672_v50 = vor.u32 %v8670_v8, %v18719_v18  ;;  %v7209_v35 = vmul.f32 %v18730_v44, %v18730_v44  ;;  %v21204_v41 = vmul.bf16 %v18072_v38, %v21180_v58 }
 0x6e2   :  { %v7694_v0 = vmul.f32 0.5, %v7624_v45  ;;  %v7418_v15 = vadd.f32 %v18695_v4, %v7348_v33  ;;  %8411 = vrot.lane.b32.xlu1 %v18415_v37, %s12559_s19  ;;  %v18753_v13 = vmul.bf16 %v12487_v32, %v18561_v57  ;;  %v7210_v38 = vmul.f32 %v18740_v54, %v18740_v54  ;;  %8234 = vrot.lane.b32.xlu0 %v18420_v20, %s12560_s22 }
 0x6e3   :  { %v8476_v43 = vsel %vm5498_vm10, %v21204_v41, %v8221_v31  ;;  %12386 = vtanh.f32 %v7487_v30  ;;  %v7279_v2 = vmul.f32 %v18730_v44, %v7209_v35  ;;  %v7763_v42 = vmul.f32 %v18570_v1, %v7693_v11 }
 0x6e4   :  { %v8577_v58 = vsel %vm5606_vm11, %v8476_v43, %v8398_v9  ;;  %v7764_v37 = vmul.f32 %v18578_v3, %v7694_v0  ;;  %v7488_v12 = vmul.f32 0.7978846, %v7418_v15  ;;  %v7280_v61 = vmul.f32 %v18740_v54, %v7210_v38  ;;  %v7088_v3 = vpop.f32.mrb[172].mxu1 }
 0x6e5   :  { %v8674_v23 = vshrl.u32 %v8577_v58, 16  ;;  %v7349_v8 = vmul.f32 0.044715, %v7279_v2  ;;  %v8677_v45 = vshll.u32 %v8577_v58, 16  ;;  %v18767_v33 = vsel %vm1388_vm0, %v18669_v48, %v8672_v50  ;;  %v12383_v19 = vpop.eup %12382  ;;  %v11269_v50 = vpop.f32.mrb[173].mxu1 }
 0x6e6   :  { %v18769_v30 = vpack.c.bf16 %v7764_v37, %v7763_v42  ;;  %12388 = vtanh.f32 %v7488_v12  ;;  %8960 = vrot.lane.b32.xlu1 %v18767_v33, %s12559_s19  ;;  %v8073_v20 = vshll.u32 %v18753_v13, 16  ;;  %v12385_v11 = vpop.eup %12384  ;;  %v7625_v35 = vadd.f32 1.0, %v12383_v19  ;;  %8890 = vrot.lane.b32.xlu0 %v18713_v59, %s12561_s21  ;;  %v7091_v9 = vpop.f32.mrb[174].mxu1 }
 0x6e7   :  { %v18771_v1 = vrot.slane %v8674_v23, 7  ;;  %v7419_v31 = vadd.f32 %v18730_v44, %v7349_v8  ;;  %v7350_v17 = vmul.f32 0.044715, %v7280_v61  ;;  %v18778_v48 = vadd.f32 %v18252_v63, %v7088_v3  ;;  %v8223_v42 = vpop.permute.xlu0 %8222  ;;  %v11270_v37 = vpop.f32.mrb[175].mxu1 }
 0x6e8   :  { %v7626_v0 = vadd.f32 1.0, %v12385_v11  ;;  %v18783_v41 = vrot.slane %v7912_v34, 1  ;;  %v8069_v43 = vshrl.u32 %v18660_v62, 16  ;;  %v7695_v32 = vmul.f32 0.5, %v7625_v35  ;;  %v8400_v19 = vpop.permute.xlu1 %8399 }
 0x6e9   :  { %v8679_v15 = vor.u32 %v8677_v45, %v18771_v1  ;;  %v7489_v2 = vmul.f32 0.7978846, %v7419_v31  ;;  %v7420_v38 = vadd.f32 %v18740_v54, %v7350_v17  ;;  %v7211_v58 = vmul.f32 %v18778_v48, %v18778_v48 }
 0x6ea   :  { %v7696_v12 = vmul.f32 0.5, %v7626_v0  ;;  %v18790_v23 = vadd.f32 %v18252_v63, %v7091_v9  ;;  %v21205_v8 = vmul.bf16 %v18100_v16, %v21181_v36  ;;  %8413 = vrot.lane.b32.xlu1 %v18458_v55, %s12559_s19  ;;  %v18803_v3 = vrot.slane %v8073_v20, 1  ;;  %8236 = vrot.lane.b32.xlu0 %v18463_v6, %s12560_s22 }
 0x6eb   :  { %v18800_v62 = vsel %vm1388_vm0, %v18719_v18, %v8679_v15  ;;  %12390 = vtanh.f32 %v7489_v2  ;;  %v7490_v61 = vmul.f32 0.7978846, %v7420_v38  ;;  %v7281_v45 = vmul.f32 %v18778_v48, %v7211_v58 }
 0x6ec   :  { %v8479_v34 = vsel %vm5498_vm10, %v21205_v8, %v8223_v42  ;;  %v7765_v63 = vmul.f32 %v18617_v29, %v7695_v32  ;;  %v7766_v36 = vmul.f32 %v18621_v51, %v7696_v12  ;;  %v7212_v16 = vmul.f32 %v18790_v23, %v18790_v23  ;;  %v7096_v17 = vpop.f32.mrb[176].mxu1 }
 0x6ed   :  { %v8579_v55 = vsel %vm5606_vm11, %v8479_v34, %v8400_v19  ;;  %v12387_v18 = vpop.eup %12386  ;;  %12392 = vtanh.f32 %v7490_v61  ;;  %v7351_v11 = vmul.f32 0.044715, %v7281_v45  ;;  %v18815_v20 = vsel %vm861_vm2, %v18683_v24, %v18734_v22  ;;  %v18829_v24 = vld [vmem:[%s20657_s7] ss:$0 sm:$0xff]  ;;  %v11273_v32 = vpop.f32.mrb[177].mxu1 }
 0x6ee   :  { %v8681_v35 = vshrl.u32 %v8579_v55, 16  ;;  %v18817_v29 = vpack.c.bf16 %v7766_v36, %v7765_v63  ;;  %v7627_v51 = vadd.f32 1.0, %v12387_v18  ;;  %v7282_v31 = vmul.f32 %v18790_v23, %v7212_v16  ;;  %8962 = vrot.lane.b32.xlu1 %v18800_v62, %s12559_s19  ;;  %8892 = vrot.lane.b32.xlu0 %v18767_v33, %s12561_s21  ;;  %v8402_v63 = vpop.permute.xlu1 %8401 }
 0x6ef   :  { %v8071_v6 = vor.u32 %v8069_v43, %v18734_v22  ;;  %v7421_v50 = vadd.f32 %v18778_v48, %v7351_v11  ;;  %v8684_v15 = vshll.u32 %v8579_v55, 16  ;;  %v18832_v9 = vadd.f32 %v18829_v24, %v7096_v17  ;;  %v7099_v22 = vpop.f32.mrb[178].mxu1  ;;  %v8225_v61 = vpop.permute.xlu0 %8224  ;;  %v21208_v55 = vld [vmem:[#allocation35_spill] sm:$0xff] }
 0x6f0   :  { %21206 = vst [vmem:[#allocation79_spill] sm:$0xff] %v18817_v29  ;;  %v18824_v0 = vrot.slane %v8681_v35, 7  ;;  %v12389_v2 = vpop.eup %12388  ;;  %v7697_v38 = vmul.f32 0.5, %v7627_v51  ;;  %v7352_v58 = vmul.f32 0.044715, %v7282_v31  ;;  %v18839_v43 = vsel %vm2127_vm1, %v18628_v40, %v18783_v41  ;;  %v11274_v45 = vpop.f32.mrb[179].mxu1 }
 0x6f1   :  { %v18843_v42 = vsel %vm861_vm2, %v8071_v6, %v18803_v3  ;;  %v7628_v37 = vadd.f32 1.0, %v12389_v2  ;;  %v7491_v12 = vmul.f32 0.7978846, %v7421_v50  ;;  %v7213_v34 = vmul.f32 %v18832_v9, %v18832_v9 }
 0x6f2   :  { %v8686_v8 = vor.u32 %v8684_v15, %v18824_v0  ;;  %v7422_v19 = vadd.f32 %v18790_v23, %v7352_v58  ;;  %v18850_v36 = vadd.f32 %v18829_v24, %v7099_v22  ;;  %v21207_v40 = vmul.bf16 %v18128_v49, %v21183_v60  ;;  %8415 = vrot.lane.b32.xlu1 %v18475_v25, %s12559_s19  ;;  %v12489_v49 = vld [vmem:[%s20653_s3 + $0x98] sm:$0xff]  }
 0x6f3   :  { %v7913_v18 = vmul.bf16 %v18605_v53, %v21208_v55  ;;  %v7698_v11 = vmul.f32 0.5, %v7628_v37  ;;  %12394 = vtanh.f32 %v7491_v12  ;;  %v7283_v35 = vmul.f32 %v18832_v9, %v7213_v34  ;;  %8238 = vrot.lane.b32.xlu0 %v18526_v14, %s12560_s22 }
 0x6f4   :  { %v8482_v16 = vsel %vm5498_vm10, %v21207_v40, %v8225_v61  ;;  %v7492_v31 = vmul.f32 0.7978846, %v7422_v19  ;;  %v7214_v17 = vmul.f32 %v18850_v36, %v18850_v36  ;;  %v18870_v60 = vmul.bf16 %v12489_v49, %v18605_v53  ;;  %v7104_v37 = vpop.f32.mrb[180].mxu1 }
 0x6f5   :  { %v8581_v51 = vsel %vm5606_vm11, %v8482_v16, %v8402_v63  ;;  %v12391_v25 = vpop.eup %12390  ;;  %v7767_v50 = vmul.f32 %v18672_v56, %v7697_v38  ;;  %v7768_v15 = vmul.f32 %v18695_v4, %v7698_v11  ;;  %v7353_v32 = vmul.f32 0.044715, %v7283_v35 }
 0x6f6   :  { %v8688_v6 = vshrl.u32 %v8581_v51, 16  ;;  %v18876_v2 = vsel %vm1388_vm0, %v18771_v1, %v8686_v8  ;;  %v7629_v58 = vadd.f32 1.0, %v12391_v25  ;;  %12396 = vtanh.f32 %v7492_v31  ;;  %v11277_v1 = vpop.f32.mrb[181].mxu1 }
 0x6f7   :  { %v7284_v14 = vmul.f32 %v18850_v36, %v7214_v17  ;;  %8964 = vrot.lane.b32.xlu1 %v18876_v2, %s12559_s19  ;;  %v12393_v12 = vpop.eup %12392  ;;  %v18883_v34 = vpack.c.bf16 %v7768_v15, %v7767_v50  ;;  %v7423_v56 = vadd.f32 %v18832_v9, %v7353_v32  ;;  %v8691_v4 = vshll.u32 %v8581_v51, 16  ;;  %8894 = vrot.lane.b32.xlu0 %v18800_v62, %s12561_s21  ;;  %v7107_v19 = vpop.f32.mrb[182].mxu1 }
 0x6f8   :  { %v18879_v22 = vrot.slane %v8688_v6, 7  ;;  %v18887_v38 = vadd.f32 %v18829_v24, %v7104_v37  ;;  %v7699_v8 = vmul.f32 0.5, %v7629_v58  ;;  %v7630_v61 = vadd.f32 1.0, %v12393_v12  ;;  %v8227_v35 = vpop.permute.xlu0 %8226  ;;  %v11278_v51 = vpop.f32.mrb[183].mxu1  ;;  %v21211_v37 = vld [vmem:[#allocation73_spill] sm:$0xff] }
 0x6f9   :  { %21209 = vst [vmem:[#allocation70_spill] sm:$0xff] %v18883_v34  ;;  %v7354_v45 = vmul.f32 0.044715, %v7284_v14  ;;  %v18891_v63 = vrot.slane %v7913_v18, 1  ;;  %v7493_v40 = vmul.f32 0.7978846, %v7423_v56  ;;  %v18897_v11 = vadd.f32 %v18829_v24, %v7107_v19  ;;  %v8404_v6 = vpop.permute.xlu1 %8403 }
 0x6fa   :  { %v8693_v16 = vor.u32 %v8691_v4, %v18879_v22  ;;  %v7215_v55 = vmul.f32 %v18887_v38, %v18887_v38  ;;  %v7700_v31 = vmul.f32 0.5, %v7630_v61  ;;  %v21210_v49 = vmul.bf16 %v18156_v47, %v21186_v26 }
 0x6fb   :  { %v7424_v17 = vadd.f32 %v18850_v36, %v7354_v45  ;;  %8417 = vrot.lane.b32.xlu1 %v18531_v28, %s12559_s19  ;;  %v8077_v25 = vshrl.u32 %v18753_v13, 16  ;;  %12398 = vtanh.f32 %v7493_v40  ;;  %v7216_v15 = vmul.f32 %v18897_v11, %v18897_v11  ;;  %8240 = vrot.lane.b32.xlu0 %v21211_v37, %s12560_s22 }
 0x6fc   :  { %v8485_v18 = vsel %vm5498_vm10, %v21210_v49, %v8227_v35  ;;  %v7285_v50 = vmul.f32 %v18887_v38, %v7215_v55  ;;  %v7769_v58 = vmul.f32 %v18730_v44, %v7699_v8  ;;  %v7770_v14 = vmul.f32 %v18740_v54, %v7700_v31  ;;  %v7112_v54 = vpop.f32.mrb[184].mxu1 }
 0x6fd   :  { %v8583_v32 = vsel %vm5606_vm11, %v8485_v18, %v8404_v6  ;;  %v7494_v47 = vmul.f32 0.7978846, %v7424_v17  ;;  %v12395_v28 = vpop.eup %12394  ;;  %v7286_v13 = vmul.f32 %v18897_v11, %v7216_v15  ;;  %v18918_v4 = vsel %vm1388_vm0, %v18824_v0, %v8693_v16  ;;  %v11281_v40 = vpop.f32.mrb[185].mxu1 }
 0x6fe   :  { %v8695_v26 = vshrl.u32 %v8583_v32, 16  ;;  %v7355_v12 = vmul.f32 0.044715, %v7285_v50  ;;  %v8698_v56 = vshll.u32 %v8583_v32, 16  ;;  %v18920_v1 = vpack.c.bf16 %v7770_v14, %v7769_v58  ;;  %v7115_v51 = vpop.f32.mrb[186].mxu1  ;;  %v21213_v58 = vld [vmem:[#allocation83_spill] sm:$0xff] }
 0x6ff   :  { %v7631_v61 = vadd.f32 1.0, %v12395_v28  ;;  %12400 = vtanh.f32 %v7494_v47  ;;  %8966 = vrot.lane.b32.xlu1 %v18918_v4, %s12559_s19  ;;  %v7356_v45 = vmul.f32 0.044715, %v7286_v13  ;;  %v18928_v19 = vadd.f32 %v18829_v24, %v7112_v54  ;;  %8896 = vrot.lane.b32.xlu0 %v18876_v2, %s12561_s21  ;;  %v8229_v50 = vpop.permute.xlu0 %8228  ;;  %v11282_v15 = vpop.f32.mrb[187].mxu1  ;;  %v21214_v14 = vld [vmem:[#allocation30_spill] sm:$0xff] }
 0x700   :  { %21212 = vst [vmem:[#allocation82_spill] sm:$0xff] %v18920_v1  ;;  %v18922_v44 = vrot.slane %v8695_v26, 7  ;;  %v7425_v8 = vadd.f32 %v18887_v38, %v7355_v12  ;;  %v18933_v0 = vsel %vm2127_vm1, %v18783_v41, %v18891_v63  ;;  %v12397_v16 = vpop.eup %12396  ;;  %v8079_v31 = vor.u32 %v8077_v25, %v18803_v3  ;;  %v12490_v25 = vld [vmem:[%s20653_s3 + $0xa0] sm:$0xff]  }
 0x701   :  { %v7701_v55 = vmul.f32 0.5, %v7631_v61  ;;  %v8081_v17 = vshll.u32 %v18870_v60, 16  ;;  %v7632_v6 = vadd.f32 1.0, %v12397_v16  ;;  %v7426_v18 = vadd.f32 %v18897_v11, %v7356_v45 }
 0x702   :  { %v8700_v35 = vor.u32 %v8698_v56, %v18922_v44  ;;  %v7495_v49 = vmul.f32 0.7978846, %v7425_v8  ;;  %v7217_v41 = vmul.f32 %v18928_v19, %v18928_v19  ;;  %v18944_v32 = vadd.f32 %v18829_v24, %v7115_v51  ;;  %v8406_v56 = vpop.permute.xlu1 %8405 }
 0x703   :  { %v21215_v47 = vmul.bf16 %v21213_v58, %v21214_v14  ;;  %8419 = vrot.lane.b32.xlu1 %v18680_v5, %s12559_s19  ;;  %v18960_v37 = vmul.bf16 %v12490_v25, %v18665_v7  ;;  %v7702_v28 = vmul.f32 0.5, %v7632_v6  ;;  %v7496_v12 = vmul.f32 0.7978846, %v7426_v18  ;;  %8242 = vrot.lane.b32.xlu0 %v18815_v20, %s12560_s22 }
 0x704   :  { %v18954_v3 = vsel %vm1388_vm0, %v18879_v22, %v8700_v35  ;;  %12402 = vtanh.f32 %v7495_v49  ;;  %v7287_v13 = vmul.f32 %v18928_v19, %v7217_v41  ;;  %v7771_v61 = vmul.f32 %v18778_v48, %v7701_v55  ;;  %v7120_v48 = vpop.f32.mrb[188].mxu1 }
 0x705   :  { %v8488_v26 = vsel %vm5498_vm10, %v21215_v47, %v8229_v50  ;;  %v7218_v5 = vmul.f32 %v18944_v32, %v18944_v32  ;;  %v8083_v54 = vrot.slane %v8081_v17, 1  ;;  %v12399_v8 = vpop.eup %12398  ;;  %v7772_v45 = vmul.f32 %v18790_v23, %v7702_v28  ;;  %v11285_v18 = vpop.f32.mrb[189].mxu1 }
 0x706   :  { %v8585_v22 = vsel %vm5606_vm11, %v8488_v26, %v8406_v56  ;;  %12404 = vtanh.f32 %v7496_v12  ;;  %v7357_v40 = vmul.f32 0.044715, %v7287_v13  ;;  %v7633_v35 = vadd.f32 1.0, %v12399_v8  ;;  %v7123_v58 = vpop.f32.mrb[190].mxu1 }
 0x707   :  { %v8702_v16 = vshrl.u32 %v8585_v22, 16  ;;  %v7288_v51 = vmul.f32 %v18944_v32, %v7218_v5  ;;  %v8705_v6 = vshll.u32 %v8585_v22, 16  ;;  %8968 = vrot.lane.b32.xlu1 %v18954_v3, %s12559_s19  ;;  %v8089_v55 = vshll.u32 %v18960_v37, 16  ;;  %8898 = vrot.lane.b32.xlu0 %v18918_v4, %s12561_s21  ;;  %v11286_v13 = vpop.f32.mrb[191].mxu1 }
 0x708   :  { %v18974_v49 = vpack.c.bf16 %v7772_v45, %v7771_v61  ;;  %v7427_v20 = vadd.f32 %v18928_v19, %v7357_v40  ;;  %v18980_v23 = vadd.f32 %v18829_v24, %v7120_v48  ;;  %v7703_v50 = vmul.f32 0.5, %v7633_v35 }
 0x709   :  { %v18977_v17 = vrot.slane %v8702_v16, 7  ;;  %v12401_v41 = vpop.eup %12400  ;;  %v7358_v15 = vmul.f32 0.044715, %v7288_v51  ;;  %v8084_v14 = vsel %vm861_vm2, %v8079_v31, %v8083_v54  ;;  %v8085_v47 = vshrl.u32 %v18870_v60, 16 }
 0x70a   :  { %v7634_v26 = vadd.f32 1.0, %v12401_v41  ;;  %v7497_v25 = vmul.f32 0.7978846, %v7427_v20  ;;  %v7219_v12 = vmul.f32 %v18980_v23, %v18980_v23  ;;  %v18991_v61 = vadd.f32 %v18829_v24, %v7123_v58 }
 0x70b   :  { %v8707_v28 = vor.u32 %v8705_v6, %v18977_v17  ;;  %v7428_v56 = vadd.f32 %v18944_v32, %v7358_v15  ;;  %8421 = vrot.lane.b32.xlu1 %v18839_v43, %s12559_s19  ;;  %v18995_v5 = vor.u32 %v8085_v47, %v8083_v54  ;;  %v18997_v31 = vrot.slane %v8089_v55, 1  ;;  %8244 = vrot.lane.b32.xlu0 %v18843_v42, %s12560_s22  ;;  %v21216_v43 = vld [vmem:[#allocation37_spill] sm:$0xff] }
 0x70c   :  { %v7704_v60 = vmul.f32 0.5, %v7634_v26  ;;  %12406 = vtanh.f32 %v7497_v25  ;;  %v7289_v22 = vmul.f32 %v18980_v23, %v7219_v12  ;;  %v7773_v45 = vmul.f32 %v18832_v9, %v7703_v50  ;;  %v7128_v42 = vpop.f32.mrb[192].mxu1 }
 0x70d   :  { %v19002_v8 = vsel %vm1388_vm0, %v18922_v44, %v8707_v28  ;;  %v7498_v40 = vmul.f32 0.7978846, %v7428_v56  ;;  %v7220_v16 = vmul.f32 %v18991_v61, %v18991_v61  ;;  %v7914_v54 = vmul.bf16 %v18665_v7, %v21216_v43  ;;  %v12491_v44 = vld [vmem:[%s20653_s3 + $0xa8] sm:$0xff]   ;;  %v11289_v58 = vpop.f32.mrb[193].mxu1 }
 0x70e   :  { %v12403_v35 = vpop.eup %12402  ;;  %v7774_v51 = vmul.f32 %v18850_v36, %v7704_v60  ;;  %v7359_v6 = vmul.f32 0.044715, %v7289_v22  ;;  %v7845_v9 = vmul.bf16 %v12491_v44, %v18726_v10  ;;  %v8093_v48 = vshrl.u32 %v18960_v37, 16  ;;  %v7131_v28 = vpop.f32.mrb[194].mxu1 }
 0x70f   :  { %v7635_v55 = vadd.f32 1.0, %v12403_v35  ;;  %12408 = vtanh.f32 %v7498_v40  ;;  %v7290_v20 = vmul.f32 %v18991_v61, %v7220_v16  ;;  %8970 = vrot.lane.b32.xlu1 %v19002_v8, %s12559_s19  ;;  %v8354_v18 = vrot.slane %v7914_v54, 1  ;;  %8900 = vrot.lane.b32.xlu0 %v18954_v3, %s12561_s21  ;;  %v11290_v22 = vpop.f32.mrb[195].mxu1  ;;  %v21218_v54 = vld [vmem:[#allocation40_spill] sm:$0xff] }
 0x710   :  { %v12405_v41 = vpop.eup %12404  ;;  %v19020_v36 = vpack.c.bf16 %v7774_v51, %v7773_v45  ;;  %v7429_v50 = vadd.f32 %v18980_v23, %v7359_v6  ;;  %v19024_v15 = vadd.f32 %v18829_v24, %v7128_v42  ;;  %v8095_v37 = vor.u32 %v8093_v48, %v18997_v31 }
 0x711   :  { %v7705_v47 = vmul.f32 0.5, %v7635_v55  ;;  %v7636_v26 = vadd.f32 1.0, %v12405_v41  ;;  %v7360_v25 = vmul.f32 0.044715, %v7290_v20  ;;  %v19031_v12 = vsel %vm2127_vm1, %v18891_v63, %v8354_v18 }
 0x712   :  { %21217 = vst [vmem:[#allocation86_spill] sm:$0xff] %v19020_v36  ;;  %v7499_v13 = vmul.f32 0.7978846, %v7429_v50  ;;  %v7221_v56 = vmul.f32 %v19024_v15, %v19024_v15  ;;  %v19036_v60 = vadd.f32 %v18829_v24, %v7131_v28  ;;  %v8097_v45 = vshll.u32 %v7845_v9, 16 }
 0x713   :  { %v7775_v40 = vmul.f32 %v18887_v38, %v7705_v47  ;;  %v7706_v16 = vmul.f32 0.5, %v7636_v26  ;;  %v7430_v43 = vadd.f32 %v18991_v61, %v7360_v25  ;;  %8423 = vrot.lane.b32.xlu1 %v18933_v0, %s12559_s19  ;;  %v7915_v63 = vmul.bf16 %v18726_v10, %v21218_v54  ;;  %8246 = vrot.lane.b32.xlu0 %v8084_v14, %s12560_s22  ;;  %v12492_v0 = vld [vmem:[%s20653_s3 + $0xb0] sm:$0xff]  }
 0x714   :  { %12410 = vtanh.f32 %v7499_v13  ;;  %v7291_v35 = vmul.f32 %v19024_v15, %v7221_v56  ;;  %v7222_v51 = vmul.f32 %v19036_v60, %v19036_v60  ;;  %v8099_v6 = vrot.slane %v8097_v45, 1  ;;  %v7136_v14 = vpop.f32.mrb[196].mxu1 }
 0x715   :  { %v7776_v44 = vmul.f32 %v18897_v11, %v7706_v16  ;;  %v7500_v48 = vmul.f32 0.7978846, %v7430_v43  ;;  %v8356_v38 = vrot.slane %v7915_v63, 1  ;;  %v7846_v55 = vmul.bf16 %v12492_v0, %v18769_v30  ;;  %v11293_v56 = vpop.f32.mrb[197].mxu1  ;;  %v21220_v16 = vld [vmem:[#allocation42_spill] sm:$0xff] }
 0x716   :  { %v12407_v20 = vpop.eup %12406  ;;  %v7361_v42 = vmul.f32 0.044715, %v7291_v35  ;;  %v7292_v41 = vmul.f32 %v19036_v60, %v7222_v51  ;;  %v19055_v50 = vsel %vm861_vm2, %v8095_v37, %v8099_v6  ;;  %v8101_v58 = vshrl.u32 %v7845_v9, 16  ;;  %v7139_v45 = vpop.f32.mrb[198].mxu1 }
 0x717   :  { %v19057_v47 = vpack.c.bf16 %v7776_v44, %v7775_v40  ;;  %v7637_v11 = vadd.f32 1.0, %v12407_v20  ;;  %12412 = vtanh.f32 %v7500_v48  ;;  %v19060_v26 = vsel %vm2127_vm1, %v8354_v18, %v8356_v38  ;;  %8902 = vrot.lane.b32.xlu0 %v19002_v8, %s12561_s21  ;;  %v11294_v44 = vpop.f32.mrb[199].mxu1 }
 0x718   :  { %v7431_v25 = vadd.f32 %v19024_v15, %v7361_v42  ;;  %v7362_v28 = vmul.f32 0.044715, %v7292_v41  ;;  %v19064_v13 = vadd.f32 %v18829_v24, %v7136_v14  ;;  %v8092_v37 = vsel %vm861_vm2, %v18995_v5, %v18997_v31 }
 0x719   :  { %21219 = vst [vmem:[#allocation92_spill] sm:$0xff] %v19057_v47  ;;  %v12409_v9 = vpop.eup %12408  ;;  %v7707_v22 = vmul.f32 0.5, %v7637_v11  ;;  %v8103_v40 = vor.u32 %v8101_v58, %v8099_v6  ;;  %v8105_v18 = vshll.u32 %v7846_v55, 16  ;;  %v7916_v43 = vmul.bf16 %v18769_v30, %v21220_v16  ;;  %v12493_v11 = vld [vmem:[%s20653_s3 + $0xb8] sm:$0xff]  }
 0x71a   :  { %v7638_v54 = vadd.f32 1.0, %v12409_v9  ;;  %v7501_v63 = vmul.f32 0.7978846, %v7431_v25  ;;  %v7432_v35 = vadd.f32 %v19036_v60, %v7362_v28  ;;  %v7223_v51 = vmul.f32 %v19064_v13, %v19064_v13 }
 0x71b   :  { %v7777_v5 = vmul.f32 %v18928_v19, %v7707_v22  ;;  %v19078_v31 = vadd.f32 %v18829_v24, %v7139_v45  ;;  %v8107_v48 = vrot.slane %v8105_v18, 1  ;;  %v8358_v0 = vrot.slane %v7916_v43, 1  ;;  %8248 = vrot.lane.b32.xlu0 %v8092_v37, %s12560_s22 }
 0x71c   :  { %v7708_v6 = vmul.f32 0.5, %v7638_v54  ;;  %12414 = vtanh.f32 %v7501_v63  ;;  %v7502_v20 = vmul.f32 0.7978846, %v7432_v35  ;;  %v7293_v42 = vmul.f32 %v19064_v13, %v7223_v51  ;;  %v7144_v45 = vpop.f32.mrb[200].mxu1 }
 0x71d   :  { %v7224_v41 = vmul.f32 %v19078_v31, %v19078_v31  ;;  %v19085_v58 = vsel %vm861_vm2, %v8103_v40, %v8107_v48  ;;  %v19088_v19 = vsel %vm2127_vm1, %v8356_v38, %v8358_v0  ;;  %v7847_v14 = vmul.bf16 %v12493_v11, %v18817_v29  ;;  %v11297_v43 = vpop.f32.mrb[201].mxu1 }
 0x71e   :  { %v12411_v25 = vpop.eup %12410  ;;  %v7778_v28 = vmul.f32 %v18944_v32, %v7708_v6  ;;  %12416 = vtanh.f32 %v7502_v20  ;;  %v7363_v56 = vmul.f32 0.044715, %v7293_v42  ;;  %v8109_v9 = vshrl.u32 %v7846_v55, 16  ;;  %v7147_v51 = vpop.f32.mrb[202].mxu1  ;;  %v21221_v55 = vld [vmem:[#allocation44_spill] sm:$0xff] }
 0x71f   :  { %v7639_v22 = vadd.f32 1.0, %v12411_v25  ;;  %v7294_v37 = vmul.f32 %v19078_v31, %v7224_v41  ;;  %v8113_v40 = vshll.u32 %v7847_v14, 16  ;;  %v19100_v16 = vadd.f32 %v18829_v24, %v7144_v45  ;;  %v11298_v11 = vpop.f32.mrb[203].mxu1 }
 0x720   :  { %v19096_v18 = vpack.c.bf16 %v7778_v28, %v7777_v5  ;;  %v7433_v38 = vadd.f32 %v19064_v13, %v7363_v56  ;;  %v8111_v54 = vor.u32 %v8109_v9, %v8107_v48  ;;  %v7917_v6 = vmul.bf16 %v18817_v29, %v21221_v55 }
 0x721   :  { %v12413_v63 = vpop.eup %12412  ;;  %v7709_v35 = vmul.f32 0.5, %v7639_v22  ;;  %v7364_v32 = vmul.f32 0.044715, %v7294_v37  ;;  %v8115_v44 = vrot.slane %v8113_v40, 1  ;;  %v7225_v5 = vmul.f32 %v19100_v16, %v19100_v16  ;;  %v12494_v40 = vld [vmem:[%s20653_s3 + $0xc0] sm:$0xff]  }
 0x722   :  { %v7640_v20 = vadd.f32 1.0, %v12413_v63  ;;  %v7503_v42 = vmul.f32 0.7978846, %v7433_v38  ;;  %v19107_v41 = vadd.f32 %v18829_v24, %v7147_v51  ;;  %v8360_v28 = vrot.slane %v7917_v6, 1 }
 0x723   :  { %v7434_v25 = vadd.f32 %v19078_v31, %v7364_v32  ;;  %v19111_v48 = vsel %vm861_vm2, %v8111_v54, %v8115_v44  ;;  %v7295_v9 = vmul.f32 %v19100_v16, %v7225_v5  ;;  %v7848_v38 = vmul.bf16 %v12494_v40, %v18883_v34 }
 0x724   :  { %v7710_v56 = vmul.f32 0.5, %v7640_v20  ;;  %12418 = vtanh.f32 %v7503_v42  ;;  %v7226_v22 = vmul.f32 %v19107_v41, %v19107_v41  ;;  %v19117_v45 = vsel %vm2127_vm1, %v8358_v0, %v8360_v28  ;;  %v7152_v20 = vpop.f32.mrb[204].mxu1 }
 0x725   :  { %v7504_v37 = vmul.f32 0.7978846, %v7434_v25  ;;  %v8117_v43 = vshrl.u32 %v7847_v14, 16  ;;  %v7779_v63 = vmul.f32 %v18980_v23, %v7709_v35  ;;  %v7365_v51 = vmul.f32 0.044715, %v7295_v9  ;;  %v11301_v23 = vpop.f32.mrb[205].mxu1 }
 0x726   :  { %v12415_v54 = vpop.eup %12414  ;;  %v7780_v32 = vmul.f32 %v18991_v61, %v7710_v56  ;;  %v7296_v55 = vmul.f32 %v19107_v41, %v7226_v22  ;;  %v8121_v42 = vshll.u32 %v7848_v38, 16  ;;  %v19130_v14 = vadd.f32 %v18829_v24, %v7152_v20  ;;  %v7155_v56 = vpop.f32.mrb[206].mxu1  ;;  %v21222_v22 = vld [vmem:[#allocation46_spill] sm:$0xff] }
 0x727   :  { %v7641_v6 = vadd.f32 1.0, %v12415_v54  ;;  %12420 = vtanh.f32 %v7504_v37  ;;  %v8119_v0 = vor.u32 %v8117_v43, %v8115_v44  ;;  %v7435_v25 = vadd.f32 %v19100_v16, %v7365_v51 }
 0x728   :  { %v12417_v5 = vpop.eup %12416  ;;  %v19126_v11 = vpack.c.bf16 %v7780_v32, %v7779_v63  ;;  %v7366_v40 = vmul.f32 0.044715, %v7296_v55  ;;  %v8123_v9 = vrot.slane %v8121_v42, 1  ;;  %v7918_v37 = vmul.bf16 %v18883_v34, %v21222_v22  ;;  %v11302_v32 = vpop.f32.mrb[207].mxu1 }
 0x729   :  { %v7711_v35 = vmul.f32 0.5, %v7641_v6  ;;  %v7642_v61 = vadd.f32 1.0, %v12417_v5  ;;  %v7505_v54 = vmul.f32 0.7978846, %v7435_v25  ;;  %v7227_v43 = vmul.f32 %v19130_v14, %v19130_v14  ;;  %v12496_v32 = vld [vmem:[%s20653_s3 + $0xd0] sm:$0xff]  }
 0x72a   :  { %v7436_v44 = vadd.f32 %v19107_v41, %v7366_v40  ;;  %v19138_v63 = vadd.f32 %v18829_v24, %v7155_v56  ;;  %v19141_v55 = vsel %vm861_vm2, %v8119_v0, %v8123_v9  ;;  %v8362_v6 = vrot.slane %v7918_v37, 1  ;;  %v12495_v0 = vld [vmem:[%s20653_s3 + $0xc8] sm:$0xff]  }
 0x72b   :  { %v7712_v51 = vmul.f32 0.5, %v7642_v61  ;;  %12422 = vtanh.f32 %v7505_v54  ;;  %v7297_v42 = vmul.f32 %v19130_v14, %v7227_v43  ;;  %v7781_v25 = vmul.f32 %v19024_v15, %v7711_v35 }
 0x72c   :  { %v7506_v20 = vmul.f32 0.7978846, %v7436_v44  ;;  %v7228_v5 = vmul.f32 %v19138_v63, %v19138_v63  ;;  %v19149_v24 = vsel %vm2127_vm1, %v8360_v28, %v8362_v6  ;;  %v7849_v23 = vmul.bf16 %v12495_v0, %v18920_v1  ;;  %v21223_v44 = vld [vmem:[#allocation48_spill] sm:$0xff] }
 0x72d   :  { %v7782_v40 = vmul.f32 %v19036_v60, %v7712_v51  ;;  %v7367_v56 = vmul.f32 0.044715, %v7297_v42  ;;  %v8125_v15 = vshrl.u32 %v7848_v38, 16  ;;  %v7919_v43 = vmul.bf16 %v18920_v1, %v21223_v44 }
 0x72e   :  { %v12419_v61 = vpop.eup %12418  ;;  %12424 = vtanh.f32 %v7506_v20  ;;  %v7298_v22 = vmul.f32 %v19138_v63, %v7228_v5  ;;  %v8129_v35 = vshll.u32 %v7849_v23, 16  ;;  %v7850_v51 = vmul.bf16 %v12496_v32, %v18974_v49 }
 0x72f   :  { %v19156_v37 = vpack.c.bf16 %v7782_v40, %v7781_v25  ;;  %v7643_v54 = vadd.f32 1.0, %v12419_v61  ;;  %v7437_v60 = vadd.f32 %v19130_v14, %v7367_v56  ;;  %v8127_v5 = vor.u32 %v8125_v15, %v8123_v9  ;;  %v21224_v9 = vld [vmem:[#allocation50_spill] sm:$0xff] }
 0x730   :  { %v7368_v28 = vmul.f32 0.044715, %v7298_v22  ;;  %v8131_v25 = vrot.slane %v8129_v35, 1  ;;  %v8364_v61 = vrot.slane %v7919_v43, 1  ;;  %v8133_v22 = vshrl.u32 %v7849_v23, 16  ;;  %v12497_v35 = vld [vmem:[%s20653_s3 + $0xd8] sm:$0xff]  }
 0x731   :  { %v12421_v20 = vpop.eup %12420  ;;  %v7713_v42 = vmul.f32 0.5, %v7643_v54  ;;  %v7507_v0 = vmul.f32 0.7978846, %v7437_v60  ;;  %v8137_v44 = vshll.u32 %v7850_v51, 16  ;;  %v7920_v15 = vmul.bf16 %v18974_v49, %v21224_v9 }
 0x732   :  { %v7644_v40 = vadd.f32 1.0, %v12421_v20  ;;  %v7438_v38 = vadd.f32 %v19138_v63, %v7368_v28  ;;  %v19167_v56 = vsel %vm861_vm2, %v8127_v5, %v8131_v25  ;;  %v19170_v29 = vsel %vm2127_vm1, %v8362_v6, %v8364_v61  ;;  %v21225_v20 = vld [vmem:[#allocation52_spill] sm:$0xff] }
 0x733   :  { %12426 = vtanh.f32 %v7507_v0  ;;  %v8135_v32 = vor.u32 %v8133_v22, %v8131_v25  ;;  %v8139_v54 = vrot.slane %v8137_v44, 1  ;;  %v7851_v60 = vmul.bf16 %v12497_v35, %v19020_v36 }
 0x734   :  { %v7714_v1 = vmul.f32 0.5, %v7644_v40  ;;  %v7508_v34 = vmul.f32 0.7978846, %v7438_v38  ;;  %v7783_v23 = vmul.f32 %v19064_v13, %v7713_v42  ;;  %v7921_v6 = vmul.bf16 %v19020_v36, %v21225_v20  ;;  %v12498_v13 = vld [vmem:[%s20653_s3 + $0xe0] sm:$0xff]  }
 0x735   :  { %v12423_v28 = vpop.eup %12422  ;;  %v19183_v25 = vsel %vm861_vm2, %v8135_v32, %v8139_v54  ;;  %v8366_v40 = vrot.slane %v7920_v15, 1  ;;  %v8141_v0 = vshrl.u32 %v7850_v51, 16  ;;  %v8145_v44 = vshll.u32 %v7851_v60, 16 }
 0x736   :  { %v7784_v43 = vmul.f32 %v19078_v31, %v7714_v1  ;;  %12428 = vtanh.f32 %v7508_v34  ;;  %v7645_v5 = vadd.f32 1.0, %v12423_v28  ;;  %v8368_v9 = vrot.slane %v7921_v6, 1  ;;  %v12499_v6 = vld [vmem:[%s20653_s3 + $0xe8] sm:$0xff]  }
 0x737   :  { %v7852_v34 = vmul.bf16 %v12498_v13, %v19057_v47  ;;  %v19192_v42 = vsel %vm2127_vm1, %v8364_v61, %v8366_v40  ;;  %v8143_v32 = vor.u32 %v8141_v0, %v8139_v54  ;;  %v8147_v35 = vrot.slane %v8145_v44, 1 }
 0x738   :  { %v12425_v38 = vpop.eup %12424  ;;  %v19185_v22 = vpack.c.bf16 %v7784_v43, %v7783_v23  ;;  %v7715_v1 = vmul.f32 0.5, %v7645_v5  ;;  %v19195_v51 = vsel %vm2127_vm1, %v8366_v40, %v8368_v9  ;;  %v8149_v15 = vshrl.u32 %v7851_v60, 16  ;;  %v21226_v43 = vld [vmem:[#allocation53_spill] sm:$0xff] }
 0x739   :  { %v7646_v31 = vadd.f32 1.0, %v12425_v38  ;;  %v8153_v28 = vshll.u32 %v7852_v34, 16  ;;  %v7922_v20 = vmul.bf16 %v19057_v47, %v21226_v43  ;;  %v19203_v5 = vmul.bf16 %v12499_v6, %v19096_v18 }
 0x73a   :  { %v19206_v61 = vsel %vm861_vm2, %v8143_v32, %v8147_v35  ;;  %v8151_v54 = vor.u32 %v8149_v15, %v8147_v35  ;;  %v8157_v40 = vshrl.u32 %v7852_v34, 16  ;;  %v7785_v60 = vmul.f32 %v19100_v16, %v7715_v1 }
 0x73b   :  { %v7716_v23 = vmul.f32 0.5, %v7646_v31  ;;  %v8155_v0 = vrot.slane %v8153_v28, 1  ;;  %v8370_v44 = vrot.slane %v7922_v20, 1  ;;  %v8161_v13 = vshll.u32 %v19203_v5, 16 }
 0x73d   :  { %v7786_v38 = vmul.f32 %v19107_v41, %v7716_v23  ;;  %v12427_v31 = vpop.eup %12426  ;;  %v19212_v43 = vsel %vm861_vm2, %v8151_v54, %v8155_v0  ;;  %v8159_v47 = vor.u32 %v8157_v40, %v8155_v0  ;;  %v19217_v32 = vsel %vm2127_vm1, %v8368_v9, %v8370_v44  ;;  %v21232_v40 = vld [vmem:[#allocation90_spill] sm:$0xff] }
 0x73e   :  { %v7647_v36 = vadd.f32 1.0, %v12427_v31  ;;  %v19219_v35 = vrot.slane %v8161_v13, 1  ;;  %v19221_v16 = vpop.permute.xlu1 %8954 }
 0x73f   :  { %v19214_v6 = vpack.c.bf16 %v7786_v38, %v7785_v60  ;;  %21227 = vst [vmem:[#allocation94_spill] sm:$0xff] %v19221_v16  ;;  %v21230_v60 = vld [vmem:[#allocation91_spill] sm:$0xff] }
 0x740   :  { %v12429_v34 = vpop.eup %12428  ;;  %v7717_v41 = vmul.f32 0.5, %v7647_v36  ;;  %v19225_v15 = vsel %vm861_vm2, %v8159_v47, %v19219_v35  ;;  %v8885_v23 = vpop.permute.xlu0 %8884  ;;  %v21229_v36 = vld [vmem:[#allocation36_spill] sm:$0xff] }
 0x741   :  { %v7648_v1 = vadd.f32 1.0, %v12429_v34  ;;  %v9162_v20 = vsel %vm5606_vm11, %v8885_v23, %v19221_v16  ;;  %v7869_v38 = vmul.bf16 %v21230_v60, %v21229_v36 }
 0x742   :  { %v8408_v54 = vpop.permute.xlu1 %8407  ;;  %v7787_v9 = vmul.f32 %v19130_v14, %v7717_v41  ;;  %9516 = vmatprep.mubr.bf16.mxu0 %v9162_v20 }
 0x743   :  { %v7718_v28 = vmul.f32 0.5, %v7648_v1  ;;  %10797 = vmatmul.mubr.msk.bf16.vlgmr.msra.gmra.mrb[72].mxu0 %vm16546_vm13, %v8885_v23 }
 0x744   :  { %v8231_v47 = vpop.permute.xlu0 %8230 }
 0x745   :  { %v7788_v0 = vmul.f32 %v19138_v63, %v7718_v28  ;;  %v8491_v31 = vsel %vm5498_vm10, %v7869_v38, %v8231_v47  ;;  %v21233_v47 = vld [vmem:[#allocation55_spill] sm:$0xff] }
 0x746   :  { %v8587_v1 = vsel %vm5606_vm11, %v8491_v31, %v8408_v54  ;;  %v7923_v31 = vmul.bf16 %v19096_v18, %v21233_v47 }
 0x747   :  { %v19235_v13 = vpack.c.bf16 %v7788_v0, %v7787_v9  ;;  %v19238_v34 = vpop.permute.xlu1 %8956  ;;  %v8709_v16 = vshrl.u32 %v8587_v1, 16  ;;  %v8712_v63 = vshll.u32 %v8587_v1, 16  ;;  %v21231_v0 = vld [vmem:[#allocation38_spill] sm:$0xff] }
 0x748   :  { %v8887_v14 = vpop.permute.xlu0 %8886  ;;  %v7870_v36 = vmul.bf16 %v21232_v40, %v21231_v0  ;;  %v12500_v40 = vld [vmem:[%s20653_s3 + $0xf0] sm:$0xff]  }
 0x749   :  { %v8711_v41 = vrot.slane %v8709_v16, 7  ;;  %v9165_v28 = vsel %vm5606_vm11, %v8887_v14, %v19238_v34  ;;  %v9027_v23 = vsel %vm6067_vm12, %v18610_v27, %v8887_v14 }
 0x74a   :  { %9522 = vmatprep.mubr.bf16.mxu0 %v9165_v28 }
 0x74b   :  { %v8410_v20 = vpop.permute.xlu1 %8409  ;;  %v8714_v9 = vor.u32 %v8712_v63, %v8711_v41  ;;  %9523 = vmatmul.mubr.bf16.gmra.mrb[76].mxu0 %v9027_v23  ;;  %v8372_v63 = vrot.slane %v7923_v31, 1 }
 0x74c   :  { %v8233_v60 = vpop.permute.xlu0 %8232 }
 0x74d   :  { %v8494_v54 = vsel %vm5498_vm10, %v7870_v36, %v8233_v60  ;;  %v19250_v16 = vsel %vm1388_vm0, %v18977_v17, %v8714_v9  ;;  %v19268_v0 = vsel %vm2127_vm1, %v8370_v44, %v8372_v63  ;;  %v7854_v36 = vmul.bf16 %v12500_v40, %v19126_v11 }
 0x74e   :  { %v8589_v38 = vsel %vm5606_vm11, %v8494_v54, %v8410_v20  ;;  %8972 = vrot.lane.b32.xlu1 %v19250_v16, %s12559_s19  ;;  %8904 = vrot.lane.b32.xlu0 %v19250_v16, %s12561_s21  ;;  %v21235_v54 = vld [vmem:[#allocation85_spill] sm:$0xff] }
 0x74f   :  { %v8716_v1 = vshrl.u32 %v8589_v38, 16  ;;  %v8719_v23 = vshll.u32 %v8589_v38, 16  ;;  %v8169_v31 = vshll.u32 %v7854_v36, 16 }
 0x750   :  { %v19257_v27 = vpop.permute.xlu1 %8958  ;;  %v8889_v14 = vpop.permute.xlu0 %8888 }
 0x751   :  { %v8718_v28 = vrot.slane %v8716_v1, 7  ;;  %v9168_v17 = vsel %vm5606_vm11, %v8889_v14, %v19257_v27  ;;  %v9031_v20 = vsel %vm6067_vm12, %v18596_v21, %v8889_v14  ;;  %v21234_v21 = vld [vmem:[#allocation39_spill] sm:$0xff] }
 0x752   :  { %9530 = vmatprep.mubr.bf16.mxu0 %v9168_v17  ;;  %8425 = vrot.lane.b32.xlu1 %v19031_v12, %s12559_s19  ;;  %v7871_v38 = vmul.bf16 %v21235_v54, %v21234_v21  ;;  %v8165_v12 = vshrl.u32 %v19203_v5, 16  ;;  %v8171_v17 = vrot.slane %v8169_v31, 1  ;;  %v12501_v31 = vld [vmem:[%s20653_s3 + $0xf8] sm:$0xff]  }
 0x753   :  { %v8721_v60 = vor.u32 %v8719_v23, %v8718_v28  ;;  %8250 = vrot.lane.b32.xlu0 %v19055_v50, %s12560_s22  ;;  %9531 = vmatmul.mubr.bf16.gmra.mrb[80].mxu0 %v9031_v20  ;;  %v21236_v20 = vld [vmem:[#allocation58_spill] sm:$0xff] }
 0x754   :  { %v8412_v9 = vpop.permute.xlu1 %8411  ;;  %v8235_v47 = vpop.permute.xlu0 %8234  ;;  %v8167_v50 = vor.u32 %v8165_v12, %v19219_v35  ;;  %v7924_v40 = vmul.bf16 %v19126_v11, %v21236_v20 }
 0x755   :  { %v8497_v44 = vsel %vm5498_vm10, %v7871_v38, %v8235_v47  ;;  %v19281_v1 = vsel %vm1388_vm0, %v8711_v41, %v8721_v60 }
 0x756   :  { %v8591_v14 = vsel %vm5606_vm11, %v8497_v44, %v8412_v9  ;;  %8974 = vrot.lane.b32.xlu1 %v19281_v1, %s12559_s19  ;;  %v19294_v41 = vsel %vm861_vm2, %v8167_v50, %v8171_v17  ;;  %v8374_v9 = vrot.slane %v7924_v40, 1  ;;  %v7855_v44 = vmul.bf16 %v12501_v31, %v19156_v37  ;;  %v21238_v50 = vld [vmem:[#allocation87_spill] sm:$0xff]  ;;  %v21240_v31 = vld [vmem:[#allocation60_spill] sm:$0xff] }
 0x757   :  { %v8723_v5 = vshrl.u32 %v8591_v14, 16  ;;  %8906 = vrot.lane.b32.xlu0 %v19281_v1, %s12561_s21  ;;  %v8726_v54 = vshll.u32 %v8591_v14, 16 }
 0x758   :  { %v19286_v23 = vpop.permute.xlu1 %8960  ;;  %v8891_v21 = vpop.permute.xlu0 %8890  ;;  %v19303_v12 = vsel %vm2127_vm1, %v8372_v63, %v8374_v9 }
 0x759   :  { %v8725_v60 = vrot.slane %v8723_v5, 7  ;;  %v9171_v38 = vsel %vm5606_vm11, %v8891_v21, %v19286_v23  ;;  %v9035_v35 = vsel %vm6067_vm12, %v18651_v52, %v8891_v21  ;;  %v21237_v52 = vld [vmem:[#allocation41_spill] sm:$0xff]  ;;  %v8177_v5 = vshll.u32 %v7855_v44, 16 }
 0x75a   :  { %9538 = vmatprep.mubr.bf16.mxu0 %v9171_v38  ;;  %8427 = vrot.lane.b32.xlu1 %v19060_v26, %s12559_s19  ;;  %v7872_v20 = vmul.bf16 %v21238_v50, %v21237_v52  ;;  %v8173_v26 = vshrl.u32 %v7854_v36, 16  ;;  %v7925_v52 = vmul.bf16 %v19156_v37, %v21240_v31  ;;  %v21242_v31 = vld [vmem:[#allocation84_spill] sm:$0xff] }
 0x75b   :  { %v8728_v14 = vor.u32 %v8726_v54, %v8725_v60  ;;  %8252 = vrot.lane.b32.xlu0 %v19085_v58, %s12560_s22  ;;  %9539 = vmatmul.mubr.bf16.gmra.mrb[84].mxu0 %v9035_v35  ;;  %v8179_v35 = vrot.slane %v8177_v5, 1 }
 0x75c   :  { %v8414_v47 = vpop.permute.xlu1 %8413  ;;  %v8237_v40 = vpop.permute.xlu0 %8236  ;;  %v8175_v58 = vor.u32 %v8173_v26, %v8171_v17 }
 0x75d   :  { %v8500_v63 = vsel %vm5498_vm10, %v7872_v20, %v8237_v40  ;;  %v19315_v21 = vsel %vm1388_vm0, %v8718_v28, %v8728_v14  ;;  %v8376_v14 = vrot.slane %v7925_v52, 1 }
 0x75e   :  { %v8593_v38 = vsel %vm5606_vm11, %v8500_v63, %v8414_v47  ;;  %8976 = vrot.lane.b32.xlu1 %v19315_v21, %s12559_s19  ;;  %v19327_v28 = vsel %vm861_vm2, %v8175_v58, %v8179_v35  ;;  %v12502_v63 = vld [vmem:[%s20653_s3 + $0x100] sm:$0xff]  }
 0x75f   :  { %v8730_v50 = vshrl.u32 %v8593_v38, 16  ;;  %8908 = vrot.lane.b32.xlu0 %v19315_v21, %s12561_s21  ;;  %v8733_v20 = vshll.u32 %v8593_v38, 16  ;;  %v19336_v5 = vsel %vm2127_vm1, %v8374_v9, %v8376_v14  ;;  %v7856_v38 = vmul.bf16 %v12502_v63, %v19185_v22  ;;  %v21244_v63 = vld [vmem:[#allocation62_spill] sm:$0xff] }
 0x760   :  { %v19320_v54 = vpop.permute.xlu1 %8962  ;;  %v8893_v36 = vpop.permute.xlu0 %8892 }
 0x761   :  { %21239 = vst [vmem:[#allocation72_spill] sm:$0xff] %v19320_v54  ;;  %v8732_v47 = vrot.slane %v8730_v50, 7  ;;  %v9174_v40 = vsel %vm5606_vm11, %v8893_v36, %v19320_v54  ;;  %v9039_v17 = vsel %vm6067_vm12, %v18713_v59, %v8893_v36  ;;  %v21241_v59 = vld [vmem:[#allocation43_spill] sm:$0xff]  ;;  %v8185_v36 = vshll.u32 %v7856_v38, 16 }
 0x762   :  { %9546 = vmatprep.mubr.bf16.mxu0 %v9174_v40  ;;  %8429 = vrot.lane.b32.xlu1 %v19088_v19, %s12559_s19  ;;  %v7873_v52 = vmul.bf16 %v21242_v31, %v21241_v59  ;;  %v8181_v19 = vshrl.u32 %v7855_v44, 16  ;;  %v7926_v59 = vmul.bf16 %v19185_v22, %v21244_v63 }
 0x763   :  { %v8735_v58 = vor.u32 %v8733_v20, %v8732_v47  ;;  %8254 = vrot.lane.b32.xlu0 %v19111_v48, %s12560_s22  ;;  %9547 = vmatmul.mubr.bf16.gmra.mrb[88].mxu0 %v9039_v17  ;;  %v8187_v17 = vrot.slane %v8185_v36, 1  ;;  %v12008_v36 = vld [vmem:[%s20658_s8 + $0x80] sm:$0xff]  }
 0x764   :  { %v8416_v26 = vpop.permute.xlu1 %8415  ;;  %v8183_v48 = vor.u32 %v8181_v19, %v8179_v35  ;;  %11304 = vmatpush3.bf16.msra.mxu0 %v12008_v36 }
 0x765   :  { %v8239_v50 = vpop.permute.xlu0 %8238  ;;  %v19348_v40 = vsel %vm1388_vm0, %v8725_v60, %v8735_v58  ;;  %v8378_v58 = vrot.slane %v7926_v59, 1  ;;  %11305 = vmatprep.subr.bf16.mxu0 %v21149_v39 }
 0x766   :  { %v8503_v9 = vsel %vm5498_vm10, %v7873_v52, %v8239_v50  ;;  %8978 = vrot.lane.b32.xlu1 %v19348_v40, %s12559_s19  ;;  %v19360_v60 = vsel %vm861_vm2, %v8183_v48, %v8187_v17 }
 0x767   :  { %v8595_v54 = vsel %vm5606_vm11, %v8503_v9, %v8416_v26  ;;  %8910 = vrot.lane.b32.xlu0 %v19348_v40, %s12561_s21  ;;  %v19372_v9 = vsel %vm2127_vm1, %v8376_v14, %v8378_v58 }
 0x768   :  { %v8737_v31 = vshrl.u32 %v8595_v54, 16  ;;  %v8740_v52 = vshll.u32 %v8595_v54, 16  ;;  %v12503_v54 = vld [vmem:[%s20653_s3 + $0x108] sm:$0xff]  }
 0x769   :  { %v19353_v20 = vpop.permute.xlu1 %8964  ;;  %v8895_v44 = vpop.permute.xlu0 %8894  ;;  %v7857_v48 = vmul.bf16 %v12503_v54, %v19214_v6 }
 0x76a   :  { %21243 = vst [vmem:[#allocation5_spill] sm:$0xff] %v19353_v20  ;;  %v8739_v26 = vrot.slane %v8737_v31, 7  ;;  %v9177_v50 = vsel %vm5606_vm11, %v8895_v44, %v19353_v20  ;;  %v9043_v35 = vsel %vm6067_vm12, %v18767_v33, %v8895_v44  ;;  %8431 = vrot.lane.b32.xlu1 %v19117_v45, %s12559_s19  ;;  %v21245_v33 = vld [vmem:[#allocation45_spill] sm:$0xff]  ;;  %v8189_v44 = vshrl.u32 %v7856_v38, 16 }
 0x76b   :  { %9554 = vmatprep.mubr.bf16.mxu0 %v9177_v50  ;;  %8256 = vrot.lane.b32.xlu0 %v19141_v55, %s12560_s22  ;;  %v21246_v45 = vld [vmem:[#allocation93_spill] sm:$0xff]  ;;  %v8193_v50 = vshll.u32 %v7857_v48, 16 }
 0x76c   :  { %v8742_v63 = vor.u32 %v8740_v52, %v8739_v26  ;;  %9555 = vmatmul.mubr.bf16.gmra.mrb[92].mxu0 %v9043_v35  ;;  %v7874_v59 = vmul.bf16 %v21246_v45, %v21245_v33  ;;  %v8191_v35 = vor.u32 %v8189_v44, %v8187_v17  ;;  %v21247_v33 = vld [vmem:[#allocation64_spill] sm:$0xff] }
 0x76d   :  { %v8418_v19 = vpop.permute.xlu1 %8417  ;;  %v8241_v31 = vpop.permute.xlu0 %8240  ;;  %v8195_v54 = vrot.slane %v8193_v50, 1  ;;  %v7927_v38 = vmul.bf16 %v19214_v6, %v21247_v33  ;;  %v21249_v33 = vld [vmem:[#allocation88_spill] sm:$0xff] }
 0x76e   :  { %v8506_v14 = vsel %vm5498_vm10, %v7874_v59, %v8241_v31  ;;  %v19384_v20 = vsel %vm1388_vm0, %v8732_v47, %v8742_v63 }
 0x76f   :  { %v8597_v52 = vsel %vm5606_vm11, %v8506_v14, %v8418_v19  ;;  %8980 = vrot.lane.b32.xlu1 %v19384_v20, %s12559_s19  ;;  %8912 = vrot.lane.b32.xlu0 %v19384_v20, %s12561_s21  ;;  %v19397_v63 = vsel %vm861_vm2, %v8191_v35, %v8195_v54  ;;  %v8380_v45 = vrot.slane %v7927_v38, 1  ;;  %v12504_v14 = vld [vmem:[%s20653_s3 + $0x110] sm:$0xff]  }
 0x770   :  { %v8744_v36 = vshrl.u32 %v8597_v52, 16  ;;  %v8747_v59 = vshll.u32 %v8597_v52, 16  ;;  %v19412_v52 = vmul.bf16 %v12504_v14, %v19235_v13 }
 0x771   :  { %v19390_v55 = vpop.permute.xlu1 %8966  ;;  %v8897_v47 = vpop.permute.xlu0 %8896  ;;  %v19406_v50 = vsel %vm2127_vm1, %v8378_v58, %v8380_v45 }
 0x772   :  { %v8746_v19 = vrot.slane %v8744_v36, 7  ;;  %v9180_v31 = vsel %vm5606_vm11, %v8897_v47, %v19390_v55  ;;  %v9047_v17 = vsel %vm6067_vm12, %v18800_v62, %v8897_v47  ;;  %v21248_v62 = vld [vmem:[#allocation47_spill] sm:$0xff]  ;;  %v8197_v36 = vshrl.u32 %v7857_v48, 16 }
 0x773   :  { %9562 = vmatprep.mubr.bf16.mxu0 %v9180_v31  ;;  %8433 = vrot.lane.b32.xlu1 %v19149_v24, %s12559_s19  ;;  %v7875_v38 = vmul.bf16 %v21249_v33, %v21248_v62  ;;  %v8201_v58 = vshll.u32 %v19412_v52, 16  ;;  %v21250_v62 = vld [vmem:[#allocation66_spill] sm:$0xff] }
 0x774   :  { %v8749_v35 = vor.u32 %v8747_v59, %v8746_v19  ;;  %8258 = vrot.lane.b32.xlu0 %v19167_v56, %s12560_s22  ;;  %9563 = vmatmul.mubr.bf16.gmra.mrb[96].mxu0 %v9047_v17  ;;  %v8199_v56 = vor.u32 %v8197_v36, %v8195_v54  ;;  %v7928_v48 = vmul.bf16 %v19235_v13, %v21250_v62 }
 0x775   :  { %v8420_v44 = vpop.permute.xlu1 %8419  ;;  %v8243_v24 = vpop.permute.xlu0 %8242  ;;  %v19428_v17 = vrot.slane %v8201_v58, 1 }
 0x776   :  { %v8509_v47 = vsel %vm5498_vm10, %v7875_v38, %v8243_v24  ;;  %v19421_v31 = vsel %vm1388_vm0, %v8739_v26, %v8749_v35 }
 0x777   :  { %v8599_v14 = vsel %vm5606_vm11, %v8509_v47, %v8420_v44  ;;  %8982 = vrot.lane.b32.xlu1 %v19421_v31, %s12559_s19  ;;  %v19436_v26 = vsel %vm861_vm2, %v8199_v56, %v19428_v17  ;;  %v19438_v44 = vrot.slane %v7928_v48, 1 }
 0x778   :  { %v8751_v33 = vshrl.u32 %v8599_v14, 16  ;;  %8914 = vrot.lane.b32.xlu0 %v19421_v31, %s12561_s21  ;;  %v8754_v24 = vshll.u32 %v8599_v14, 16  ;;  %v21251_v14 = vld [vmem:[#allocation49_spill] sm:$0xff] }
 0x779   :  { %v19426_v59 = vpop.permute.xlu1 %8968  ;;  %v8899_v38 = vpop.permute.xlu0 %8898  ;;  %v19448_v47 = vsel %vm2127_vm1, %v8380_v45, %v19438_v44  ;;  %v7876_v62 = vmul.bf16 %v18513_v46, %v21251_v14 }
 0x77a   :  { %v8753_v35 = vrot.slane %v8751_v33, 7  ;;  %v9183_v54 = vsel %vm5606_vm11, %v8899_v38, %v19426_v59  ;;  %v9051_v36 = vsel %vm6067_vm12, %v18876_v2, %v8899_v38 }
 0x77b   :  { %9570 = vmatprep.mubr.bf16.mxu0 %v9183_v54  ;;  %8435 = vrot.lane.b32.xlu1 %v19170_v29, %s12559_s19 }
 0x77c   :  { %v8756_v56 = vor.u32 %v8754_v24, %v8753_v35  ;;  %8260 = vrot.lane.b32.xlu0 %v19183_v25, %s12560_s22  ;;  %9571 = vmatmul.mubr.bf16.gmra.mrb[100].mxu0 %v9051_v36 }
 0x77d   :  { %v8422_v58 = vpop.permute.xlu1 %8421  ;;  %v8245_v48 = vpop.permute.xlu0 %8244 }
 0x77e   :  { %v8512_v2 = vsel %vm5498_vm10, %v7876_v62, %v8245_v48  ;;  %v19456_v33 = vsel %vm1388_vm0, %v8746_v19, %v8756_v56 }
 0x77f   :  { %v8601_v29 = vsel %vm5606_vm11, %v8512_v2, %v8422_v58  ;;  %8984 = vrot.lane.b32.xlu1 %v19456_v33, %s12559_s19  ;;  %v21252_v58 = vld [vmem:[#allocation51_spill] sm:$0xff] }
 0x780   :  { %v8758_v38 = vshrl.u32 %v8601_v29, 16  ;;  %8916 = vrot.lane.b32.xlu0 %v19456_v33, %s12561_s21  ;;  %v8761_v46 = vshll.u32 %v8601_v29, 16  ;;  %v7877_v56 = vmul.bf16 %v18561_v57, %v21252_v58 }
 0x781   :  { %v19461_v45 = vpop.permute.xlu1 %8970  ;;  %v8901_v25 = vpop.permute.xlu0 %8900 }
 0x782   :  { %v8760_v24 = vrot.slane %v8758_v38, 7  ;;  %v9186_v54 = vsel %vm5606_vm11, %v8901_v25, %v19461_v45  ;;  %v9055_v19 = vsel %vm6067_vm12, %v18918_v4, %v8901_v25 }
 0x783   :  { %9578 = vmatprep.mubr.bf16.mxu0 %v9186_v54  ;;  %8437 = vrot.lane.b32.xlu1 %v19192_v42, %s12559_s19 }
 0x784   :  { %v8763_v36 = vor.u32 %v8761_v46, %v8760_v24  ;;  %8262 = vrot.lane.b32.xlu0 %v19206_v61, %s12560_s22  ;;  %9579 = vmatmul.mubr.bf16.gmra.mrb[104].mxu0 %v9055_v19  ;;  %v21253_v46 = vld [vmem:[#allocation54_spill] sm:$0xff] }
 0x785   :  { %v8247_v14 = vpop.permute.xlu0 %8246  ;;  %v8424_v62 = vpop.permute.xlu1 %8423  ;;  %v7878_v54 = vmul.bf16 %v18605_v53, %v21253_v46 }
 0x786   :  { %v8515_v48 = vsel %vm5498_vm10, %v7877_v56, %v8247_v14  ;;  %v19477_v2 = vsel %vm1388_vm0, %v8753_v35, %v8763_v36 }
 0x787   :  { %v8603_v4 = vsel %vm5606_vm11, %v8515_v48, %v8424_v62  ;;  %8986 = vrot.lane.b32.xlu1 %v19477_v2, %s12559_s19 }
 0x788   :  { %v8765_v42 = vshrl.u32 %v8603_v4, 16  ;;  %8918 = vrot.lane.b32.xlu0 %v19477_v2, %s12561_s21  ;;  %v8768_v29 = vshll.u32 %v8603_v4, 16 }
 0x78a   :  { %v8767_v61 = vrot.slane %v8765_v42, 7 }
 0x78b   :  { %8439 = vrot.lane.b32.xlu1 %v19195_v51, %s12559_s19  ;;  %v8903_v51 = vpop.permute.xlu0 %8902 }
 0x78c   :  { %v8770_v57 = vor.u32 %v8768_v29, %v8767_v61  ;;  %8264 = vrot.lane.b32.xlu0 %v19212_v43, %s12560_s22  ;;  %v9059_v19 = vsel %vm6067_vm12, %v18954_v3, %v8903_v51  ;;  %v21254_v29 = vld [vmem:[#allocation56_spill] sm:$0xff] }
 0x78d   :  { %v7879_v3 = vmul.bf16 %v18665_v7, %v21254_v29 }
 0x78e   :  { %v19489_v35 = vsel %vm1388_vm0, %v8760_v24, %v8770_v57 }
 0x78f   :  { %8988 = vrot.lane.b32.xlu1 %v19489_v35, %s12559_s19  ;;  %v8249_v38 = vpop.permute.xlu0 %8248 }
 0x790   :  { %8920 = vrot.lane.b32.xlu0 %v19489_v35, %s12561_s21 }
 0x793   :  { %8441 = vrot.lane.b32.xlu1 %v19217_v32, %s12559_s19  ;;  %v8518_v32 = vsel %vm5498_vm10, %v7878_v54, %v8249_v38 }
 0x794   :  { %8266 = vrot.lane.b32.xlu0 %v19225_v15, %s12560_s22 }
 0x7c0   :  { %v19499_v25 = vpop.permute.xlu1 %8972  ;;  %v8905_v43 = vpop.permute.xlu0 %8904 }
 0x7c1   :  { %v9189_v24 = vsel %vm5606_vm11, %v8903_v51, %v19499_v25  ;;  %v9063_v57 = vsel %vm6067_vm12, %v19002_v8, %v8905_v43 }
 0x7c2   :  { %9586 = vmatprep.mubr.bf16.mxu0 %v9189_v24 }
 0x7c3   :  { %9587 = vmatmul.mubr.bf16.gmra.mrb[108].mxu0 %v9059_v19 }
 0x7c4   :  { %v8426_v36 = vpop.permute.xlu1 %8425 }
 0x7c5   :  { %v8605_v15 = vsel %vm5606_vm11, %v8518_v32, %v8426_v36  ;;  %v8251_v58 = vpop.permute.xlu0 %8250 }
 0x7c6   :  { %v8772_v56 = vshrl.u32 %v8605_v15, 16  ;;  %v8775_v62 = vshll.u32 %v8605_v15, 16  ;;  %v8521_v51 = vsel %vm5498_vm10, %v7879_v3, %v8251_v58  ;;  %v21255_v15 = vld [vmem:[#allocation57_spill] sm:$0xff] }
 0x7c7   :  { %v7880_v58 = vmul.bf16 %v18726_v10, %v21255_v15 }
 0x7c8   :  { %v8774_v14 = vrot.slane %v8772_v56, 7  ;;  %v19509_v48 = vpop.permute.xlu1 %8974 }
 0x7c9   :  { %v8907_v4 = vpop.permute.xlu0 %8906  ;;  %v9192_v53 = vsel %vm5606_vm11, %v8905_v43, %v19509_v48 }
 0x7ca   :  { %v8777_v42 = vor.u32 %v8775_v62, %v8774_v14  ;;  %9594 = vmatprep.mubr.bf16.mxu0 %v9192_v53  ;;  %v9067_v56 = vsel %vm6067_vm12, %v19250_v16, %v8907_v4 }
 0x7cb   :  { %9595 = vmatmul.mubr.bf16.gmra.mrb[112].mxu0 %v9063_v57 }
 0x7cc   :  { %v8428_v38 = vpop.permute.xlu1 %8427  ;;  %v19519_v24 = vsel %vm1388_vm0, %v8767_v61, %v8777_v42 }
 0x7cd   :  { %v8607_v46 = vsel %vm5606_vm11, %v8521_v51, %v8428_v38  ;;  %v8253_v54 = vpop.permute.xlu0 %8252  ;;  %8990 = vrot.lane.b32.xlu1 %v19519_v24, %s12559_s19  ;;  %8922 = vrot.lane.b32.xlu0 %v19519_v24, %s12561_s21  ;;  %v21256_v51 = vld [vmem:[#allocation59_spill] sm:$0xff] }
 0x7ce   :  { %v8779_v7 = vshrl.u32 %v8607_v46, 16  ;;  %v8782_v32 = vshll.u32 %v8607_v46, 16  ;;  %v8524_v62 = vsel %vm5498_vm10, %v7880_v58, %v8253_v54  ;;  %v7881_v38 = vmul.bf16 %v18769_v30, %v21256_v51  ;;  %v21257_v58 = vld [vmem:[#allocation61_spill] sm:$0xff] }
 0x7d0   :  { %v8781_v19 = vrot.slane %v8779_v7, 7  ;;  %v19526_v8 = vpop.permute.xlu1 %8976 }
 0x7d1   :  { %v8909_v43 = vpop.permute.xlu0 %8908  ;;  %8443 = vrot.lane.b32.xlu1 %v19268_v0, %s12559_s19  ;;  %8268 = vrot.lane.b32.xlu0 %v19294_v41, %s12560_s22  ;;  %v9195_v61 = vsel %vm5606_vm11, %v8907_v4, %v19526_v8 }
 0x7d2   :  { %v8784_v36 = vor.u32 %v8782_v32, %v8781_v19  ;;  %9602 = vmatprep.mubr.bf16.mxu0 %v9195_v61  ;;  %v9071_v46 = vsel %vm6067_vm12, %v19281_v1, %v8909_v43 }
 0x7d3   :  { %9603 = vmatmul.mubr.bf16.gmra.mrb[116].mxu0 %v9067_v56  ;;  %v21258_v56 = vld [vmem:[#allocation79_spill] sm:$0xff] }
 0x7d4   :  { %v8430_v53 = vpop.permute.xlu1 %8429  ;;  %v19540_v0 = vsel %vm1388_vm0, %v8774_v14, %v8784_v36 }
 0x7d5   :  { %v8609_v41 = vsel %vm5606_vm11, %v8524_v62, %v8430_v53  ;;  %v8255_v42 = vpop.permute.xlu0 %8254  ;;  %8992 = vrot.lane.b32.xlu1 %v19540_v0, %s12559_s19  ;;  %8924 = vrot.lane.b32.xlu0 %v19540_v0, %s12561_s21  ;;  %v7882_v62 = vmul.bf16 %v21258_v56, %v21257_v58  ;;  %v21261_v56 = vld [vmem:[#allocation65_spill] sm:$0xff] }
 0x7d6   :  { %v8786_v10 = vshrl.u32 %v8609_v41, 16  ;;  %v8789_v3 = vshll.u32 %v8609_v41, 16  ;;  %v8527_v54 = vsel %vm5498_vm10, %v7881_v38, %v8255_v42  ;;  %v21259_v38 = vld [vmem:[#allocation63_spill] sm:$0xff] }
 0x7d8   :  { %v8788_v29 = vrot.slane %v8786_v10, 7  ;;  %v19547_v16 = vpop.permute.xlu1 %8978 }
 0x7d9   :  { %v8911_v4 = vpop.permute.xlu0 %8910  ;;  %8445 = vrot.lane.b32.xlu1 %v19303_v12, %s12559_s19  ;;  %8270 = vrot.lane.b32.xlu0 %v19327_v28, %s12560_s22  ;;  %v9198_v14 = vsel %vm5606_vm11, %v8909_v43, %v19547_v16 }
 0x7da   :  { %v8791_v57 = vor.u32 %v8789_v3, %v8788_v29  ;;  %9610 = vmatprep.mubr.bf16.mxu0 %v9198_v14  ;;  %v9075_v53 = vsel %vm6067_vm12, %v19315_v21, %v8911_v4 }
 0x7db   :  { %9611 = vmatmul.mubr.bf16.gmra.mrb[120].mxu0 %v9071_v46  ;;  %v21260_v46 = vld [vmem:[#allocation70_spill] sm:$0xff] }
 0x7dc   :  { %v8432_v7 = vpop.permute.xlu1 %8431  ;;  %v19561_v12 = vsel %vm1388_vm0, %v8781_v19, %v8791_v57 }
 0x7dd   :  { %v8611_v28 = vsel %vm5606_vm11, %v8527_v54, %v8432_v7  ;;  %v8257_v32 = vpop.permute.xlu0 %8256  ;;  %8994 = vrot.lane.b32.xlu1 %v19561_v12, %s12559_s19  ;;  %8926 = vrot.lane.b32.xlu0 %v19561_v12, %s12561_s21  ;;  %v7883_v54 = vmul.bf16 %v21260_v46, %v21259_v38  ;;  %v12009_v38 = vld [vmem:[%s20658_s8 + $0x88] sm:$0xff]   ;;  %v21263_v46 = vld [vmem:[#allocation67_spill] sm:$0xff]  ;;  %s10833_s8 = sld [smem:[#allocation3 + $0x1]] }
 0x7de   :  { %v8793_v30 = vshrl.u32 %v8611_v28, 16  ;;  %v8796_v36 = vshll.u32 %v8611_v28, 16  ;;  %v8530_v41 = vsel %vm5498_vm10, %v7882_v62, %v8257_v32  ;;  %v21262_v62 = vld [vmem:[#allocation82_spill] sm:$0xff]  ;;  %11306 = vmatpush3.bf16.msra.mxu0 %v12009_v38 }
 0x7e0   :  { %v8795_v61 = vrot.slane %v8793_v30, 7 }
 0x7e1   :  { %v19568_v1 = vpop.permute.xlu1 %8980  ;;  %v8913_v43 = vpop.permute.xlu0 %8912  ;;  %8447 = vrot.lane.b32.xlu1 %v19336_v5, %s12559_s19  ;;  %8272 = vrot.lane.b32.xlu0 %v19360_v60, %s12560_s22 }
 0x7e2   :  { %v9201_v19 = vsel %vm5606_vm11, %v8911_v4, %v19568_v1  ;;  %v8798_v15 = vor.u32 %v8796_v36, %v8795_v61  ;;  %v9079_v7 = vsel %vm6067_vm12, %v19348_v40, %v8913_v43 }
 0x7e3   :  { %9618 = vmatprep.mubr.bf16.mxu0 %v9201_v19 }
 0x7e4   :  { %9619 = vmatmul.mubr.bf16.gmra.mrb[124].mxu0 %v9075_v53  ;;  %v19582_v5 = vsel %vm1388_vm0, %v8788_v29, %v8798_v15  ;;  %v7884_v53 = vmul.bf16 %v21262_v62, %v21261_v56  ;;  %v21265_v56 = vld [vmem:[#allocation69_spill] sm:$0xff]  ;;  %v21266_v62 = vld [vmem:[#allocation86_spill] sm:$0xff] }
 0x7e5   :  { %v8434_v42 = vpop.permute.xlu1 %8433  ;;  %8996 = vrot.lane.b32.xlu1 %v19582_v5, %s12559_s19  ;;  %8928 = vrot.lane.b32.xlu0 %v19582_v5, %s12561_s21 }
 0x7e6   :  { %v8613_v60 = vsel %vm5606_vm11, %v8530_v41, %v8434_v42  ;;  %v8259_v10 = vpop.permute.xlu0 %8258 }
 0x7e7   :  { %v8800_v3 = vshrl.u32 %v8613_v60, 16  ;;  %v8803_v57 = vshll.u32 %v8613_v60, 16  ;;  %v8533_v28 = vsel %vm5498_vm10, %v7883_v54, %v8259_v10 }
 0x7e9   :  { %v8802_v14 = vrot.slane %v8800_v3, 7  ;;  %v19589_v21 = vpop.permute.xlu1 %8982  ;;  %8449 = vrot.lane.b32.xlu1 %v19372_v9, %s12559_s19  ;;  %8274 = vrot.lane.b32.xlu0 %v19397_v63, %s12560_s22  ;;  %v8205_v3 = vshrl.u32 %v19412_v52, 16 }
 0x7ea   :  { %v8915_v4 = vpop.permute.xlu0 %8914  ;;  %v9204_v29 = vsel %vm5606_vm11, %v8913_v43, %v19589_v21 }
 0x7eb   :  { %v8805_v51 = vor.u32 %v8803_v57, %v8802_v14  ;;  %9626 = vmatprep.mubr.bf16.mxu0 %v9204_v29  ;;  %v9083_v41 = vsel %vm6067_vm12, %v19384_v20, %v8915_v4  ;;  %v8207_v20 = vor.u32 %v8205_v3, %v19428_v17  ;;  %v7885_v17 = vmul.bf16 %v18974_v49, %v21263_v46 }
 0x7ec   :  { %9627 = vmatmul.mubr.bf16.gmra.mrb[128].mxu0 %v9079_v7 }
 0x7ed   :  { %v8436_v32 = vpop.permute.xlu1 %8435  ;;  %v19603_v9 = vsel %vm1388_vm0, %v8795_v61, %v8805_v51 }
 0x7ee   :  { %v8615_v63 = vsel %vm5606_vm11, %v8533_v28, %v8436_v32  ;;  %v8261_v30 = vpop.permute.xlu0 %8260  ;;  %8998 = vrot.lane.b32.xlu1 %v19603_v9, %s12559_s19  ;;  %8930 = vrot.lane.b32.xlu0 %v19603_v9, %s12561_s21 }
 0x7ef   :  { %v8807_v36 = vshrl.u32 %v8615_v63, 16  ;;  %v8810_v15 = vshll.u32 %v8615_v63, 16  ;;  %v8536_v42 = vsel %vm5498_vm10, %v7884_v53, %v8261_v30  ;;  %v7886_v53 = vmul.bf16 %v21266_v62, %v21265_v56 }
 0x7f1   :  { %v8809_v19 = vrot.slane %v8807_v36, 7  ;;  %v19610_v40 = vpop.permute.xlu1 %8984 }
 0x7f2   :  { %v8917_v43 = vpop.permute.xlu0 %8916  ;;  %8451 = vrot.lane.b32.xlu1 %v19406_v50, %s12559_s19  ;;  %8276 = vrot.lane.b32.xlu0 %v19436_v26, %s12560_s22  ;;  %v9207_v61 = vsel %vm5606_vm11, %v8915_v4, %v19610_v40 }
 0x7f3   :  { %v8812_v58 = vor.u32 %v8810_v15, %v8809_v19  ;;  %9634 = vmatprep.mubr.bf16.mxu0 %v9207_v61  ;;  %v9087_v54 = vsel %vm6067_vm12, %v19421_v31, %v8917_v43  ;;  %v21264_v15 = vld [vmem:[#allocation68_spill] sm:$0xff] }
 0x7f4   :  { %9635 = vmatmul.mubr.bf16.gmra.mrb[132].mxu0 %v9083_v41 }
 0x7f5   :  { %v8438_v60 = vpop.permute.xlu1 %8437  ;;  %v19624_v50 = vsel %vm1388_vm0, %v8802_v14, %v8812_v58 }
 0x7f6   :  { %v8617_v26 = vsel %vm5606_vm11, %v8536_v42, %v8438_v60  ;;  %v8263_v10 = vpop.permute.xlu0 %8262  ;;  %9000 = vrot.lane.b32.xlu1 %v19624_v50, %s12559_s19  ;;  %8932 = vrot.lane.b32.xlu0 %v19624_v50, %s12561_s21 }
 0x7f7   :  { %v8814_v57 = vshrl.u32 %v8617_v26, 16  ;;  %v8817_v29 = vshll.u32 %v8617_v26, 16 }
 0x7f9   :  { %v8816_v4 = vrot.slane %v8814_v57, 7  ;;  %v19633_v51 = vpop.permute.xlu1 %8986 }
 0x7fa   :  { %8453 = vrot.lane.b32.xlu1 %v19448_v47, %s12559_s19  ;;  %8278 = vrot.lane.b32.xlu0 %v8207_v20, %s12560_s22  ;;  %v9210_v14 = vsel %vm5606_vm11, %v8917_v43, %v19633_v51  ;;  %v8919_v7 = vpop.permute.xlu0 %8918  ;;  %v8539_v47 = vsel %vm5498_vm10, %v7885_v17, %v8263_v10  ;;  %v8384_v43 = vsel %vm2127_vm1, %v19438_v44, %v21264_v15 }
 0x7fb   :  { %v8819_v52 = vor.u32 %v8817_v29, %v8816_v4  ;;  %9642 = vmatprep.mubr.bf16.mxu0 %v9210_v14  ;;  %v9091_v41 = vsel %vm6067_vm12, %v19456_v33, %v8919_v7 }
 0x7fc   :  { %9643 = vmatmul.mubr.bf16.gmra.mrb[136].mxu0 %v9087_v54 }
 0x7fd   :  { %v8440_v28 = vpop.permute.xlu1 %8439  ;;  %v19649_v32 = vsel %vm1388_vm0, %v8809_v19, %v8819_v52 }
 0x7fe   :  { %v8619_v63 = vsel %vm5606_vm11, %v8539_v47, %v8440_v28  ;;  %9002 = vrot.lane.b32.xlu1 %v19649_v32, %s12559_s19  ;;  %8934 = vrot.lane.b32.xlu0 %v19649_v32, %s12561_s21  ;;  %v8265_v19 = vpop.permute.xlu0 %8264  ;;  %v21267_v47 = vld [vmem:[#allocation74_spill] sm:$0xff]  ;;  %v21268_v28 = vld [vmem:[#allocation92_spill] sm:$0xff] }
 0x7ff   :  { %v8821_v49 = vshrl.u32 %v8619_v63, 16  ;;  %v8824_v31 = vshll.u32 %v8619_v63, 16  ;;  %v8542_v42 = vsel %vm5498_vm10, %v7886_v53, %v8265_v19  ;;  %v7887_v63 = vmul.bf16 %v21268_v28, %v21267_v47 }
 0x801   :  { %v8823_v30 = vrot.slane %v8821_v49, 7  ;;  %v19656_v36 = vpop.permute.xlu1 %8988 }
 0x802   :  { %8455 = vrot.lane.b32.xlu1 %v8384_v43, %s12559_s19  ;;  %v9213_v61 = vsel %vm5606_vm11, %v8919_v7, %v19656_v36  ;;  %v8921_v52 = vpop.permute.xlu0 %8920 }
 0x803   :  { %v8826_v58 = vor.u32 %v8824_v31, %v8823_v30  ;;  %9650 = vmatprep.mubr.bf16.mxu0 %v9213_v61  ;;  %v9095_v49 = vsel %vm6067_vm12, %v19477_v2, %v8921_v52 }
 0x804   :  { %9651 = vmatmul.mubr.bf16.gmra.mrb[140].mxu0 %v9091_v41 }
 0x805   :  { %v8442_v60 = vpop.permute.xlu1 %8441  ;;  %v19670_v44 = vsel %vm1388_vm0, %v8816_v4, %v8826_v58 }
 0x806   :  { %v8621_v26 = vsel %vm5606_vm11, %v8542_v42, %v8442_v60  ;;  %9004 = vrot.lane.b32.xlu1 %v19670_v44, %s12559_s19  ;;  %8936 = vrot.lane.b32.xlu0 %v19670_v44, %s12561_s21  ;;  %v8267_v46 = vpop.permute.xlu0 %8266  ;;  %v21269_v42 = vld [vmem:[#allocation75_spill] sm:$0xff] }
 0x807   :  { %v8828_v10 = vshrl.u32 %v8621_v26, 16  ;;  %v8831_v57 = vshll.u32 %v8621_v26, 16  ;;  %v7888_v2 = vmul.bf16 %v19096_v18, %v21269_v42 }
 0x809   :  { %v8830_v3 = vrot.slane %v8828_v10, 7 }
 0x80b   :  { %v8833_v20 = vor.u32 %v8831_v57, %v8830_v3 }
 0x80d   :  { %v19678_v33 = vsel %vm1388_vm0, %v8823_v30, %v8833_v20  ;;  %v8545_v30 = vsel %vm5498_vm10, %v7887_v63, %v8267_v46 }
 0x80e   :  { %9006 = vrot.lane.b32.xlu1 %v19678_v33, %s12559_s19  ;;  %8938 = vrot.lane.b32.xlu0 %v19678_v33, %s12561_s21 }
 0x816   :  { %v9518_v4 = vpop.f32.mrb[72].mxu0 }
 0x817   :  { %v9519_v29 = vpop.f32.mrb[73].mxu0 }
 0x818   :  { %v9520_v14 = vpop.f32.mrb[74].mxu0 }
 0x819   :  { %v9521_v38 = vpop.f32.mrb[75].mxu0 }
 0x83f   :  { %v19684_v17 = vpop.permute.xlu1 %8990  ;;  %v8923_v54 = vpop.permute.xlu0 %8922 }
 0x840   :  { %v9216_v7 = vsel %vm5606_vm11, %v8921_v52, %v19684_v17  ;;  %v9099_v60 = vsel %vm6067_vm12, %v19489_v35, %v8923_v54 }
 0x841   :  { %9656 = vmatprep.mubr.bf16.mxu0 %v9216_v7 }
 0x842   :  { %9657 = vmatmul.mubr.bf16.gmra.mrb[144].mxu0 %v9095_v49 }
 0x843   :  { %v8444_v31 = vpop.permute.xlu1 %8443  ;;  %v8269_v15 = vpop.permute.xlu0 %8268 }
 0x844   :  { %v8623_v43 = vsel %vm5606_vm11, %v8545_v30, %v8444_v31  ;;  %v8548_v26 = vsel %vm5498_vm10, %v7888_v2, %v8269_v15 }
 0x845   :  { %v8835_v19 = vshrl.u32 %v8623_v43, 16  ;;  %v8838_v58 = vshll.u32 %v8623_v43, 16 }
 0x847   :  { %v8837_v61 = vrot.slane %v8835_v19, 7  ;;  %v19694_v56 = vpop.permute.xlu1 %8992  ;;  %v8925_v62 = vpop.permute.xlu0 %8924 }
 0x848   :  { %v9219_v53 = vsel %vm5606_vm11, %v8923_v54, %v19694_v56  ;;  %v9103_v7 = vsel %vm6067_vm12, %v19519_v24, %v8925_v62 }
 0x849   :  { %v8840_v41 = vor.u32 %v8838_v58, %v8837_v61  ;;  %9664 = vmatprep.mubr.bf16.mxu0 %v9219_v53 }
 0x84a   :  { %9665 = vmatmul.mubr.bf16.gmra.mrb[148].mxu0 %v9099_v60 }
 0x84b   :  { %v8446_v10 = vpop.permute.xlu1 %8445  ;;  %v8271_v57 = vpop.permute.xlu0 %8270  ;;  %v19704_v20 = vsel %vm1388_vm0, %v8830_v3, %v8840_v41  ;;  %v21270_v3 = vld [vmem:[#allocation76_spill] sm:$0xff] }
 0x84c   :  { %v8625_v4 = vsel %vm5606_vm11, %v8548_v26, %v8446_v10  ;;  %9008 = vrot.lane.b32.xlu1 %v19704_v20, %s12559_s19  ;;  %8940 = vrot.lane.b32.xlu0 %v19704_v20, %s12561_s21  ;;  %v7889_v54 = vmul.bf16 %v19126_v11, %v21270_v3 }
 0x84d   :  { %v8842_v18 = vshrl.u32 %v8625_v4, 16  ;;  %v8845_v14 = vshll.u32 %v8625_v4, 16 }
 0x84e   :  { %v8551_v47 = vsel %vm5498_vm10, %v7889_v54, %v8271_v57 }
 0x84f   :  { %v8844_v29 = vrot.slane %v8842_v18, 7  ;;  %v19711_v35 = vpop.permute.xlu1 %8994  ;;  %v8927_v38 = vpop.permute.xlu0 %8926 }
 0x850   :  { %v9222_v52 = vsel %vm5606_vm11, %v8925_v62, %v19711_v35  ;;  %v9107_v53 = vsel %vm6067_vm12, %v19540_v0, %v8927_v38 }
 0x851   :  { %v8847_v46 = vor.u32 %v8845_v14, %v8844_v29  ;;  %9672 = vmatprep.mubr.bf16.mxu0 %v9222_v52 }
 0x852   :  { %9673 = vmatmul.mubr.bf16.gmra.mrb[152].mxu0 %v9103_v7 }
 0x853   :  { %v8448_v28 = vpop.permute.xlu1 %8447  ;;  %v8273_v63 = vpop.permute.xlu0 %8272  ;;  %v19721_v49 = vsel %vm1388_vm0, %v8837_v61, %v8847_v46  ;;  %v21271_v61 = vld [vmem:[#allocation77_spill] sm:$0xff] }
 0x854   :  { %v8627_v30 = vsel %vm5606_vm11, %v8551_v47, %v8448_v28  ;;  %9010 = vrot.lane.b32.xlu1 %v19721_v49, %s12559_s19  ;;  %8942 = vrot.lane.b32.xlu0 %v19721_v49, %s12561_s21  ;;  %v7890_v62 = vmul.bf16 %v19156_v37, %v21271_v61 }
 0x855   :  { %v8849_v11 = vshrl.u32 %v8627_v30, 16  ;;  %v8852_v15 = vshll.u32 %v8627_v30, 16 }
 0x856   :  { %v8554_v41 = vsel %vm5498_vm10, %v7890_v62, %v8273_v63 }
 0x857   :  { %v8851_v31 = vrot.slane %v8849_v11, 7  ;;  %v19728_v24 = vpop.permute.xlu1 %8996  ;;  %v8929_v43 = vpop.permute.xlu0 %8928 }
 0x858   :  { %v9225_v19 = vsel %vm5606_vm11, %v8927_v38, %v19728_v24  ;;  %v9111_v52 = vsel %vm6067_vm12, %v19561_v12, %v8929_v43 }
 0x859   :  { %v8854_v58 = vor.u32 %v8852_v15, %v8851_v31  ;;  %9680 = vmatprep.mubr.bf16.mxu0 %v9225_v19 }
 0x85a   :  { %9681 = vmatmul.mubr.bf16.gmra.mrb[156].mxu0 %v9107_v53 }
 0x85b   :  { %v8450_v42 = vpop.permute.xlu1 %8449  ;;  %v8275_v2 = vpop.permute.xlu0 %8274  ;;  %v19738_v60 = vsel %vm1388_vm0, %v8844_v29, %v8854_v58  ;;  %v21272_v29 = vld [vmem:[#allocation78_spill] sm:$0xff] }
 0x85c   :  { %v8629_v26 = vsel %vm5606_vm11, %v8554_v41, %v8450_v42  ;;  %9012 = vrot.lane.b32.xlu1 %v19738_v60, %s12559_s19  ;;  %8944 = vrot.lane.b32.xlu0 %v19738_v60, %s12561_s21  ;;  %v7891_v38 = vmul.bf16 %v19185_v22, %v21272_v29 }
 0x85d   :  { %v8856_v37 = vshrl.u32 %v8629_v26, 16  ;;  %v8859_v57 = vshll.u32 %v8629_v26, 16 }
 0x85e   :  { %v8557_v46 = vsel %vm5498_vm10, %v7891_v38, %v8275_v2 }
 0x85f   :  { %v8858_v10 = vrot.slane %v8856_v37, 7 }
 0x860   :  { %v19745_v0 = vpop.permute.xlu1 %8998  ;;  %v8931_v4 = vpop.permute.xlu0 %8930 }
 0x861   :  { %v9228_v18 = vsel %vm5606_vm11, %v8929_v43, %v19745_v0  ;;  %v8861_v14 = vor.u32 %v8859_v57, %v8858_v10  ;;  %v9115_v43 = vsel %vm6067_vm12, %v19582_v5, %v8931_v4 }
 0x862   :  { %9688 = vmatprep.mubr.bf16.mxu0 %v9228_v18 }
 0x863   :  { %9689 = vmatmul.mubr.bf16.gmra.mrb[160].mxu0 %v9111_v52  ;;  %v19755_v54 = vsel %vm1388_vm0, %v8851_v31, %v8861_v14  ;;  %v21273_v31 = vld [vmem:[#allocation80_spill] sm:$0xff] }
 0x864   :  { %v8452_v3 = vpop.permute.xlu1 %8451  ;;  %v8277_v47 = vpop.permute.xlu0 %8276  ;;  %9014 = vrot.lane.b32.xlu1 %v19755_v54, %s12559_s19  ;;  %8946 = vrot.lane.b32.xlu0 %v19755_v54, %s12561_s21  ;;  %v7892_v15 = vmul.bf16 %v19214_v6, %v21273_v31 }
 0x865   :  { %v8631_v7 = vsel %vm5606_vm11, %v8557_v46, %v8452_v3 }
 0x866   :  { %v8863_v22 = vshrl.u32 %v8631_v7, 16  ;;  %v8866_v63 = vshll.u32 %v8631_v7, 16  ;;  %v8560_v58 = vsel %vm5498_vm10, %v7892_v15, %v8277_v47 }
 0x868   :  { %v8865_v28 = vrot.slane %v8863_v22, 7  ;;  %v19762_v12 = vpop.permute.xlu1 %9000  ;;  %v8933_v19 = vpop.permute.xlu0 %8932 }
 0x869   :  { %v9231_v30 = vsel %vm5606_vm11, %v8931_v4, %v19762_v12  ;;  %v9119_v4 = vsel %vm6067_vm12, %v19603_v9, %v8933_v19 }
 0x86a   :  { %v8868_v11 = vor.u32 %v8866_v63, %v8865_v28  ;;  %9696 = vmatprep.mubr.bf16.mxu0 %v9231_v30 }
 0x86b   :  { %9697 = vmatmul.mubr.bf16.gmra.mrb[164].mxu0 %v9115_v43 }
 0x86c   :  { %v8454_v61 = vpop.permute.xlu1 %8453  ;;  %v19772_v62 = vsel %vm1388_vm0, %v8858_v10, %v8868_v11  ;;  %v8279_v2 = vpop.permute.xlu0 %8278  ;;  %v21274_v10 = vld [vmem:[#allocation81_spill] sm:$0xff] }
 0x86d   :  { %v8633_v53 = vsel %vm5606_vm11, %v8560_v58, %v8454_v61  ;;  %9016 = vrot.lane.b32.xlu1 %v19772_v62, %s12559_s19  ;;  %8948 = vrot.lane.b32.xlu0 %v19772_v62, %s12561_s21  ;;  %v7893_v57 = vmul.bf16 %v19235_v13, %v21274_v10 }
 0x86e   :  { %v8870_v6 = vshrl.u32 %v8633_v53, 16  ;;  %v8873_v42 = vshll.u32 %v8633_v53, 16 }
 0x86f   :  { %v8563_v18 = vsel %vm5498_vm10, %v7893_v57, %v8279_v2 }
 0x870   :  { %v8872_v41 = vrot.slane %v8870_v6, 7  ;;  %v19779_v5 = vpop.permute.xlu1 %9002  ;;  %v8935_v52 = vpop.permute.xlu0 %8934 }
 0x871   :  { %v9234_v26 = vsel %vm5606_vm11, %v8933_v19, %v19779_v5  ;;  %v9123_v22 = vsel %vm6067_vm12, %v19624_v50, %v8935_v52 }
 0x872   :  { %v8875_v37 = vor.u32 %v8873_v42, %v8872_v41  ;;  %9704 = vmatprep.mubr.bf16.mxu0 %v9234_v26 }
 0x873   :  { %9705 = vmatmul.mubr.bf16.gmra.mrb[168].mxu0 %v9119_v4 }
 0x874   :  { %v8456_v14 = vpop.permute.xlu1 %8455  ;;  %v19789_v29 = vsel %vm1388_vm0, %v8865_v28, %v8875_v37 }
 0x875   :  { %v8635_v38 = vsel %vm5606_vm11, %v8563_v18, %v8456_v14  ;;  %8950 = vrot.lane.b32.xlu0 %v19789_v29, %s12561_s21  ;;  %9018 = vrot.lane.b32.xlu1 %v19789_v29, %s12559_s19 }
 0x876   :  { %v8877_v13 = vshrl.u32 %v8635_v38, 16  ;;  %v8880_v3 = vshll.u32 %v8635_v38, 16 }
 0x878   :  { %v8879_v46 = vrot.slane %v8877_v13, 7  ;;  %v19796_v9 = vpop.permute.xlu1 %9004  ;;  %v8937_v63 = vpop.permute.xlu0 %8936 }
 0x879   :  { %v9237_v7 = vsel %vm5606_vm11, %v8935_v52, %v19796_v9  ;;  %v9127_v31 = vsel %vm6067_vm12, %v19649_v32, %v8937_v63 }
 0x87a   :  { %v8882_v47 = vor.u32 %v8880_v3, %v8879_v46  ;;  %9712 = vmatprep.mubr.bf16.mxu0 %v9237_v7 }
 0x87b   :  { %9713 = vmatmul.mubr.bf16.gmra.mrb[172].mxu0 %v9123_v22 }
 0x87c   :  { %v8883_v28 = vsel %vm1388_vm0, %v8872_v41, %v8882_v47 }
 0x87d   :  { %8952 = vrot.lane.b32.xlu0 %v8883_v28, %s12561_s21  ;;  %9020 = vrot.lane.b32.xlu1 %v8883_v28, %s12559_s19  ;;  %s10834_s19 = sld [smem:[#allocation3 + $0x2]] }
 0x880   :  { %v19805_v30 = vpop.permute.xlu1 %9006  ;;  %v8939_v15 = vpop.permute.xlu0 %8938 }
 0x881   :  { %v9240_v11 = vsel %vm5606_vm11, %v8937_v63, %v19805_v30  ;;  %v9131_v19 = vsel %vm6067_vm12, %v19670_v44, %v8939_v15  ;;  %v21275_v63 = vld [vmem:[#allocation71_spill] sm:$0xff] }
 0x882   :  { %9720 = vmatprep.mubr.bf16.mxu0 %v9240_v11 }
 0x883   :  { %9721 = vmatmul.mubr.bf16.gmra.mrb[176].mxu0 %v9127_v31  ;;  %v21276_v31 = vld [vmem:[#allocation94_spill] sm:$0xff] }
 0x8be   :  { %v19811_v50 = vpop.permute.xlu1 %9008  ;;  %v8941_v58 = vpop.permute.xlu0 %8940 }
 0x8bf   :  { %v9243_v43 = vsel %vm5606_vm11, %v8939_v15, %v19811_v50  ;;  %v9135_v32 = vsel %vm6067_vm12, %v19678_v33, %v8941_v58 }
 0x8c0   :  { %9728 = vmatprep.mubr.bf16.mxu0 %v9243_v43 }
 0x8c1   :  { %9729 = vmatmul.mubr.bf16.gmra.mrb[180].mxu0 %v9131_v19  ;;  %v12507_v19 = vld [vmem:[%s20652_s2 + $0x10] sm:$0xff] }
 0x8c6   :  { %v19817_v61 = vpop.permute.xlu1 %9010  ;;  %v8943_v6 = vpop.permute.xlu0 %8942 }
 0x8c7   :  { %v9246_v53 = vsel %vm5606_vm11, %v8941_v58, %v19817_v61  ;;  %v9139_v44 = vsel %vm6067_vm12, %v19704_v20, %v8943_v6 }
 0x8c8   :  { %9736 = vmatprep.mubr.bf16.mxu0 %v9246_v53 }
 0x8c9   :  { %9737 = vmatmul.mubr.bf16.gmra.mrb[184].mxu0 %v9135_v32 }
 0x8ce   :  { %v19823_v41 = vpop.permute.xlu1 %9012  ;;  %v8945_v2 = vpop.permute.xlu0 %8944 }
 0x8cf   :  { %v9249_v42 = vsel %vm5606_vm11, %v8943_v6, %v19823_v41  ;;  %v9143_v4 = vsel %vm6067_vm12, %v19721_v49, %v8945_v2 }
 0x8d0   :  { %9744 = vmatprep.mubr.bf16.mxu0 %v9249_v42  ;;  %v12508_v42 = vld [vmem:[%s20652_s2 + $0x18] sm:$0xff] }
 0x8d1   :  { %9745 = vmatmul.mubr.bf16.gmra.mrb[188].mxu0 %v9139_v44 }
 0x8d6   :  { %v19829_v37 = vpop.permute.xlu1 %9014  ;;  %v8947_v14 = vpop.permute.xlu0 %8946 }
 0x8d7   :  { %v9652_v26 = vpop.f32.mrb[140].mxu0  ;;  %v9252_v33 = vsel %vm5606_vm11, %v8945_v2, %v19829_v37  ;;  %v9147_v13 = vsel %vm6067_vm12, %v19738_v60, %v8947_v14 }
 0x8d8   :  { %v9653_v10 = vpop.f32.mrb[141].mxu0  ;;  %9752 = vmatprep.mubr.bf16.mxu0 %v9252_v33 }
 0x8d9   :  { %v9654_v57 = vpop.f32.mrb[142].mxu0  ;;  %9753 = vmatmul.mubr.bf16.gmra.mrb[192].mxu0 %v9143_v4 }
 0x8da   :  { %v9655_v18 = vpop.f32.mrb[143].mxu0 }
 0x8df   :  { %v19835_v38 = vpop.permute.xlu1 %9016  ;;  %v8949_v52 = vpop.permute.xlu0 %8948 }
 0x8e0   :  { %v9255_v20 = vsel %vm5606_vm11, %v8947_v14, %v19835_v38  ;;  %v9151_v49 = vsel %vm6067_vm12, %v19755_v54, %v8949_v52 }
 0x8e1   :  { %9760 = vmatprep.mubr.bf16.mxu0 %v9255_v20 }
 0x8e2   :  { %9761 = vmatmul.mubr.bf16.gmra.mrb[196].mxu0 %v9147_v13 }
 0x8e7   :  { %v19841_v46 = vpop.permute.xlu1 %9018  ;;  %v8951_v7 = vpop.permute.xlu0 %8950 }
 0x8e8   :  { %v9258_v3 = vsel %vm5606_vm11, %v8949_v52, %v19841_v46  ;;  %v9155_v60 = vsel %vm6067_vm12, %v19772_v62, %v8951_v7  ;;  %v21277_v62 = vld [vmem:[#allocation72_spill] sm:$0xff] }
 0x8e9   :  { %9768 = vmatprep.mubr.bf16.mxu0 %v9258_v3  ;;  %v12510_v3 = vld [vmem:[%s20652_s2 + $0x28] sm:$0xff] }
 0x8ea   :  { %9769 = vmatmul.mubr.bf16.gmra.mrb[200].mxu0 %v9151_v49 }
 0x8ef   :  { %v19847_v47 = vpop.permute.xlu1 %9020  ;;  %v8953_v22 = vpop.permute.xlu0 %8952 }
 0x8f0   :  { %v9261_v28 = vsel %vm5606_vm11, %v8951_v7, %v19847_v47  ;;  %v9263_v11 = vsel %vm5606_vm11, %v8953_v22, %v21275_v63  ;;  %v9159_v54 = vsel %vm6067_vm12, %v19789_v29, %v8953_v22 }
 0x8f1   :  { %9776 = vmatprep.mubr.bf16.mxu0 %v9261_v28 }
 0x8f2   :  { %9777 = vmatmul.mubr.bf16.gmra.mrb[204].mxu0 %v9155_v60 }
 0x8f3   :  { %9784 = vmatprep.mubr.bf16.mxu0 %v9263_v11 }
 0x8fa   :  { %9785 = vmatmul.mubr.bf16.gmra.mrb[208].mxu0 %v9159_v54 }
 0x8fb   :  { %11307 = vmatprep.mubr.msk.bf16.mxu0 %vm12555_vm6, %v21149_v39 }
 0x902   :  { %11308 = vmatmul.mubr.msk.bf16.vlgmr.msra.gmra.mrb[212].mxu0 %vm5498_vm10, %v21276_v31 }
 0x903   :  { %11311 = vmatprep.mubr.msk.bf16.mxu0 %vm12555_vm6, %v21149_v39 }
 0x90a   :  { %11312 = vmatmul.mubr.msk.bf16.gmra.mrb[76].mxu0 %vm5498_vm10, %v19238_v34  ;;  %v21278_v34 = vld [vmem:[#allocation5_spill] sm:$0xff] }
 0x90b   :  { %11315 = vmatprep.mubr.msk.bf16.mxu0 %vm12555_vm6, %v21149_v39 }
 0x912   :  { %11316 = vmatmul.mubr.msk.bf16.gmra.mrb[80].mxu0 %vm5498_vm10, %v19257_v27 }
 0x913   :  { %11319 = vmatprep.mubr.msk.bf16.mxu0 %vm12555_vm6, %v21149_v39 }
 0x91a   :  { %11320 = vmatmul.mubr.msk.bf16.gmra.mrb[84].mxu0 %vm5498_vm10, %v19286_v23 }
 0x91b   :  { %11323 = vmatprep.mubr.msk.bf16.mxu0 %vm12555_vm6, %v21149_v39 }
 0x922   :  { %11324 = vmatmul.mubr.msk.bf16.gmra.mrb[88].mxu0 %vm5498_vm10, %v21277_v62 }
 0x923   :  { %11327 = vmatprep.mubr.msk.bf16.mxu0 %vm12555_vm6, %v21149_v39 }
 0x92a   :  { %11328 = vmatmul.mubr.msk.bf16.gmra.mrb[92].mxu0 %vm5498_vm10, %v21278_v34 }
 0x92b   :  { %11331 = vmatprep.mubr.msk.bf16.mxu0 %vm12555_vm6, %v21149_v39 }
 0x932   :  { %11332 = vmatmul.mubr.msk.bf16.gmra.mrb[96].mxu0 %vm5498_vm10, %v19390_v55 }
 0x933   :  { %11335 = vmatprep.mubr.msk.bf16.mxu0 %vm12555_vm6, %v21149_v39 }
 0x93a   :  { %11336 = vmatmul.mubr.msk.bf16.gmra.mrb[100].mxu0 %vm5498_vm10, %v19426_v59 }
 0x93b   :  { %11339 = vmatprep.mubr.msk.bf16.mxu0 %vm12555_vm6, %v21149_v39 }
 0x942   :  { %11340 = vmatmul.mubr.msk.bf16.gmra.mrb[104].mxu0 %vm5498_vm10, %v19461_v45 }
 0x943   :  { %11343 = vmatprep.mubr.msk.bf16.mxu0 %vm12555_vm6, %v21149_v39 }
 0x94a   :  { %11344 = vmatmul.mubr.msk.bf16.gmra.mrb[108].mxu0 %vm5498_vm10, %v19499_v25 }
 0x94b   :  { %11347 = vmatprep.mubr.msk.bf16.mxu0 %vm12555_vm6, %v21149_v39 }
 0x952   :  { %11348 = vmatmul.mubr.msk.bf16.gmra.mrb[112].mxu0 %vm5498_vm10, %v19509_v48 }
 0x953   :  { %11351 = vmatprep.mubr.msk.bf16.mxu0 %vm12555_vm6, %v21149_v39 }
 0x95a   :  { %11352 = vmatmul.mubr.msk.bf16.gmra.mrb[116].mxu0 %vm5498_vm10, %v19526_v8 }
 0x95b   :  { %11355 = vmatprep.mubr.msk.bf16.mxu0 %vm12555_vm6, %v21149_v39 }
 0x962   :  { %11356 = vmatmul.mubr.msk.bf16.gmra.mrb[120].mxu0 %vm5498_vm10, %v19547_v16  ;;  %v19972_v16 = vld [vmem:[%s20659_s9] ss:$0 sm:$0xff] }
 0x963   :  { %11359 = vmatprep.mubr.msk.bf16.mxu0 %vm12555_vm6, %v21149_v39 }
 0x96a   :  { %11360 = vmatmul.mubr.msk.bf16.gmra.mrb[124].mxu0 %vm5498_vm10, %v19568_v1  ;;  %v19974_v1 = vstv %s10833_s8 }
 0x96b   :  { %11363 = vmatprep.mubr.msk.bf16.mxu0 %vm12555_vm6, %v21149_v39  ;;  %v10105_v58 = vmul.f32 %v12507_v19, %v19974_v1  ;;  %v10106_v44 = vmul.f32 %v12508_v42, %v19974_v1  ;;  %v10108_v49 = vmul.f32 %v12510_v3, %v19974_v1 }
 0x972   :  { %11364 = vmatmul.mubr.msk.bf16.gmra.mrb[128].mxu0 %vm5498_vm10, %v19589_v21 }
 0x973   :  { %11367 = vmatprep.mubr.msk.bf16.mxu0 %vm12555_vm6, %v21149_v39 }
 0x97a   :  { %11368 = vmatmul.mubr.msk.bf16.gmra.mrb[132].mxu0 %vm5498_vm10, %v19610_v40  ;;  %v19978_v40 = vstv %s10834_s19 }
 0x97b   :  { %11371 = vmatprep.mubr.msk.bf16.mxu0 %vm12555_vm6, %v21149_v39 }
 0x982   :  { %11372 = vmatmul.mubr.msk.bf16.gmra.mrb[136].mxu0 %vm5498_vm10, %v19633_v51 }
 0x983   :  { %11375 = vmatprep.mubr.msk.bf16.mxu0 %vm12555_vm6, %v21149_v39 }
 0x98a   :  { %11376 = vmatmul.mubr.msk.bf16.gmra.mrb[216].mxu0 %vm5498_vm10, %v19656_v36  ;;  %v12505_v36 = vld [vmem:[%s20652_s2] sm:$0xff] }
 0x98b   :  { %11379 = vmatprep.mubr.msk.bf16.mxu0 %vm12555_vm6, %v21149_v39 }
 0x992   :  { %11380 = vmatmul.mubr.msk.bf16.gmra.mrb[144].mxu0 %vm5498_vm10, %v19684_v17  ;;  %v10103_v17 = vmul.f32 %v12505_v36, %v19974_v1 }
 0x993   :  { %11383 = vmatprep.mubr.msk.bf16.mxu0 %vm12555_vm6, %v21149_v39 }
 0x99a   :  { %11384 = vmatmul.mubr.msk.bf16.gmra.mrb[148].mxu0 %vm5498_vm10, %v19694_v56 }
 0x99b   :  { %11387 = vmatprep.mubr.msk.bf16.mxu0 %vm12555_vm6, %v21149_v39 }
 0x9a2   :  { %11388 = vmatmul.mubr.msk.bf16.gmra.mrb[152].mxu0 %vm5498_vm10, %v19711_v35 }
 0x9a3   :  { %11391 = vmatprep.mubr.msk.bf16.mxu0 %vm12555_vm6, %v21149_v39 }
 0x9aa   :  { %11392 = vmatmul.mubr.msk.bf16.gmra.mrb[156].mxu0 %vm5498_vm10, %v19728_v24 }
 0x9ab   :  { %11395 = vmatprep.mubr.msk.bf16.mxu0 %vm12555_vm6, %v21149_v39 }
 0x9b2   :  { %11396 = vmatmul.mubr.msk.bf16.gmra.mrb[160].mxu0 %vm5498_vm10, %v19745_v0 }
 0x9b3   :  { %11399 = vmatprep.mubr.msk.bf16.mxu0 %vm12555_vm6, %v21149_v39 }
 0x9ba   :  { %11400 = vmatmul.mubr.msk.bf16.gmra.mrb[164].mxu0 %vm5498_vm10, %v19762_v12  ;;  %v12506_v12 = vld [vmem:[%s20652_s2 + $0x8] sm:$0xff] }
 0x9bb   :  { %11403 = vmatprep.mubr.msk.bf16.mxu0 %vm12555_vm6, %v21149_v39 }
 0x9c2   :  { %11404 = vmatmul.mubr.msk.bf16.gmra.mrb[168].mxu0 %vm5498_vm10, %v19779_v5  ;;  %v10104_v5 = vmul.f32 %v12506_v12, %v19974_v1 }
 0x9c3   :  { %11407 = vmatprep.mubr.msk.bf16.mxu0 %vm12555_vm6, %v21149_v39 }
 0x9ca   :  { %11408 = vmatmul.mubr.msk.bf16.gmra.mrb[172].mxu0 %vm5498_vm10, %v19796_v9 }
 0x9cb   :  { %11411 = vmatprep.mubr.msk.bf16.mxu0 %vm12555_vm6, %v21149_v39 }
 0x9cd   :  { %v9786_v27 = vpop.f32.mrb[208].mxu0 }
 0x9ce   :  { %v9787_v23 = vpop.f32.mrb[209].mxu0 }
 0x9cf   :  { %v9788_v55 = vpop.f32.mrb[210].mxu0 }
 0x9d0   :  { %v9789_v59 = vpop.f32.mrb[211].mxu0  ;;  %v12512_v55 = vld [vmem:[%s20652_s2 + $0x38] sm:$0xff] }
 0x9d1   :  { %v10110_v59 = vmul.f32 %v12512_v55, %v19974_v1 }
 0x9d2   :  { %11412 = vmatmul.mubr.msk.bf16.gmra.mrb[176].mxu0 %vm5498_vm10, %v19805_v30 }
 0x9d3   :  { %11415 = vmatprep.mubr.msk.bf16.mxu0 %vm12555_vm6, %v21149_v39 }
 0x9d5   :  { %v9825_v45 = vpop.f32.mrb[212].mxu0 }
 0x9d6   :  { %v11309_v25 = vpop.f32.mrb[213].mxu0 }
 0x9d7   :  { %v9827_v48 = vpop.f32.mrb[214].mxu0 }
 0x9d8   :  { %v11310_v8 = vpop.f32.mrb[215].mxu0 }
 0x9da   :  { %11416 = vmatmul.mubr.msk.bf16.gmra.mrb[180].mxu0 %vm5498_vm10, %v19811_v50 }
 0x9db   :  { %11419 = vmatprep.mubr.msk.bf16.mxu0 %vm12555_vm6, %v21149_v39 }
 0x9dd   :  { %v9831_v21 = vpop.f32.mrb[76].mxu0 }
 0x9de   :  { %v11523_v51 = vadd.f32 %v19972_v16, %v9831_v21  ;;  %v11313_v56 = vpop.f32.mrb[77].mxu0 }
 0x9df   :  { %v9834_v35 = vpop.f32.mrb[78].mxu0 }
 0x9e0   :  { %v10136_v24 = vmul.f32 %v11523_v51, %v19978_v40  ;;  %v11524_v0 = vadd.f32 %v19972_v16, %v9834_v35  ;;  %v11314_v29 = vpop.f32.mrb[79].mxu0 }
 0x9e2   :  { %v10168_v9 = vadd.f32 %v10136_v24, %v10103_v17  ;;  %v10137_v30 = vmul.f32 %v11524_v0, %v19978_v40  ;;  %11420 = vmatmul.mubr.msk.bf16.gmra.mrb[184].mxu0 %vm5498_vm10, %v19817_v61  ;;  %v12514_v0 = vld [vmem:[%s20652_s2 + $0x48] sm:$0xff] }
 0x9e3   :  { %11423 = vmatprep.mubr.msk.bf16.mxu0 %vm12555_vm6, %v21149_v39  ;;  %v10112_v12 = vmul.f32 %v12514_v0, %v19974_v1 }
 0x9e4   :  { %10200 = vst.msk [vmem:[%s20660_s10] sm:$0xff] %vm2271_vm3, %v10168_v9  ;;  %v10169_v15 = vadd.f32 %v10137_v30, %v10104_v5 }
 0x9e5   :  { %v9839_v50 = vpop.f32.mrb[80].mxu0 }
 0x9e6   :  { %10201 = vst.msk [vmem:[%s20660_s10 + $0x8] sm:$0xff] %vm2271_vm3, %v10169_v15  ;;  %v11525_v43 = vadd.f32 %v19972_v16, %v9839_v50  ;;  %v11317_v61 = vpop.f32.mrb[81].mxu0 }
 0x9e7   :  { %v9842_v53 = vpop.f32.mrb[82].mxu0 }
 0x9e8   :  { %v10138_v32 = vmul.f32 %v11525_v43, %v19978_v40  ;;  %v11526_v6 = vadd.f32 %v19972_v16, %v9842_v53  ;;  %v11318_v2 = vpop.f32.mrb[83].mxu0 }
 0x9ea   :  { %v10170_v26 = vadd.f32 %v10138_v32, %v10105_v58  ;;  %v10139_v10 = vmul.f32 %v11526_v6, %v19978_v40  ;;  %11424 = vmatmul.mubr.msk.bf16.gmra.mrb[188].mxu0 %vm5498_vm10, %v19823_v41  ;;  %v12509_v41 = vld [vmem:[%s20652_s2 + $0x20] sm:$0xff]  ;;  %v12516_v32 = vld [vmem:[%s20652_s2 + $0x58] sm:$0xff] }
 0x9eb   :  { %11427 = vmatprep.mubr.msk.bf16.mxu0 %vm12555_vm6, %v21149_v39  ;;  %v10107_v18 = vmul.f32 %v12509_v41, %v19974_v1  ;;  %v10114_v6 = vmul.f32 %v12516_v32, %v19974_v1 }
 0x9ec   :  { %10202 = vst.msk [vmem:[%s20660_s10 + $0x10] sm:$0xff] %vm2271_vm3, %v10170_v26  ;;  %v10171_v33 = vadd.f32 %v10139_v10, %v10106_v44 }
 0x9ed   :  { %v9847_v57 = vpop.f32.mrb[84].mxu0 }
 0x9ee   :  { %10203 = vst.msk [vmem:[%s20660_s10 + $0x18] sm:$0xff] %vm2271_vm3, %v10171_v33  ;;  %v11527_v4 = vadd.f32 %v19972_v16, %v9847_v57  ;;  %v11321_v14 = vpop.f32.mrb[85].mxu0 }
 0x9ef   :  { %v9850_v20 = vpop.f32.mrb[86].mxu0  ;;  %v12518_v14 = vld [vmem:[%s20652_s2 + $0x68] sm:$0xff] }
 0x9f0   :  { %v10140_v13 = vmul.f32 %v11527_v4, %v19978_v40  ;;  %v11528_v52 = vadd.f32 %v19972_v16, %v9850_v20  ;;  %v11322_v7 = vpop.f32.mrb[87].mxu0  ;;  %v10116_v20 = vmul.f32 %v12518_v14, %v19974_v1 }
 0x9f2   :  { %v10172_v22 = vadd.f32 %v10140_v13, %v10107_v18  ;;  %v10141_v28 = vmul.f32 %v11528_v52, %v19978_v40  ;;  %11428 = vmatmul.mubr.msk.bf16.gmra.mrb[192].mxu0 %vm5498_vm10, %v19829_v37  ;;  %v12511_v37 = vld [vmem:[%s20652_s2 + $0x30] sm:$0xff] }
 0x9f3   :  { %11431 = vmatprep.mubr.msk.bf16.mxu0 %vm12555_vm6, %v21149_v39  ;;  %v10109_v31 = vmul.f32 %v12511_v37, %v19974_v1 }
 0x9f4   :  { %10204 = vst.msk [vmem:[%s20660_s10 + $0x20] sm:$0xff] %vm2271_vm3, %v10172_v22  ;;  %v10173_v60 = vadd.f32 %v10141_v28, %v10108_v49  ;;  %v12519_v28 = vld [vmem:[%s20652_s2 + $0x70] sm:$0xff] }
 0x9f5   :  { %v9855_v11 = vpop.f32.mrb[88].mxu0 }
 0x9f6   :  { %10205 = vst.msk [vmem:[%s20660_s10 + $0x28] sm:$0xff] %vm2271_vm3, %v10173_v60  ;;  %v11529_v54 = vadd.f32 %v19972_v16, %v9855_v11  ;;  %v11325_v62 = vpop.f32.mrb[89].mxu0 }
 0x9f7   :  { %v9858_v34 = vpop.f32.mrb[90].mxu0 }
 0x9f8   :  { %v10142_v27 = vmul.f32 %v11529_v54, %v19978_v40  ;;  %v11530_v23 = vadd.f32 %v19972_v16, %v9858_v34  ;;  %v11326_v45 = vpop.f32.mrb[91].mxu0 }
 0x9fa   :  { %v10174_v25 = vadd.f32 %v10142_v27, %v10109_v31  ;;  %v10143_v48 = vmul.f32 %v11530_v23, %v19978_v40  ;;  %11432 = vmatmul.mubr.msk.bf16.gmra.mrb[196].mxu0 %vm5498_vm10, %v19835_v38  ;;  %v12513_v38 = vld [vmem:[%s20652_s2 + $0x40] sm:$0xff]  ;;  %v12520_v31 = vld [vmem:[%s20652_s2 + $0x78] sm:$0xff] }
 0x9fb   :  { %11435 = vmatprep.mubr.msk.bf16.mxu0 %vm12555_vm6, %v21149_v39  ;;  %v10111_v36 = vmul.f32 %v12513_v38, %v19974_v1  ;;  %v10118_v62 = vmul.f32 %v12520_v31, %v19974_v1 }
 0x9fc   :  { %10206 = vst.msk [vmem:[%s20660_s10 + $0x30] sm:$0xff] %vm2271_vm3, %v10174_v25  ;;  %v10175_v8 = vadd.f32 %v10143_v48, %v10110_v59  ;;  %v12521_v25 = vld [vmem:[%s20652_s2 + $0x80] sm:$0xff] }
 0x9fd   :  { %v9863_v21 = vpop.f32.mrb[92].mxu0  ;;  %v10119_v48 = vmul.f32 %v12521_v25, %v19974_v1 }
 0x9fe   :  { %10207 = vst.msk [vmem:[%s20660_s10 + $0x38] sm:$0xff] %vm2271_vm3, %v10175_v8  ;;  %v11531_v51 = vadd.f32 %v19972_v16, %v9863_v21  ;;  %v11329_v17 = vpop.f32.mrb[93].mxu0 }
 0x9ff   :  { %v9866_v56 = vpop.f32.mrb[94].mxu0 }
 0xa00   :  { %v10144_v35 = vmul.f32 %v11531_v51, %v19978_v40  ;;  %v11532_v24 = vadd.f32 %v19972_v16, %v9866_v56  ;;  %v11330_v5 = vpop.f32.mrb[95].mxu0 }
 0xa02   :  { %v10176_v29 = vadd.f32 %v10144_v35, %v10111_v36  ;;  %v10145_v9 = vmul.f32 %v11532_v24, %v19978_v40  ;;  %11436 = vmatmul.mubr.msk.bf16.gmra.mrb[200].mxu0 %vm5498_vm10, %v19841_v46  ;;  %v12515_v46 = vld [vmem:[%s20652_s2 + $0x50] sm:$0xff]  ;;  %v12522_v36 = vld [vmem:[%s20652_s2 + $0x88] sm:$0xff] }
 0xa03   :  { %11439 = vmatprep.mubr.msk.bf16.mxu0 %vm12555_vm6, %v21149_v39  ;;  %v10113_v43 = vmul.f32 %v12515_v46, %v19974_v1  ;;  %v10120_v17 = vmul.f32 %v12522_v36, %v19974_v1 }
 0xa04   :  { %10208 = vst.msk [vmem:[%s20660_s10 + $0x40] sm:$0xff] %vm2271_vm3, %v10176_v29  ;;  %v10177_v30 = vadd.f32 %v10145_v9, %v10112_v12  ;;  %v12523_v29 = vld [vmem:[%s20652_s2 + $0x90] sm:$0xff] }
 0xa05   :  { %v9871_v15 = vpop.f32.mrb[96].mxu0  ;;  %v10121_v9 = vmul.f32 %v12523_v29, %v19974_v1 }
 0xa06   :  { %10209 = vst.msk [vmem:[%s20660_s10 + $0x48] sm:$0xff] %vm2271_vm3, %v10177_v30  ;;  %v11533_v50 = vadd.f32 %v19972_v16, %v9871_v15  ;;  %v11333_v19 = vpop.f32.mrb[97].mxu0 }
 0xa07   :  { %v9874_v58 = vpop.f32.mrb[98].mxu0 }
 0xa08   :  { %v10146_v61 = vmul.f32 %v11533_v50, %v19978_v40  ;;  %v11534_v53 = vadd.f32 %v19972_v16, %v9874_v58  ;;  %v11334_v42 = vpop.f32.mrb[99].mxu0 }
 0xa0a   :  { %v10178_v44 = vadd.f32 %v10146_v61, %v10113_v43  ;;  %v10147_v2 = vmul.f32 %v11534_v53, %v19978_v40  ;;  %11440 = vmatmul.mubr.msk.bf16.gmra.mrb[204].mxu0 %vm5498_vm10, %v19847_v47  ;;  %v12517_v47 = vld [vmem:[%s20652_s2 + $0x60] sm:$0xff]  ;;  %v12524_v43 = vld [vmem:[%s20652_s2 + $0x98] sm:$0xff] }
 0xa0b   :  { %11443 = vmatprep.mubr.msk.bf16.mxu0 %vm12555_vm6, %v21149_v39  ;;  %v10115_v39 = vmul.f32 %v12517_v47, %v19974_v1  ;;  %v10122_v19 = vmul.f32 %v12524_v43, %v19974_v1 }
 0xa0c   :  { %10210 = vst.msk [vmem:[%s20660_s10 + $0x50] sm:$0xff] %vm2271_vm3, %v10178_v44  ;;  %v10179_v26 = vadd.f32 %v10147_v2, %v10114_v6  ;;  %v12525_v44 = vld [vmem:[%s20652_s2 + $0xa0] sm:$0xff] }
 0xa0d   :  { %v9879_v10 = vpop.f32.mrb[100].mxu0  ;;  %v10123_v2 = vmul.f32 %v12525_v44, %v19974_v1 }
 0xa0e   :  { %10211 = vst.msk [vmem:[%s20660_s10 + $0x58] sm:$0xff] %vm2271_vm3, %v10179_v26  ;;  %v11535_v33 = vadd.f32 %v19972_v16, %v9879_v10  ;;  %v11337_v57 = vpop.f32.mrb[101].mxu0 }
 0xa0f   :  { %v9882_v4 = vpop.f32.mrb[102].mxu0 }
 0xa10   :  { %v10148_v41 = vmul.f32 %v11535_v33, %v19978_v40  ;;  %v11536_v18 = vadd.f32 %v19972_v16, %v9882_v4  ;;  %v11338_v13 = vpop.f32.mrb[103].mxu0 }
 0xa12   :  { %v10180_v52 = vadd.f32 %v10148_v41, %v10115_v39  ;;  %v10149_v3 = vmul.f32 %v11536_v18, %v19978_v40  ;;  %11444 = vmatmul.mubr.msk.bf16.gmra.mrb[220].mxu0 %vm5498_vm10, %v21275_v63  ;;  %v10117_v63 = vmul.f32 %v12519_v28, %v19974_v1  ;;  %v12526_v39 = vld [vmem:[%s20652_s2 + $0xa8] sm:$0xff] }
 0xa13   :  { %v10124_v57 = vmul.f32 %v12526_v39, %v19974_v1 }
 0xa14   :  { %10212 = vst.msk [vmem:[%s20660_s10 + $0x60] sm:$0xff] %vm2271_vm3, %v10180_v52  ;;  %v10181_v49 = vadd.f32 %v10149_v3, %v10116_v20  ;;  %v12527_v52 = vld [vmem:[%s20652_s2 + $0xb0] sm:$0xff] }
 0xa15   :  { %v9887_v7 = vpop.f32.mrb[104].mxu0  ;;  %v10125_v3 = vmul.f32 %v12527_v52, %v19974_v1 }
 0xa16   :  { %10213 = vst.msk [vmem:[%s20660_s10 + $0x68] sm:$0xff] %vm2271_vm3, %v10181_v49  ;;  %v11537_v22 = vadd.f32 %v19972_v16, %v9887_v7  ;;  %v11341_v60 = vpop.f32.mrb[105].mxu0 }
 0xa17   :  { %v9890_v11 = vpop.f32.mrb[106].mxu0 }
 0xa18   :  { %v10150_v54 = vmul.f32 %v11537_v22, %v19978_v40  ;;  %v11538_v37 = vadd.f32 %v19972_v16, %v9890_v11  ;;  %v11342_v34 = vpop.f32.mrb[107].mxu0 }
 0xa1a   :  { %v10182_v27 = vadd.f32 %v10150_v54, %v10117_v63  ;;  %v10151_v23 = vmul.f32 %v11538_v37, %v19978_v40  ;;  %v12528_v63 = vld [vmem:[%s20652_s2 + $0xb8] sm:$0xff] }
 0xa1b   :  { %v10126_v60 = vmul.f32 %v12528_v63, %v19974_v1 }
 0xa1c   :  { %10214 = vst.msk [vmem:[%s20660_s10 + $0x70] sm:$0xff] %vm2271_vm3, %v10182_v27  ;;  %v10183_v55 = vadd.f32 %v10151_v23, %v10118_v62  ;;  %v12529_v27 = vld [vmem:[%s20652_s2 + $0xc0] sm:$0xff] }
 0xa1d   :  { %v9895_v59 = vpop.f32.mrb[108].mxu0  ;;  %v10127_v23 = vmul.f32 %v12529_v27, %v19974_v1 }
 0xa1e   :  { %10215 = vst.msk [vmem:[%s20660_s10 + $0x78] sm:$0xff] %vm2271_vm3, %v10183_v55  ;;  %v11539_v45 = vadd.f32 %v19972_v16, %v9895_v59  ;;  %v11345_v8 = vpop.f32.mrb[109].mxu0 }
 0xa1f   :  { %v9898_v21 = vpop.f32.mrb[110].mxu0 }
 0xa20   :  { %v10152_v51 = vmul.f32 %v11539_v45, %v19978_v40  ;;  %v11540_v38 = vadd.f32 %v19972_v16, %v9898_v21  ;;  %v11346_v56 = vpop.f32.mrb[111].mxu0 }
 0xa22   :  { %v10184_v35 = vadd.f32 %v10152_v51, %v10119_v48  ;;  %v10153_v24 = vmul.f32 %v11540_v38, %v19978_v40  ;;  %v12530_v48 = vld [vmem:[%s20652_s2 + $0xc8] sm:$0xff] }
 0xa23   :  { %v10128_v8 = vmul.f32 %v12530_v48, %v19974_v1 }
 0xa24   :  { %10216 = vst.msk [vmem:[%s20660_s10 + $0x80] sm:$0xff] %vm2271_vm3, %v10184_v35  ;;  %v10185_v0 = vadd.f32 %v10153_v24, %v10120_v17  ;;  %v12531_v35 = vld [vmem:[%s20652_s2 + $0xd0] sm:$0xff] }
 0xa25   :  { %v9903_v12 = vpop.f32.mrb[112].mxu0  ;;  %v10129_v24 = vmul.f32 %v12531_v35, %v19974_v1 }
 0xa26   :  { %10217 = vst.msk [vmem:[%s20660_s10 + $0x88] sm:$0xff] %vm2271_vm3, %v10185_v0  ;;  %v11541_v5 = vadd.f32 %v19972_v16, %v9903_v12  ;;  %v11349_v30 = vpop.f32.mrb[113].mxu0 }
 0xa27   :  { %v9906_v15 = vpop.f32.mrb[114].mxu0 }
 0xa28   :  { %v10154_v50 = vmul.f32 %v11541_v5, %v19978_v40  ;;  %v11542_v46 = vadd.f32 %v19972_v16, %v9906_v15  ;;  %v11350_v58 = vpop.f32.mrb[115].mxu0 }
 0xa2a   :  { %v10186_v61 = vadd.f32 %v10154_v50, %v10121_v9  ;;  %v10155_v53 = vmul.f32 %v11542_v46, %v19978_v40  ;;  %v12532_v9 = vld [vmem:[%s20652_s2 + $0xd8] sm:$0xff] }
 0xa2b   :  { %v10130_v30 = vmul.f32 %v12532_v9, %v19974_v1 }
 0xa2c   :  { %10218 = vst.msk [vmem:[%s20660_s10 + $0x90] sm:$0xff] %vm2271_vm3, %v10186_v61  ;;  %v10187_v32 = vadd.f32 %v10155_v53, %v10122_v19  ;;  %v12533_v61 = vld [vmem:[%s20652_s2 + $0xe0] sm:$0xff] }
 0xa2d   :  { %v9911_v6 = vpop.f32.mrb[116].mxu0  ;;  %v10131_v53 = vmul.f32 %v12533_v61, %v19974_v1 }
 0xa2e   :  { %10219 = vst.msk [vmem:[%s20660_s10 + $0x98] sm:$0xff] %vm2271_vm3, %v10187_v32  ;;  %v11543_v42 = vadd.f32 %v19972_v16, %v9911_v6  ;;  %v11353_v26 = vpop.f32.mrb[117].mxu0 }
 0xa2f   :  { %v9914_v10 = vpop.f32.mrb[118].mxu0 }
 0xa30   :  { %v10156_v33 = vmul.f32 %v11543_v42, %v19978_v40  ;;  %v11544_v47 = vadd.f32 %v19972_v16, %v9914_v10  ;;  %v11354_v4 = vpop.f32.mrb[119].mxu0 }
 0xa32   :  { %v10188_v41 = vadd.f32 %v10156_v33, %v10123_v2  ;;  %v10157_v18 = vmul.f32 %v11544_v47, %v19978_v40  ;;  %v12534_v2 = vld [vmem:[%s20652_s2 + $0xe8] sm:$0xff] }
 0xa33   :  { %v10132_v26 = vmul.f32 %v12534_v2, %v19974_v1 }
 0xa34   :  { %10220 = vst.msk [vmem:[%s20660_s10 + $0xa0] sm:$0xff] %vm2271_vm3, %v10188_v41  ;;  %v10189_v14 = vadd.f32 %v10157_v18, %v10124_v57  ;;  %v12535_v41 = vld [vmem:[%s20652_s2 + $0xf0] sm:$0xff] }
 0xa35   :  { %v9919_v20 = vpop.f32.mrb[120].mxu0  ;;  %v10133_v18 = vmul.f32 %v12535_v41, %v19974_v1 }
 0xa36   :  { %10221 = vst.msk [vmem:[%s20660_s10 + $0xa8] sm:$0xff] %vm2271_vm3, %v10189_v14  ;;  %v11545_v13 = vadd.f32 %v19972_v16, %v9919_v20  ;;  %v11357_v49 = vpop.f32.mrb[121].mxu0 }
 0xa37   :  { %v9922_v7 = vpop.f32.mrb[122].mxu0 }
 0xa38   :  { %v10158_v22 = vmul.f32 %v11545_v13, %v19978_v40  ;;  %v11546_v28 = vadd.f32 %v19972_v16, %v9922_v7  ;;  %v11358_v11 = vpop.f32.mrb[123].mxu0 }
 0xa3a   :  { %v10190_v54 = vadd.f32 %v10158_v22, %v10125_v3  ;;  %v10159_v37 = vmul.f32 %v11546_v28, %v19978_v40  ;;  %v12536_v3 = vld [vmem:[%s20652_s2 + $0xf8] sm:$0xff] }
 0xa3b   :  { %v10134_v49 = vmul.f32 %v12536_v3, %v19974_v1 }
 0xa3c   :  { %10222 = vst.msk [vmem:[%s20660_s10 + $0xb0] sm:$0xff] %vm2271_vm3, %v10190_v54  ;;  %v10191_v31 = vadd.f32 %v10159_v37, %v10126_v60  ;;  %v20329_v37 = vstv %s10835_s30 }
 0xa3d   :  { %v9927_v62 = vpop.f32.mrb[124].mxu0 }
 0xa3e   :  { %10223 = vst.msk [vmem:[%s20660_s10 + $0xb8] sm:$0xff] %vm2271_vm3, %v10191_v31  ;;  %v11547_v34 = vadd.f32 %v19972_v16, %v9927_v62  ;;  %v11361_v55 = vpop.f32.mrb[125].mxu0  ;;  %v20331_v62 = vstv %s10836_s13 }
 0xa3f   :  { %v9930_v59 = vpop.f32.mrb[126].mxu0 }
 0xa40   :  { %v10160_v45 = vmul.f32 %v11547_v34, %v19978_v40  ;;  %v11548_v25 = vadd.f32 %v19972_v16, %v9930_v59  ;;  %v11362_v21 = vpop.f32.mrb[127].mxu0  ;;  %v10838_v34 = vld [vmem:[%s20652_s2 + $0x108] sm:$0xff] }
 0xa41   :  { %v10270_v48 = vmul.f32 %v10838_v34, %v20329_v37 }
 0xa42   :  { %v10192_v51 = vadd.f32 %v10160_v45, %v10127_v23  ;;  %v10161_v38 = vmul.f32 %v11548_v25, %v19978_v40 }
 0xa44   :  { %10224 = vst.msk [vmem:[%s20660_s10 + $0xc0] sm:$0xff] %vm2271_vm3, %v10192_v51  ;;  %v10193_v36 = vadd.f32 %v10161_v38, %v10128_v8  ;;  %v10839_v38 = vld [vmem:[%s20652_s2 + $0x110] sm:$0xff] }
 0xa45   :  { %v9935_v17 = vpop.f32.mrb[128].mxu0 }
 0xa46   :  { %10225 = vst.msk [vmem:[%s20660_s10 + $0xc8] sm:$0xff] %vm2271_vm3, %v10193_v36  ;;  %v11549_v56 = vadd.f32 %v19972_v16, %v9935_v17  ;;  %v11365_v0 = vpop.f32.mrb[129].mxu0 }
 0xa47   :  { %v9938_v12 = vpop.f32.mrb[130].mxu0 }
 0xa48   :  { %v10162_v5 = vmul.f32 %v11549_v56, %v19978_v40  ;;  %v11550_v29 = vadd.f32 %v19972_v16, %v9938_v12  ;;  %v11366_v15 = vpop.f32.mrb[131].mxu0  ;;  %v10840_v56 = vld [vmem:[%s20652_s2 + $0x118] sm:$0xff] }
 0xa49   :  { %v10272_v9 = vmul.f32 %v10840_v56, %v20329_v37 }
 0xa4a   :  { %v10194_v50 = vadd.f32 %v10162_v5, %v10129_v24  ;;  %v10163_v46 = vmul.f32 %v11550_v29, %v19978_v40  ;;  %v10271_v24 = vmul.f32 %v10839_v38, %v20329_v37 }
 0xa4c   :  { %10226 = vst.msk [vmem:[%s20660_s10 + $0xd0] sm:$0xff] %vm2271_vm3, %v10194_v50  ;;  %v10195_v43 = vadd.f32 %v10163_v46, %v10130_v30  ;;  %v10841_v46 = vld [vmem:[%s20652_s2 + $0x120] sm:$0xff] }
 0xa4d   :  { %v9943_v19 = vpop.f32.mrb[132].mxu0 }
 0xa4e   :  { %10227 = vst.msk [vmem:[%s20660_s10 + $0xd8] sm:$0xff] %vm2271_vm3, %v10195_v43  ;;  %v11551_v58 = vadd.f32 %v19972_v16, %v9943_v19  ;;  %v11369_v32 = vpop.f32.mrb[133].mxu0 }
 0xa4f   :  { %v9946_v6 = vpop.f32.mrb[134].mxu0 }
 0xa50   :  { %v10164_v42 = vmul.f32 %v11551_v58, %v19978_v40  ;;  %v11552_v44 = vadd.f32 %v19972_v16, %v9946_v6  ;;  %v11370_v10 = vpop.f32.mrb[135].mxu0  ;;  %v10842_v58 = vld [vmem:[%s20652_s2 + $0x128] sm:$0xff] }
 0xa51   :  { %v10274_v2 = vmul.f32 %v10842_v58, %v20329_v37 }
 0xa52   :  { %v10196_v33 = vadd.f32 %v10164_v42, %v10131_v53  ;;  %v10165_v47 = vmul.f32 %v11552_v44, %v19978_v40  ;;  %v10273_v53 = vmul.f32 %v10841_v46, %v20329_v37 }
 0xa54   :  { %10228 = vst.msk [vmem:[%s20660_s10 + $0xe0] sm:$0xff] %vm2271_vm3, %v10196_v33  ;;  %v10197_v39 = vadd.f32 %v10165_v47, %v10132_v26  ;;  %v10843_v47 = vld [vmem:[%s20652_s2 + $0x130] sm:$0xff] }
 0xa55   :  { %v9951_v57 = vpop.f32.mrb[136].mxu0 }
 0xa56   :  { %10229 = vst.msk [vmem:[%s20660_s10 + $0xe8] sm:$0xff] %vm2271_vm3, %v10197_v39  ;;  %v11553_v4 = vadd.f32 %v19972_v16, %v9951_v57  ;;  %v11373_v14 = vpop.f32.mrb[137].mxu0 }
 0xa57   :  { %v9954_v20 = vpop.f32.mrb[138].mxu0 }
 0xa58   :  { %v10166_v13 = vmul.f32 %v11553_v4, %v19978_v40  ;;  %v11554_v52 = vadd.f32 %v19972_v16, %v9954_v20  ;;  %v11374_v7 = vpop.f32.mrb[139].mxu0  ;;  %v10844_v4 = vld [vmem:[%s20652_s2 + $0x138] sm:$0xff] }
 0xa59   :  { %v10276_v3 = vmul.f32 %v10844_v4, %v20329_v37 }
 0xa5a   :  { %v10198_v22 = vadd.f32 %v10166_v13, %v10133_v18  ;;  %v10167_v28 = vmul.f32 %v11554_v52, %v19978_v40  ;;  %v10837_v40 = vld [vmem:[%s20652_s2 + $0x100] sm:$0xff]  ;;  %v10275_v18 = vmul.f32 %v10843_v47, %v20329_v37 }
 0xa5b   :  { %v10269_v23 = vmul.f32 %v10837_v40, %v20329_v37 }
 0xa5c   :  { %10230 = vst.msk [vmem:[%s20660_s10 + $0xf0] sm:$0xff] %vm2271_vm3, %v10198_v22  ;;  %v10199_v63 = vadd.f32 %v10167_v28, %v10134_v49  ;;  %v10845_v28 = vld [vmem:[%s20652_s2 + $0x140] sm:$0xff] }
 0xa5d   :  { %v9959_v60 = vpop.f32.mrb[216].mxu0 }
 0xa5e   :  { %10231 = vst.msk [vmem:[%s20660_s10 + $0xf8] sm:$0xff] %vm2271_vm3, %v10199_v63  ;;  %v11377_v11 = vpop.f32.mrb[217].mxu0 }
 0xa5f   :  { %v9961_v1 = vpop.f32.mrb[218].mxu0  ;;  %v10846_v11 = vld [vmem:[%s20652_s2 + $0x148] sm:$0xff] }
 0xa60   :  { %v11378_v54 = vpop.f32.mrb[219].mxu0 }
 0xa61   :  { %v10277_v54 = vmul.f32 %v10845_v28, %v20329_v37 }
 0xa65   :  { %v9965_v31 = vpop.f32.mrb[144].mxu0 }
 0xa66   :  { %v11555_v27 = vadd.f32 %v19972_v16, %v9965_v31  ;;  %v11381_v55 = vpop.f32.mrb[145].mxu0 }
 0xa67   :  { %v9968_v59 = vpop.f32.mrb[146].mxu0 }
 0xa68   :  { %v10302_v45 = vmul.f32 %v11555_v27, %v20331_v62  ;;  %v11556_v25 = vadd.f32 %v19972_v16, %v9968_v59  ;;  %v11382_v8 = vpop.f32.mrb[147].mxu0 }
 0xa6a   :  { %v10334_v21 = vadd.f32 %v10302_v45, %v10269_v23  ;;  %v10303_v51 = vmul.f32 %v11556_v25, %v20331_v62  ;;  %v10278_v23 = vmul.f32 %v10846_v11, %v20329_v37  ;;  %v10847_v25 = vld [vmem:[%s20652_s2 + $0x150] sm:$0xff] }
 0xa6b   :  { %v10279_v38 = vmul.f32 %v10847_v25, %v20329_v37 }
 0xa6c   :  { %10869 = vst.msk [vmem:[%s20660_s10 + $0x100] sm:$0xff] %vm2271_vm3, %v10334_v21  ;;  %v10335_v36 = vadd.f32 %v10303_v51, %v10270_v48  ;;  %v10848_v21 = vld [vmem:[%s20652_s2 + $0x158] sm:$0xff] }
 0xa6d   :  { %v9973_v17 = vpop.f32.mrb[148].mxu0 }
 0xa6e   :  { %10870 = vst.msk [vmem:[%s20660_s10 + $0x108] sm:$0xff] %vm2271_vm3, %v10335_v36  ;;  %v11557_v35 = vadd.f32 %v19972_v16, %v9973_v17  ;;  %v11385_v0 = vpop.f32.mrb[149].mxu0 }
 0xa6f   :  { %v9976_v12 = vpop.f32.mrb[150].mxu0 }
 0xa70   :  { %v10304_v5 = vmul.f32 %v11557_v35, %v20331_v62  ;;  %v11558_v29 = vadd.f32 %v19972_v16, %v9976_v12  ;;  %v11386_v30 = vpop.f32.mrb[151].mxu0 }
 0xa72   :  { %v10336_v15 = vadd.f32 %v10304_v5, %v10271_v24  ;;  %v10305_v50 = vmul.f32 %v11558_v29, %v20331_v62  ;;  %v10280_v24 = vmul.f32 %v10848_v21, %v20329_v37  ;;  %v10849_v29 = vld [vmem:[%s20652_s2 + $0x160] sm:$0xff] }
 0xa73   :  { %v10281_v46 = vmul.f32 %v10849_v29, %v20329_v37 }
 0xa74   :  { %10871 = vst.msk [vmem:[%s20660_s10 + $0x110] sm:$0xff] %vm2271_vm3, %v10336_v15  ;;  %v10337_v43 = vadd.f32 %v10305_v50, %v10272_v9  ;;  %v10850_v15 = vld [vmem:[%s20652_s2 + $0x168] sm:$0xff] }
 0xa75   :  { %v9981_v19 = vpop.f32.mrb[152].mxu0 }
 0xa76   :  { %10872 = vst.msk [vmem:[%s20660_s10 + $0x118] sm:$0xff] %vm2271_vm3, %v10337_v43  ;;  %v11559_v61 = vadd.f32 %v19972_v16, %v9981_v19  ;;  %v11389_v32 = vpop.f32.mrb[153].mxu0 }
 0xa77   :  { %v9984_v6 = vpop.f32.mrb[154].mxu0 }
 0xa78   :  { %v10306_v42 = vmul.f32 %v11559_v61, %v20331_v62  ;;  %v11560_v44 = vadd.f32 %v19972_v16, %v9984_v6  ;;  %v11390_v26 = vpop.f32.mrb[155].mxu0 }
 0xa7a   :  { %v10338_v10 = vadd.f32 %v10306_v42, %v10273_v53  ;;  %v10307_v33 = vmul.f32 %v11560_v44, %v20331_v62  ;;  %v10282_v53 = vmul.f32 %v10850_v15, %v20329_v37  ;;  %v10851_v44 = vld [vmem:[%s20652_s2 + $0x170] sm:$0xff] }
 0xa7b   :  { %v10283_v47 = vmul.f32 %v10851_v44, %v20329_v37 }
 0xa7c   :  { %10873 = vst.msk [vmem:[%s20660_s10 + $0x120] sm:$0xff] %vm2271_vm3, %v10338_v10  ;;  %v10339_v39 = vadd.f32 %v10307_v33, %v10274_v2  ;;  %v10852_v10 = vld [vmem:[%s20652_s2 + $0x178] sm:$0xff] }
 0xa7d   :  { %v9989_v57 = vpop.f32.mrb[156].mxu0 }
 0xa7e   :  { %10874 = vst.msk [vmem:[%s20660_s10 + $0x128] sm:$0xff] %vm2271_vm3, %v10339_v39  ;;  %v11561_v41 = vadd.f32 %v19972_v16, %v9989_v57  ;;  %v11393_v14 = vpop.f32.mrb[157].mxu0 }
 0xa7f   :  { %v9992_v20 = vpop.f32.mrb[158].mxu0 }
 0xa80   :  { %v10308_v13 = vmul.f32 %v11561_v41, %v20331_v62  ;;  %v11562_v52 = vadd.f32 %v19972_v16, %v9992_v20  ;;  %v11394_v49 = vpop.f32.mrb[159].mxu0 }
 0xa82   :  { %v10340_v7 = vadd.f32 %v10308_v13, %v10275_v18  ;;  %v10309_v22 = vmul.f32 %v11562_v52, %v20331_v62  ;;  %v10284_v18 = vmul.f32 %v10852_v10, %v20329_v37  ;;  %v10853_v52 = vld [vmem:[%s20652_s2 + $0x180] sm:$0xff] }
 0xa83   :  { %v10285_v28 = vmul.f32 %v10853_v52, %v20329_v37 }
 0xa84   :  { %10875 = vst.msk [vmem:[%s20660_s10 + $0x130] sm:$0xff] %vm2271_vm3, %v10340_v7  ;;  %v10341_v63 = vadd.f32 %v10309_v22, %v10276_v3  ;;  %v10854_v7 = vld [vmem:[%s20652_s2 + $0x188] sm:$0xff] }
 0xa85   :  { %v9997_v60 = vpop.f32.mrb[160].mxu0 }
 0xa86   :  { %10876 = vst.msk [vmem:[%s20660_s10 + $0x138] sm:$0xff] %vm2271_vm3, %v10341_v63  ;;  %v11563_v1 = vadd.f32 %v19972_v16, %v9997_v60  ;;  %v11397_v40 = vpop.f32.mrb[161].mxu0 }
 0xa87   :  { %v10000_v31 = vpop.f32.mrb[162].mxu0 }
 0xa88   :  { %v10310_v34 = vmul.f32 %v11563_v1, %v20331_v62  ;;  %v11564_v27 = vadd.f32 %v19972_v16, %v10000_v31  ;;  %v11398_v55 = vpop.f32.mrb[163].mxu0 }
 0xa8a   :  { %v10342_v59 = vadd.f32 %v10310_v34, %v10277_v54  ;;  %v10311_v45 = vmul.f32 %v11564_v27, %v20331_v62  ;;  %v10286_v54 = vmul.f32 %v10854_v7, %v20329_v37  ;;  %v10855_v27 = vld [vmem:[%s20652_s2 + $0x190] sm:$0xff] }
 0xa8b   :  { %v10287_v25 = vmul.f32 %v10855_v27, %v20329_v37 }
 0xa8c   :  { %10877 = vst.msk [vmem:[%s20660_s10 + $0x140] sm:$0xff] %vm2271_vm3, %v10342_v59  ;;  %v10343_v48 = vadd.f32 %v10311_v45, %v10278_v23  ;;  %v10856_v59 = vld [vmem:[%s20652_s2 + $0x198] sm:$0xff] }
 0xa8d   :  { %v10005_v8 = vpop.f32.mrb[164].mxu0 }
 0xa8e   :  { %10878 = vst.msk [vmem:[%s20660_s10 + $0x148] sm:$0xff] %vm2271_vm3, %v10343_v48  ;;  %v11565_v51 = vadd.f32 %v19972_v16, %v10005_v8  ;;  %v11401_v36 = vpop.f32.mrb[165].mxu0 }
 0xa8f   :  { %v10008_v17 = vpop.f32.mrb[166].mxu0 }
 0xa90   :  { %v10312_v56 = vmul.f32 %v11565_v51, %v20331_v62  ;;  %v11566_v35 = vadd.f32 %v19972_v16, %v10008_v17  ;;  %v11402_v0 = vpop.f32.mrb[167].mxu0 }
 0xa92   :  { %v10344_v12 = vadd.f32 %v10312_v56, %v10279_v38  ;;  %v10313_v5 = vmul.f32 %v11566_v35, %v20331_v62  ;;  %v10288_v38 = vmul.f32 %v10856_v59, %v20329_v37  ;;  %v10857_v35 = vld [vmem:[%s20652_s2 + $0x1a0] sm:$0xff] }
 0xa93   :  { %v10289_v29 = vmul.f32 %v10857_v35, %v20329_v37 }
 0xa94   :  { %10879 = vst.msk [vmem:[%s20660_s10 + $0x150] sm:$0xff] %vm2271_vm3, %v10344_v12  ;;  %v10345_v9 = vadd.f32 %v10313_v5, %v10280_v24  ;;  %v10858_v12 = vld [vmem:[%s20652_s2 + $0x1a8] sm:$0xff] }
 0xa95   :  { %v10013_v30 = vpop.f32.mrb[168].mxu0 }
 0xa96   :  { %10880 = vst.msk [vmem:[%s20660_s10 + $0x158] sm:$0xff] %vm2271_vm3, %v10345_v9  ;;  %v11567_v50 = vadd.f32 %v19972_v16, %v10013_v30  ;;  %v11405_v43 = vpop.f32.mrb[169].mxu0 }
 0xa97   :  { %v10016_v19 = vpop.f32.mrb[170].mxu0 }
 0xa98   :  { %v10314_v58 = vmul.f32 %v11567_v50, %v20331_v62  ;;  %v11568_v61 = vadd.f32 %v19972_v16, %v10016_v19  ;;  %v11406_v32 = vpop.f32.mrb[171].mxu0 }
 0xa9a   :  { %v10346_v6 = vadd.f32 %v10314_v58, %v10281_v46  ;;  %v10315_v42 = vmul.f32 %v11568_v61, %v20331_v62  ;;  %v10290_v46 = vmul.f32 %v10858_v12, %v20329_v37  ;;  %v10859_v61 = vld [vmem:[%s20652_s2 + $0x1b0] sm:$0xff] }
 0xa9b   :  { %v10291_v44 = vmul.f32 %v10859_v61, %v20329_v37 }
 0xa9c   :  { %10881 = vst.msk [vmem:[%s20660_s10 + $0x160] sm:$0xff] %vm2271_vm3, %v10346_v6  ;;  %v10347_v2 = vadd.f32 %v10315_v42, %v10282_v53  ;;  %v10860_v6 = vld [vmem:[%s20652_s2 + $0x1b8] sm:$0xff] }
 0xa9d   :  { %v10021_v26 = vpop.f32.mrb[172].mxu0 }
 0xa9e   :  { %10882 = vst.msk [vmem:[%s20660_s10 + $0x168] sm:$0xff] %vm2271_vm3, %v10347_v2  ;;  %v11569_v33 = vadd.f32 %v19972_v16, %v10021_v26  ;;  %v11409_v39 = vpop.f32.mrb[173].mxu0 }
 0xa9f   :  { %v10024_v57 = vpop.f32.mrb[174].mxu0 }
 0xaa0   :  { %v10316_v4 = vmul.f32 %v11569_v33, %v20331_v62  ;;  %v11570_v41 = vadd.f32 %v19972_v16, %v10024_v57  ;;  %v11410_v14 = vpop.f32.mrb[175].mxu0 }
 0xaa2   :  { %v10348_v20 = vadd.f32 %v10316_v4, %v10283_v47  ;;  %v10317_v13 = vmul.f32 %v11570_v41, %v20331_v62  ;;  %v10292_v47 = vmul.f32 %v10860_v6, %v20329_v37  ;;  %v10861_v41 = vld [vmem:[%s20652_s2 + $0x1c0] sm:$0xff] }
 0xaa3   :  { %v10293_v52 = vmul.f32 %v10861_v41, %v20329_v37 }
 0xaa4   :  { %10883 = vst.msk [vmem:[%s20660_s10 + $0x170] sm:$0xff] %vm2271_vm3, %v10348_v20  ;;  %v10349_v3 = vadd.f32 %v10317_v13, %v10284_v18  ;;  %v10862_v20 = vld [vmem:[%s20652_s2 + $0x1c8] sm:$0xff] }
 0xaa5   :  { %v10029_v49 = vpop.f32.mrb[176].mxu0 }
 0xaa6   :  { %10884 = vst.msk [vmem:[%s20660_s10 + $0x178] sm:$0xff] %vm2271_vm3, %v10349_v3  ;;  %v11571_v22 = vadd.f32 %v19972_v16, %v10029_v49  ;;  %v11413_v63 = vpop.f32.mrb[177].mxu0 }
 0xaa7   :  { %v10032_v60 = vpop.f32.mrb[178].mxu0 }
 0xaa8   :  { %v10318_v11 = vmul.f32 %v11571_v22, %v20331_v62  ;;  %v11572_v1 = vadd.f32 %v19972_v16, %v10032_v60  ;;  %v11414_v40 = vpop.f32.mrb[179].mxu0 }
 0xaaa   :  { %v10350_v31 = vadd.f32 %v10318_v11, %v10285_v28  ;;  %v10319_v34 = vmul.f32 %v11572_v1, %v20331_v62  ;;  %v10294_v28 = vmul.f32 %v10862_v20, %v20329_v37  ;;  %v10863_v1 = vld [vmem:[%s20652_s2 + $0x1d0] sm:$0xff] }
 0xaab   :  { %v10295_v27 = vmul.f32 %v10863_v1, %v20329_v37 }
 0xaac   :  { %10885 = vst.msk [vmem:[%s20660_s10 + $0x180] sm:$0xff] %vm2271_vm3, %v10350_v31  ;;  %v10351_v23 = vadd.f32 %v10319_v34, %v10286_v54  ;;  %v10864_v31 = vld [vmem:[%s20652_s2 + $0x1d8] sm:$0xff] }
 0xaad   :  { %v10037_v55 = vpop.f32.mrb[180].mxu0 }
 0xaae   :  { %10886 = vst.msk [vmem:[%s20660_s10 + $0x188] sm:$0xff] %vm2271_vm3, %v10351_v23  ;;  %v11573_v45 = vadd.f32 %v19972_v16, %v10037_v55  ;;  %v11417_v48 = vpop.f32.mrb[181].mxu0 }
 0xaaf   :  { %v10040_v8 = vpop.f32.mrb[182].mxu0 }
 0xab0   :  { %v10320_v21 = vmul.f32 %v11573_v45, %v20331_v62  ;;  %v11574_v51 = vadd.f32 %v19972_v16, %v10040_v8  ;;  %v11418_v36 = vpop.f32.mrb[183].mxu0 }
 0xab2   :  { %v10352_v17 = vadd.f32 %v10320_v21, %v10287_v25  ;;  %v10321_v56 = vmul.f32 %v11574_v51, %v20331_v62  ;;  %v10296_v25 = vmul.f32 %v10864_v31, %v20329_v37  ;;  %v10865_v51 = vld [vmem:[%s20652_s2 + $0x1e0] sm:$0xff] }
 0xab3   :  { %v10297_v35 = vmul.f32 %v10865_v51, %v20329_v37 }
 0xab4   :  { %10887 = vst.msk [vmem:[%s20660_s10 + $0x190] sm:$0xff] %vm2271_vm3, %v10352_v17  ;;  %v10353_v24 = vadd.f32 %v10321_v56, %v10288_v38  ;;  %v10866_v17 = vld [vmem:[%s20652_s2 + $0x1e8] sm:$0xff] }
 0xab5   :  { %v10045_v0 = vpop.f32.mrb[184].mxu0 }
 0xab6   :  { %10888 = vst.msk [vmem:[%s20660_s10 + $0x198] sm:$0xff] %vm2271_vm3, %v10353_v24  ;;  %v11575_v5 = vadd.f32 %v19972_v16, %v10045_v0  ;;  %v11421_v9 = vpop.f32.mrb[185].mxu0 }
 0xab7   :  { %v10048_v30 = vpop.f32.mrb[186].mxu0 }
 0xab8   :  { %v10322_v15 = vmul.f32 %v11575_v5, %v20331_v62  ;;  %v11576_v50 = vadd.f32 %v19972_v16, %v10048_v30  ;;  %v11422_v43 = vpop.f32.mrb[187].mxu0 }
 0xaba   :  { %v10354_v19 = vadd.f32 %v10322_v15, %v10289_v29  ;;  %v10323_v58 = vmul.f32 %v11576_v50, %v20331_v62  ;;  %v10298_v29 = vmul.f32 %v10866_v17, %v20329_v37  ;;  %v10867_v50 = vld [vmem:[%s20652_s2 + $0x1f0] sm:$0xff] }
 0xabb   :  { %v10299_v61 = vmul.f32 %v10867_v50, %v20329_v37 }
 0xabc   :  { %10889 = vst.msk [vmem:[%s20660_s10 + $0x1a0] sm:$0xff] %vm2271_vm3, %v10354_v19  ;;  %v10355_v53 = vadd.f32 %v10323_v58, %v10290_v46  ;;  %v10868_v19 = vld [vmem:[%s20652_s2 + $0x1f8] sm:$0xff] }
 0xabd   :  { %v10053_v32 = vpop.f32.mrb[188].mxu0 }
 0xabe   :  { %10890 = vst.msk [vmem:[%s20660_s10 + $0x1a8] sm:$0xff] %vm2271_vm3, %v10355_v53  ;;  %v11577_v42 = vadd.f32 %v19972_v16, %v10053_v32  ;;  %v11425_v2 = vpop.f32.mrb[189].mxu0 }
 0xabf   :  { %v10056_v26 = vpop.f32.mrb[190].mxu0 }
 0xac0   :  { %v10324_v10 = vmul.f32 %v11577_v42, %v20331_v62  ;;  %v11578_v33 = vadd.f32 %v19972_v16, %v10056_v26  ;;  %v11426_v39 = vpop.f32.mrb[191].mxu0 }
 0xac2   :  { %v10356_v57 = vadd.f32 %v10324_v10, %v10291_v44  ;;  %v10325_v4 = vmul.f32 %v11578_v33, %v20331_v62  ;;  %v10300_v44 = vmul.f32 %v10868_v19, %v20329_v37 }
 0xac4   :  { %10891 = vst.msk [vmem:[%s20660_s10 + $0x1b0] sm:$0xff] %vm2271_vm3, %v10356_v57  ;;  %v10357_v18 = vadd.f32 %v10325_v4, %v10292_v47 }
 0xac5   :  { %v10061_v14 = vpop.f32.mrb[192].mxu0 }
 0xac6   :  { %10892 = vst.msk [vmem:[%s20660_s10 + $0x1b8] sm:$0xff] %vm2271_vm3, %v10357_v18  ;;  %v11579_v13 = vadd.f32 %v19972_v16, %v10061_v14  ;;  %v11429_v3 = vpop.f32.mrb[193].mxu0 }
 0xac7   :  { %v10064_v49 = vpop.f32.mrb[194].mxu0 }
 0xac8   :  { %v10326_v7 = vmul.f32 %v11579_v13, %v20331_v62  ;;  %v11580_v22 = vadd.f32 %v19972_v16, %v10064_v49  ;;  %v11430_v63 = vpop.f32.mrb[195].mxu0 }
 0xaca   :  { %v10358_v60 = vadd.f32 %v10326_v7, %v10293_v52  ;;  %v10327_v11 = vmul.f32 %v11580_v22, %v20331_v62 }
 0xacc   :  { %10893 = vst.msk [vmem:[%s20660_s10 + $0x1c0] sm:$0xff] %vm2271_vm3, %v10358_v60  ;;  %v10359_v54 = vadd.f32 %v10327_v11, %v10294_v28 }
 0xacd   :  { %v10069_v40 = vpop.f32.mrb[196].mxu0 }
 0xace   :  { %10894 = vst.msk [vmem:[%s20660_s10 + $0x1c8] sm:$0xff] %vm2271_vm3, %v10359_v54  ;;  %v11581_v34 = vadd.f32 %v19972_v16, %v10069_v40  ;;  %v11433_v23 = vpop.f32.mrb[197].mxu0 }
 0xacf   :  { %v10072_v55 = vpop.f32.mrb[198].mxu0 }
 0xad0   :  { %v10328_v59 = vmul.f32 %v11581_v34, %v20331_v62  ;;  %v11582_v45 = vadd.f32 %v19972_v16, %v10072_v55  ;;  %v11434_v48 = vpop.f32.mrb[199].mxu0 }
 0xad2   :  { %v10360_v8 = vadd.f32 %v10328_v59, %v10295_v27  ;;  %v10329_v21 = vmul.f32 %v11582_v45, %v20331_v62 }
 0xad4   :  { %10895 = vst.msk [vmem:[%s20660_s10 + $0x1d0] sm:$0xff] %vm2271_vm3, %v10360_v8  ;;  %v10361_v38 = vadd.f32 %v10329_v21, %v10296_v25 }
 0xad5   :  { %v10077_v36 = vpop.f32.mrb[200].mxu0 }
 0xad6   :  { %10896 = vst.msk [vmem:[%s20660_s10 + $0x1d8] sm:$0xff] %vm2271_vm3, %v10361_v38  ;;  %v11583_v56 = vadd.f32 %v19972_v16, %v10077_v36  ;;  %v11437_v24 = vpop.f32.mrb[201].mxu0 }
 0xad7   :  { %v10080_v0 = vpop.f32.mrb[202].mxu0 }
 0xad8   :  { %v10330_v12 = vmul.f32 %v11583_v56, %v20331_v62  ;;  %v11584_v5 = vadd.f32 %v19972_v16, %v10080_v0  ;;  %v11438_v9 = vpop.f32.mrb[203].mxu0 }
 0xada   :  { %v10362_v30 = vadd.f32 %v10330_v12, %v10297_v35  ;;  %v10331_v15 = vmul.f32 %v11584_v5, %v20331_v62 }
 0xadc   :  { %10897 = vst.msk [vmem:[%s20660_s10 + $0x1e0] sm:$0xff] %vm2271_vm3, %v10362_v30  ;;  %v10363_v46 = vadd.f32 %v10331_v15, %v10298_v29 }
 0xadd   :  { %v10085_v43 = vpop.f32.mrb[204].mxu0 }
 0xade   :  { %10898 = vst.msk [vmem:[%s20660_s10 + $0x1e8] sm:$0xff] %vm2271_vm3, %v10363_v46  ;;  %v11585_v58 = vadd.f32 %v19972_v16, %v10085_v43  ;;  %v11441_v53 = vpop.f32.mrb[205].mxu0 }
 0xadf   :  { %v10088_v32 = vpop.f32.mrb[206].mxu0 }
 0xae0   :  { %v10332_v6 = vmul.f32 %v11585_v58, %v20331_v62  ;;  %v11586_v42 = vadd.f32 %v19972_v16, %v10088_v32  ;;  %v11442_v2 = vpop.f32.mrb[207].mxu0 }
 0xae2   :  { %v10364_v26 = vadd.f32 %v10332_v6, %v10299_v61  ;;  %v10333_v10 = vmul.f32 %v11586_v42, %v20331_v62 }
 0xae4   :  { %10899 = vst.msk [vmem:[%s20660_s10 + $0x1f0] sm:$0xff] %vm2271_vm3, %v10364_v26  ;;  %v10365_v33 = vadd.f32 %v10333_v10, %v10300_v44 }
 0xae5   :  { %v10093_v47 = vpop.f32.mrb[220].mxu0 }
 0xae6   :  { %10900 = vst.msk [vmem:[%s20660_s10 + $0x1f8] sm:$0xff] %vm2271_vm3, %v10365_v33  ;;  %v11445_v39 = vpop.f32.mrb[221].mxu0 }
 0xae7   :  { %v10095_v16 = vpop.f32.mrb[222].mxu0 }
 0xae8   :  { %v11446_v57 = vpop.f32.mrb[223].mxu0 }

</bundles_post_ra>
